<compile_context>
chip_gen: v6e
topology: v6e:2x2x1
jax: 0.10.0
libtpu: 0.0.40
codegen_flags: <defaults>
</compile_context>

<pallas_src>
import functools
import math

import jax
import jax.numpy as jnp
from jax.experimental import pallas as pl
from jax.experimental.pallas import tpu as pltpu

VMEM_LIMIT = 32 * 1024 * 1024   # <= v7x guidance (64 MiB physical), plenty on v5e/v6e
TILE_CAP = 1024                 # coarse rows per grid step (4096 fine rows / 4 q-steps)


# ----------------------------------------------------------------------------
# In-kernel helpers
# ----------------------------------------------------------------------------
def _gelu(y):
    # tanh-approx GELU in f32 (EUP slot).
    return 0.5 * y * (1.0 + jnp.tanh(0.7978845608028654 * (y + 0.044715 * (y * y * y))))


def _dot32(a_bf16, w_ref):
    return jnp.dot(a_bf16, w_ref[...], preferred_element_type=jnp.float32)


def _store(ref, val):
    """Fine-scale output blocks are either flat (tm, C) or (1, tm, C)."""
    if len(ref.shape) == val.ndim:
        ref[...] = val
    else:
        ref[0] = val


def _head(h_f32, wh_ref, bh_ref):
    """1-channel mask head: VPU multiply + lane reduction (no extra MXU pass,
    no lane-sparse MASK_PAD writeback)."""
    return jnp.sum(h_f32 * wh_ref[...], axis=-1, keepdims=True) + bh_ref[...]


# ----------------------------------------------------------------------------
# Fused kernel bodies
# ----------------------------------------------------------------------------
def _enc0_kernel(x_ref, we_ref, be_ref, ws_ref, bs_ref, s_ref, d_ref):
    """Patch-embed stage: h = GELU(x@We+be); s = h; d = ReLU(h@Ws+bs)."""
    h = _gelu(_dot32(x_ref[0], we_ref) + be_ref[...])
    hb = h.astype(jnp.bfloat16)
    s_ref[0] = hb.astype(s_ref.dtype)
    d = jnp.maximum(_dot32(hb, ws_ref) + bs_ref[...], 0.0)
    d_ref[0] = d.astype(d_ref.dtype)


def _enc_kernel(x_ref, we_ref, be_ref, ws_ref, bs_ref, s_ref, d_ref):
    """Patch-merge stage with fused space_to_depth: x_ref is (4, 1, tm, C) -
    the 4 child pixels of every output pixel.  We is split (4, C, C')."""
    acc = jnp.dot(x_ref[0, 0], we_ref[0], preferred_element_type=jnp.float32)
    for q in range(1, 4):
        acc = acc + jnp.dot(x_ref[q, 0], we_ref[q], preferred_element_type=jnp.float32)
    h = _gelu(acc + be_ref[...])
    hb = h.astype(jnp.bfloat16)
    s_ref[0] = hb.astype(s_ref.dtype)
    d = jnp.maximum(_dot32(hb, ws_ref) + bs_ref[...], 0.0)
    d_ref[0] = d.astype(d_ref.dtype)


def _enc_last_kernel(x_ref, we_ref, be_ref, ws_ref, bs_ref, wu_ref, p_ref):
    """Deepest stage: merge-embed + skip + hoisted decoder up-projection."""
    acc = jnp.dot(x_ref[0], we_ref[0], preferred_element_type=jnp.float32)
    for q in range(1, 4):
        acc = acc + jnp.dot(x_ref[q], we_ref[q], preferred_element_type=jnp.float32)
    h = _gelu(acc + be_ref[...])
    d = jnp.maximum(_dot32(h.astype(jnp.bfloat16), ws_ref) + bs_ref[...], 0.0)
    p_ref[...] = _dot32(d.astype(jnp.bfloat16), wu_ref).astype(p_ref.dtype)


def _dec_kernel(p_ref, d_ref, ws_ref, b_ref, wu_ref, o_ref):
    """h = GELU(up + skip@Ws + b); out = h @ Wu (next level's projection).
    p_ref is the coarse (tm, C) block, shared by the 4 q grid steps (fused
    nearest-2x upsample)."""
    h = _gelu(p_ref[...].astype(jnp.float32) + _dot32(d_ref[0], ws_ref) + b_ref[...])
    _store(o_ref, _dot32(h.astype(jnp.bfloat16), wu_ref).astype(o_ref.dtype))


def _dec_mask_kernel(p_ref, d_ref, ws_ref, b_ref, wu_ref, wh_ref, bh_ref, o_ref, m_ref):
    h = _gelu(p_ref[...].astype(jnp.float32) + _dot32(d_ref[0], ws_ref) + b_ref[...])
    _store(o_ref, _dot32(h.astype(jnp.bfloat16), wu_ref).astype(o_ref.dtype))
    _store(m_ref, _head(h, wh_ref, bh_ref).astype(m_ref.dtype))


def _former_kernel(p_ref, b_ref, wp_ref, wh_ref, bh_ref, o_ref, m_ref):
    """f = GELU(up + b); mask = head(f); proj = f @ Wp."""
    h = _gelu(p_ref[...].astype(jnp.float32) + b_ref[...])
    _store(o_ref, _dot32(h.astype(jnp.bfloat16), wp_ref).astype(o_ref.dtype))
    _store(m_ref, _head(h, wh_ref, bh_ref).astype(m_ref.dtype))


def _former_last_kernel(p_ref, b1_ref, wh1_ref, bh1_ref, wc_ref, bc_ref,
                        whf_ref, bhf_ref, m1_ref, mf_ref):
    """f1 = GELU(up + b1); mask1; ff = GELU(f1@Wc+bc); final mask."""
    f1 = _gelu(p_ref[...].astype(jnp.float32) + b1_ref[...])
    _store(m1_ref, _head(f1, wh1_ref, bh1_ref).astype(m1_ref.dtype))
    ff = _gelu(_dot32(f1.astype(jnp.bfloat16), wc_ref) + bc_ref[...])
    _store(mf_ref, _head(ff, whf_ref, bhf_ref).astype(mf_ref.dtype))


# ----------------------------------------------------------------------------
# BlockSpec / pallas_call plumbing
# ----------------------------------------------------------------------------
def pick_tile(n, cap=TILE_CAP):
    """Largest tile <= cap that divides n (multiple of 8), else the full n."""
    if n <= cap:
        return n
    t = (cap // 8) * 8
    while t >= 8 and n % t:
        t -= 8
    return t if t >= 8 and n % t == 0 else n


def _const_spec(a, rank=2):
    zeros = (0,) * a.ndim
    if rank == 1:
        return pl.BlockSpec(a.shape, lambda i, _z=zeros: _z)
    return pl.BlockSpec(a.shape, lambda i, q, _z=zeros: _z)


def _fine_in3(tm, c):
    # read a (4, Nc, C) quad-grouped array: one q-slice of tm rows per step
    return pl.BlockSpec((1, tm, c), lambda i, q: (q, i, 0))


def _quad_in4(tm, c):
    # fused space_to_depth: read all 4 children of tm output pixels
    return pl.BlockSpec((4, 1, tm, c), lambda i, q: (0, q, i, 0))


def _coarse_in(tm, c):
    # coarse-scale input; block index ignores q -> DMA'd once, reused 4x
    return pl.BlockSpec((tm, c), lambda i, q: (i, 0))


def _enc_out(tm, c, n_coarse, dtype):
    # encoder s/d outputs: always stored (4, Nc, C) quad-grouped
    return (jax.ShapeDtypeStruct((4, n_coarse, c), dtype),
            pl.BlockSpec((1, tm, c), lambda i, q: (q, i, 0)))


def _fine_out(tm, c, n_coarse, n_fine, dtype):
    # fine-scale outputs: flat quad-major slab when 8-row aligned (the big
    # scales), otherwise a (4, Nc, C) slab (tiny deep scales only).
    if tm % 8 == 0:
        nb = n_coarse // tm
        return (jax.ShapeDtypeStruct((n_fine, c), dtype),
                pl.BlockSpec((tm, c), lambda i, q, _nb=nb: (q * _nb + i, 0)))
    return (jax.ShapeDtypeStruct((4, n_coarse, c), dtype),
            pl.BlockSpec((1, tm, c), lambda i, q: (q, i, 0)))


def _as_rows(a):
    return a if a.ndim == 2 else a.reshape(a.shape[0] * a.shape[1], a.shape[2])


def _cost(rows, kn_pairs, gelu_ch, ins, out_shapes):
    flops = 2 * rows * sum(int(k) * int(n) for k, n in kn_pairs)
    nbytes = sum(int(a.size) * a.dtype.itemsize for a in ins)
    nbytes += sum(math.prod(o.shape) * jnp.dtype(o.dtype).itemsize for o in out_shapes)
    return pl.CostEstimate(flops=int(flops), transcendentals=int(rows * gelu_ch),
                           bytes_accessed=int(nbytes))


def _qcall(kernel, n_coarse, tm, in_arrays, in_specs, out_shapes, out_specs, cost):
    """Run a stage over grid (coarse row tiles, 4 quad children)."""
    res = pl.pallas_call(
        kernel,
        out_shape=tuple(out_shapes),
        grid=(n_coarse // tm, 4),
        in_specs=in_specs,
        out_specs=tuple(out_specs),
        compiler_params=pltpu.CompilerParams(
            dimension_semantics=("parallel", "parallel"),
            vmem_limit_bytes=VMEM_LIMIT),
        cost_estimate=cost,
    )(*in_arrays)
    return res if isinstance(res, (list, tuple)) else (res,)


# ----------------------------------------------------------------------------
# Layout plumbing (XLA): initial patchify and final mask de-permutation
# ----------------------------------------------------------------------------
def build_x0(inp, levels=3, patch=4):
    """(B,H,W,C) -> (4, N/4, patch*patch*C): 4x4-patchified rows in nested
    quad-major order, split along the finest quad level."""
    B, H, W, C = inp.shape
    hb, wb = H // (patch << levels), W // (patch << levels)
    x = inp.reshape(B, hb, *([2] * levels), patch, wb, *([2] * levels), patch, C)
    di = list(range(2, 2 + levels))                # coarsest .. finest (rows)
    pi = 2 + levels
    jdim = 3 + levels
    dj = list(range(4 + levels, 4 + 2 * levels))   # coarsest .. finest (cols)
    pj = 4 + 2 * levels
    cd = 5 + 2 * levels
    perm = []
    for lvl in range(levels - 1, -1, -1):          # finest quad level outermost
        perm += [di[lvl], dj[lvl]]
    perm += [0, 1, jdim, pi, pj, cd]
    x = x.transpose(perm)
    n = B * (H // patch) * (W // patch)
    return x.reshape(4, n // 4, patch * patch * C)


def rows_to_mask(rows, B, Ht, Wt, levels):
    """quad-major ordered 1-channel mask rows -> (B, 1, Ht, Wt) float32."""
    hb, wb = Ht >> levels, Wt >> levels
    x = rows.reshape(*([2, 2] * levels), B, hb, wb)
    bdim = 2 * levels
    perm = ([bdim, bdim + 1] + list(range(2 * levels - 2, -1, -2))
            + [bdim + 2] + list(range(2 * levels - 1, 0, -2)))
    x = x.transpose(perm).reshape(B, Ht, Wt)
    return x[:, None, :, :].astype(jnp.float32)


# ----------------------------------------------------------------------------
# Deterministic parameter init (matmul weights bf16, biases f32 as (1, N))
# ----------------------------------------------------------------------------
def init_linear(key, k_in, k_out, w_dtype=jnp.bfloat16):
    kw, kb = jax.random.split(key)
    w = (jax.random.normal(kw, (k_in, k_out), jnp.float32) / jnp.sqrt(k_in)).astype(w_dtype)
    b = (jax.random.normal(kb, (k_out,), jnp.float32) * 0.01).reshape(1, k_out)
    return w, b


def init_head(key, k_in):
    kw, kb = jax.random.split(key)
    w = jax.random.normal(kw, (1, k_in), jnp.float32) / jnp.sqrt(k_in)
    b = jax.random.normal(kb, (1, 1), jnp.float32) * 0.01
    return w, b


def init_net_params(key, num_tl, embed_dim, in_ch_per_half=3):
    """Mirrors Net.__init__ shapes (embed_dim * 2**i channels at 4 scales)."""
    p = {}
    kid = iter(jax.random.split(key, 64))
    E = embed_dim
    in_ch = 2 * in_ch_per_half * (num_tl // 2)        # concat(x, y) channels
    chans = [E, 2 * E, 4 * E, 8 * E]

    # encoder: 4x4 patch embed + 3 fused (space_to_depth + linear) merges;
    # merge weights stored (4, Cin, Cout), split along the child-pixel axis.
    p["enc0_w"], p["enc0_b"] = init_linear(next(kid), in_ch * 16, E)
    for i in range(1, 4):
        w, b = init_linear(next(kid), chans[i - 1] * 4, chans[i])
        p[f"enc{i}_w"] = w.reshape(4, chans[i - 1], chans[i])
        p[f"enc{i}_b"] = b

    # skip layers (MSMU stand-ins): per-scale channel mixers
    for i in range(4):
        p[f"skip{i}_w"], p[f"skip{i}_b"] = init_linear(next(kid), chans[i], chans[i])

    # decoder fuse weights: up-projection (hoisted into the producer kernel),
    # skip mix and bias.
    p["dec0u_w"], _ = init_linear(next(kid), 8 * E, 4 * E)
    p["dec0s_w"], p["dec0_b"] = init_linear(next(kid), 4 * E, 4 * E)
    p["dec1u_w"], _ = init_linear(next(kid), 4 * E, 2 * E)
    p["dec1s_w"], p["dec1_b"] = init_linear(next(kid), 2 * E, 2 * E)
    p["dec2u_w"], _ = init_linear(next(kid), 2 * E, E)
    p["dec2s_w"], p["dec2_b"] = init_linear(next(kid), E, E)

    # multiscale former refine mixers + 1-channel mask heads
    p["fconv2_w"], p["fconv2_b"] = init_linear(next(kid), E, E)
    p["fconv1_w"], p["fconv1_b"] = init_linear(next(kid), E, E)
    p["fconvf_w"], p["fconvf_b"] = init_linear(next(kid), E, E)
    for name in ("head4", "head2", "head1", "headf"):
        p[f"{name}_w"], p[f"{name}_b"] = init_head(next(kid), E)
    return p


# ----------------------------------------------------------------------------
# Forward (mirrors Net.forward structure)
# ----------------------------------------------------------------------------
def net_forward(params, x, y, num_tl, embed_dim, tile_cap=TILE_CAP):
    assert num_tl >= 2
    E = embed_dim
    B, C, H, W = x.shape
    assert y.shape == x.shape
    assert H % 32 == 0 and W % 32 == 0         # deepest encoder scale is /32
    in_ch = x.shape[1] + y.shape[1]
    assert params["enc0_w"].shape[0] == 16 * in_ch
    bf16 = jnp.bfloat16

    # row counts per scale
    n0 = B * (H // 4) * (W // 4)               # /4
    n1, n2, n3 = n0 // 4, n0 // 16, n0 // 64   # /8, /16, /32
    nh, nf = 4 * n0, 16 * n0                   # /2, /1

    # decompose + concat temporal halves; patchify to quad-major rows (XLA)
    inp = jnp.concatenate([x, y], axis=1).transpose(0, 2, 3, 1).astype(bf16)
    x0 = build_x0(inp, levels=3, patch=4)      # (4, n1, 16*in_ch)

    # ---------------- SGMP_Encoder + fused MSMU skip mixers ----------------
    tm0 = pick_tile(n1, tile_cap)
    s0_sh, s0_sp = _enc_out(tm0, E, n1, bf16)
    s0, d0 = _qcall(
        _enc0_kernel, n1, tm0,
        [x0, params["enc0_w"], params["enc0_b"], params["skip0_w"], params["skip0_b"]],
        [_fine_in3(tm0, 16 * in_ch),
         _const_spec(params["enc0_w"]), _const_spec(params["enc0_b"]),
         _const_spec(params["skip0_w"]), _const_spec(params["skip0_b"])],
        [s0_sh, s0_sh], [s0_sp, s0_sp],
        _cost(n0, [(16 * in_ch, E), (E, E)], E,
              [x0, params["enc0_w"], params["skip0_w"]], [s0_sh, s0_sh]))

    s0q = s0.reshape(4, 4, n2, E)              # free-ish leading-dim split
    tm1 = pick_tile(n2, tile_cap)
    s1_sh, s1_sp = _enc_out(tm1, 2 * E, n2, bf16)
    s1, d1 = _qcall(
        _enc_kernel, n2, tm1,
        [s0q, params["enc1_w"], params["enc1_b"], params["skip1_w"], params["skip1_b"]],
        [_quad_in4(tm1, E),
         _const_spec(params["enc1_w"]), _const_spec(params["enc1_b"]),
         _const_spec(params["skip1_w"]), _const_spec(params["skip1_b"])],
        [s1_sh, s1_sh], [s1_sp, s1_sp],
        _cost(n1, [(4 * E, 2 * E), (2 * E, 2 * E)], 2 * E,
              [s0q, params["enc1_w"], params["skip1_w"]], [s1_sh, s1_sh]))

    s1q = s1.reshape(4, 4, n3, 2 * E)
    tm2 = pick_tile(n3, tile_cap)
    s2_sh, s2_sp = _enc_out(tm2, 4 * E, n3, bf16)
    s2, d2 = _qcall(
        _enc_kernel, n3, tm2,
        [s1q, params["enc2_w"], params["enc2_b"], params["skip2_w"], params["skip2_b"]],
        [_quad_in4(tm2, 2 * E),
         _const_spec(params["enc2_w"]), _const_spec(params["enc2_b"]),
         _const_spec(params["skip2_w"]), _const_spec(params["skip2_b"])],
        [s2_sh, s2_sh], [s2_sp, s2_sp],
        _cost(n2, [(8 * E, 4 * E), (4 * E, 4 * E)], 4 * E,
              [s1q, params["enc2_w"], params["skip2_w"]], [s2_sh, s2_sh]))

    # deepest stage: merge + skip + hoisted decoder-level-0 up-projection
    tm3 = pick_tile(n3, tile_cap)
    p0_sh = jax.ShapeDtypeStruct((n3, 4 * E), bf16)
    p0 = pl.pallas_call(
        _enc_last_kernel,
        out_shape=p0_sh,
        grid=(n3 // tm3,),
        in_specs=[pl.BlockSpec((4, tm3, 4 * E), lambda i: (0, i, 0)),
                  _const_spec(params["enc3_w"], rank=1),
                  _const_spec(params["enc3_b"], rank=1),
                  _const_spec(params["skip3_w"], rank=1),
                  _const_spec(params["skip3_b"], rank=1),
                  _const_spec(params["dec0u_w"], rank=1)],
        out_specs=pl.BlockSpec((tm3, 4 * E), lambda i: (i, 0)),
        compiler_params=pltpu.CompilerParams(
            dimension_semantics=("parallel",), vmem_limit_bytes=VMEM_LIMIT),
        cost_estimate=_cost(n3, [(16 * E, 8 * E), (8 * E, 8 * E), (8 * E, 4 * E)], 8 * E,
                            [s2, params["enc3_w"], params["skip3_w"], params["dec0u_w"]],
                            [p0_sh]),
    )(s2, params["enc3_w"], params["enc3_b"], params["skip3_w"],
      params["skip3_b"], params["dec0u_w"])

    # ---------------- Decoder: top-down fuse, upsample fused into the grid ----
    tmd2 = pick_tile(n3, tile_cap)
    p1_sh, p1_sp = _fine_out(tmd2, 2 * E, n3, n2, bf16)
    (p1,) = _qcall(
        _dec_kernel, n3, tmd2,
        [p0, d2, params["dec0s_w"], params["dec0_b"], params["dec1u_w"]],
        [_coarse_in(tmd2, 4 * E), _fine_in3(tmd2, 4 * E),
         _const_spec(params["dec0s_w"]), _const_spec(params["dec0_b"]),
         _const_spec(params["dec1u_w"])],
        [p1_sh], [p1_sp],
        _cost(n2, [(4 * E, 4 * E), (4 * E, 2 * E)], 4 * E,
              [p0, d2, params["dec0s_w"], params["dec1u_w"]], [p1_sh]))
    p1 = _as_rows(p1)

    tmd1 = pick_tile(n2, tile_cap)
    p2_sh, p2_sp = _fine_out(tmd1, E, n2, n1, bf16)
    (p2,) = _qcall(
        _dec_kernel, n2, tmd1,
        [p1, d1, params["dec1s_w"], params["dec1_b"], params["dec2u_w"]],
        [_coarse_in(tmd1, 2 * E), _fine_in3(tmd1, 2 * E),
         _const_spec(params["dec1s_w"]), _const_spec(params["dec1_b"]),
         _const_spec(params["dec2u_w"])],
        [p2_sh], [p2_sp],
        _cost(n1, [(2 * E, 2 * E), (2 * E, E)], 2 * E,
              [p1, d1, params["dec1s_w"], params["dec2u_w"]], [p2_sh]))
    p2 = _as_rows(p2)

    tmd0 = pick_tile(n1, tile_cap)
    pf2_sh, pf2_sp = _fine_out(tmd0, E, n1, n0, bf16)
    m4_sh, m4_sp = _fine_out(tmd0, 1, n1, n0, bf16)
    pf2, m4 = _qcall(
        _dec_mask_kernel, n1, tmd0,
        [p2, d0, params["dec2s_w"], params["dec2_b"], params["fconv2_w"],
         params["head4_w"], params["head4_b"]],
        [_coarse_in(tmd0, E), _fine_in3(tmd0, E),
         _const_spec(params["dec2s_w"]), _const_spec(params["dec2_b"]),
         _const_spec(params["fconv2_w"]), _const_spec(params["head4_w"]),
         _const_spec(params["head4_b"])],
        [pf2_sh, m4_sh], [pf2_sp, m4_sp],
        _cost(n0, [(E, E), (E, E)], E,
              [p2, d0, params["dec2s_w"], params["fconv2_w"]], [pf2_sh, m4_sh]))
    pf2 = _as_rows(pf2)

    # ---------------- Multiscale_Former: masks at /2 and /1 ----------------
    tmf2 = pick_tile(n0, tile_cap)
    pf1_sh, pf1_sp = _fine_out(tmf2, E, n0, nh, bf16)
    m2_sh, m2_sp = _fine_out(tmf2, 1, n0, nh, bf16)
    pf1, m2 = _qcall(
        _former_kernel, n0, tmf2,
        [pf2, params["fconv2_b"], params["fconv1_w"], params["head2_w"], params["head2_b"]],
        [_coarse_in(tmf2, E),
         _const_spec(params["fconv2_b"]), _const_spec(params["fconv1_w"]),
         _const_spec(params["head2_w"]), _const_spec(params["head2_b"])],
        [pf1_sh, m2_sh], [pf1_sp, m2_sp],
        _cost(nh, [(E, E)], E, [pf2, params["fconv1_w"]], [pf1_sh, m2_sh]))
    pf1 = _as_rows(pf1)

    tmf1 = pick_tile(nh, tile_cap)
    m1_sh, m1_sp = _fine_out(tmf1, 1, nh, nf, bf16)
    mf_sh, mf_sp = _fine_out(tmf1, 1, nh, nf, bf16)
    m1, mf = _qcall(
        _former_last_kernel, nh, tmf1,
        [pf1, params["fconv1_b"], params["head1_w"], params["head1_b"],
         params["fconvf_w"], params["fconvf_b"], params["headf_w"], params["headf_b"]],
        [_coarse_in(tmf1, E),
         _const_spec(params["fconv1_b"]), _const_spec(params["head1_w"]),
         _const_spec(params["head1_b"]), _const_spec(params["fconvf_w"]),
         _const_spec(params["fconvf_b"]), _const_spec(params["headf_w"]),
         _const_spec(params["headf_b"])],
        [m1_sh, mf_sh], [m1_sp, mf_sp],
        _cost(nf, [(E, E)], 2 * E, [pf1, params["fconvf_w"]], [m1_sh, mf_sh]))

    return {
        "pred_masks": rows_to_mask(mf, B, H, W, levels=5),
        "aux_pred_masks": [
            rows_to_mask(m1, B, H, W, levels=5),
            rows_to_mask(m2, B, H // 2, W // 2, levels=4),
            rows_to_mask(m4, B, H // 4, W // 4, levels=3),
        ],
    }


# ----------------------------------------------------------------------------
if __name__ == "__main__":
    NUM_TL = 2          # Net(num_tl=2) -> self.num_tl = 1
    EMBED_DIM = 32      # small embed_dim for the demo
    B, C, H, W = 2, 3, 32, 32

    key = jax.random.PRNGKey(0)
    kx, ky, kp = jax.random.split(key, 3)
    x = jax.random.normal(kx, (B, C, H, W), jnp.float32)
    y = jax.random.normal(ky, (B, C, H, W), jnp.float32)

    params = init_net_params(kp, NUM_TL, EMBED_DIM, in_ch_per_half=C)

    fwd = jax.jit(functools.partial(net_forward, num_tl=NUM_TL, embed_dim=EMBED_DIM))
    result = fwd(params, x, y)
    jax.block_until_ready(result)

    assert result["pred_masks"].shape == (B, 1, H, W)
    assert result["aux_pred_masks"][0].shape == (B, 1, H, W)
    assert result["aux_pred_masks"][1].shape == (B, 1, H // 2, W // 2)
    assert result["aux_pred_masks"][2].shape == (B, 1, H // 4, W // 4)
    assert all(bool(jnp.all(jnp.isfinite(m)))
               for m in [result["pred_masks"]] + result["aux_pred_masks"])
    print("KERNEL_OK")
</pallas_src>

<mosaic_0001>
module attributes {stable_mosaic.version = 11 : i64} {
  func.func @_enc0_kernel(%arg0: i32, %arg1: i32, %arg2: memref<1x32x96xbf16, #tpu.memory_space<vmem>>, %arg3: memref<96x32xbf16, #tpu.memory_space<vmem>>, %arg4: memref<1x32xf32, #tpu.memory_space<vmem>>, %arg5: memref<32x32xbf16, #tpu.memory_space<vmem>>, %arg6: memref<1x32xf32, #tpu.memory_space<vmem>>, %arg7: memref<1x32x32xbf16, #tpu.memory_space<vmem>>, %arg8: memref<1x32x32xbf16, #tpu.memory_space<vmem>>) attributes {dimension_semantics = [#tpu.dimension_semantics<parallel>, #tpu.dimension_semantics<parallel>], iteration_bounds = array<i64: 1, 4>, scalar_prefetch = 0 : i64, scratch_operands = 0 : i64, tpu.core_type = #tpu.core_type<tc>, window_params = [{transform_indices = @transform_0, window_bounds = array<i64: 1, 32, 96>}, {pipeline_mode = #tpu.pipeline_mode<synchronous>, transform_indices = @transform_1, window_bounds = array<i64: 96, 32>}, {pipeline_mode = #tpu.pipeline_mode<synchronous>, transform_indices = @transform_2, window_bounds = array<i64: 1, 32>}, {pipeline_mode = #tpu.pipeline_mode<synchronous>, transform_indices = @transform_3, window_bounds = array<i64: 32, 32>}, {pipeline_mode = #tpu.pipeline_mode<synchronous>, transform_indices = @transform_4, window_bounds = array<i64: 1, 32>}, {transform_indices = @transform_5, window_bounds = array<i64: 1, 32, 32>}, {transform_indices = @transform_6, window_bounds = array<i64: 1, 32, 32>}]} {
    %c0 = arith.constant 0 : index
    %c0_0 = arith.constant 0 : index
    %c0_1 = arith.constant 0 : index
    %0 = vector.load %arg2[%c0, %c0_0, %c0_1] : memref<1x32x96xbf16, #tpu.memory_space<vmem>>, vector<1x32x96xbf16>
    %1 = vector.shape_cast %0 : vector<1x32x96xbf16> to vector<32x96xbf16>
    %c0_2 = arith.constant 0 : index
    %c0_3 = arith.constant 0 : index
    %2 = vector.load %arg3[%c0_2, %c0_3] : memref<96x32xbf16, #tpu.memory_space<vmem>>, vector<96x32xbf16>
    %cst = arith.constant dense<0.000000e+00> : vector<32x32xf32>
    %3 = tpu.matmul %1, %2, %cst {dimension_numbers = #tpu.dot_dimension_numbers<[1], [0], [0], [1], [0, 0, 1, 1], [], []>} : vector<32x96xbf16>, vector<96x32xbf16>, vector<32x32xf32> -> vector<32x32xf32>
    %c0_4 = arith.constant 0 : index
    %c0_5 = arith.constant 0 : index
    %4 = vector.load %arg4[%c0_4, %c0_5] : memref<1x32xf32, #tpu.memory_space<vmem>>, vector<1x32xf32>
    %5 = vector.broadcast %4 : vector<1x32xf32> to vector<32x32xf32>
    %6 = arith.addf %3, %5 : vector<32x32xf32>
    %cst_6 = arith.constant 5.000000e-01 : f32
    %7 = vector.broadcast %cst_6 : f32 to vector<32x32xf32>
    %8 = arith.mulf %7, %6 : vector<32x32xf32>
    %9 = arith.mulf %6, %6 : vector<32x32xf32>
    %10 = arith.mulf %9, %6 : vector<32x32xf32>
    %cst_7 = arith.constant 4.471500e-02 : f32
    %11 = vector.broadcast %cst_7 : f32 to vector<32x32xf32>
    %12 = arith.mulf %11, %10 : vector<32x32xf32>
    %13 = arith.addf %6, %12 : vector<32x32xf32>
    %cst_8 = arith.constant 0.797884583 : f32
    %14 = vector.broadcast %cst_8 : f32 to vector<32x32xf32>
    %15 = arith.mulf %14, %13 : vector<32x32xf32>
    %16 = math.tanh %15 : vector<32x32xf32>
    %cst_9 = arith.constant 1.000000e+00 : f32
    %17 = vector.broadcast %cst_9 : f32 to vector<32x32xf32>
    %18 = arith.addf %17, %16 : vector<32x32xf32>
    %19 = arith.mulf %8, %18 : vector<32x32xf32>
    %20 = arith.truncf %19 : vector<32x32xf32> to vector<32x32xbf16>
    %c0_10 = arith.constant 0 : index
    %c0_11 = arith.constant 0 : index
    %c0_12 = arith.constant 0 : index
    %21 = vector.load %arg7[%c0_10, %c0_11, %c0_12] : memref<1x32x32xbf16, #tpu.memory_space<vmem>>, vector<1x32x32xbf16>
    %22 = vector.shape_cast %21 : vector<1x32x32xbf16> to vector<32x32xbf16>
    %23 = vector.shape_cast %20 : vector<32x32xbf16> to vector<1x32x32xbf16>
    tpu.vector_store %arg7[%c0_10, %c0_11, %c0_12], %23 {strides = array<i32>} : memref<1x32x32xbf16, #tpu.memory_space<vmem>>, vector<1x32x32xbf16>,
    %c0_13 = arith.constant 0 : index
    %c0_14 = arith.constant 0 : index
    %24 = vector.load %arg5[%c0_13, %c0_14] : memref<32x32xbf16, #tpu.memory_space<vmem>>, vector<32x32xbf16>
    %cst_15 = arith.constant dense<0.000000e+00> : vector<32x32xf32>
    %25 = tpu.matmul %20, %24, %cst_15 {dimension_numbers = #tpu.dot_dimension_numbers<[1], [0], [0], [1], [0, 0, 1, 1], [], []>} : vector<32x32xbf16>, vector<32x32xbf16>, vector<32x32xf32> -> vector<32x32xf32>
    %c0_16 = arith.constant 0 : index
    %c0_17 = arith.constant 0 : index
    %26 = vector.load %arg6[%c0_16, %c0_17] : memref<1x32xf32, #tpu.memory_space<vmem>>, vector<1x32xf32>
    %27 = vector.broadcast %26 : vector<1x32xf32> to vector<32x32xf32>
    %28 = arith.addf %25, %27 : vector<32x32xf32>
    %cst_18 = arith.constant 0.000000e+00 : f32
    %29 = vector.broadcast %cst_18 : f32 to vector<32x32xf32>
    %30 = arith.maximumf %28, %29 : vector<32x32xf32>
    %31 = arith.truncf %30 : vector<32x32xf32> to vector<32x32xbf16>
    %c0_19 = arith.constant 0 : index
    %c0_20 = arith.constant 0 : index
    %c0_21 = arith.constant 0 : index
    %32 = vector.load %arg8[%c0_19, %c0_20, %c0_21] : memref<1x32x32xbf16, #tpu.memory_space<vmem>>, vector<1x32x32xbf16>
    %33 = vector.shape_cast %32 : vector<1x32x32xbf16> to vector<32x32xbf16>
    %34 = vector.shape_cast %31 : vector<32x32xbf16> to vector<1x32x32xbf16>
    tpu.vector_store %arg8[%c0_19, %c0_20, %c0_21], %34 {strides = array<i32>} : memref<1x32x32xbf16, #tpu.memory_space<vmem>>, vector<1x32x32xbf16>,
    return
  }
  func.func @transform_0(%arg0: i32, %arg1: i32) -> (i32, i32, i32) {
    %c0_i32 = arith.constant 0 : i32
    %c0_i32_0 = arith.constant 0 : i32
    return %arg1, %arg0, %c0_i32 : i32, i32, i32
  }
  func.func @transform_1(%arg0: i32, %arg1: i32) -> (i32, i32) {
    %c0_i32 = arith.constant 0 : i32
    %c0_i32_0 = arith.constant 0 : i32
    %c0_i32_1 = arith.constant 0 : i32
    return %c0_i32, %c0_i32_0 : i32, i32
  }
  func.func @transform_2(%arg0: i32, %arg1: i32) -> (i32, i32) {
    %c0_i32 = arith.constant 0 : i32
    %c0_i32_0 = arith.constant 0 : i32
    %c0_i32_1 = arith.constant 0 : i32
    return %c0_i32, %c0_i32_0 : i32, i32
  }
  func.func @transform_3(%arg0: i32, %arg1: i32) -> (i32, i32) {
    %c0_i32 = arith.constant 0 : i32
    %c0_i32_0 = arith.constant 0 : i32
    %c0_i32_1 = arith.constant 0 : i32
    return %c0_i32, %c0_i32_0 : i32, i32
  }
  func.func @transform_4(%arg0: i32, %arg1: i32) -> (i32, i32) {
    %c0_i32 = arith.constant 0 : i32
    %c0_i32_0 = arith.constant 0 : i32
    %c0_i32_1 = arith.constant 0 : i32
    return %c0_i32, %c0_i32_0 : i32, i32
  }
  func.func @transform_5(%arg0: i32, %arg1: i32) -> (i32, i32, i32) {
    %c0_i32 = arith.constant 0 : i32
    %c0_i32_0 = arith.constant 0 : i32
    return %arg1, %arg0, %c0_i32 : i32, i32, i32
  }
  func.func @transform_6(%arg0: i32, %arg1: i32) -> (i32, i32, i32) {
    %c0_i32 = arith.constant 0 : i32
    %c0_i32_0 = arith.constant 0 : i32
    return %arg1, %arg0, %c0_i32 : i32, i32, i32
  }
}

module attributes {stable_mosaic.version = 11 : i64} {
  func.func @_enc_kernel(%arg0: i32, %arg1: i32, %arg2: memref<4x1x8x32xbf16, #tpu.memory_space<vmem>>, %arg3: memref<4x32x64xbf16, #tpu.memory_space<vmem>>, %arg4: memref<1x64xf32, #tpu.memory_space<vmem>>, %arg5: memref<64x64xbf16, #tpu.memory_space<vmem>>, %arg6: memref<1x64xf32, #tpu.memory_space<vmem>>, %arg7: memref<1x8x64xbf16, #tpu.memory_space<vmem>>, %arg8: memref<1x8x64xbf16, #tpu.memory_space<vmem>>) attributes {dimension_semantics = [#tpu.dimension_semantics<parallel>, #tpu.dimension_semantics<parallel>], iteration_bounds = array<i64: 1, 4>, scalar_prefetch = 0 : i64, scratch_operands = 0 : i64, tpu.core_type = #tpu.core_type<tc>, window_params = [{transform_indices = @transform_0, window_bounds = array<i64: 4, 1, 8, 32>}, {pipeline_mode = #tpu.pipeline_mode<synchronous>, transform_indices = @transform_1, window_bounds = array<i64: 4, 32, 64>}, {pipeline_mode = #tpu.pipeline_mode<synchronous>, transform_indices = @transform_2, window_bounds = array<i64: 1, 64>}, {pipeline_mode = #tpu.pipeline_mode<synchronous>, transform_indices = @transform_3, window_bounds = array<i64: 64, 64>}, {pipeline_mode = #tpu.pipeline_mode<synchronous>, transform_indices = @transform_4, window_bounds = array<i64: 1, 64>}, {transform_indices = @transform_5, window_bounds = array<i64: 1, 8, 64>}, {transform_indices = @transform_6, window_bounds = array<i64: 1, 8, 64>}]} {
    %c0 = arith.constant 0 : index
    %c0_0 = arith.constant 0 : index
    %c0_1 = arith.constant 0 : index
    %c0_2 = arith.constant 0 : index
    %0 = vector.load %arg2[%c0, %c0_0, %c0_1, %c0_2] : memref<4x1x8x32xbf16, #tpu.memory_space<vmem>>, vector<1x1x8x32xbf16>
    %1 = vector.shape_cast %0 : vector<1x1x8x32xbf16> to vector<8x32xbf16>
    %c0_3 = arith.constant 0 : index
    %c0_4 = arith.constant 0 : index
    %c0_5 = arith.constant 0 : index
    %2 = vector.load %arg3[%c0_3, %c0_4, %c0_5] : memref<4x32x64xbf16, #tpu.memory_space<vmem>>, vector<1x32x64xbf16>
    %3 = vector.shape_cast %2 : vector<1x32x64xbf16> to vector<32x64xbf16>
    %cst = arith.constant dense<0.000000e+00> : vector<8x64xf32>
    %4 = tpu.matmul %1, %3, %cst {dimension_numbers = #tpu.dot_dimension_numbers<[1], [0], [0], [1], [0, 0, 1, 1], [], []>} : vector<8x32xbf16>, vector<32x64xbf16>, vector<8x64xf32> -> vector<8x64xf32>
    %c1 = arith.constant 1 : index
    %c0_6 = arith.constant 0 : index
    %c0_7 = arith.constant 0 : index
    %c0_8 = arith.constant 0 : index
    %5 = vector.load %arg2[%c1, %c0_6, %c0_7, %c0_8] : memref<4x1x8x32xbf16, #tpu.memory_space<vmem>>, vector<1x1x8x32xbf16>
    %6 = vector.shape_cast %5 : vector<1x1x8x32xbf16> to vector<8x32xbf16>
    %c1_9 = arith.constant 1 : index
    %c0_10 = arith.constant 0 : index
    %c0_11 = arith.constant 0 : index
    %7 = vector.load %arg3[%c1_9, %c0_10, %c0_11] : memref<4x32x64xbf16, #tpu.memory_space<vmem>>, vector<1x32x64xbf16>
    %8 = vector.shape_cast %7 : vector<1x32x64xbf16> to vector<32x64xbf16>
    %cst_12 = arith.constant dense<0.000000e+00> : vector<8x64xf32>
    %9 = tpu.matmul %6, %8, %cst_12 {dimension_numbers = #tpu.dot_dimension_numbers<[1], [0], [0], [1], [0, 0, 1, 1], [], []>} : vector<8x32xbf16>, vector<32x64xbf16>, vector<8x64xf32> -> vector<8x64xf32>
    %10 = arith.addf %4, %9 : vector<8x64xf32>
    %c2 = arith.constant 2 : index
    %c0_13 = arith.constant 0 : index
    %c0_14 = arith.constant 0 : index
    %c0_15 = arith.constant 0 : index
    %11 = vector.load %arg2[%c2, %c0_13, %c0_14, %c0_15] : memref<4x1x8x32xbf16, #tpu.memory_space<vmem>>, vector<1x1x8x32xbf16>
    %12 = vector.shape_cast %11 : vector<1x1x8x32xbf16> to vector<8x32xbf16>
    %c2_16 = arith.constant 2 : index
    %c0_17 = arith.constant 0 : index
    %c0_18 = arith.constant 0 : index
    %13 = vector.load %arg3[%c2_16, %c0_17, %c0_18] : memref<4x32x64xbf16, #tpu.memory_space<vmem>>, vector<1x32x64xbf16>
    %14 = vector.shape_cast %13 : vector<1x32x64xbf16> to vector<32x64xbf16>
    %cst_19 = arith.constant dense<0.000000e+00> : vector<8x64xf32>
    %15 = tpu.matmul %12, %14, %cst_19 {dimension_numbers = #tpu.dot_dimension_numbers<[1], [0], [0], [1], [0, 0, 1, 1], [], []>} : vector<8x32xbf16>, vector<32x64xbf16>, vector<8x64xf32> -> vector<8x64xf32>
    %16 = arith.addf %10, %15 : vector<8x64xf32>
    %c3 = arith.constant 3 : index
    %c0_20 = arith.constant 0 : index
    %c0_21 = arith.constant 0 : index
    %c0_22 = arith.constant 0 : index
    %17 = vector.load %arg2[%c3, %c0_20, %c0_21, %c0_22] : memref<4x1x8x32xbf16, #tpu.memory_space<vmem>>, vector<1x1x8x32xbf16>
    %18 = vector.shape_cast %17 : vector<1x1x8x32xbf16> to vector<8x32xbf16>
    %c3_23 = arith.constant 3 : index
    %c0_24 = arith.constant 0 : index
    %c0_25 = arith.constant 0 : index
    %19 = vector.load %arg3[%c3_23, %c0_24, %c0_25] : memref<4x32x64xbf16, #tpu.memory_space<vmem>>, vector<1x32x64xbf16>
    %20 = vector.shape_cast %19 : vector<1x32x64xbf16> to vector<32x64xbf16>
    %cst_26 = arith.constant dense<0.000000e+00> : vector<8x64xf32>
    %21 = tpu.matmul %18, %20, %cst_26 {dimension_numbers = #tpu.dot_dimension_numbers<[1], [0], [0], [1], [0, 0, 1, 1], [], []>} : vector<8x32xbf16>, vector<32x64xbf16>, vector<8x64xf32> -> vector<8x64xf32>
    %22 = arith.addf %16, %21 : vector<8x64xf32>
    %c0_27 = arith.constant 0 : index
    %c0_28 = arith.constant 0 : index
    %23 = vector.load %arg4[%c0_27, %c0_28] : memref<1x64xf32, #tpu.memory_space<vmem>>, vector<1x64xf32>
    %24 = vector.broadcast %23 : vector<1x64xf32> to vector<8x64xf32>
    %25 = arith.addf %22, %24 : vector<8x64xf32>
    %cst_29 = arith.constant 5.000000e-01 : f32
    %26 = vector.broadcast %cst_29 : f32 to vector<8x64xf32>
    %27 = arith.mulf %26, %25 : vector<8x64xf32>
    %28 = arith.mulf %25, %25 : vector<8x64xf32>
    %29 = arith.mulf %28, %25 : vector<8x64xf32>
    %cst_30 = arith.constant 4.471500e-02 : f32
    %30 = vector.broadcast %cst_30 : f32 to vector<8x64xf32>
    %31 = arith.mulf %30, %29 : vector<8x64xf32>
    %32 = arith.addf %25, %31 : vector<8x64xf32>
    %cst_31 = arith.constant 0.797884583 : f32
    %33 = vector.broadcast %cst_31 : f32 to vector<8x64xf32>
    %34 = arith.mulf %33, %32 : vector<8x64xf32>
    %35 = math.tanh %34 : vector<8x64xf32>
    %cst_32 = arith.constant 1.000000e+00 : f32
    %36 = vector.broadcast %cst_32 : f32 to vector<8x64xf32>
    %37 = arith.addf %36, %35 : vector<8x64xf32>
    %38 = arith.mulf %27, %37 : vector<8x64xf32>
    %39 = arith.truncf %38 : vector<8x64xf32> to vector<8x64xbf16>
    %c0_33 = arith.constant 0 : index
    %c0_34 = arith.constant 0 : index
    %c0_35 = arith.constant 0 : index
    %40 = vector.load %arg7[%c0_33, %c0_34, %c0_35] : memref<1x8x64xbf16, #tpu.memory_space<vmem>>, vector<1x8x64xbf16>
    %41 = vector.shape_cast %40 : vector<1x8x64xbf16> to vector<8x64xbf16>
    %42 = vector.shape_cast %39 : vector<8x64xbf16> to vector<1x8x64xbf16>
    tpu.vector_store %arg7[%c0_33, %c0_34, %c0_35], %42 {strides = array<i32>} : memref<1x8x64xbf16, #tpu.memory_space<vmem>>, vector<1x8x64xbf16>,
    %c0_36 = arith.constant 0 : index
    %c0_37 = arith.constant 0 : index
    %43 = vector.load %arg5[%c0_36, %c0_37] : memref<64x64xbf16, #tpu.memory_space<vmem>>, vector<64x64xbf16>
    %cst_38 = arith.constant dense<0.000000e+00> : vector<8x64xf32>
    %44 = tpu.matmul %39, %43, %cst_38 {dimension_numbers = #tpu.dot_dimension_numbers<[1], [0], [0], [1], [0, 0, 1, 1], [], []>} : vector<8x64xbf16>, vector<64x64xbf16>, vector<8x64xf32> -> vector<8x64xf32>
    %c0_39 = arith.constant 0 : index
    %c0_40 = arith.constant 0 : index
    %45 = vector.load %arg6[%c0_39, %c0_40] : memref<1x64xf32, #tpu.memory_space<vmem>>, vector<1x64xf32>
    %46 = vector.broadcast %45 : vector<1x64xf32> to vector<8x64xf32>
    %47 = arith.addf %44, %46 : vector<8x64xf32>
    %cst_41 = arith.constant 0.000000e+00 : f32
    %48 = vector.broadcast %cst_41 : f32 to vector<8x64xf32>
    %49 = arith.maximumf %47, %48 : vector<8x64xf32>
    %50 = arith.truncf %49 : vector<8x64xf32> to vector<8x64xbf16>
    %c0_42 = arith.constant 0 : index
    %c0_43 = arith.constant 0 : index
    %c0_44 = arith.constant 0 : index
    %51 = vector.load %arg8[%c0_42, %c0_43, %c0_44] : memref<1x8x64xbf16, #tpu.memory_space<vmem>>, vector<1x8x64xbf16>
    %52 = vector.shape_cast %51 : vector<1x8x64xbf16> to vector<8x64xbf16>
    %53 = vector.shape_cast %50 : vector<8x64xbf16> to vector<1x8x64xbf16>
    tpu.vector_store %arg8[%c0_42, %c0_43, %c0_44], %53 {strides = array<i32>} : memref<1x8x64xbf16, #tpu.memory_space<vmem>>, vector<1x8x64xbf16>,
    return
  }
  func.func @transform_0(%arg0: i32, %arg1: i32) -> (i32, i32, i32, i32) {
    %c0_i32 = arith.constant 0 : i32
    %c0_i32_0 = arith.constant 0 : i32
    %c0_i32_1 = arith.constant 0 : i32
    return %c0_i32, %arg1, %arg0, %c0_i32_0 : i32, i32, i32, i32
  }
  func.func @transform_1(%arg0: i32, %arg1: i32) -> (i32, i32, i32) {
    %c0_i32 = arith.constant 0 : i32
    %c0_i32_0 = arith.constant 0 : i32
    %c0_i32_1 = arith.constant 0 : i32
    %c0_i32_2 = arith.constant 0 : i32
    return %c0_i32, %c0_i32_0, %c0_i32_1 : i32, i32, i32
  }
  func.func @transform_2(%arg0: i32, %arg1: i32) -> (i32, i32) {
    %c0_i32 = arith.constant 0 : i32
    %c0_i32_0 = arith.constant 0 : i32
    %c0_i32_1 = arith.constant 0 : i32
    return %c0_i32, %c0_i32_0 : i32, i32
  }
  func.func @transform_3(%arg0: i32, %arg1: i32) -> (i32, i32) {
    %c0_i32 = arith.constant 0 : i32
    %c0_i32_0 = arith.constant 0 : i32
    %c0_i32_1 = arith.constant 0 : i32
    return %c0_i32, %c0_i32_0 : i32, i32
  }
  func.func @transform_4(%arg0: i32, %arg1: i32) -> (i32, i32) {
    %c0_i32 = arith.constant 0 : i32
    %c0_i32_0 = arith.constant 0 : i32
    %c0_i32_1 = arith.constant 0 : i32
    return %c0_i32, %c0_i32_0 : i32, i32
  }
  func.func @transform_5(%arg0: i32, %arg1: i32) -> (i32, i32, i32) {
    %c0_i32 = arith.constant 0 : i32
    %c0_i32_0 = arith.constant 0 : i32
    return %arg1, %arg0, %c0_i32 : i32, i32, i32
  }
  func.func @transform_6(%arg0: i32, %arg1: i32) -> (i32, i32, i32) {
    %c0_i32 = arith.constant 0 : i32
    %c0_i32_0 = arith.constant 0 : i32
    return %arg1, %arg0, %c0_i32 : i32, i32, i32
  }
}

module attributes {stable_mosaic.version = 11 : i64} {
  func.func @_enc_last_kernel(%arg0: i32, %arg1: memref<4x2x128xbf16, #tpu.memory_space<vmem>>, %arg2: memref<4x128x256xbf16, #tpu.memory_space<vmem>>, %arg3: memref<1x256xf32, #tpu.memory_space<vmem>>, %arg4: memref<256x256xbf16, #tpu.memory_space<vmem>>, %arg5: memref<1x256xf32, #tpu.memory_space<vmem>>, %arg6: memref<256x128xbf16, #tpu.memory_space<vmem>>, %arg7: memref<2x128xbf16, #tpu.memory_space<vmem>>) attributes {dimension_semantics = [#tpu.dimension_semantics<parallel>], iteration_bounds = array<i64: 1>, scalar_prefetch = 0 : i64, scratch_operands = 0 : i64, tpu.core_type = #tpu.core_type<tc>, window_params = [{transform_indices = @transform_0, window_bounds = array<i64: 4, 2, 128>}, {pipeline_mode = #tpu.pipeline_mode<synchronous>, transform_indices = @transform_1, window_bounds = array<i64: 4, 128, 256>}, {pipeline_mode = #tpu.pipeline_mode<synchronous>, transform_indices = @transform_2, window_bounds = array<i64: 1, 256>}, {pipeline_mode = #tpu.pipeline_mode<synchronous>, transform_indices = @transform_3, window_bounds = array<i64: 256, 256>}, {pipeline_mode = #tpu.pipeline_mode<synchronous>, transform_indices = @transform_4, window_bounds = array<i64: 1, 256>}, {pipeline_mode = #tpu.pipeline_mode<synchronous>, transform_indices = @transform_5, window_bounds = array<i64: 256, 128>}, {transform_indices = @transform_6, window_bounds = array<i64: 2, 128>}]} {
    %c0 = arith.constant 0 : index
    %c0_0 = arith.constant 0 : index
    %c0_1 = arith.constant 0 : index
    %0 = vector.load %arg1[%c0, %c0_0, %c0_1] : memref<4x2x128xbf16, #tpu.memory_space<vmem>>, vector<1x2x128xbf16>
    %1 = vector.shape_cast %0 : vector<1x2x128xbf16> to vector<2x128xbf16>
    %c0_2 = arith.constant 0 : index
    %c0_3 = arith.constant 0 : index
    %c0_4 = arith.constant 0 : index
    %2 = vector.load %arg2[%c0_2, %c0_3, %c0_4] : memref<4x128x256xbf16, #tpu.memory_space<vmem>>, vector<1x128x256xbf16>
    %3 = vector.shape_cast %2 : vector<1x128x256xbf16> to vector<128x256xbf16>
    %cst = arith.constant dense<0.000000e+00> : vector<2x256xf32>
    %4 = tpu.matmul %1, %3, %cst {dimension_numbers = #tpu.dot_dimension_numbers<[1], [0], [0], [1], [0, 0, 1, 1], [], []>} : vector<2x128xbf16>, vector<128x256xbf16>, vector<2x256xf32> -> vector<2x256xf32>
    %c1 = arith.constant 1 : index
    %c0_5 = arith.constant 0 : index
    %c0_6 = arith.constant 0 : index
    %5 = vector.load %arg1[%c1, %c0_5, %c0_6] : memref<4x2x128xbf16, #tpu.memory_space<vmem>>, vector<1x2x128xbf16>
    %6 = vector.shape_cast %5 : vector<1x2x128xbf16> to vector<2x128xbf16>
    %c1_7 = arith.constant 1 : index
    %c0_8 = arith.constant 0 : index
    %c0_9 = arith.constant 0 : index
    %7 = vector.load %arg2[%c1_7, %c0_8, %c0_9] : memref<4x128x256xbf16, #tpu.memory_space<vmem>>, vector<1x128x256xbf16>
    %8 = vector.shape_cast %7 : vector<1x128x256xbf16> to vector<128x256xbf16>
    %cst_10 = arith.constant dense<0.000000e+00> : vector<2x256xf32>
    %9 = tpu.matmul %6, %8, %cst_10 {dimension_numbers = #tpu.dot_dimension_numbers<[1], [0], [0], [1], [0, 0, 1, 1], [], []>} : vector<2x128xbf16>, vector<128x256xbf16>, vector<2x256xf32> -> vector<2x256xf32>
    %10 = arith.addf %4, %9 : vector<2x256xf32>
    %c2 = arith.constant 2 : index
    %c0_11 = arith.constant 0 : index
    %c0_12 = arith.constant 0 : index
    %11 = vector.load %arg1[%c2, %c0_11, %c0_12] : memref<4x2x128xbf16, #tpu.memory_space<vmem>>, vector<1x2x128xbf16>
    %12 = vector.shape_cast %11 : vector<1x2x128xbf16> to vector<2x128xbf16>
    %c2_13 = arith.constant 2 : index
    %c0_14 = arith.constant 0 : index
    %c0_15 = arith.constant 0 : index
    %13 = vector.load %arg2[%c2_13, %c0_14, %c0_15] : memref<4x128x256xbf16, #tpu.memory_space<vmem>>, vector<1x128x256xbf16>
    %14 = vector.shape_cast %13 : vector<1x128x256xbf16> to vector<128x256xbf16>
    %cst_16 = arith.constant dense<0.000000e+00> : vector<2x256xf32>
    %15 = tpu.matmul %12, %14, %cst_16 {dimension_numbers = #tpu.dot_dimension_numbers<[1], [0], [0], [1], [0, 0, 1, 1], [], []>} : vector<2x128xbf16>, vector<128x256xbf16>, vector<2x256xf32> -> vector<2x256xf32>
    %16 = arith.addf %10, %15 : vector<2x256xf32>
    %c3 = arith.constant 3 : index
    %c0_17 = arith.constant 0 : index
    %c0_18 = arith.constant 0 : index
    %17 = vector.load %arg1[%c3, %c0_17, %c0_18] : memref<4x2x128xbf16, #tpu.memory_space<vmem>>, vector<1x2x128xbf16>
    %18 = vector.shape_cast %17 : vector<1x2x128xbf16> to vector<2x128xbf16>
    %c3_19 = arith.constant 3 : index
    %c0_20 = arith.constant 0 : index
    %c0_21 = arith.constant 0 : index
    %19 = vector.load %arg2[%c3_19, %c0_20, %c0_21] : memref<4x128x256xbf16, #tpu.memory_space<vmem>>, vector<1x128x256xbf16>
    %20 = vector.shape_cast %19 : vector<1x128x256xbf16> to vector<128x256xbf16>
    %cst_22 = arith.constant dense<0.000000e+00> : vector<2x256xf32>
    %21 = tpu.matmul %18, %20, %cst_22 {dimension_numbers = #tpu.dot_dimension_numbers<[1], [0], [0], [1], [0, 0, 1, 1], [], []>} : vector<2x128xbf16>, vector<128x256xbf16>, vector<2x256xf32> -> vector<2x256xf32>
    %22 = arith.addf %16, %21 : vector<2x256xf32>
    %c0_23 = arith.constant 0 : index
    %c0_24 = arith.constant 0 : index
    %23 = vector.load %arg3[%c0_23, %c0_24] : memref<1x256xf32, #tpu.memory_space<vmem>>, vector<1x256xf32>
    %24 = vector.broadcast %23 : vector<1x256xf32> to vector<2x256xf32>
    %25 = arith.addf %22, %24 : vector<2x256xf32>
    %cst_25 = arith.constant 5.000000e-01 : f32
    %26 = vector.broadcast %cst_25 : f32 to vector<2x256xf32>
    %27 = arith.mulf %26, %25 : vector<2x256xf32>
    %28 = arith.mulf %25, %25 : vector<2x256xf32>
    %29 = arith.mulf %28, %25 : vector<2x256xf32>
    %cst_26 = arith.constant 4.471500e-02 : f32
    %30 = vector.broadcast %cst_26 : f32 to vector<2x256xf32>
    %31 = arith.mulf %30, %29 : vector<2x256xf32>
    %32 = arith.addf %25, %31 : vector<2x256xf32>
    %cst_27 = arith.constant 0.797884583 : f32
    %33 = vector.broadcast %cst_27 : f32 to vector<2x256xf32>
    %34 = arith.mulf %33, %32 : vector<2x256xf32>
    %35 = math.tanh %34 : vector<2x256xf32>
    %cst_28 = arith.constant 1.000000e+00 : f32
    %36 = vector.broadcast %cst_28 : f32 to vector<2x256xf32>
    %37 = arith.addf %36, %35 : vector<2x256xf32>
    %38 = arith.mulf %27, %37 : vector<2x256xf32>
    %39 = arith.truncf %38 : vector<2x256xf32> to vector<2x256xbf16>
    %c0_29 = arith.constant 0 : index
    %c0_30 = arith.constant 0 : index
    %40 = vector.load %arg4[%c0_29, %c0_30] : memref<256x256xbf16, #tpu.memory_space<vmem>>, vector<256x256xbf16>
    %cst_31 = arith.constant dense<0.000000e+00> : vector<2x256xf32>
    %41 = tpu.matmul %39, %40, %cst_31 {dimension_numbers = #tpu.dot_dimension_numbers<[1], [0], [0], [1], [0, 0, 1, 1], [], []>} : vector<2x256xbf16>, vector<256x256xbf16>, vector<2x256xf32> -> vector<2x256xf32>
    %c0_32 = arith.constant 0 : index
    %c0_33 = arith.constant 0 : index
    %42 = vector.load %arg5[%c0_32, %c0_33] : memref<1x256xf32, #tpu.memory_space<vmem>>, vector<1x256xf32>
    %43 = vector.broadcast %42 : vector<1x256xf32> to vector<2x256xf32>
    %44 = arith.addf %41, %43 : vector<2x256xf32>
    %cst_34 = arith.constant 0.000000e+00 : f32
    %45 = vector.broadcast %cst_34 : f32 to vector<2x256xf32>
    %46 = arith.maximumf %44, %45 : vector<2x256xf32>
    %47 = arith.truncf %46 : vector<2x256xf32> to vector<2x256xbf16>
    %c0_35 = arith.constant 0 : index
    %c0_36 = arith.constant 0 : index
    %48 = vector.load %arg6[%c0_35, %c0_36] : memref<256x128xbf16, #tpu.memory_space<vmem>>, vector<256x128xbf16>
    %cst_37 = arith.constant dense<0.000000e+00> : vector<2x128xf32>
    %49 = tpu.matmul %47, %48, %cst_37 {dimension_numbers = #tpu.dot_dimension_numbers<[1], [0], [0], [1], [0, 0, 1, 1], [], []>} : vector<2x256xbf16>, vector<256x128xbf16>, vector<2x128xf32> -> vector<2x128xf32>
    %50 = arith.truncf %49 : vector<2x128xf32> to vector<2x128xbf16>
    %c0_38 = arith.constant 0 : index
    %c0_39 = arith.constant 0 : index
    %51 = vector.load %arg7[%c0_38, %c0_39] : memref<2x128xbf16, #tpu.memory_space<vmem>>, vector<2x128xbf16>
    tpu.vector_store %arg7[%c0_38, %c0_39], %50 {strides = array<i32>} : memref<2x128xbf16, #tpu.memory_space<vmem>>, vector<2x128xbf16>,
    return
  }
  func.func @transform_0(%arg0: i32) -> (i32, i32, i32) {
    %c0_i32 = arith.constant 0 : i32
    %c0_i32_0 = arith.constant 0 : i32
    %c0_i32_1 = arith.constant 0 : i32
    return %c0_i32, %arg0, %c0_i32_0 : i32, i32, i32
  }
  func.func @transform_1(%arg0: i32) -> (i32, i32, i32) {
    %c0_i32 = arith.constant 0 : i32
    %c0_i32_0 = arith.constant 0 : i32
    %c0_i32_1 = arith.constant 0 : i32
    %c0_i32_2 = arith.constant 0 : i32
    return %c0_i32, %c0_i32_0, %c0_i32_1 : i32, i32, i32
  }
  func.func @transform_2(%arg0: i32) -> (i32, i32) {
    %c0_i32 = arith.constant 0 : i32
    %c0_i32_0 = arith.constant 0 : i32
    %c0_i32_1 = arith.constant 0 : i32
    return %c0_i32, %c0_i32_0 : i32, i32
  }
  func.func @transform_3(%arg0: i32) -> (i32, i32) {
    %c0_i32 = arith.constant 0 : i32
    %c0_i32_0 = arith.constant 0 : i32
    %c0_i32_1 = arith.constant 0 : i32
    return %c0_i32, %c0_i32_0 : i32, i32
  }
  func.func @transform_4(%arg0: i32) -> (i32, i32) {
    %c0_i32 = arith.constant 0 : i32
    %c0_i32_0 = arith.constant 0 : i32
    %c0_i32_1 = arith.constant 0 : i32
    return %c0_i32, %c0_i32_0 : i32, i32
  }
  func.func @transform_5(%arg0: i32) -> (i32, i32) {
    %c0_i32 = arith.constant 0 : i32
    %c0_i32_0 = arith.constant 0 : i32
    %c0_i32_1 = arith.constant 0 : i32
    return %c0_i32, %c0_i32_0 : i32, i32
  }
  func.func @transform_6(%arg0: i32) -> (i32, i32) {
    %c0_i32 = arith.constant 0 : i32
    %c0_i32_0 = arith.constant 0 : i32
    return %arg0, %c0_i32 : i32, i32
  }
}

module attributes {stable_mosaic.version = 11 : i64} {
  func.func @_enc_kernel(%arg0: i32, %arg1: i32, %arg2: memref<4x1x2x64xbf16, #tpu.memory_space<vmem>>, %arg3: memref<4x64x128xbf16, #tpu.memory_space<vmem>>, %arg4: memref<1x128xf32, #tpu.memory_space<vmem>>, %arg5: memref<128x128xbf16, #tpu.memory_space<vmem>>, %arg6: memref<1x128xf32, #tpu.memory_space<vmem>>, %arg7: memref<1x2x128xbf16, #tpu.memory_space<vmem>>, %arg8: memref<1x2x128xbf16, #tpu.memory_space<vmem>>) attributes {dimension_semantics = [#tpu.dimension_semantics<parallel>, #tpu.dimension_semantics<parallel>], iteration_bounds = array<i64: 1, 4>, scalar_prefetch = 0 : i64, scratch_operands = 0 : i64, tpu.core_type = #tpu.core_type<tc>, window_params = [{transform_indices = @transform_0, window_bounds = array<i64: 4, 1, 2, 64>}, {pipeline_mode = #tpu.pipeline_mode<synchronous>, transform_indices = @transform_1, window_bounds = array<i64: 4, 64, 128>}, {pipeline_mode = #tpu.pipeline_mode<synchronous>, transform_indices = @transform_2, window_bounds = array<i64: 1, 128>}, {pipeline_mode = #tpu.pipeline_mode<synchronous>, transform_indices = @transform_3, window_bounds = array<i64: 128, 128>}, {pipeline_mode = #tpu.pipeline_mode<synchronous>, transform_indices = @transform_4, window_bounds = array<i64: 1, 128>}, {transform_indices = @transform_5, window_bounds = array<i64: 1, 2, 128>}, {transform_indices = @transform_6, window_bounds = array<i64: 1, 2, 128>}]} {
    %c0 = arith.constant 0 : index
    %c0_0 = arith.constant 0 : index
    %c0_1 = arith.constant 0 : index
    %c0_2 = arith.constant 0 : index
    %0 = vector.load %arg2[%c0, %c0_0, %c0_1, %c0_2] : memref<4x1x2x64xbf16, #tpu.memory_space<vmem>>, vector<1x1x2x64xbf16>
    %1 = vector.shape_cast %0 : vector<1x1x2x64xbf16> to vector<2x64xbf16>
    %c0_3 = arith.constant 0 : index
    %c0_4 = arith.constant 0 : index
    %c0_5 = arith.constant 0 : index
    %2 = vector.load %arg3[%c0_3, %c0_4, %c0_5] : memref<4x64x128xbf16, #tpu.memory_space<vmem>>, vector<1x64x128xbf16>
    %3 = vector.shape_cast %2 : vector<1x64x128xbf16> to vector<64x128xbf16>
    %cst = arith.constant dense<0.000000e+00> : vector<2x128xf32>
    %4 = tpu.matmul %1, %3, %cst {dimension_numbers = #tpu.dot_dimension_numbers<[1], [0], [0], [1], [0, 0, 1, 1], [], []>} : vector<2x64xbf16>, vector<64x128xbf16>, vector<2x128xf32> -> vector<2x128xf32>
    %c1 = arith.constant 1 : index
    %c0_6 = arith.constant 0 : index
    %c0_7 = arith.constant 0 : index
    %c0_8 = arith.constant 0 : index
    %5 = vector.load %arg2[%c1, %c0_6, %c0_7, %c0_8] : memref<4x1x2x64xbf16, #tpu.memory_space<vmem>>, vector<1x1x2x64xbf16>
    %6 = vector.shape_cast %5 : vector<1x1x2x64xbf16> to vector<2x64xbf16>
    %c1_9 = arith.constant 1 : index
    %c0_10 = arith.constant 0 : index
    %c0_11 = arith.constant 0 : index
    %7 = vector.load %arg3[%c1_9, %c0_10, %c0_11] : memref<4x64x128xbf16, #tpu.memory_space<vmem>>, vector<1x64x128xbf16>
    %8 = vector.shape_cast %7 : vector<1x64x128xbf16> to vector<64x128xbf16>
    %cst_12 = arith.constant dense<0.000000e+00> : vector<2x128xf32>
    %9 = tpu.matmul %6, %8, %cst_12 {dimension_numbers = #tpu.dot_dimension_numbers<[1], [0], [0], [1], [0, 0, 1, 1], [], []>} : vector<2x64xbf16>, vector<64x128xbf16>, vector<2x128xf32> -> vector<2x128xf32>
    %10 = arith.addf %4, %9 : vector<2x128xf32>
    %c2 = arith.constant 2 : index
    %c0_13 = arith.constant 0 : index
    %c0_14 = arith.constant 0 : index
    %c0_15 = arith.constant 0 : index
    %11 = vector.load %arg2[%c2, %c0_13, %c0_14, %c0_15] : memref<4x1x2x64xbf16, #tpu.memory_space<vmem>>, vector<1x1x2x64xbf16>
    %12 = vector.shape_cast %11 : vector<1x1x2x64xbf16> to vector<2x64xbf16>
    %c2_16 = arith.constant 2 : index
    %c0_17 = arith.constant 0 : index
    %c0_18 = arith.constant 0 : index
    %13 = vector.load %arg3[%c2_16, %c0_17, %c0_18] : memref<4x64x128xbf16, #tpu.memory_space<vmem>>, vector<1x64x128xbf16>
    %14 = vector.shape_cast %13 : vector<1x64x128xbf16> to vector<64x128xbf16>
    %cst_19 = arith.constant dense<0.000000e+00> : vector<2x128xf32>
    %15 = tpu.matmul %12, %14, %cst_19 {dimension_numbers = #tpu.dot_dimension_numbers<[1], [0], [0], [1], [0, 0, 1, 1], [], []>} : vector<2x64xbf16>, vector<64x128xbf16>, vector<2x128xf32> -> vector<2x128xf32>
    %16 = arith.addf %10, %15 : vector<2x128xf32>
    %c3 = arith.constant 3 : index
    %c0_20 = arith.constant 0 : index
    %c0_21 = arith.constant 0 : index
    %c0_22 = arith.constant 0 : index
    %17 = vector.load %arg2[%c3, %c0_20, %c0_21, %c0_22] : memref<4x1x2x64xbf16, #tpu.memory_space<vmem>>, vector<1x1x2x64xbf16>
    %18 = vector.shape_cast %17 : vector<1x1x2x64xbf16> to vector<2x64xbf16>
    %c3_23 = arith.constant 3 : index
    %c0_24 = arith.constant 0 : index
    %c0_25 = arith.constant 0 : index
    %19 = vector.load %arg3[%c3_23, %c0_24, %c0_25] : memref<4x64x128xbf16, #tpu.memory_space<vmem>>, vector<1x64x128xbf16>
    %20 = vector.shape_cast %19 : vector<1x64x128xbf16> to vector<64x128xbf16>
    %cst_26 = arith.constant dense<0.000000e+00> : vector<2x128xf32>
    %21 = tpu.matmul %18, %20, %cst_26 {dimension_numbers = #tpu.dot_dimension_numbers<[1], [0], [0], [1], [0, 0, 1, 1], [], []>} : vector<2x64xbf16>, vector<64x128xbf16>, vector<2x128xf32> -> vector<2x128xf32>
    %22 = arith.addf %16, %21 : vector<2x128xf32>
    %c0_27 = arith.constant 0 : index
    %c0_28 = arith.constant 0 : index
    %23 = vector.load %arg4[%c0_27, %c0_28] : memref<1x128xf32, #tpu.memory_space<vmem>>, vector<1x128xf32>
    %24 = vector.broadcast %23 : vector<1x128xf32> to vector<2x128xf32>
    %25 = arith.addf %22, %24 : vector<2x128xf32>
    %cst_29 = arith.constant 5.000000e-01 : f32
    %26 = vector.broadcast %cst_29 : f32 to vector<2x128xf32>
    %27 = arith.mulf %26, %25 : vector<2x128xf32>
    %28 = arith.mulf %25, %25 : vector<2x128xf32>
    %29 = arith.mulf %28, %25 : vector<2x128xf32>
    %cst_30 = arith.constant 4.471500e-02 : f32
    %30 = vector.broadcast %cst_30 : f32 to vector<2x128xf32>
    %31 = arith.mulf %30, %29 : vector<2x128xf32>
    %32 = arith.addf %25, %31 : vector<2x128xf32>
    %cst_31 = arith.constant 0.797884583 : f32
    %33 = vector.broadcast %cst_31 : f32 to vector<2x128xf32>
    %34 = arith.mulf %33, %32 : vector<2x128xf32>
    %35 = math.tanh %34 : vector<2x128xf32>
    %cst_32 = arith.constant 1.000000e+00 : f32
    %36 = vector.broadcast %cst_32 : f32 to vector<2x128xf32>
    %37 = arith.addf %36, %35 : vector<2x128xf32>
    %38 = arith.mulf %27, %37 : vector<2x128xf32>
    %39 = arith.truncf %38 : vector<2x128xf32> to vector<2x128xbf16>
    %c0_33 = arith.constant 0 : index
    %c0_34 = arith.constant 0 : index
    %c0_35 = arith.constant 0 : index
    %40 = vector.load %arg7[%c0_33, %c0_34, %c0_35] : memref<1x2x128xbf16, #tpu.memory_space<vmem>>, vector<1x2x128xbf16>
    %41 = vector.shape_cast %40 : vector<1x2x128xbf16> to vector<2x128xbf16>
    %42 = vector.shape_cast %39 : vector<2x128xbf16> to vector<1x2x128xbf16>
    tpu.vector_store %arg7[%c0_33, %c0_34, %c0_35], %42 {strides = array<i32>} : memref<1x2x128xbf16, #tpu.memory_space<vmem>>, vector<1x2x128xbf16>,
    %c0_36 = arith.constant 0 : index
    %c0_37 = arith.constant 0 : index
    %43 = vector.load %arg5[%c0_36, %c0_37] : memref<128x128xbf16, #tpu.memory_space<vmem>>, vector<128x128xbf16>
    %cst_38 = arith.constant dense<0.000000e+00> : vector<2x128xf32>
    %44 = tpu.matmul %39, %43, %cst_38 {dimension_numbers = #tpu.dot_dimension_numbers<[1], [0], [0], [1], [0, 0, 1, 1], [], []>} : vector<2x128xbf16>, vector<128x128xbf16>, vector<2x128xf32> -> vector<2x128xf32>
    %c0_39 = arith.constant 0 : index
    %c0_40 = arith.constant 0 : index
    %45 = vector.load %arg6[%c0_39, %c0_40] : memref<1x128xf32, #tpu.memory_space<vmem>>, vector<1x128xf32>
    %46 = vector.broadcast %45 : vector<1x128xf32> to vector<2x128xf32>
    %47 = arith.addf %44, %46 : vector<2x128xf32>
    %cst_41 = arith.constant 0.000000e+00 : f32
    %48 = vector.broadcast %cst_41 : f32 to vector<2x128xf32>
    %49 = arith.maximumf %47, %48 : vector<2x128xf32>
    %50 = arith.truncf %49 : vector<2x128xf32> to vector<2x128xbf16>
    %c0_42 = arith.constant 0 : index
    %c0_43 = arith.constant 0 : index
    %c0_44 = arith.constant 0 : index
    %51 = vector.load %arg8[%c0_42, %c0_43, %c0_44] : memref<1x2x128xbf16, #tpu.memory_space<vmem>>, vector<1x2x128xbf16>
    %52 = vector.shape_cast %51 : vector<1x2x128xbf16> to vector<2x128xbf16>
    %53 = vector.shape_cast %50 : vector<2x128xbf16> to vector<1x2x128xbf16>
    tpu.vector_store %arg8[%c0_42, %c0_43, %c0_44], %53 {strides = array<i32>} : memref<1x2x128xbf16, #tpu.memory_space<vmem>>, vector<1x2x128xbf16>,
    return
  }
  func.func @transform_0(%arg0: i32, %arg1: i32) -> (i32, i32, i32, i32) {
    %c0_i32 = arith.constant 0 : i32
    %c0_i32_0 = arith.constant 0 : i32
    %c0_i32_1 = arith.constant 0 : i32
    return %c0_i32, %arg1, %arg0, %c0_i32_0 : i32, i32, i32, i32
  }
  func.func @transform_1(%arg0: i32, %arg1: i32) -> (i32, i32, i32) {
    %c0_i32 = arith.constant 0 : i32
    %c0_i32_0 = arith.constant 0 : i32
    %c0_i32_1 = arith.constant 0 : i32
    %c0_i32_2 = arith.constant 0 : i32
    return %c0_i32, %c0_i32_0, %c0_i32_1 : i32, i32, i32
  }
  func.func @transform_2(%arg0: i32, %arg1: i32) -> (i32, i32) {
    %c0_i32 = arith.constant 0 : i32
    %c0_i32_0 = arith.constant 0 : i32
    %c0_i32_1 = arith.constant 0 : i32
    return %c0_i32, %c0_i32_0 : i32, i32
  }
  func.func @transform_3(%arg0: i32, %arg1: i32) -> (i32, i32) {
    %c0_i32 = arith.constant 0 : i32
    %c0_i32_0 = arith.constant 0 : i32
    %c0_i32_1 = arith.constant 0 : i32
    return %c0_i32, %c0_i32_0 : i32, i32
  }
  func.func @transform_4(%arg0: i32, %arg1: i32) -> (i32, i32) {
    %c0_i32 = arith.constant 0 : i32
    %c0_i32_0 = arith.constant 0 : i32
    %c0_i32_1 = arith.constant 0 : i32
    return %c0_i32, %c0_i32_0 : i32, i32
  }
  func.func @transform_5(%arg0: i32, %arg1: i32) -> (i32, i32, i32) {
    %c0_i32 = arith.constant 0 : i32
    %c0_i32_0 = arith.constant 0 : i32
    return %arg1, %arg0, %c0_i32 : i32, i32, i32
  }
  func.func @transform_6(%arg0: i32, %arg1: i32) -> (i32, i32, i32) {
    %c0_i32 = arith.constant 0 : i32
    %c0_i32_0 = arith.constant 0 : i32
    return %arg1, %arg0, %c0_i32 : i32, i32, i32
  }
}

module attributes {stable_mosaic.version = 11 : i64} {
  func.func @_dec_kernel(%arg0: i32, %arg1: i32, %arg2: memref<2x128xbf16, #tpu.memory_space<vmem>>, %arg3: memref<1x2x128xbf16, #tpu.memory_space<vmem>>, %arg4: memref<128x128xbf16, #tpu.memory_space<vmem>>, %arg5: memref<1x128xf32, #tpu.memory_space<vmem>>, %arg6: memref<128x64xbf16, #tpu.memory_space<vmem>>, %arg7: memref<1x2x64xbf16, #tpu.memory_space<vmem>>) attributes {dimension_semantics = [#tpu.dimension_semantics<parallel>, #tpu.dimension_semantics<parallel>], iteration_bounds = array<i64: 1, 4>, scalar_prefetch = 0 : i64, scratch_operands = 0 : i64, tpu.core_type = #tpu.core_type<tc>, window_params = [{transform_indices = @transform_0, window_bounds = array<i64: 2, 128>}, {transform_indices = @transform_1, window_bounds = array<i64: 1, 2, 128>}, {pipeline_mode = #tpu.pipeline_mode<synchronous>, transform_indices = @transform_2, window_bounds = array<i64: 128, 128>}, {pipeline_mode = #tpu.pipeline_mode<synchronous>, transform_indices = @transform_3, window_bounds = array<i64: 1, 128>}, {pipeline_mode = #tpu.pipeline_mode<synchronous>, transform_indices = @transform_4, window_bounds = array<i64: 128, 64>}, {transform_indices = @transform_5, window_bounds = array<i64: 1, 2, 64>}]} {
    %c0 = arith.constant 0 : index
    %c0_0 = arith.constant 0 : index
    %0 = vector.load %arg2[%c0, %c0_0] : memref<2x128xbf16, #tpu.memory_space<vmem>>, vector<2x128xbf16>
    %1 = arith.extf %0 : vector<2x128xbf16> to vector<2x128xf32>
    %c0_1 = arith.constant 0 : index
    %c0_2 = arith.constant 0 : index
    %c0_3 = arith.constant 0 : index
    %2 = vector.load %arg3[%c0_1, %c0_2, %c0_3] : memref<1x2x128xbf16, #tpu.memory_space<vmem>>, vector<1x2x128xbf16>
    %3 = vector.shape_cast %2 : vector<1x2x128xbf16> to vector<2x128xbf16>
    %c0_4 = arith.constant 0 : index
    %c0_5 = arith.constant 0 : index
    %4 = vector.load %arg4[%c0_4, %c0_5] : memref<128x128xbf16, #tpu.memory_space<vmem>>, vector<128x128xbf16>
    %cst = arith.constant dense<0.000000e+00> : vector<2x128xf32>
    %5 = tpu.matmul %3, %4, %cst {dimension_numbers = #tpu.dot_dimension_numbers<[1], [0], [0], [1], [0, 0, 1, 1], [], []>} : vector<2x128xbf16>, vector<128x128xbf16>, vector<2x128xf32> -> vector<2x128xf32>
    %6 = arith.addf %1, %5 : vector<2x128xf32>
    %c0_6 = arith.constant 0 : index
    %c0_7 = arith.constant 0 : index
    %7 = vector.load %arg5[%c0_6, %c0_7] : memref<1x128xf32, #tpu.memory_space<vmem>>, vector<1x128xf32>
    %8 = vector.broadcast %7 : vector<1x128xf32> to vector<2x128xf32>
    %9 = arith.addf %6, %8 : vector<2x128xf32>
    %cst_8 = arith.constant 5.000000e-01 : f32
    %10 = vector.broadcast %cst_8 : f32 to vector<2x128xf32>
    %11 = arith.mulf %10, %9 : vector<2x128xf32>
    %12 = arith.mulf %9, %9 : vector<2x128xf32>
    %13 = arith.mulf %12, %9 : vector<2x128xf32>
    %cst_9 = arith.constant 4.471500e-02 : f32
    %14 = vector.broadcast %cst_9 : f32 to vector<2x128xf32>
    %15 = arith.mulf %14, %13 : vector<2x128xf32>
    %16 = arith.addf %9, %15 : vector<2x128xf32>
    %cst_10 = arith.constant 0.797884583 : f32
    %17 = vector.broadcast %cst_10 : f32 to vector<2x128xf32>
    %18 = arith.mulf %17, %16 : vector<2x128xf32>
    %19 = math.tanh %18 : vector<2x128xf32>
    %cst_11 = arith.constant 1.000000e+00 : f32
    %20 = vector.broadcast %cst_11 : f32 to vector<2x128xf32>
    %21 = arith.addf %20, %19 : vector<2x128xf32>
    %22 = arith.mulf %11, %21 : vector<2x128xf32>
    %23 = arith.truncf %22 : vector<2x128xf32> to vector<2x128xbf16>
    %c0_12 = arith.constant 0 : index
    %c0_13 = arith.constant 0 : index
    %24 = vector.load %arg6[%c0_12, %c0_13] : memref<128x64xbf16, #tpu.memory_space<vmem>>, vector<128x64xbf16>
    %cst_14 = arith.constant dense<0.000000e+00> : vector<2x64xf32>
    %25 = tpu.matmul %23, %24, %cst_14 {dimension_numbers = #tpu.dot_dimension_numbers<[1], [0], [0], [1], [0, 0, 1, 1], [], []>} : vector<2x128xbf16>, vector<128x64xbf16>, vector<2x64xf32> -> vector<2x64xf32>
    %26 = arith.truncf %25 : vector<2x64xf32> to vector<2x64xbf16>
    %c0_15 = arith.constant 0 : index
    %c0_16 = arith.constant 0 : index
    %c0_17 = arith.constant 0 : index
    %27 = vector.load %arg7[%c0_15, %c0_16, %c0_17] : memref<1x2x64xbf16, #tpu.memory_space<vmem>>, vector<1x2x64xbf16>
    %28 = vector.shape_cast %27 : vector<1x2x64xbf16> to vector<2x64xbf16>
    %29 = vector.shape_cast %26 : vector<2x64xbf16> to vector<1x2x64xbf16>
    tpu.vector_store %arg7[%c0_15, %c0_16, %c0_17], %29 {strides = array<i32>} : memref<1x2x64xbf16, #tpu.memory_space<vmem>>, vector<1x2x64xbf16>,
    return
  }
  func.func @transform_0(%arg0: i32, %arg1: i32) -> (i32, i32) {
    %c0_i32 = arith.constant 0 : i32
    %c0_i32_0 = arith.constant 0 : i32
    return %arg0, %c0_i32 : i32, i32
  }
  func.func @transform_1(%arg0: i32, %arg1: i32) -> (i32, i32, i32) {
    %c0_i32 = arith.constant 0 : i32
    %c0_i32_0 = arith.constant 0 : i32
    return %arg1, %arg0, %c0_i32 : i32, i32, i32
  }
  func.func @transform_2(%arg0: i32, %arg1: i32) -> (i32, i32) {
    %c0_i32 = arith.constant 0 : i32
    %c0_i32_0 = arith.constant 0 : i32
    %c0_i32_1 = arith.constant 0 : i32
    return %c0_i32, %c0_i32_0 : i32, i32
  }
  func.func @transform_3(%arg0: i32, %arg1: i32) -> (i32, i32) {
    %c0_i32 = arith.constant 0 : i32
    %c0_i32_0 = arith.constant 0 : i32
    %c0_i32_1 = arith.constant 0 : i32
    return %c0_i32, %c0_i32_0 : i32, i32
  }
  func.func @transform_4(%arg0: i32, %arg1: i32) -> (i32, i32) {
    %c0_i32 = arith.constant 0 : i32
    %c0_i32_0 = arith.constant 0 : i32
    %c0_i32_1 = arith.constant 0 : i32
    return %c0_i32, %c0_i32_0 : i32, i32
  }
  func.func @transform_5(%arg0: i32, %arg1: i32) -> (i32, i32, i32) {
    %c0_i32 = arith.constant 0 : i32
    %c0_i32_0 = arith.constant 0 : i32
    return %arg1, %arg0, %c0_i32 : i32, i32, i32
  }
}

module attributes {stable_mosaic.version = 11 : i64} {
  func.func @_dec_kernel(%arg0: i32, %arg1: i32, %arg2: memref<8x64xbf16, #tpu.memory_space<vmem>>, %arg3: memref<1x8x64xbf16, #tpu.memory_space<vmem>>, %arg4: memref<64x64xbf16, #tpu.memory_space<vmem>>, %arg5: memref<1x64xf32, #tpu.memory_space<vmem>>, %arg6: memref<64x32xbf16, #tpu.memory_space<vmem>>, %arg7: memref<8x32xbf16, #tpu.memory_space<vmem>>) attributes {dimension_semantics = [#tpu.dimension_semantics<parallel>, #tpu.dimension_semantics<parallel>], iteration_bounds = array<i64: 1, 4>, scalar_prefetch = 0 : i64, scratch_operands = 0 : i64, tpu.core_type = #tpu.core_type<tc>, window_params = [{transform_indices = @transform_0, window_bounds = array<i64: 8, 64>}, {transform_indices = @transform_1, window_bounds = array<i64: 1, 8, 64>}, {pipeline_mode = #tpu.pipeline_mode<synchronous>, transform_indices = @transform_2, window_bounds = array<i64: 64, 64>}, {pipeline_mode = #tpu.pipeline_mode<synchronous>, transform_indices = @transform_3, window_bounds = array<i64: 1, 64>}, {pipeline_mode = #tpu.pipeline_mode<synchronous>, transform_indices = @transform_4, window_bounds = array<i64: 64, 32>}, {transform_indices = @transform_5, window_bounds = array<i64: 8, 32>}]} {
    %c0 = arith.constant 0 : index
    %c0_0 = arith.constant 0 : index
    %0 = vector.load %arg2[%c0, %c0_0] : memref<8x64xbf16, #tpu.memory_space<vmem>>, vector<8x64xbf16>
    %1 = arith.extf %0 : vector<8x64xbf16> to vector<8x64xf32>
    %c0_1 = arith.constant 0 : index
    %c0_2 = arith.constant 0 : index
    %c0_3 = arith.constant 0 : index
    %2 = vector.load %arg3[%c0_1, %c0_2, %c0_3] : memref<1x8x64xbf16, #tpu.memory_space<vmem>>, vector<1x8x64xbf16>
    %3 = vector.shape_cast %2 : vector<1x8x64xbf16> to vector<8x64xbf16>
    %c0_4 = arith.constant 0 : index
    %c0_5 = arith.constant 0 : index
    %4 = vector.load %arg4[%c0_4, %c0_5] : memref<64x64xbf16, #tpu.memory_space<vmem>>, vector<64x64xbf16>
    %cst = arith.constant dense<0.000000e+00> : vector<8x64xf32>
    %5 = tpu.matmul %3, %4, %cst {dimension_numbers = #tpu.dot_dimension_numbers<[1], [0], [0], [1], [0, 0, 1, 1], [], []>} : vector<8x64xbf16>, vector<64x64xbf16>, vector<8x64xf32> -> vector<8x64xf32>
    %6 = arith.addf %1, %5 : vector<8x64xf32>
    %c0_6 = arith.constant 0 : index
    %c0_7 = arith.constant 0 : index
    %7 = vector.load %arg5[%c0_6, %c0_7] : memref<1x64xf32, #tpu.memory_space<vmem>>, vector<1x64xf32>
    %8 = vector.broadcast %7 : vector<1x64xf32> to vector<8x64xf32>
    %9 = arith.addf %6, %8 : vector<8x64xf32>
    %cst_8 = arith.constant 5.000000e-01 : f32
    %10 = vector.broadcast %cst_8 : f32 to vector<8x64xf32>
    %11 = arith.mulf %10, %9 : vector<8x64xf32>
    %12 = arith.mulf %9, %9 : vector<8x64xf32>
    %13 = arith.mulf %12, %9 : vector<8x64xf32>
    %cst_9 = arith.constant 4.471500e-02 : f32
    %14 = vector.broadcast %cst_9 : f32 to vector<8x64xf32>
    %15 = arith.mulf %14, %13 : vector<8x64xf32>
    %16 = arith.addf %9, %15 : vector<8x64xf32>
    %cst_10 = arith.constant 0.797884583 : f32
    %17 = vector.broadcast %cst_10 : f32 to vector<8x64xf32>
    %18 = arith.mulf %17, %16 : vector<8x64xf32>
    %19 = math.tanh %18 : vector<8x64xf32>
    %cst_11 = arith.constant 1.000000e+00 : f32
    %20 = vector.broadcast %cst_11 : f32 to vector<8x64xf32>
    %21 = arith.addf %20, %19 : vector<8x64xf32>
    %22 = arith.mulf %11, %21 : vector<8x64xf32>
    %23 = arith.truncf %22 : vector<8x64xf32> to vector<8x64xbf16>
    %c0_12 = arith.constant 0 : index
    %c0_13 = arith.constant 0 : index
    %24 = vector.load %arg6[%c0_12, %c0_13] : memref<64x32xbf16, #tpu.memory_space<vmem>>, vector<64x32xbf16>
    %cst_14 = arith.constant dense<0.000000e+00> : vector<8x32xf32>
    %25 = tpu.matmul %23, %24, %cst_14 {dimension_numbers = #tpu.dot_dimension_numbers<[1], [0], [0], [1], [0, 0, 1, 1], [], []>} : vector<8x64xbf16>, vector<64x32xbf16>, vector<8x32xf32> -> vector<8x32xf32>
    %26 = arith.truncf %25 : vector<8x32xf32> to vector<8x32xbf16>
    %c0_15 = arith.constant 0 : index
    %c0_16 = arith.constant 0 : index
    %27 = vector.load %arg7[%c0_15, %c0_16] : memref<8x32xbf16, #tpu.memory_space<vmem>>, vector<8x32xbf16>
    tpu.vector_store %arg7[%c0_15, %c0_16], %26 {strides = array<i32>} : memref<8x32xbf16, #tpu.memory_space<vmem>>, vector<8x32xbf16>,
    return
  }
  func.func @transform_0(%arg0: i32, %arg1: i32) -> (i32, i32) {
    %c0_i32 = arith.constant 0 : i32
    %c0_i32_0 = arith.constant 0 : i32
    return %arg0, %c0_i32 : i32, i32
  }
  func.func @transform_1(%arg0: i32, %arg1: i32) -> (i32, i32, i32) {
    %c0_i32 = arith.constant 0 : i32
    %c0_i32_0 = arith.constant 0 : i32
    return %arg1, %arg0, %c0_i32 : i32, i32, i32
  }
  func.func @transform_2(%arg0: i32, %arg1: i32) -> (i32, i32) {
    %c0_i32 = arith.constant 0 : i32
    %c0_i32_0 = arith.constant 0 : i32
    %c0_i32_1 = arith.constant 0 : i32
    return %c0_i32, %c0_i32_0 : i32, i32
  }
  func.func @transform_3(%arg0: i32, %arg1: i32) -> (i32, i32) {
    %c0_i32 = arith.constant 0 : i32
    %c0_i32_0 = arith.constant 0 : i32
    %c0_i32_1 = arith.constant 0 : i32
    return %c0_i32, %c0_i32_0 : i32, i32
  }
  func.func @transform_4(%arg0: i32, %arg1: i32) -> (i32, i32) {
    %c0_i32 = arith.constant 0 : i32
    %c0_i32_0 = arith.constant 0 : i32
    %c0_i32_1 = arith.constant 0 : i32
    return %c0_i32, %c0_i32_0 : i32, i32
  }
  func.func @transform_5(%arg0: i32, %arg1: i32) -> (i32, i32) {
    %c1_i32 = arith.constant 1 : i32
    %0 = arith.muli %arg1, %c1_i32 : i32
    %1 = arith.addi %0, %arg0 : i32
    %c0_i32 = arith.constant 0 : i32
    %c0_i32_0 = arith.constant 0 : i32
    return %1, %c0_i32 : i32, i32
  }
}

module attributes {stable_mosaic.version = 11 : i64} {
  func.func @_dec_mask_kernel(%arg0: i32, %arg1: i32, %arg2: memref<32x32xbf16, #tpu.memory_space<vmem>>, %arg3: memref<1x32x32xbf16, #tpu.memory_space<vmem>>, %arg4: memref<32x32xbf16, #tpu.memory_space<vmem>>, %arg5: memref<1x32xf32, #tpu.memory_space<vmem>>, %arg6: memref<32x32xbf16, #tpu.memory_space<vmem>>, %arg7: memref<1x32xf32, #tpu.memory_space<vmem>>, %arg8: memref<1x1xf32, #tpu.memory_space<vmem>>, %arg9: memref<32x32xbf16, #tpu.memory_space<vmem>>, %arg10: memref<32x1xbf16, #tpu.memory_space<vmem>>) attributes {dimension_semantics = [#tpu.dimension_semantics<parallel>, #tpu.dimension_semantics<parallel>], iteration_bounds = array<i64: 1, 4>, scalar_prefetch = 0 : i64, scratch_operands = 0 : i64, tpu.core_type = #tpu.core_type<tc>, window_params = [{transform_indices = @transform_0, window_bounds = array<i64: 32, 32>}, {transform_indices = @transform_1, window_bounds = array<i64: 1, 32, 32>}, {pipeline_mode = #tpu.pipeline_mode<synchronous>, transform_indices = @transform_2, window_bounds = array<i64: 32, 32>}, {pipeline_mode = #tpu.pipeline_mode<synchronous>, transform_indices = @transform_3, window_bounds = array<i64: 1, 32>}, {pipeline_mode = #tpu.pipeline_mode<synchronous>, transform_indices = @transform_4, window_bounds = array<i64: 32, 32>}, {pipeline_mode = #tpu.pipeline_mode<synchronous>, transform_indices = @transform_5, window_bounds = array<i64: 1, 32>}, {pipeline_mode = #tpu.pipeline_mode<synchronous>, transform_indices = @transform_6, window_bounds = array<i64: 1, 1>}, {transform_indices = @transform_7, window_bounds = array<i64: 32, 32>}, {transform_indices = @transform_8, window_bounds = array<i64: 32, 1>}]} {
    %c0 = arith.constant 0 : index
    %c0_0 = arith.constant 0 : index
    %0 = vector.load %arg2[%c0, %c0_0] : memref<32x32xbf16, #tpu.memory_space<vmem>>, vector<32x32xbf16>
    %1 = arith.extf %0 : vector<32x32xbf16> to vector<32x32xf32>
    %c0_1 = arith.constant 0 : index
    %c0_2 = arith.constant 0 : index
    %c0_3 = arith.constant 0 : index
    %2 = vector.load %arg3[%c0_1, %c0_2, %c0_3] : memref<1x32x32xbf16, #tpu.memory_space<vmem>>, vector<1x32x32xbf16>
    %3 = vector.shape_cast %2 : vector<1x32x32xbf16> to vector<32x32xbf16>
    %c0_4 = arith.constant 0 : index
    %c0_5 = arith.constant 0 : index
    %4 = vector.load %arg4[%c0_4, %c0_5] : memref<32x32xbf16, #tpu.memory_space<vmem>>, vector<32x32xbf16>
    %cst = arith.constant dense<0.000000e+00> : vector<32x32xf32>
    %5 = tpu.matmul %3, %4, %cst {dimension_numbers = #tpu.dot_dimension_numbers<[1], [0], [0], [1], [0, 0, 1, 1], [], []>} : vector<32x32xbf16>, vector<32x32xbf16>, vector<32x32xf32> -> vector<32x32xf32>
    %6 = arith.addf %1, %5 : vector<32x32xf32>
    %c0_6 = arith.constant 0 : index
    %c0_7 = arith.constant 0 : index
    %7 = vector.load %arg5[%c0_6, %c0_7] : memref<1x32xf32, #tpu.memory_space<vmem>>, vector<1x32xf32>
    %8 = vector.broadcast %7 : vector<1x32xf32> to vector<32x32xf32>
    %9 = arith.addf %6, %8 : vector<32x32xf32>
    %cst_8 = arith.constant 5.000000e-01 : f32
    %10 = vector.broadcast %cst_8 : f32 to vector<32x32xf32>
    %11 = arith.mulf %10, %9 : vector<32x32xf32>
    %12 = arith.mulf %9, %9 : vector<32x32xf32>
    %13 = arith.mulf %12, %9 : vector<32x32xf32>
    %cst_9 = arith.constant 4.471500e-02 : f32
    %14 = vector.broadcast %cst_9 : f32 to vector<32x32xf32>
    %15 = arith.mulf %14, %13 : vector<32x32xf32>
    %16 = arith.addf %9, %15 : vector<32x32xf32>
    %cst_10 = arith.constant 0.797884583 : f32
    %17 = vector.broadcast %cst_10 : f32 to vector<32x32xf32>
    %18 = arith.mulf %17, %16 : vector<32x32xf32>
    %19 = math.tanh %18 : vector<32x32xf32>
    %cst_11 = arith.constant 1.000000e+00 : f32
    %20 = vector.broadcast %cst_11 : f32 to vector<32x32xf32>
    %21 = arith.addf %20, %19 : vector<32x32xf32>
    %22 = arith.mulf %11, %21 : vector<32x32xf32>
    %23 = arith.truncf %22 : vector<32x32xf32> to vector<32x32xbf16>
    %c0_12 = arith.constant 0 : index
    %c0_13 = arith.constant 0 : index
    %24 = vector.load %arg6[%c0_12, %c0_13] : memref<32x32xbf16, #tpu.memory_space<vmem>>, vector<32x32xbf16>
    %cst_14 = arith.constant dense<0.000000e+00> : vector<32x32xf32>
    %25 = tpu.matmul %23, %24, %cst_14 {dimension_numbers = #tpu.dot_dimension_numbers<[1], [0], [0], [1], [0, 0, 1, 1], [], []>} : vector<32x32xbf16>, vector<32x32xbf16>, vector<32x32xf32> -> vector<32x32xf32>
    %26 = arith.truncf %25 : vector<32x32xf32> to vector<32x32xbf16>
    %c0_15 = arith.constant 0 : index
    %c0_16 = arith.constant 0 : index
    %27 = vector.load %arg9[%c0_15, %c0_16] : memref<32x32xbf16, #tpu.memory_space<vmem>>, vector<32x32xbf16>
    tpu.vector_store %arg9[%c0_15, %c0_16], %26 {strides = array<i32>} : memref<32x32xbf16, #tpu.memory_space<vmem>>, vector<32x32xbf16>,
    %c0_17 = arith.constant 0 : index
    %c0_18 = arith.constant 0 : index
    %28 = vector.load %arg7[%c0_17, %c0_18] : memref<1x32xf32, #tpu.memory_space<vmem>>, vector<1x32xf32>
    %29 = vector.broadcast %28 : vector<1x32xf32> to vector<32x32xf32>
    %30 = arith.mulf %22, %29 : vector<32x32xf32>
    %cst_19 = arith.constant dense<0.000000e+00> : vector<32xf32>
    %31 = vector.multi_reduction <add>, %30, %cst_19 [1] : vector<32x32xf32> to vector<32xf32>
    %32 = vector.shape_cast %31 : vector<32xf32> to vector<32x1xf32>
    %c0_20 = arith.constant 0 : index
    %c0_21 = arith.constant 0 : index
    %33 = vector.load %arg8[%c0_20, %c0_21] : memref<1x1xf32, #tpu.memory_space<vmem>>, vector<1x1xf32>
    %34 = vector.broadcast %33 : vector<1x1xf32> to vector<32x1xf32>
    %35 = arith.addf %32, %34 : vector<32x1xf32>
    %36 = arith.truncf %35 : vector<32x1xf32> to vector<32x1xbf16>
    %c0_22 = arith.constant 0 : index
    %c0_23 = arith.constant 0 : index
    %37 = vector.load %arg10[%c0_22, %c0_23] : memref<32x1xbf16, #tpu.memory_space<vmem>>, vector<32x1xbf16>
    tpu.vector_store %arg10[%c0_22, %c0_23], %36 {strides = array<i32>} : memref<32x1xbf16, #tpu.memory_space<vmem>>, vector<32x1xbf16>,
    return
  }
  func.func @transform_0(%arg0: i32, %arg1: i32) -> (i32, i32) {
    %c0_i32 = arith.constant 0 : i32
    %c0_i32_0 = arith.constant 0 : i32
    return %arg0, %c0_i32 : i32, i32
  }
  func.func @transform_1(%arg0: i32, %arg1: i32) -> (i32, i32, i32) {
    %c0_i32 = arith.constant 0 : i32
    %c0_i32_0 = arith.constant 0 : i32
    return %arg1, %arg0, %c0_i32 : i32, i32, i32
  }
  func.func @transform_2(%arg0: i32, %arg1: i32) -> (i32, i32) {
    %c0_i32 = arith.constant 0 : i32
    %c0_i32_0 = arith.constant 0 : i32
    %c0_i32_1 = arith.constant 0 : i32
    return %c0_i32, %c0_i32_0 : i32, i32
  }
  func.func @transform_3(%arg0: i32, %arg1: i32) -> (i32, i32) {
    %c0_i32 = arith.constant 0 : i32
    %c0_i32_0 = arith.constant 0 : i32
    %c0_i32_1 = arith.constant 0 : i32
    return %c0_i32, %c0_i32_0 : i32, i32
  }
  func.func @transform_4(%arg0: i32, %arg1: i32) -> (i32, i32) {
    %c0_i32 = arith.constant 0 : i32
    %c0_i32_0 = arith.constant 0 : i32
    %c0_i32_1 = arith.constant 0 : i32
    return %c0_i32, %c0_i32_0 : i32, i32
  }
  func.func @transform_5(%arg0: i32, %arg1: i32) -> (i32, i32) {
    %c0_i32 = arith.constant 0 : i32
    %c0_i32_0 = arith.constant 0 : i32
    %c0_i32_1 = arith.constant 0 : i32
    return %c0_i32, %c0_i32_0 : i32, i32
  }
  func.func @transform_6(%arg0: i32, %arg1: i32) -> (i32, i32) {
    %c0_i32 = arith.constant 0 : i32
    %c0_i32_0 = arith.constant 0 : i32
    %c0_i32_1 = arith.constant 0 : i32
    return %c0_i32, %c0_i32_0 : i32, i32
  }
  func.func @transform_7(%arg0: i32, %arg1: i32) -> (i32, i32) {
    %c1_i32 = arith.constant 1 : i32
    %0 = arith.muli %arg1, %c1_i32 : i32
    %1 = arith.addi %0, %arg0 : i32
    %c0_i32 = arith.constant 0 : i32
    %c0_i32_0 = arith.constant 0 : i32
    return %1, %c0_i32 : i32, i32
  }
  func.func @transform_8(%arg0: i32, %arg1: i32) -> (i32, i32) {
    %c1_i32 = arith.constant 1 : i32
    %0 = arith.muli %arg1, %c1_i32 : i32
    %1 = arith.addi %0, %arg0 : i32
    %c0_i32 = arith.constant 0 : i32
    %c0_i32_0 = arith.constant 0 : i32
    return %1, %c0_i32 : i32, i32
  }
}

module attributes {stable_mosaic.version = 11 : i64} {
  func.func @_former_kernel(%arg0: i32, %arg1: i32, %arg2: memref<128x32xbf16, #tpu.memory_space<vmem>>, %arg3: memref<1x32xf32, #tpu.memory_space<vmem>>, %arg4: memref<32x32xbf16, #tpu.memory_space<vmem>>, %arg5: memref<1x32xf32, #tpu.memory_space<vmem>>, %arg6: memref<1x1xf32, #tpu.memory_space<vmem>>, %arg7: memref<128x32xbf16, #tpu.memory_space<vmem>>, %arg8: memref<128x1xbf16, #tpu.memory_space<vmem>>) attributes {dimension_semantics = [#tpu.dimension_semantics<parallel>, #tpu.dimension_semantics<parallel>], iteration_bounds = array<i64: 1, 4>, scalar_prefetch = 0 : i64, scratch_operands = 0 : i64, tpu.core_type = #tpu.core_type<tc>, window_params = [{transform_indices = @transform_0, window_bounds = array<i64: 128, 32>}, {pipeline_mode = #tpu.pipeline_mode<synchronous>, transform_indices = @transform_1, window_bounds = array<i64: 1, 32>}, {pipeline_mode = #tpu.pipeline_mode<synchronous>, transform_indices = @transform_2, window_bounds = array<i64: 32, 32>}, {pipeline_mode = #tpu.pipeline_mode<synchronous>, transform_indices = @transform_3, window_bounds = array<i64: 1, 32>}, {pipeline_mode = #tpu.pipeline_mode<synchronous>, transform_indices = @transform_4, window_bounds = array<i64: 1, 1>}, {transform_indices = @transform_5, window_bounds = array<i64: 128, 32>}, {transform_indices = @transform_6, window_bounds = array<i64: 128, 1>}]} {
    %c0 = arith.constant 0 : index
    %c0_0 = arith.constant 0 : index
    %0 = vector.load %arg2[%c0, %c0_0] : memref<128x32xbf16, #tpu.memory_space<vmem>>, vector<128x32xbf16>
    %1 = arith.extf %0 : vector<128x32xbf16> to vector<128x32xf32>
    %c0_1 = arith.constant 0 : index
    %c0_2 = arith.constant 0 : index
    %2 = vector.load %arg3[%c0_1, %c0_2] : memref<1x32xf32, #tpu.memory_space<vmem>>, vector<1x32xf32>
    %3 = vector.broadcast %2 : vector<1x32xf32> to vector<128x32xf32>
    %4 = arith.addf %1, %3 : vector<128x32xf32>
    %cst = arith.constant 5.000000e-01 : f32
    %5 = vector.broadcast %cst : f32 to vector<128x32xf32>
    %6 = arith.mulf %5, %4 : vector<128x32xf32>
    %7 = arith.mulf %4, %4 : vector<128x32xf32>
    %8 = arith.mulf %7, %4 : vector<128x32xf32>
    %cst_3 = arith.constant 4.471500e-02 : f32
    %9 = vector.broadcast %cst_3 : f32 to vector<128x32xf32>
    %10 = arith.mulf %9, %8 : vector<128x32xf32>
    %11 = arith.addf %4, %10 : vector<128x32xf32>
    %cst_4 = arith.constant 0.797884583 : f32
    %12 = vector.broadcast %cst_4 : f32 to vector<128x32xf32>
    %13 = arith.mulf %12, %11 : vector<128x32xf32>
    %14 = math.tanh %13 : vector<128x32xf32>
    %cst_5 = arith.constant 1.000000e+00 : f32
    %15 = vector.broadcast %cst_5 : f32 to vector<128x32xf32>
    %16 = arith.addf %15, %14 : vector<128x32xf32>
    %17 = arith.mulf %6, %16 : vector<128x32xf32>
    %18 = arith.truncf %17 : vector<128x32xf32> to vector<128x32xbf16>
    %c0_6 = arith.constant 0 : index
    %c0_7 = arith.constant 0 : index
    %19 = vector.load %arg4[%c0_6, %c0_7] : memref<32x32xbf16, #tpu.memory_space<vmem>>, vector<32x32xbf16>
    %cst_8 = arith.constant dense<0.000000e+00> : vector<128x32xf32>
    %20 = tpu.matmul %18, %19, %cst_8 {dimension_numbers = #tpu.dot_dimension_numbers<[1], [0], [0], [1], [0, 0, 1, 1], [], []>} : vector<128x32xbf16>, vector<32x32xbf16>, vector<128x32xf32> -> vector<128x32xf32>
    %21 = arith.truncf %20 : vector<128x32xf32> to vector<128x32xbf16>
    %c0_9 = arith.constant 0 : index
    %c0_10 = arith.constant 0 : index
    %22 = vector.load %arg7[%c0_9, %c0_10] : memref<128x32xbf16, #tpu.memory_space<vmem>>, vector<128x32xbf16>
    tpu.vector_store %arg7[%c0_9, %c0_10], %21 {strides = array<i32>} : memref<128x32xbf16, #tpu.memory_space<vmem>>, vector<128x32xbf16>,
    %c0_11 = arith.constant 0 : index
    %c0_12 = arith.constant 0 : index
    %23 = vector.load %arg5[%c0_11, %c0_12] : memref<1x32xf32, #tpu.memory_space<vmem>>, vector<1x32xf32>
    %24 = vector.broadcast %23 : vector<1x32xf32> to vector<128x32xf32>
    %25 = arith.mulf %17, %24 : vector<128x32xf32>
    %cst_13 = arith.constant dense<0.000000e+00> : vector<128xf32>
    %26 = vector.multi_reduction <add>, %25, %cst_13 [1] : vector<128x32xf32> to vector<128xf32>
    %27 = vector.shape_cast %26 : vector<128xf32> to vector<128x1xf32>
    %c0_14 = arith.constant 0 : index
    %c0_15 = arith.constant 0 : index
    %28 = vector.load %arg6[%c0_14, %c0_15] : memref<1x1xf32, #tpu.memory_space<vmem>>, vector<1x1xf32>
    %29 = vector.broadcast %28 : vector<1x1xf32> to vector<128x1xf32>
    %30 = arith.addf %27, %29 : vector<128x1xf32>
    %31 = arith.truncf %30 : vector<128x1xf32> to vector<128x1xbf16>
    %c0_16 = arith.constant 0 : index
    %c0_17 = arith.constant 0 : index
    %32 = vector.load %arg8[%c0_16, %c0_17] : memref<128x1xbf16, #tpu.memory_space<vmem>>, vector<128x1xbf16>
    tpu.vector_store %arg8[%c0_16, %c0_17], %31 {strides = array<i32>} : memref<128x1xbf16, #tpu.memory_space<vmem>>, vector<128x1xbf16>,
    return
  }
  func.func @transform_0(%arg0: i32, %arg1: i32) -> (i32, i32) {
    %c0_i32 = arith.constant 0 : i32
    %c0_i32_0 = arith.constant 0 : i32
    return %arg0, %c0_i32 : i32, i32
  }
  func.func @transform_1(%arg0: i32, %arg1: i32) -> (i32, i32) {
    %c0_i32 = arith.constant 0 : i32
    %c0_i32_0 = arith.constant 0 : i32
    %c0_i32_1 = arith.constant 0 : i32
    return %c0_i32, %c0_i32_0 : i32, i32
  }
  func.func @transform_2(%arg0: i32, %arg1: i32) -> (i32, i32) {
    %c0_i32 = arith.constant 0 : i32
    %c0_i32_0 = arith.constant 0 : i32
    %c0_i32_1 = arith.constant 0 : i32
    return %c0_i32, %c0_i32_0 : i32, i32
  }
  func.func @transform_3(%arg0: i32, %arg1: i32) -> (i32, i32) {
    %c0_i32 = arith.constant 0 : i32
    %c0_i32_0 = arith.constant 0 : i32
    %c0_i32_1 = arith.constant 0 : i32
    return %c0_i32, %c0_i32_0 : i32, i32
  }
  func.func @transform_4(%arg0: i32, %arg1: i32) -> (i32, i32) {
    %c0_i32 = arith.constant 0 : i32
    %c0_i32_0 = arith.constant 0 : i32
    %c0_i32_1 = arith.constant 0 : i32
    return %c0_i32, %c0_i32_0 : i32, i32
  }
  func.func @transform_5(%arg0: i32, %arg1: i32) -> (i32, i32) {
    %c1_i32 = arith.constant 1 : i32
    %0 = arith.muli %arg1, %c1_i32 : i32
    %1 = arith.addi %0, %arg0 : i32
    %c0_i32 = arith.constant 0 : i32
    %c0_i32_0 = arith.constant 0 : i32
    return %1, %c0_i32 : i32, i32
  }
  func.func @transform_6(%arg0: i32, %arg1: i32) -> (i32, i32) {
    %c1_i32 = arith.constant 1 : i32
    %0 = arith.muli %arg1, %c1_i32 : i32
    %1 = arith.addi %0, %arg0 : i32
    %c0_i32 = arith.constant 0 : i32
    %c0_i32_0 = arith.constant 0 : i32
    return %1, %c0_i32 : i32, i32
  }
}

module attributes {stable_mosaic.version = 11 : i64} {
  func.func @_former_last_kernel(%arg0: i32, %arg1: i32, %arg2: memref<512x32xbf16, #tpu.memory_space<vmem>>, %arg3: memref<1x32xf32, #tpu.memory_space<vmem>>, %arg4: memref<1x32xf32, #tpu.memory_space<vmem>>, %arg5: memref<1x1xf32, #tpu.memory_space<vmem>>, %arg6: memref<32x32xbf16, #tpu.memory_space<vmem>>, %arg7: memref<1x32xf32, #tpu.memory_space<vmem>>, %arg8: memref<1x32xf32, #tpu.memory_space<vmem>>, %arg9: memref<1x1xf32, #tpu.memory_space<vmem>>, %arg10: memref<512x1xbf16, #tpu.memory_space<vmem>>, %arg11: memref<512x1xbf16, #tpu.memory_space<vmem>>) attributes {dimension_semantics = [#tpu.dimension_semantics<parallel>, #tpu.dimension_semantics<parallel>], iteration_bounds = array<i64: 1, 4>, scalar_prefetch = 0 : i64, scratch_operands = 0 : i64, tpu.core_type = #tpu.core_type<tc>, window_params = [{transform_indices = @transform_0, window_bounds = array<i64: 512, 32>}, {pipeline_mode = #tpu.pipeline_mode<synchronous>, transform_indices = @transform_1, window_bounds = array<i64: 1, 32>}, {pipeline_mode = #tpu.pipeline_mode<synchronous>, transform_indices = @transform_2, window_bounds = array<i64: 1, 32>}, {pipeline_mode = #tpu.pipeline_mode<synchronous>, transform_indices = @transform_3, window_bounds = array<i64: 1, 1>}, {pipeline_mode = #tpu.pipeline_mode<synchronous>, transform_indices = @transform_4, window_bounds = array<i64: 32, 32>}, {pipeline_mode = #tpu.pipeline_mode<synchronous>, transform_indices = @transform_5, window_bounds = array<i64: 1, 32>}, {pipeline_mode = #tpu.pipeline_mode<synchronous>, transform_indices = @transform_6, window_bounds = array<i64: 1, 32>}, {pipeline_mode = #tpu.pipeline_mode<synchronous>, transform_indices = @transform_7, window_bounds = array<i64: 1, 1>}, {transform_indices = @transform_8, window_bounds = array<i64: 512, 1>}, {transform_indices = @transform_9, window_bounds = array<i64: 512, 1>}]} {
    %c0 = arith.constant 0 : index
    %c0_0 = arith.constant 0 : index
    %0 = vector.load %arg2[%c0, %c0_0] : memref<512x32xbf16, #tpu.memory_space<vmem>>, vector<512x32xbf16>
    %1 = arith.extf %0 : vector<512x32xbf16> to vector<512x32xf32>
    %c0_1 = arith.constant 0 : index
    %c0_2 = arith.constant 0 : index
    %2 = vector.load %arg3[%c0_1, %c0_2] : memref<1x32xf32, #tpu.memory_space<vmem>>, vector<1x32xf32>
    %3 = vector.broadcast %2 : vector<1x32xf32> to vector<512x32xf32>
    %4 = arith.addf %1, %3 : vector<512x32xf32>
    %cst = arith.constant 5.000000e-01 : f32
    %5 = vector.broadcast %cst : f32 to vector<512x32xf32>
    %6 = arith.mulf %5, %4 : vector<512x32xf32>
    %7 = arith.mulf %4, %4 : vector<512x32xf32>
    %8 = arith.mulf %7, %4 : vector<512x32xf32>
    %cst_3 = arith.constant 4.471500e-02 : f32
    %9 = vector.broadcast %cst_3 : f32 to vector<512x32xf32>
    %10 = arith.mulf %9, %8 : vector<512x32xf32>
    %11 = arith.addf %4, %10 : vector<512x32xf32>
    %cst_4 = arith.constant 0.797884583 : f32
    %12 = vector.broadcast %cst_4 : f32 to vector<512x32xf32>
    %13 = arith.mulf %12, %11 : vector<512x32xf32>
    %14 = math.tanh %13 : vector<512x32xf32>
    %cst_5 = arith.constant 1.000000e+00 : f32
    %15 = vector.broadcast %cst_5 : f32 to vector<512x32xf32>
    %16 = arith.addf %15, %14 : vector<512x32xf32>
    %17 = arith.mulf %6, %16 : vector<512x32xf32>
    %c0_6 = arith.constant 0 : index
    %c0_7 = arith.constant 0 : index
    %18 = vector.load %arg4[%c0_6, %c0_7] : memref<1x32xf32, #tpu.memory_space<vmem>>, vector<1x32xf32>
    %19 = vector.broadcast %18 : vector<1x32xf32> to vector<512x32xf32>
    %20 = arith.mulf %17, %19 : vector<512x32xf32>
    %cst_8 = arith.constant dense<0.000000e+00> : vector<512xf32>
    %21 = vector.multi_reduction <add>, %20, %cst_8 [1] : vector<512x32xf32> to vector<512xf32>
    %22 = vector.shape_cast %21 : vector<512xf32> to vector<512x1xf32>
    %c0_9 = arith.constant 0 : index
    %c0_10 = arith.constant 0 : index
    %23 = vector.load %arg5[%c0_9, %c0_10] : memref<1x1xf32, #tpu.memory_space<vmem>>, vector<1x1xf32>
    %24 = vector.broadcast %23 : vector<1x1xf32> to vector<512x1xf32>
    %25 = arith.addf %22, %24 : vector<512x1xf32>
    %26 = arith.truncf %25 : vector<512x1xf32> to vector<512x1xbf16>
    %c0_11 = arith.constant 0 : index
    %c0_12 = arith.constant 0 : index
    %27 = vector.load %arg10[%c0_11, %c0_12] : memref<512x1xbf16, #tpu.memory_space<vmem>>, vector<512x1xbf16>
    tpu.vector_store %arg10[%c0_11, %c0_12], %26 {strides = array<i32>} : memref<512x1xbf16, #tpu.memory_space<vmem>>, vector<512x1xbf16>,
    %28 = arith.truncf %17 : vector<512x32xf32> to vector<512x32xbf16>
    %c0_13 = arith.constant 0 : index
    %c0_14 = arith.constant 0 : index
    %29 = vector.load %arg6[%c0_13, %c0_14] : memref<32x32xbf16, #tpu.memory_space<vmem>>, vector<32x32xbf16>
    %cst_15 = arith.constant dense<0.000000e+00> : vector<512x32xf32>
    %30 = tpu.matmul %28, %29, %cst_15 {dimension_numbers = #tpu.dot_dimension_numbers<[1], [0], [0], [1], [0, 0, 1, 1], [], []>} : vector<512x32xbf16>, vector<32x32xbf16>, vector<512x32xf32> -> vector<512x32xf32>
    %c0_16 = arith.constant 0 : index
    %c0_17 = arith.constant 0 : index
    %31 = vector.load %arg7[%c0_16, %c0_17] : memref<1x32xf32, #tpu.memory_space<vmem>>, vector<1x32xf32>
    %32 = vector.broadcast %31 : vector<1x32xf32> to vector<512x32xf32>
    %33 = arith.addf %30, %32 : vector<512x32xf32>
    %cst_18 = arith.constant 5.000000e-01 : f32
    %34 = vector.broadcast %cst_18 : f32 to vector<512x32xf32>
    %35 = arith.mulf %34, %33 : vector<512x32xf32>
    %36 = arith.mulf %33, %33 : vector<512x32xf32>
    %37 = arith.mulf %36, %33 : vector<512x32xf32>
    %cst_19 = arith.constant 4.471500e-02 : f32
    %38 = vector.broadcast %cst_19 : f32 to vector<512x32xf32>
    %39 = arith.mulf %38, %37 : vector<512x32xf32>
    %40 = arith.addf %33, %39 : vector<512x32xf32>
    %cst_20 = arith.constant 0.797884583 : f32
    %41 = vector.broadcast %cst_20 : f32 to vector<512x32xf32>
    %42 = arith.mulf %41, %40 : vector<512x32xf32>
    %43 = math.tanh %42 : vector<512x32xf32>
    %cst_21 = arith.constant 1.000000e+00 : f32
    %44 = vector.broadcast %cst_21 : f32 to vector<512x32xf32>
    %45 = arith.addf %44, %43 : vector<512x32xf32>
    %46 = arith.mulf %35, %45 : vector<512x32xf32>
    %c0_22 = arith.constant 0 : index
    %c0_23 = arith.constant 0 : index
    %47 = vector.load %arg8[%c0_22, %c0_23] : memref<1x32xf32, #tpu.memory_space<vmem>>, vector<1x32xf32>
    %48 = vector.broadcast %47 : vector<1x32xf32> to vector<512x32xf32>
    %49 = arith.mulf %46, %48 : vector<512x32xf32>
    %cst_24 = arith.constant dense<0.000000e+00> : vector<512xf32>
    %50 = vector.multi_reduction <add>, %49, %cst_24 [1] : vector<512x32xf32> to vector<512xf32>
    %51 = vector.shape_cast %50 : vector<512xf32> to vector<512x1xf32>
    %c0_25 = arith.constant 0 : index
    %c0_26 = arith.constant 0 : index
    %52 = vector.load %arg9[%c0_25, %c0_26] : memref<1x1xf32, #tpu.memory_space<vmem>>, vector<1x1xf32>
    %53 = vector.broadcast %52 : vector<1x1xf32> to vector<512x1xf32>
    %54 = arith.addf %51, %53 : vector<512x1xf32>
    %55 = arith.truncf %54 : vector<512x1xf32> to vector<512x1xbf16>
    %c0_27 = arith.constant 0 : index
    %c0_28 = arith.constant 0 : index
    %56 = vector.load %arg11[%c0_27, %c0_28] : memref<512x1xbf16, #tpu.memory_space<vmem>>, vector<512x1xbf16>
    tpu.vector_store %arg11[%c0_27, %c0_28], %55 {strides = array<i32>} : memref<512x1xbf16, #tpu.memory_space<vmem>>, vector<512x1xbf16>,
    return
  }
  func.func @transform_0(%arg0: i32, %arg1: i32) -> (i32, i32) {
    %c0_i32 = arith.constant 0 : i32
    %c0_i32_0 = arith.constant 0 : i32
    return %arg0, %c0_i32 : i32, i32
  }
  func.func @transform_1(%arg0: i32, %arg1: i32) -> (i32, i32) {
    %c0_i32 = arith.constant 0 : i32
    %c0_i32_0 = arith.constant 0 : i32
    %c0_i32_1 = arith.constant 0 : i32
    return %c0_i32, %c0_i32_0 : i32, i32
  }
  func.func @transform_2(%arg0: i32, %arg1: i32) -> (i32, i32) {
    %c0_i32 = arith.constant 0 : i32
    %c0_i32_0 = arith.constant 0 : i32
    %c0_i32_1 = arith.constant 0 : i32
    return %c0_i32, %c0_i32_0 : i32, i32
  }
  func.func @transform_3(%arg0: i32, %arg1: i32) -> (i32, i32) {
    %c0_i32 = arith.constant 0 : i32
    %c0_i32_0 = arith.constant 0 : i32
    %c0_i32_1 = arith.constant 0 : i32
    return %c0_i32, %c0_i32_0 : i32, i32
  }
  func.func @transform_4(%arg0: i32, %arg1: i32) -> (i32, i32) {
    %c0_i32 = arith.constant 0 : i32
    %c0_i32_0 = arith.constant 0 : i32
    %c0_i32_1 = arith.constant 0 : i32
    return %c0_i32, %c0_i32_0 : i32, i32
  }
  func.func @transform_5(%arg0: i32, %arg1: i32) -> (i32, i32) {
    %c0_i32 = arith.constant 0 : i32
    %c0_i32_0 = arith.constant 0 : i32
    %c0_i32_1 = arith.constant 0 : i32
    return %c0_i32, %c0_i32_0 : i32, i32
  }
  func.func @transform_6(%arg0: i32, %arg1: i32) -> (i32, i32) {
    %c0_i32 = arith.constant 0 : i32
    %c0_i32_0 = arith.constant 0 : i32
    %c0_i32_1 = arith.constant 0 : i32
    return %c0_i32, %c0_i32_0 : i32, i32
  }
  func.func @transform_7(%arg0: i32, %arg1: i32) -> (i32, i32) {
    %c0_i32 = arith.constant 0 : i32
    %c0_i32_0 = arith.constant 0 : i32
    %c0_i32_1 = arith.constant 0 : i32
    return %c0_i32, %c0_i32_0 : i32, i32
  }
  func.func @transform_8(%arg0: i32, %arg1: i32) -> (i32, i32) {
    %c1_i32 = arith.constant 1 : i32
    %0 = arith.muli %arg1, %c1_i32 : i32
    %1 = arith.addi %0, %arg0 : i32
    %c0_i32 = arith.constant 0 : i32
    %c0_i32_0 = arith.constant 0 : i32
    return %1, %c0_i32 : i32, i32
  }
  func.func @transform_9(%arg0: i32, %arg1: i32) -> (i32, i32) {
    %c1_i32 = arith.constant 1 : i32
    %0 = arith.muli %arg1, %c1_i32 : i32
    %1 = arith.addi %0, %arg0 : i32
    %c0_i32 = arith.constant 0 : i32
    %c0_i32_0 = arith.constant 0 : i32
    return %1, %c0_i32 : i32, i32
  }
}

</mosaic_0001>

<bundles_post_ra>
// kernel: net_forward.9
= control target key start
LH: loop header
LB: loop body
LE: loop exit
PB: predicated region body
PF: predicated region fallthrough
CT: control target
= control target key end

     0   :  { %s923_s21 = smov 0   ;;  %s925_s22 = smov 0   ;;  %s1004_s0 = inlined_call_operand.vmem [shape: bf16[4,32,96], index: 0, kind: input, shape index: {}]   ;;  %s1005_s1 = inlined_call_operand.vmem [shape: bf16[96,32], index: 1, kind: input, shape index: {}]   ;;  %s1006_s2 = inlined_call_operand.vmem [shape: f32[1,32], index: 2, kind: input, shape index: {}]   ;;  %s1007_s3 = inlined_call_operand.vmem [shape: bf16[32,32], index: 3, kind: input, shape index: {}]   ;;  %s1008_s4 = inlined_call_operand.vmem [shape: f32[1,32], index: 4, kind: input, shape index: {}]   ;;  %s1009_s5 = inlined_call_operand.vmem [shape: bf16[4,32,32], index: 5, kind: output, shape index: {0}]   ;;  %s1010_s6 = inlined_call_operand.vmem [shape: bf16[4,32,32], index: 6, kind: output, shape index: {1}]  }
   0x1   :  { %s927_s23 = smov 0  }
   0x2 LB: > { %s26_s24 = sadd.s32 1, %s882_s22  ;;  %p742_p0 = scmp.ge.s32.totalorder %s886_s23, 1  ;;  %s886_s23 = sphi %s927_s23, %s17_s23   ;;  %s882_s22 = sphi %s925_s22, %s1012_s22   ;;  %s878_s21 = sphi %s923_s21, %s1011_s21  }
   0x3   : > { %p27_p1 = scmp.ge.s32.totalorder %s26_s24, 4  ;;  %p238_p2 = scmp.lt.s32.totalorder %s886_s23, 5 }
   0x5   : > { %s1014_s24 = smov (%p27_p1, %s26_s24), 0  ;;  %p239_p3 = pnand %p742_p0, %p238_p2 }
   0x6   : > { %p286_p4 = scmp.lt.s32.totalorder (!%p239_p3), %s878_s21, 3 }
   0x7   : > { %242 = sbr.rel (%p239_p3) target bundleno = 475 (0x1db), region = 40 }
   0xc   : > { %v846_v0 = vld [vmem:[%s1005_s1 + $0x28] sm:$0xff]   ;;  %v847_v1 = vld [vmem:[%s1005_s1 + $0x20] sm:$0xff]   ;;  %s1016_s21 = smov (!%p286_p4, %s878_s21), 3  ;;  %v848_v2 = vld [vmem:[%s1005_s1 + $0x18] sm:$0xff]   ;;  %vm385_vm0 = vcmask 785408   ;;  %vm493_vm1 = vcmask 257024  }
   0xd   : > { %798 = vmatprep.subr.bf16.mxu0 %v846_v0  ;;  %s950_s7 = sshll.u32 %s1016_s21, 4  ;;  %v849_v4 = vld [vmem:[%s1005_s1 + $0x10] sm:$0xff]   ;;  %v850_v5 = vld [vmem:[%s1005_s1 + $0x8] sm:$0xff]   ;;  %v851_v6 = vld [vmem:[%s1005_s1] sm:$0xff]   ;;  %vm521_vm2 = vcmask 261120  }
   0xe   : > { %799 = vmatpush3.bf16.msra.mxu0 %v846_v0  ;;  %s293_s10 = scalar_lea.vmem %s1004_s0, %s950_s7  ;;  %v854_v8 = vld [vmem:[%s1007_s3 + $0x8] sm:$0xff]   ;;  %v855_v9 = vld [vmem:[%s1007_s3] sm:$0xff]   ;;  %s303_s28 = scalar_lea.vmem %s1009_s5, %s950_s7 }
   0xf   : > { %800 = vmatprep.subr.bf16.mxu0 %v847_v1  ;;  %v852_v3 = vld [vmem:[%s293_s10] sm:$0xff]   ;;  %v853_v7 = vld [vmem:[%s293_s10 + $0x8] sm:$0xff]   ;;  %814 = vmatprep.subr.bf16.mxu1 %v854_v8  ;;  %s313_s10 = scalar_lea.vmem %s1010_s6, %s950_s7 }
  0x10   : > { %810 = vmatprep.mubr.msk.bf16.mxu0 %vm385_vm0, %v852_v3  ;;  %815 = vmatpush3.bf16.msra.mxu1 %v854_v8  ;;  %v749_v10 = vld [vmem:[%s1006_s2] ss:$0 sm:$0xff] }
  0x11   : > { %816 = vmatprep.subr.bf16.mxu1 %v855_v9  ;;  %v764_v61 = vld [vmem:[%s1008_s4] ss:$0 sm:$0xff] }
  0x12   : > { %801 = vmatpush3.bf16.msra.mxu0 %v847_v1 }
  0x13   : > { %802 = vmatprep.subr.bf16.mxu0 %v848_v2 }
  0x14   : > { %817 = vmatpush3.bf16.msra.mxu1 %v855_v9 }
  0x16   : > { %803 = vmatpush3.bf16.msra.mxu0 %v848_v2 }
  0x17   : > { %804 = vmatprep.subr.bf16.mxu0 %v849_v4 }
  0x1a   : > { %805 = vmatpush3.bf16.msra.mxu0 %v849_v4 }
  0x1b   : > { %806 = vmatprep.subr.bf16.mxu0 %v850_v5 }
  0x1e   : > { %807 = vmatpush3.bf16.msra.mxu0 %v850_v5 }
  0x1f   : > { %808 = vmatprep.subr.bf16.mxu0 %v851_v6 }
  0x22   : > { %809 = vmatpush3.bf16.msra.mxu0 %v851_v6 }
  0x25   : > { %811 = vmatmul.mubr.msk.bf16.vlgmr.msra.gmra.mxu0 %vm385_vm0, %v853_v7 }
  0xe5   : > { %v812_v11 = vpop.f32.mrf.mxu0 }
  0xe6   : > { %v435_v12 = vadd.f32 %v812_v11, %v749_v10 }
  0xe7   : > { %v426_v13 = vpop.f32.mrf.mxu0 }
  0xe8   : > { %v447_v14 = vmul.f32 %v435_v12, %v435_v12  ;;  %v427_v15 = vadd.f32 %v749_v10, %v426_v13  ;;  %v443_v40 = vmul.f32 0.5, %v435_v12 }
  0xe9   : > { %v813_v16 = vpop.f32.mrf.mxu0 }
  0xea   : > { %v451_v17 = vmul.f32 %v447_v14, %v435_v12  ;;  %v445_v18 = vmul.f32 %v427_v15, %v427_v15  ;;  %v438_v19 = vadd.f32 %v813_v16, %v749_v10  ;;  %v441_v43 = vmul.f32 0.5, %v427_v15 }
  0xeb   : > { %v429_v20 = vpop.f32.mrf.mxu0 }
  0xec   : > { %v455_v21 = vmul.f32 0.044715, %v451_v17  ;;  %v449_v22 = vmul.f32 %v445_v18, %v427_v15  ;;  %v448_v23 = vmul.f32 %v438_v19, %v438_v19  ;;  %v430_v24 = vadd.f32 %v749_v10, %v429_v20 }
  0xed   : > { %v444_v47 = vmul.f32 0.5, %v438_v19 }
  0xee   : > { %v459_v25 = vadd.f32 %v455_v21, %v435_v12  ;;  %v453_v26 = vmul.f32 0.044715, %v449_v22  ;;  %v452_v27 = vmul.f32 %v448_v23, %v438_v19  ;;  %v446_v28 = vmul.f32 %v430_v24, %v430_v24 }
  0xef   : > { %v442_v54 = vmul.f32 0.5, %v430_v24 }
  0xf0   : > { %v463_v29 = vmul.f32 0.7978846, %v459_v25  ;;  %v457_v30 = vadd.f32 %v453_v26, %v427_v15  ;;  %v456_v31 = vmul.f32 0.044715, %v452_v27  ;;  %v450_v32 = vmul.f32 %v446_v28, %v430_v24 }
  0xf2   : > { %856 = vtanh.f32 %v463_v29  ;;  %v461_v33 = vmul.f32 0.7978846, %v457_v30  ;;  %v460_v34 = vadd.f32 %v456_v31, %v438_v19  ;;  %v454_v35 = vmul.f32 0.044715, %v450_v32 }
  0xf4   : > { %v464_v36 = vmul.f32 0.7978846, %v460_v34  ;;  %858 = vtanh.f32 %v461_v33  ;;  %v458_v37 = vadd.f32 %v454_v35, %v430_v24 }
  0xf6   : > { %860 = vtanh.f32 %v464_v36  ;;  %v462_v38 = vmul.f32 0.7978846, %v458_v37 }
  0xf8   : > { %862 = vtanh.f32 %v462_v38 }
  0xff   : > { %v857_v39 = vpop.eup %856 }
 0x100   : > { %v471_v41 = vadd.f32 1.0, %v857_v39 }
 0x101   : > { %v859_v42 = vpop.eup %858 }
 0x102   : > { %v469_v44 = vadd.f32 1.0, %v859_v42  ;;  %v475_v45 = vmul.f32 %v471_v41, %v443_v40 }
 0x103   : > { %v861_v46 = vpop.eup %860 }
 0x104   : > { %v473_v48 = vmul.f32 %v469_v44, %v441_v43  ;;  %v472_v49 = vadd.f32 1.0, %v861_v46  ;;  %v780_v50 = vpack.c.bf16 %v475_v45, %v475_v45 }
 0x105   : > { %v863_v51 = vpop.eup %862 }
 0x106   : > { %v778_v52 = vpack.c.bf16 %v473_v48, %v473_v48  ;;  %v476_v53 = vmul.f32 %v472_v49, %v444_v47  ;;  %496 = vst.msk [vmem:[%s303_s28 + $0x8] sm:$0xf] %vm493_vm1, %v780_v50  ;;  %v470_v55 = vadd.f32 1.0, %v863_v51 }
 0x108   : > { %494 = vst.msk [vmem:[%s303_s28] sm:$0xf] %vm493_vm1, %v778_v52  ;;  %v781_v56 = vpack.c.bf16 %v476_v53, %v476_v53  ;;  %v474_v57 = vmul.f32 %v470_v55, %v442_v54  ;;  %v478_v60 = vpack.c.bf16 %v476_v53, %v475_v45 }
 0x10a   : > { %497 = vst.msk [vmem:[%s303_s28 + $0xc] sm:$0xf] %vm493_vm1, %v781_v56  ;;  %v477_v58 = vpack.c.bf16 %v474_v57, %v473_v48  ;;  %v779_v59 = vpack.c.bf16 %v474_v57, %v474_v57 }
 0x10c   : > { %495 = vst.msk [vmem:[%s303_s28 + $0x4] sm:$0xf] %vm493_vm1, %v779_v59  ;;  %818 = vmatprep.mubr.msk.bf16.mxu1 %vm521_vm2, %v477_v58 }
 0x10d   : > { %819 = vmatmul.mubr.msk.bf16.vlgmr.msra.gmra.mxu1 %vm521_vm2, %v478_v60 }
 0x1cd   : > { %v820_v62 = vpop.f32.mrf.mxu1 }
 0x1ce   : > { %v571_v63 = vadd.f32 %v820_v62, %v764_v61 }
 0x1cf   : > { %v562_v0 = vpop.f32.mrf.mxu1 }
 0x1d0   : > { %v579_v1 = vmax.f32 %v571_v63, 0.0  ;;  %v563_v2 = vadd.f32 %v764_v61, %v562_v0 }
 0x1d1   : > { %v821_v3 = vpop.f32.mrf.mxu1 }
 0x1d2   : > { %v784_v4 = vpack.c.bf16 %v579_v1, %v579_v1  ;;  %v577_v5 = vmax.f32 %v563_v2, 0.0  ;;  %v574_v6 = vadd.f32 %v821_v3, %v764_v61 }
 0x1d3   : > { %v565_v7 = vpop.f32.mrf.mxu1 }
 0x1d4   : > { %599 = vst.msk [vmem:[%s313_s10 + $0x8] sm:$0xf] %vm493_vm1, %v784_v4  ;;  %v782_v8 = vpack.c.bf16 %v577_v5, %v577_v5  ;;  %v580_v9 = vmax.f32 %v574_v6, 0.0  ;;  %v566_v10 = vadd.f32 %v764_v61, %v565_v7 }
 0x1d6   : > { %597 = vst.msk [vmem:[%s313_s10] sm:$0xf] %vm493_vm1, %v782_v8  ;;  %v785_v11 = vpack.c.bf16 %v580_v9, %v580_v9  ;;  %v578_v12 = vmax.f32 %v566_v10, 0.0 }
 0x1d8   : > { %600 = vst.msk [vmem:[%s313_s10 + $0xc] sm:$0xf] %vm493_vm1, %v785_v11  ;;  %v783_v13 = vpack.c.bf16 %v578_v12, %v578_v12 }
 0x1da   : > { %598 = vst.msk [vmem:[%s313_s10 + $0x4] sm:$0xf] %vm493_vm1, %v783_v13 }
 0x1db PF: > { %s17_s23 = sadd.s32 1, %s886_s23   ;;  %s1011_s21 = smov %s882_s22 }
 0x1dc   : > { %p14_p5 = scmp.ge.s32.totalorder %s17_s23, 6   ;;  %s1012_s22 = smov %s1014_s24 }
 0x1de   :  { %16 = sbr.rel (!%p14_p5) target bundleno = 2 (0x2), region = 82 }

// kernel: net_forward.10
= control target key start
LH: loop header
LB: loop body
LE: loop exit
PB: predicated region body
PF: predicated region fallthrough
CT: control target
= control target key end

     0   :  { %s1062_s21 = smov 0   ;;  %s1064_s22 = smov 0   ;;  %s1182_s0 = inlined_call_operand.vmem [shape: bf16[4,4,8,32], index: 0, kind: input, shape index: {}]   ;;  %s1183_s1 = inlined_call_operand.vmem [shape: bf16[4,32,64], index: 1, kind: input, shape index: {}]   ;;  %s1184_s2 = inlined_call_operand.vmem [shape: f32[1,64], index: 2, kind: input, shape index: {}]   ;;  %s1185_s3 = inlined_call_operand.vmem [shape: bf16[64,64], index: 3, kind: input, shape index: {}]   ;;  %s1186_s4 = inlined_call_operand.vmem [shape: f32[1,64], index: 4, kind: input, shape index: {}]   ;;  %s1187_s5 = inlined_call_operand.vmem [shape: bf16[4,8,64], index: 5, kind: output, shape index: {0}]   ;;  %s1188_s6 = inlined_call_operand.vmem [shape: bf16[4,8,64], index: 6, kind: output, shape index: {1}]  }
   0x1   :  { %s1066_s23 = smov 0   ;;  %s1068_s24 = smov 0  }
   0x2   :  { %s1070_s25 = smov 0  }
   0x3 LB: > { %s26_s26 = sadd.s32 1, %s1019_s24  ;;  %p45_p1 = scmp.ne.s32.totalorder %s1011_s22, %s1007_s21  ;;  %s1023_s25 = sphi %s1070_s25, %s17_s25   ;;  %s1019_s24 = sphi %s1068_s24, %s1192_s24   ;;  %s1015_s23 = sphi %s1066_s23, %s1191_s23   ;;  %s1011_s22 = sphi %s1064_s22, %s1190_s22   ;;  %s1007_s21 = sphi %s1062_s21, %s1189_s21  }
   0x4   : > { %p27_p0 = scmp.ge.s32.totalorder %s26_s26, 4  ;;  %p46_p2 = scmp.eq.s32.totalorder %s1023_s25, 0 }
   0x5   : > { %s38_s28 = sadd.s32 1, %s1011_s22  ;;  %p825_p5 = scmp.ge.s32.totalorder %s1023_s25, 4 }
   0x6   : > { %s1194_s26 = smov (%p27_p0, %s26_s26), 0  ;;  %p47_p3 = por %p46_p2, %p45_p1 }
   0x7   : > { %s33_s27 = ssub.s32 %s1019_s24, %s1194_s26  ;;  %223 = sbr.rel (%p825_p5) target bundleno = 19 (0x13), region = 32 }
   0x8   : > { %p36_p4 = scmp.eq.s32.totalorder %s33_s27, 0 }
   0xa   : > { %s1097_s29 = scalar_select %p36_p4, %s1011_s22, %s38_s28  }
   0xc   : > { %226 = sbr.rel (!%p47_p3) target bundleno = 19 (0x13), region = 36  ;;  %s228_s30 = sand.u32 (%p47_p3), 1, %s1011_s22  }
   0xd   : > { %s827_s7 = sshll.u32 (%p47_p3), %s1019_s24, 2  ;;  %s826_s8 = sshll.u32 (%p47_p3), %s228_s30, 4 }
   0xe   : > { %s233_s11 = scalar_lea.vmem (%p47_p3), %s1182_s0, %s827_s7  ;;  %s230_s12 = scalar_lea.vmem (%p47_p3), [#allocation2], %s826_s8 }
   0xf   : > { %v250_v0 = vld [vmem:[%s233_s11] sm:$0xf] (%p47_p3)  ;;  %v252_v1 = vld [vmem:[%s233_s11 + $0x10] sm:$0xf] (%p47_p3) }
  0x10   : > { %251 = vst [vmem:[%s230_s12] sm:$0xf] (%p47_p3), %v250_v0  ;;  %253 = vst [vmem:[%s230_s12 + $0x4] sm:$0xf] (%p47_p3), %v252_v1  ;;  %v254_v2 = vld [vmem:[%s233_s11 + $0x20] sm:$0xf] (%p47_p3) }
  0x11   : > { %v256_v3 = vld [vmem:[%s233_s11 + $0x30] sm:$0xf]  ;;  %255 = vst [vmem:[%s230_s12 + $0x8] sm:$0xf] %v254_v2 }
  0x12   : > { %257 = vst [vmem:[%s230_s12 + $0xc] sm:$0xf] %v256_v3 }
  0x13 PF: > { %p828_p6 = scmp.ge.s32.totalorder %s1023_s25, 1  ;;  %p288_p7 = scmp.lt.s32.totalorder %s1023_s25, 5 }
  0x15   : > { %p289_p8 = pnand %p828_p6, %p288_p7 }
  0x16   : > { %s295_s17 = sand.u32 (!%p289_p8), 1, %s1007_s21   ;;  %p333_p9 = scmp.lt.s32.totalorder (!%p289_p8), %s1015_s23, 3 }
  0x17   : > { %292 = sbr.rel (%p289_p8) target bundleno = 480 (0x1e0), region = 77  ;;  %s829_s18 = sshll.u32 (!%p289_p8), %s295_s17, 4 }
  0x18   : > { %s297_s30 = scalar_lea.vmem (!%p289_p8), [#allocation2], %s829_s18 }
  0x1c   : > { %v971_v4 = vld [vmem:[%s1183_s1 + $0x18] sm:$0xff]   ;;  %v1025_v5 = vmov 0.0   ;;  %v972_v6 = vld [vmem:[%s1183_s1 + $0x10] sm:$0xff]   ;;  %vm1026_vm0 = vmmov 0   ;;  %v974_v7 = vld [vmem:[%s1183_s1 + $0x28] sm:$0xff]   ;;  %vm372_vm1 = vcmask 261120  }
  0x1d   : > { %885 = vmatprep.subr.bf16.mxu1 %v1025_v5  ;;  %901 = vmatprep.subr.bf16.mxu0 %v1025_v5  ;;  %v973_v8 = vld [vmem:[%s1183_s1 + $0x8] sm:$0xff]   ;;  %v832_v9 = vld [vmem:[%s297_s30 + $0x4] sm:$0xf]  ;;  %v348_v13 = vld [vmem:[%s297_s30] sm:$0xf]  ;;  %s1196_s23 = smov (!%p333_p9, %s1015_s23), 3 }
  0x1e   : > { %886 = vmatpush3.bf16.msra.mxu1 %v971_v4  ;;  %889 = vmatprep.mubr.msk.bf16.mxu1 %vm1026_vm0, %v1025_v5  ;;  %v976_v10 = vld [vmem:[%s1183_s1 + $0x20] sm:$0xff]   ;;  %v843_v12 = vld [vmem:[%s297_s30 + $0x8] sm:$0xf]  ;;  %v978_v15 = vld [vmem:[%s1183_s1 + $0x30] sm:$0xff]   ;;  %s830_s7 = sshll.u32 %s1196_s23, 2  ;;  %vm656_vm2 = vcmask 523264  }
  0x1f   : > { %887 = vmatprep.subr.bf16.mxu1 %v1025_v5  ;;  %905 = vmatprep.mubr.msk.bf16.mxu0 %vm1026_vm0, %v1025_v5  ;;  %v975_v11 = vld [vmem:[%s1183_s1] sm:$0xff]   ;;  %v977_v14 = vld [vmem:[%s1183_s1 + $0x38] sm:$0xff]   ;;  %v980_v18 = vld [vmem:[%s1185_s3 + $0x10] sm:$0xff]   ;;  %s339_s9 = scalar_lea.vmem %s1187_s5, %s830_s7  ;;  %vm615_vm3 = vcmask 519168   ;;  %s346_s13 = scalar_lea.vmem %s1188_s6, %s830_s7 }
  0x20   : > { %902 = vmatpush3.bf16.msra.mxu0 %v974_v7  ;;  %v851_v16 = vld [vmem:[%s297_s30 + $0xc] sm:$0xf]  ;;  %v982_v20 = vld [vmem:[%s1185_s3] sm:$0xff]  }
  0x21   : > { %903 = vmatprep.subr.bf16.mxu0 %v1025_v5  ;;  %v979_v17 = vld [vmem:[%s1185_s3 + $0x18] sm:$0xff]   ;;  %v981_v19 = vld [vmem:[%s1185_s3 + $0x8] sm:$0xff]   ;;  %v859_v36 = vld [vmem:[%s1184_s2] ss:$0 sm:$0xff] }
  0x22   : > { %888 = vmatpush3.bf16.msra.mxu1 %v972_v6  ;;  %v860_v52 = vld [vmem:[%s1186_s4] ss:$0 sm:$0xff] }
  0x23   : > { %893 = vmatprep.subr.bf16.mxu1 %v1025_v5 }
  0x24   : > { %904 = vmatpush3.bf16.msra.mxu0 %v976_v10 }
  0x25   : > { %890 = vmatmul.mubr.msk.bf16.vlgmr.msra.gmra.mxu1 %vm372_vm1, %v832_v9  ;;  %917 = vmatprep.subr.bf16.mxu0 %v1025_v5 }
  0x26   : > { %894 = vmatpush3.bf16.msra.mxu1 %v973_v8  ;;  %897 = vmatprep.mubr.msk.bf16.mxu1 %vm1026_vm0, %v1025_v5 }
  0x27   : > { %895 = vmatprep.subr.bf16.mxu1 %v1025_v5  ;;  %906 = vmatmul.mubr.msk.bf16.vlgmr.msra.gmra.mxu0 %vm372_vm1, %v843_v12 }
  0x28   : > { %925 = vmatprep.mubr.msk.bf16.mxu0 %vm1026_vm0, %v1025_v5  ;;  %918 = vmatpush3.bf16.msra.mxu0 %v979_v17 }
  0x29   : > { %919 = vmatprep.subr.bf16.mxu0 %v1025_v5 }
  0x2a   : > { %896 = vmatpush3.bf16.msra.mxu1 %v975_v11 }
  0x2b   : > { %909 = vmatprep.subr.bf16.mxu1 %v1025_v5 }
  0x2c   : > { %920 = vmatpush3.bf16.msra.mxu0 %v980_v18 }
  0x2d   : > { %898 = vmatmul.mubr.msk.bf16.vlgmr.msra.gmra.mxu1 %vm372_vm1, %v348_v13  ;;  %921 = vmatprep.subr.bf16.mxu0 %v1025_v5 }
  0x2e   : > { %910 = vmatpush3.bf16.msra.mxu1 %v977_v14  ;;  %913 = vmatprep.mubr.msk.bf16.mxu1 %vm1026_vm0, %v1025_v5 }
  0x2f   : > { %911 = vmatprep.subr.bf16.mxu1 %v1025_v5 }
  0x30   : > { %922 = vmatpush3.bf16.msra.mxu0 %v981_v19 }
  0x31   : > { %923 = vmatprep.subr.bf16.mxu0 %v1025_v5 }
  0x32   : > { %912 = vmatpush3.bf16.msra.mxu1 %v978_v15 }
  0x34   : > { %924 = vmatpush3.bf16.msra.mxu0 %v982_v20 }
  0x35   : > { %914 = vmatmul.mubr.msk.bf16.vlgmr.msra.gmra.mxu1 %vm372_vm1, %v851_v16 }
  0xe5   : > { %v410_v21 = vpop.f32.mrf.mxu1 }
  0xe7   : > { %v891_v22 = vpop.f32.mrf.mxu1  ;;  %v527_v24 = vpop.f32.mrf.mxu0 }
  0xe9   : > { %v413_v23 = vpop.f32.mrf.mxu1  ;;  %v907_v26 = vpop.f32.mrf.mxu0 }
  0xeb   : > { %v892_v25 = vpop.f32.mrf.mxu1  ;;  %v530_v28 = vpop.f32.mrf.mxu0 }
  0xed   : > { %v465_v27 = vpop.f32.mrf.mxu1  ;;  %v908_v30 = vpop.f32.mrf.mxu0 }
  0xee   : > { %v466_v31 = vadd.f32 %v465_v27, %v410_v21 }
  0xef   : > { %v899_v29 = vpop.f32.mrf.mxu1 }
  0xf0   : > { %v533_v34 = vadd.f32 %v527_v24, %v466_v31 }
  0xf1   : > { %v468_v32 = vpop.f32.mrf.mxu1 }
  0xf3   : > { %v900_v33 = vpop.f32.mrf.mxu1 }
  0xf5   : > { %v590_v35 = vpop.f32.mrf.mxu1 }
  0xf6   : > { %v596_v37 = vadd.f32 %v590_v35, %v533_v34 }
  0xf7   : > { %v915_v38 = vpop.f32.mrf.mxu1 }
  0xf8   : > { %v604_v39 = vadd.f32 %v859_v36, %v596_v37 }
  0xf9   : > { %v593_v40 = vpop.f32.mrf.mxu1 }
  0xfa   : > { %v606_v41 = vmul.f32 %v604_v39, %v604_v39  ;;  %v605_v48 = vmul.f32 0.5, %v604_v39 }
  0xfb   : > { %v916_v42 = vpop.f32.mrf.mxu1 }
  0xfc   : > { %v607_v43 = vmul.f32 %v606_v41, %v604_v39 }
  0xfe   : > { %v608_v44 = vmul.f32 0.044715, %v607_v43 }
 0x100   : > { %v609_v45 = vadd.f32 %v608_v44, %v604_v39 }
 0x102   : > { %v610_v46 = vmul.f32 0.7978846, %v609_v45 }
 0x104   : > { %983 = vtanh.f32 %v610_v46 }
 0x111   : > { %v984_v47 = vpop.eup %983 }
 0x112   : > { %v612_v49 = vadd.f32 1.0, %v984_v47 }
 0x114   : > { %v613_v50 = vmul.f32 %v612_v49, %v605_v48 }
 0x116   : > { %v614_v51 = vpack.c.bf16 %v613_v50, %v613_v50 }
 0x118   : > { %926 = vmatmul.mubr.msk.bf16.vlgmr.msra.gmra.mxu0 %vm656_vm2, %v614_v51  ;;  %616 = vst.msk [vmem:[%s339_s9] sm:$0xf] %vm615_vm3, %v614_v51 }
 0x1d8   : > { %v694_v53 = vpop.f32.mrf.mxu0 }
 0x1d9   : > { %v695_v54 = vadd.f32 %v860_v52, %v694_v53 }
 0x1da   : > { %v927_v55 = vpop.f32.mrf.mxu0 }
 0x1db   : > { %v700_v56 = vmax.f32 %v695_v54, 0.0 }
 0x1dc   : > { %v697_v57 = vpop.f32.mrf.mxu0 }
 0x1dd   : > { %v701_v58 = vpack.c.bf16 %v700_v56, %v700_v56 }
 0x1de   : > { %v928_v59 = vpop.f32.mrf.mxu0 }
 0x1df   : > { %702 = vst.msk [vmem:[%s346_s13] sm:$0xf] %vm615_vm3, %v701_v58 }
 0x1e0 PF: > { %s17_s25 = sadd.s32 1, %s1023_s25   ;;  %s1189_s21 = smov %s1011_s22 }
 0x1e1   : > { %p14_p10 = scmp.ge.s32.totalorder %s17_s25, 6   ;;  %s1190_s22 = smov %s1097_s29 }
 0x1e2   : > { %s1191_s23 = smov %s1019_s24  ;;  %s1192_s24 = smov %s1194_s26 }
 0x1e3   :  { %16 = sbr.rel (!%p14_p10) target bundleno = 3 (0x3), region = 134 }

// kernel: net_forward.11
= control target key start
LH: loop header
LB: loop body
LE: loop exit
PB: predicated region body
PF: predicated region fallthrough
CT: control target
= control target key end

     0   :  { %s1195_s21 = smov 0   ;;  %s1197_s22 = smov 0   ;;  %s1386_s0 = inlined_call_operand.vmem [shape: bf16[4,4,2,64], index: 0, kind: input, shape index: {}]   ;;  %s1387_s1 = inlined_call_operand.vmem [shape: bf16[4,64,128], index: 1, kind: input, shape index: {}]   ;;  %s1388_s2 = inlined_call_operand.vmem [shape: f32[1,128], index: 2, kind: input, shape index: {}]   ;;  %s1389_s3 = inlined_call_operand.vmem [shape: bf16[128,128], index: 3, kind: input, shape index: {}]   ;;  %s1390_s4 = inlined_call_operand.vmem [shape: f32[1,128], index: 4, kind: input, shape index: {}]   ;;  %s1391_s5 = inlined_call_operand.vmem [shape: bf16[4,2,128], index: 5, kind: output, shape index: {0}]   ;;  %s1392_s6 = inlined_call_operand.vmem [shape: bf16[4,2,128], index: 6, kind: output, shape index: {1}]  }
   0x1   :  { %s1199_s23 = smov 0   ;;  %s1201_s24 = smov 0  }
   0x2   :  { %s1203_s25 = smov 0  }
   0x3 LB: > { %s26_s26 = sadd.s32 1, %s1152_s24  ;;  %p45_p1 = scmp.ne.s32.totalorder %s1144_s22, %s1140_s21  ;;  %s1156_s25 = sphi %s1203_s25, %s17_s25   ;;  %s1152_s24 = sphi %s1201_s24, %s1396_s24   ;;  %s1148_s23 = sphi %s1199_s23, %s1395_s23   ;;  %s1144_s22 = sphi %s1197_s22, %s1394_s22   ;;  %s1140_s21 = sphi %s1195_s21, %s1393_s21  }
   0x4   : > { %p27_p0 = scmp.ge.s32.totalorder %s26_s26, 4  ;;  %p46_p2 = scmp.eq.s32.totalorder %s1156_s25, 0 }
   0x5   : > { %s38_s28 = sadd.s32 1, %s1144_s22  ;;  %p890_p5 = scmp.ge.s32.totalorder %s1156_s25, 4 }
   0x6   : > { %s1398_s26 = smov (%p27_p0, %s26_s26), 0  ;;  %p47_p3 = por %p46_p2, %p45_p1 }
   0x7   : > { %s33_s27 = ssub.s32 %s1152_s24, %s1398_s26  ;;  %223 = sbr.rel (%p890_p5) target bundleno = 18 (0x12), region = 32 }
   0x8   : > { %p36_p4 = scmp.eq.s32.totalorder %s33_s27, 0 }
   0xa   : > { %s1230_s29 = scalar_select %p36_p4, %s1144_s22, %s38_s28  }
   0xc   : > { %226 = sbr.rel (!%p47_p3) target bundleno = 18 (0x12), region = 36  ;;  %s228_s30 = sand.u32 (%p47_p3), 1, %s1144_s22  }
   0xd   : > { %s232_s9 = scalar_lea.vmem (%p47_p3), %s1386_s0, %s1152_s24  ;;  %s891_s10 = sshll.u32 (%p47_p3), %s228_s30, 2 }
   0xe   : > { %v249_v0 = vld [vmem:[%s232_s9] sm:$0x1] (%p47_p3)  ;;  %v251_v1 = vld [vmem:[%s232_s9 + $0x4] sm:$0x1] (%p47_p3)  ;;  %v253_v2 = vld [vmem:[%s232_s9 + $0x8] sm:$0x1] (%p47_p3) }
   0xf   : > { %v255_v3 = vld [vmem:[%s232_s9 + $0xc] sm:$0x1] (%p47_p3)  ;;  %s230_s11 = scalar_lea.vmem (%p47_p3), [#allocation2], %s891_s10 }
  0x10   : > { %250 = vst [vmem:[%s230_s11] sm:$0x1] (%p47_p3), %v249_v0  ;;  %252 = vst [vmem:[%s230_s11 + $0x1] sm:$0x1] (%p47_p3), %v251_v1 }
  0x11   : > { %254 = vst [vmem:[%s230_s11 + $0x2] sm:$0x1] %v253_v2  ;;  %256 = vst [vmem:[%s230_s11 + $0x3] sm:$0x1] %v255_v3 }
  0x12 PF: > { %p892_p6 = scmp.ge.s32.totalorder %s1156_s25, 1  ;;  %p279_p7 = scmp.lt.s32.totalorder %s1156_s25, 5 }
  0x14   : > { %p280_p8 = pnand %p892_p6, %p279_p7 }
  0x15   : > { %s286_s16 = sand.u32 (!%p280_p8), 1, %s1140_s21   ;;  %p322_p9 = scmp.lt.s32.totalorder (!%p280_p8), %s1148_s23, 3 }
  0x16   : > { %283 = sbr.rel (%p280_p8) target bundleno = 503 (0x1f7), region = 70  ;;  %s893_s27 = sshll.u32 (!%p280_p8), %s286_s16, 2 }
  0x17   : > { %s1272_s10 = scalar_lea.vmem (!%p280_p8), [#allocation2], %s893_s27 }
  0x1b   : > { %v1092_v4 = vld [vmem:[%s1387_s1 + $0x38] sm:$0xff]   ;;  %v1158_v5 = vmov 0.0   ;;  %v1093_v6 = vld [vmem:[%s1387_s1 + $0x30] sm:$0xff]   ;;  %vm1159_vm0 = vmmov 0   ;;  %v1094_v7 = vld [vmem:[%s1387_s1 + $0x28] sm:$0xff]   ;;  %vm379_vm1 = vcmask 523264  }
  0x1c   : > { %982 = vmatprep.subr.bf16.mxu1 %v1158_v5  ;;  %1006 = vmatprep.subr.bf16.mxu0 %v1158_v5  ;;  %v1097_v8 = vld [vmem:[%s1387_s1 + $0x58] sm:$0xff]   ;;  %v1099_v9 = vld [vmem:[%s1387_s1 + $0x50] sm:$0xff]   ;;  %v1095_v10 = vld [vmem:[%s1387_s1 + $0x20] sm:$0xff]   ;;  %s1400_s23 = smov (!%p322_p9, %s1148_s23), 3 }
  0x1d   : > { %983 = vmatpush3.bf16.msra.mxu1 %v1092_v4  ;;  %990 = vmatprep.mubr.msk.bf16.mxu1 %vm1159_vm0, %v1158_v5  ;;  %v1101_v11 = vld [vmem:[%s1387_s1 + $0x48] sm:$0xff]   ;;  %v894_v12 = vld [vmem:[%s1272_s10 + $0x1] sm:$0x1]  ;;  %v1096_v13 = vld [vmem:[%s1387_s1 + $0x18] sm:$0xff]   ;;  %s327_s14 = scalar_lea.vmem %s1391_s5, %s1400_s23  ;;  %s333_s18 = scalar_lea.vmem %s1392_s6, %s1400_s23 }
  0x1e   : > { %984 = vmatprep.subr.bf16.mxu1 %v1158_v5  ;;  %1014 = vmatprep.mubr.msk.bf16.mxu0 %vm1159_vm0, %v1158_v5  ;;  %v1103_v14 = vld [vmem:[%s1387_s1 + $0x40] sm:$0xff]   ;;  %v1098_v15 = vld [vmem:[%s1387_s1 + $0x10] sm:$0xff]   ;;  %v1100_v17 = vld [vmem:[%s1387_s1 + $0x8] sm:$0xff]  }
  0x1f   : > { %1007 = vmatpush3.bf16.msra.mxu0 %v1097_v8  ;;  %v913_v16 = vld [vmem:[%s1272_s10 + $0x2] sm:$0x1]  ;;  %v335_v19 = vld [vmem:[%s1272_s10] sm:$0x1]  ;;  %v1104_v20 = vld [vmem:[%s1387_s1 + $0x78] sm:$0xff]  }
  0x20   : > { %1008 = vmatprep.subr.bf16.mxu0 %v1158_v5  ;;  %v1102_v18 = vld [vmem:[%s1387_s1] sm:$0xff]   ;;  %v1105_v21 = vld [vmem:[%s1387_s1 + $0x70] sm:$0xff]   ;;  %v1106_v22 = vld [vmem:[%s1387_s1 + $0x68] sm:$0xff]  }
  0x21   : > { %985 = vmatpush3.bf16.msra.mxu1 %v1093_v6  ;;  %v1107_v23 = vld [vmem:[%s1387_s1 + $0x60] sm:$0xff]   ;;  %v1108_v25 = vld [vmem:[%s1389_s3 + $0x38] sm:$0xff]   ;;  %v1109_v26 = vld [vmem:[%s1389_s3 + $0x30] sm:$0xff]  }
  0x22   : > { %986 = vmatprep.subr.bf16.mxu1 %v1158_v5  ;;  %v927_v24 = vld [vmem:[%s1272_s10 + $0x3] sm:$0x1]  ;;  %v1110_v27 = vld [vmem:[%s1389_s3 + $0x28] sm:$0xff]   ;;  %v1112_v29 = vld [vmem:[%s1389_s3 + $0x18] sm:$0xff]  }
  0x23   : > { %1009 = vmatpush3.bf16.msra.mxu0 %v1099_v9  ;;  %v1111_v28 = vld [vmem:[%s1389_s3 + $0x20] sm:$0xff]   ;;  %v1113_v30 = vld [vmem:[%s1389_s3 + $0x10] sm:$0xff]   ;;  %v1114_v31 = vld [vmem:[%s1389_s3 + $0x8] sm:$0xff]  }
  0x24   : > { %1010 = vmatprep.subr.bf16.mxu0 %v1158_v5  ;;  %v1115_v32 = vld [vmem:[%s1389_s3] sm:$0xff]  }
  0x25   : > { %987 = vmatpush3.bf16.msra.mxu1 %v1094_v7  ;;  %v941_v48 = vld [vmem:[%s1388_s2] ss:$0 sm:$0xff] }
  0x26   : > { %988 = vmatprep.subr.bf16.mxu1 %v1158_v5  ;;  %v942_v0 = vld [vmem:[%s1390_s4] ss:$0 sm:$0xff] }
  0x27   : > { %1011 = vmatpush3.bf16.msra.mxu0 %v1101_v11 }
  0x28   : > { %1012 = vmatprep.subr.bf16.mxu0 %v1158_v5 }
  0x29   : > { %989 = vmatpush3.bf16.msra.mxu1 %v1095_v10 }
  0x2a   : > { %994 = vmatprep.subr.bf16.mxu1 %v1158_v5 }
  0x2b   : > { %1013 = vmatpush3.bf16.msra.mxu0 %v1103_v14 }
  0x2c   : > { %991 = vmatmul.mubr.msk.bf16.vlgmr.msra.gmra.mxu1 %vm379_vm1, %v894_v12  ;;  %1030 = vmatprep.subr.bf16.mxu0 %v1158_v5 }
  0x2d   : > { %995 = vmatpush3.bf16.msra.mxu1 %v1096_v13  ;;  %1002 = vmatprep.mubr.msk.bf16.mxu1 %vm1159_vm0, %v1158_v5 }
  0x2e   : > { %996 = vmatprep.subr.bf16.mxu1 %v1158_v5  ;;  %1015 = vmatmul.mubr.msk.bf16.vlgmr.msra.gmra.mxu0 %vm379_vm1, %v913_v16 }
  0x2f   : > { %1046 = vmatprep.mubr.msk.bf16.mxu0 %vm1159_vm0, %v1158_v5  ;;  %1031 = vmatpush3.bf16.msra.mxu0 %v1108_v25 }
  0x30   : > { %1032 = vmatprep.subr.bf16.mxu0 %v1158_v5 }
  0x31   : > { %997 = vmatpush3.bf16.msra.mxu1 %v1098_v15 }
  0x32   : > { %998 = vmatprep.subr.bf16.mxu1 %v1158_v5 }
  0x33   : > { %1033 = vmatpush3.bf16.msra.mxu0 %v1109_v26 }
  0x34   : > { %1034 = vmatprep.subr.bf16.mxu0 %v1158_v5 }
  0x35   : > { %999 = vmatpush3.bf16.msra.mxu1 %v1100_v17 }
  0x36   : > { %1000 = vmatprep.subr.bf16.mxu1 %v1158_v5 }
  0x37   : > { %1035 = vmatpush3.bf16.msra.mxu0 %v1110_v27 }
  0x38   : > { %1036 = vmatprep.subr.bf16.mxu0 %v1158_v5 }
  0x39   : > { %1001 = vmatpush3.bf16.msra.mxu1 %v1102_v18 }
  0x3a   : > { %1018 = vmatprep.subr.bf16.mxu1 %v1158_v5 }
  0x3b   : > { %1037 = vmatpush3.bf16.msra.mxu0 %v1111_v28 }
  0x3c   : > { %1003 = vmatmul.mubr.msk.bf16.vlgmr.msra.gmra.mxu1 %vm379_vm1, %v335_v19  ;;  %1038 = vmatprep.subr.bf16.mxu0 %v1158_v5 }
  0x3d   : > { %1019 = vmatpush3.bf16.msra.mxu1 %v1104_v20  ;;  %1026 = vmatprep.mubr.msk.bf16.mxu1 %vm1159_vm0, %v1158_v5 }
  0x3e   : > { %1020 = vmatprep.subr.bf16.mxu1 %v1158_v5 }
  0x3f   : > { %1039 = vmatpush3.bf16.msra.mxu0 %v1112_v29 }
  0x40   : > { %1040 = vmatprep.subr.bf16.mxu0 %v1158_v5 }
  0x41   : > { %1021 = vmatpush3.bf16.msra.mxu1 %v1105_v21 }
  0x42   : > { %1022 = vmatprep.subr.bf16.mxu1 %v1158_v5 }
  0x43   : > { %1041 = vmatpush3.bf16.msra.mxu0 %v1113_v30 }
  0x44   : > { %1042 = vmatprep.subr.bf16.mxu0 %v1158_v5 }
  0x45   : > { %1023 = vmatpush3.bf16.msra.mxu1 %v1106_v22 }
  0x46   : > { %1024 = vmatprep.subr.bf16.mxu1 %v1158_v5 }
  0x47   : > { %1043 = vmatpush3.bf16.msra.mxu0 %v1114_v31 }
  0x48   : > { %1044 = vmatprep.subr.bf16.mxu0 %v1158_v5 }
  0x49   : > { %1025 = vmatpush3.bf16.msra.mxu1 %v1107_v23 }
  0x4b   : > { %1045 = vmatpush3.bf16.msra.mxu0 %v1115_v32 }
  0x4c   : > { %1027 = vmatmul.mubr.msk.bf16.vlgmr.msra.gmra.mxu1 %vm379_vm1, %v927_v24 }
  0xec   : > { %v417_v33 = vpop.f32.mrf.mxu1 }
  0xee   : > { %v992_v34 = vpop.f32.mrf.mxu1  ;;  %v562_v37 = vpop.f32.mrf.mxu0 }
  0xf0   : > { %v420_v35 = vpop.f32.mrf.mxu1  ;;  %v1016_v38 = vpop.f32.mrf.mxu0 }
  0xf2   : > { %v993_v36 = vpop.f32.mrf.mxu1  ;;  %v565_v39 = vpop.f32.mrf.mxu0 }
  0xf4   : > { %v1017_v40 = vpop.f32.mrf.mxu0 }
  0xfc   : > { %v484_v41 = vpop.f32.mrf.mxu1 }
  0xfd   : > { %v485_v45 = vadd.f32 %v484_v41, %v417_v33 }
  0xfe   : > { %v1004_v42 = vpop.f32.mrf.mxu1 }
  0xff   : > { %v568_v46 = vadd.f32 %v562_v37, %v485_v45 }
 0x100   : > { %v487_v43 = vpop.f32.mrf.mxu1 }
 0x102   : > { %v1005_v44 = vpop.f32.mrf.mxu1 }
 0x10c   : > { %v641_v47 = vpop.f32.mrf.mxu1 }
 0x10d   : > { %v647_v49 = vadd.f32 %v641_v47, %v568_v46 }
 0x10e   : > { %v1028_v50 = vpop.f32.mrf.mxu1 }
 0x10f   : > { %v655_v51 = vadd.f32 %v941_v48, %v647_v49 }
 0x110   : > { %v644_v52 = vpop.f32.mrf.mxu1 }
 0x111   : > { %v657_v53 = vmul.f32 %v655_v51, %v655_v51  ;;  %v656_v60 = vmul.f32 0.5, %v655_v51 }
 0x112   : > { %v1029_v54 = vpop.f32.mrf.mxu1 }
 0x113   : > { %v658_v55 = vmul.f32 %v657_v53, %v655_v51 }
 0x115   : > { %v659_v56 = vmul.f32 0.044715, %v658_v55 }
 0x117   : > { %v660_v57 = vadd.f32 %v659_v56, %v655_v51 }
 0x119   : > { %v661_v58 = vmul.f32 0.7978846, %v660_v57 }
 0x11b   : > { %1116 = vtanh.f32 %v661_v58 }
 0x128   : > { %v1117_v59 = vpop.eup %1116 }
 0x129   : > { %v663_v61 = vadd.f32 1.0, %v1117_v59 }
 0x12b   : > { %v664_v62 = vmul.f32 %v663_v61, %v656_v60 }
 0x12d   : > { %v665_v63 = vpack.c.bf16 %v664_v62, %v664_v62 }
 0x12f   : > { %1047 = vmatmul.mubr.bf16.vlgmr.msra.gmra.mxu0 %v665_v63  ;;  %666 = vst [vmem:[%s327_s14] sm:$0x1] %v665_v63 }
 0x1ef   : > { %v772_v1 = vpop.f32.mrf.mxu0 }
 0x1f0   : > { %v773_v2 = vadd.f32 %v942_v0, %v772_v1 }
 0x1f1   : > { %v1048_v3 = vpop.f32.mrf.mxu0 }
 0x1f2   : > { %v778_v4 = vmax.f32 %v773_v2, 0.0 }
 0x1f3   : > { %v775_v5 = vpop.f32.mrf.mxu0 }
 0x1f4   : > { %v779_v6 = vpack.c.bf16 %v778_v4, %v778_v4 }
 0x1f5   : > { %v1049_v7 = vpop.f32.mrf.mxu0 }
 0x1f6   : > { %780 = vst [vmem:[%s333_s18] sm:$0x1] %v779_v6 }
 0x1f7 PF: > { %s17_s25 = sadd.s32 1, %s1156_s25   ;;  %s1393_s21 = smov %s1144_s22 }
 0x1f8   : > { %p14_p10 = scmp.ge.s32.totalorder %s17_s25, 6   ;;  %s1394_s22 = smov %s1230_s29 }
 0x1f9   : > { %s1395_s23 = smov %s1152_s24  ;;  %s1396_s24 = smov %s1398_s26 }
 0x1fa   :  { %16 = sbr.rel (!%p14_p10) target bundleno = 3 (0x3), region = 127 }

// kernel: net_forward.12
= control target key start
LH: loop header
LB: loop body
LE: loop exit
PB: predicated region body
PF: predicated region fallthrough
CT: control target
= control target key end

     0   :  { %v1393_v1 = vmov 0   ;;  %s1790_s1 = inlined_call_operand.vmem [shape: bf16[4,128,256], index: 1, kind: input, shape index: {}]   ;;  %s1791_s0 = inlined_call_operand.vmem [shape: bf16[4,2,128], index: 0, kind: input, shape index: {}]   ;;  %s1792_s3 = inlined_call_operand.vmem [shape: bf16[256,256], index: 3, kind: input, shape index: {}]   ;;  %s1793_s5 = inlined_call_operand.vmem [shape: bf16[256,128], index: 5, kind: input, shape index: {}]   ;;  %s1794_s2 = inlined_call_operand.vmem [shape: f32[1,256], index: 2, kind: input, shape index: {}]   ;;  %s1795_s4 = inlined_call_operand.vmem [shape: f32[1,256], index: 4, kind: input, shape index: {}]   ;;  %s1796_s6 = inlined_call_operand.vmem [shape: bf16[2,128], index: 6, kind: output, shape index: {}]  }
   0x1   :  { %v1229_v0 = vld [vmem:[%s1790_s1 + $0xf4] ss:$8 sps:$4 sm:$0xff]   ;;  %172 = vmatprep.mubr.bf16.mxu0 %v1393_v1  ;;  %293 = vmatprep.mubr.bf16.mxu1 %v1393_v1  ;;  %v1233_v3 = vld [vmem:[%s1790_s1 + $0xf0] ss:$8 sps:$4 sm:$0xff]   ;;  %v1235_v5 = vld [vmem:[%s1790_s1 + $0xe4] ss:$8 sps:$4 sm:$0xff]  }
   0x2   :  { %v1231_v2 = vld [vmem:[%s1790_s1 + $0x74] ss:$8 sps:$4 sm:$0xff]   ;;  %140 = vmatprep.subr.bf16.mxu0 %v1229_v0  ;;  %v1234_v4 = vld [vmem:[%s1790_s1 + $0x70] ss:$8 sps:$4 sm:$0xff]   ;;  %v1237_v6 = vld [vmem:[%s1790_s1 + $0x64] ss:$8 sps:$4 sm:$0xff]  }
   0x3   :  { %261 = vmatprep.subr.bf16.mxu1 %v1231_v2  ;;  %141 = vmatpush1.bf16.msra.mxu0 %v1233_v3  ;;  %v1239_v7 = vld [vmem:[%s1790_s1 + $0xe0] ss:$8 sps:$4 sm:$0xff]   ;;  %v1241_v9 = vld [vmem:[%s1790_s1 + $0xd4] ss:$8 sps:$4 sm:$0xff]   ;;  %v1245_v11 = vld [vmem:[%s1790_s1 + $0xd0] ss:$8 sps:$4 sm:$0xff]  }
   0x4   :  { %262 = vmatpush1.bf16.msra.mxu1 %v1234_v4  ;;  %142 = vmatprep.subr.bf16.mxu0 %v1235_v5  ;;  %v1240_v8 = vld [vmem:[%s1790_s1 + $0x60] ss:$8 sps:$4 sm:$0xff]   ;;  %v1243_v10 = vld [vmem:[%s1790_s1 + $0x54] ss:$8 sps:$4 sm:$0xff]   ;;  %v1246_v12 = vld [vmem:[%s1790_s1 + $0x50] ss:$8 sps:$4 sm:$0xff]  }
   0x5   :  { %263 = vmatprep.subr.bf16.mxu1 %v1237_v6  ;;  %v1247_v13 = vld [vmem:[%s1790_s1 + $0xc4] ss:$8 sps:$4 sm:$0xff]   ;;  %v1251_v15 = vld [vmem:[%s1790_s1 + $0xc0] ss:$8 sps:$4 sm:$0xff]   ;;  %v1253_v17 = vld [vmem:[%s1790_s1 + $0xb4] ss:$8 sps:$4 sm:$0xff]  }
   0x6   :  { %v1249_v14 = vld [vmem:[%s1790_s1 + $0x44] ss:$8 sps:$4 sm:$0xff]   ;;  %v1252_v16 = vld [vmem:[%s1790_s1 + $0x40] ss:$8 sps:$4 sm:$0xff]   ;;  %v1255_v18 = vld [vmem:[%s1790_s1 + $0x34] ss:$8 sps:$4 sm:$0xff]  }
   0x7   :  { %143 = vmatpush1.bf16.msra.mxu0 %v1239_v7  ;;  %v1257_v19 = vld [vmem:[%s1790_s1 + $0xb0] ss:$8 sps:$4 sm:$0xff]   ;;  %v1259_v21 = vld [vmem:[%s1790_s1 + $0xa4] ss:$8 sps:$4 sm:$0xff]   ;;  %v1263_v23 = vld [vmem:[%s1790_s1 + $0xa0] ss:$8 sps:$4 sm:$0xff]  }
   0x8   :  { %264 = vmatpush1.bf16.msra.mxu1 %v1240_v8  ;;  %144 = vmatprep.subr.bf16.mxu0 %v1241_v9  ;;  %v1258_v20 = vld [vmem:[%s1790_s1 + $0x30] ss:$8 sps:$4 sm:$0xff]   ;;  %v1261_v22 = vld [vmem:[%s1790_s1 + $0x24] ss:$8 sps:$4 sm:$0xff]   ;;  %v1264_v24 = vld [vmem:[%s1790_s1 + $0x20] ss:$8 sps:$4 sm:$0xff]  }
   0x9   :  { %265 = vmatprep.subr.bf16.mxu1 %v1243_v10  ;;  %v1265_v25 = vld [vmem:[%s1790_s1 + $0x94] ss:$8 sps:$4 sm:$0xff]   ;;  %v1269_v27 = vld [vmem:[%s1790_s1 + $0x90] ss:$8 sps:$4 sm:$0xff]   ;;  %v1271_v29 = vld [vmem:[%s1790_s1 + $0x84] ss:$8 sps:$4 sm:$0xff]  }
   0xa   :  { %v1267_v26 = vld [vmem:[%s1790_s1 + $0x14] ss:$8 sps:$4 sm:$0xff]   ;;  %v1270_v28 = vld [vmem:[%s1790_s1 + $0x10] ss:$8 sps:$4 sm:$0xff]   ;;  %v1273_v30 = vld [vmem:[%s1790_s1 + $0x4] ss:$8 sps:$4 sm:$0xff]  }
   0xb   :  { %145 = vmatpush1.bf16.msra.mxu0 %v1245_v11  ;;  %v1275_v31 = vld [vmem:[%s1790_s1 + $0x80] ss:$8 sps:$4 sm:$0xff]   ;;  %v1279_v33 = vld [vmem:[%s1790_s1 + $0x174] ss:$8 sps:$4 sm:$0xff]   ;;  %v1277_v37 = vld [vmem:[%s1790_s1 + $0x170] ss:$8 sps:$4 sm:$0xff]  }
   0xc   :  { %266 = vmatpush1.bf16.msra.mxu1 %v1246_v12  ;;  %146 = vmatprep.subr.bf16.mxu0 %v1247_v13  ;;  %v1276_v32 = vld [vmem:[%s1790_s1] ss:$8 sps:$4 sm:$0xff]   ;;  %v1282_v34 = vld [vmem:[%s1790_s1 + $0x1f4] ss:$8 sps:$4 sm:$0xff]   ;;  %v1280_v38 = vld [vmem:[%s1790_s1 + $0x1f0] ss:$8 sps:$4 sm:$0xff]  }
   0xd   :  { %267 = vmatprep.subr.bf16.mxu1 %v1249_v14  ;;  %v1043_v35 = vld [vmem:[%s1791_s0 + $0x1] sm:$0x1]  ;;  %v24_v36 = vld [vmem:[%s1791_s0] sm:$0x1]  ;;  %v1285_v39 = vld [vmem:[%s1790_s1 + $0x164] ss:$8 sps:$4 sm:$0xff]  }
   0xe   :  { %v1288_v40 = vld [vmem:[%s1790_s1 + $0x1e4] ss:$8 sps:$4 sm:$0xff]   ;;  %v1283_v41 = vld [vmem:[%s1790_s1 + $0x160] ss:$8 sps:$4 sm:$0xff]   ;;  %v1291_v43 = vld [vmem:[%s1790_s1 + $0x154] ss:$8 sps:$4 sm:$0xff]  }
   0xf   :  { %147 = vmatpush1.bf16.msra.mxu0 %v1251_v15  ;;  %v1286_v42 = vld [vmem:[%s1790_s1 + $0x1e0] ss:$8 sps:$4 sm:$0xff]   ;;  %v1294_v44 = vld [vmem:[%s1790_s1 + $0x1d4] ss:$8 sps:$4 sm:$0xff]   ;;  %v1289_v45 = vld [vmem:[%s1790_s1 + $0x150] ss:$8 sps:$4 sm:$0xff]  }
  0x10   :  { %268 = vmatpush1.bf16.msra.mxu1 %v1252_v16  ;;  %148 = vmatprep.subr.bf16.mxu0 %v1253_v17  ;;  %v1292_v46 = vld [vmem:[%s1790_s1 + $0x1d0] ss:$8 sps:$4 sm:$0xff]   ;;  %v1297_v47 = vld [vmem:[%s1790_s1 + $0x144] ss:$8 sps:$4 sm:$0xff]   ;;  %v1295_v49 = vld [vmem:[%s1790_s1 + $0x140] ss:$8 sps:$4 sm:$0xff]  }
  0x11   :  { %269 = vmatprep.subr.bf16.mxu1 %v1255_v18  ;;  %v1300_v48 = vld [vmem:[%s1790_s1 + $0x1c4] ss:$8 sps:$4 sm:$0xff]   ;;  %v1298_v50 = vld [vmem:[%s1790_s1 + $0x1c0] ss:$8 sps:$4 sm:$0xff]   ;;  %v1303_v51 = vld [vmem:[%s1790_s1 + $0x134] ss:$8 sps:$4 sm:$0xff]  }
  0x12   :  { %v1306_v52 = vld [vmem:[%s1790_s1 + $0x1b4] ss:$8 sps:$4 sm:$0xff]   ;;  %v1301_v53 = vld [vmem:[%s1790_s1 + $0x130] ss:$8 sps:$4 sm:$0xff]   ;;  %v1309_v55 = vld [vmem:[%s1790_s1 + $0x124] ss:$8 sps:$4 sm:$0xff]  }
  0x13   :  { %149 = vmatpush1.bf16.msra.mxu0 %v1257_v19  ;;  %v1304_v54 = vld [vmem:[%s1790_s1 + $0x1b0] ss:$8 sps:$4 sm:$0xff]   ;;  %v1312_v56 = vld [vmem:[%s1790_s1 + $0x1a4] ss:$8 sps:$4 sm:$0xff]   ;;  %v1307_v57 = vld [vmem:[%s1790_s1 + $0x120] ss:$8 sps:$4 sm:$0xff]  }
  0x14   :  { %270 = vmatpush1.bf16.msra.mxu1 %v1258_v20  ;;  %150 = vmatprep.subr.bf16.mxu0 %v1259_v21  ;;  %v1310_v58 = vld [vmem:[%s1790_s1 + $0x1a0] ss:$8 sps:$4 sm:$0xff]   ;;  %v1315_v59 = vld [vmem:[%s1790_s1 + $0x114] ss:$8 sps:$4 sm:$0xff]   ;;  %v1313_v61 = vld [vmem:[%s1790_s1 + $0x110] ss:$8 sps:$4 sm:$0xff]  }
  0x15   :  { %271 = vmatprep.subr.bf16.mxu1 %v1261_v22  ;;  %v1318_v60 = vld [vmem:[%s1790_s1 + $0x194] ss:$8 sps:$4 sm:$0xff]   ;;  %v1316_v62 = vld [vmem:[%s1790_s1 + $0x190] ss:$8 sps:$4 sm:$0xff]   ;;  %v1321_v63 = vld [vmem:[%s1790_s1 + $0x104] ss:$8 sps:$4 sm:$0xff]  }
  0x16   :  { %v1324_v0 = vld [vmem:[%s1790_s1 + $0x184] ss:$8 sps:$4 sm:$0xff]   ;;  %v1322_v2 = vld [vmem:[%s1790_s1 + $0x180] ss:$8 sps:$4 sm:$0xff]   ;;  %v1325_v5 = vld [vmem:[%s1792_s3 + $0x70] ss:$8 sps:$4 sm:$0xff]  }
  0x17   :  { %151 = vmatpush1.bf16.msra.mxu0 %v1263_v23  ;;  %v1092_v3 = vld [vmem:[%s1791_s0 + $0x2] sm:$0x1]  ;;  %v1125_v4 = vld [vmem:[%s1791_s0 + $0x3] sm:$0x1]  ;;  %v1327_v6 = vld [vmem:[%s1792_s3 + $0x74] ss:$8 sps:$4 sm:$0xff]  }
  0x18   :  { %272 = vmatpush1.bf16.msra.mxu1 %v1264_v24  ;;  %152 = vmatprep.subr.bf16.mxu0 %v1265_v25  ;;  %v1330_v7 = vld [vmem:[%s1792_s3 + $0x64] ss:$8 sps:$4 sm:$0xff]   ;;  %v1328_v8 = vld [vmem:[%s1792_s3 + $0x60] ss:$8 sps:$4 sm:$0xff]   ;;  %v1333_v9 = vld [vmem:[%s1792_s3 + $0x54] ss:$8 sps:$4 sm:$0xff]  }
  0x19   :  { %273 = vmatprep.subr.bf16.mxu1 %v1267_v26  ;;  %v1331_v10 = vld [vmem:[%s1792_s3 + $0x50] ss:$8 sps:$4 sm:$0xff]   ;;  %v1336_v11 = vld [vmem:[%s1792_s3 + $0x44] ss:$8 sps:$4 sm:$0xff]   ;;  %v1334_v12 = vld [vmem:[%s1792_s3 + $0x40] ss:$8 sps:$4 sm:$0xff]  }
  0x1a   :  { %v1339_v13 = vld [vmem:[%s1792_s3 + $0x34] ss:$8 sps:$4 sm:$0xff]   ;;  %v1337_v14 = vld [vmem:[%s1792_s3 + $0x30] ss:$8 sps:$4 sm:$0xff]   ;;  %v1342_v15 = vld [vmem:[%s1792_s3 + $0x24] ss:$8 sps:$4 sm:$0xff]  }
  0x1b   :  { %153 = vmatpush1.bf16.msra.mxu0 %v1269_v27  ;;  %v1340_v16 = vld [vmem:[%s1792_s3 + $0x20] ss:$8 sps:$4 sm:$0xff]   ;;  %v1345_v17 = vld [vmem:[%s1792_s3 + $0x14] ss:$8 sps:$4 sm:$0xff]   ;;  %v1343_v18 = vld [vmem:[%s1792_s3 + $0x10] ss:$8 sps:$4 sm:$0xff]  }
  0x1c   :  { %274 = vmatpush1.bf16.msra.mxu1 %v1270_v28  ;;  %154 = vmatprep.subr.bf16.mxu0 %v1271_v29  ;;  %v1348_v19 = vld [vmem:[%s1792_s3 + $0x4] ss:$8 sps:$4 sm:$0xff]   ;;  %v1346_v20 = vld [vmem:[%s1792_s3] ss:$8 sps:$4 sm:$0xff]   ;;  %v1351_v21 = vld [vmem:[%s1792_s3 + $0xf4] ss:$8 sps:$4 sm:$0xff]  }
  0x1d   :  { %275 = vmatprep.subr.bf16.mxu1 %v1273_v30  ;;  %v1349_v22 = vld [vmem:[%s1792_s3 + $0xf0] ss:$8 sps:$4 sm:$0xff]   ;;  %v1354_v23 = vld [vmem:[%s1792_s3 + $0xe4] ss:$8 sps:$4 sm:$0xff]   ;;  %v1352_v24 = vld [vmem:[%s1792_s3 + $0xe0] ss:$8 sps:$4 sm:$0xff]  }
  0x1e   :  { %v1357_v25 = vld [vmem:[%s1792_s3 + $0xd4] ss:$8 sps:$4 sm:$0xff]   ;;  %v1355_v26 = vld [vmem:[%s1792_s3 + $0xd0] ss:$8 sps:$4 sm:$0xff]   ;;  %v1360_v27 = vld [vmem:[%s1792_s3 + $0xc4] ss:$8 sps:$4 sm:$0xff]  }
  0x1f   :  { %155 = vmatpush1.bf16.msra.mxu0 %v1275_v31  ;;  %v1358_v28 = vld [vmem:[%s1792_s3 + $0xc0] ss:$8 sps:$4 sm:$0xff]   ;;  %v1363_v29 = vld [vmem:[%s1792_s3 + $0xb4] ss:$8 sps:$4 sm:$0xff]   ;;  %v1361_v30 = vld [vmem:[%s1792_s3 + $0xb0] ss:$8 sps:$4 sm:$0xff]  }
  0x20   :  { %276 = vmatpush1.bf16.msra.mxu1 %v1276_v32  ;;  %401 = vmatprep.subr.bf16.mxu0 %v1279_v33  ;;  %v1366_v31 = vld [vmem:[%s1792_s3 + $0xa4] ss:$8 sps:$4 sm:$0xff]   ;;  %v1364_v32 = vld [vmem:[%s1792_s3 + $0xa0] ss:$8 sps:$4 sm:$0xff]   ;;  %v1369_v33 = vld [vmem:[%s1792_s3 + $0x94] ss:$8 sps:$4 sm:$0xff]  }
  0x21   :  { %543 = vmatprep.subr.bf16.mxu1 %v1282_v34  ;;  %v1367_v34 = vld [vmem:[%s1792_s3 + $0x90] ss:$8 sps:$4 sm:$0xff]  }
  0x22   :  { %173 = vmatmul.mubr.bf16.vlgmr.msra.gmra.mxu0 %v1043_v35  ;;  %v1372_v35 = vld [vmem:[%s1792_s3 + $0x84] ss:$8 sps:$4 sm:$0xff]  }
  0x23   :  { %294 = vmatmul.mubr.bf16.vlgmr.msra.gmra.mxu1 %v24_v36  ;;  %402 = vmatpush1.bf16.msra.mxu0 %v1277_v37  ;;  %v1370_v36 = vld [vmem:[%s1792_s3 + $0x80] ss:$8 sps:$4 sm:$0xff]   ;;  %v1373_v37 = vld [vmem:[%s1793_s5 + $0x78] sm:$0xff]  }
  0x24   :  { %544 = vmatpush1.bf16.msra.mxu1 %v1280_v38  ;;  %403 = vmatprep.subr.bf16.mxu0 %v1285_v39  ;;  %v1374_v38 = vld [vmem:[%s1793_s5 + $0x38] sm:$0xff]   ;;  %v1375_v39 = vld [vmem:[%s1793_s5 + $0x70] sm:$0xff]  }
  0x25   :  { %545 = vmatprep.subr.bf16.mxu1 %v1288_v40  ;;  %433 = vmatprep.mubr.bf16.mxu0 %v1393_v1  ;;  %v1376_v40 = vld [vmem:[%s1793_s5 + $0x30] sm:$0xff]  }
  0x26   :  { %575 = vmatprep.mubr.bf16.mxu1 %v1393_v1  ;;  %v1319_v1 = vld [vmem:[%s1790_s1 + $0x100] ss:$8 sps:$4 sm:$0xff]  }
  0x27   :  { %404 = vmatpush1.bf16.msra.mxu0 %v1283_v41  ;;  %v1377_v41 = vld [vmem:[%s1793_s5 + $0x68] sm:$0xff]  }
  0x28   :  { %546 = vmatpush1.bf16.msra.mxu1 %v1286_v42  ;;  %405 = vmatprep.subr.bf16.mxu0 %v1291_v43  ;;  %v1378_v42 = vld [vmem:[%s1793_s5 + $0x28] sm:$0xff]   ;;  %v1379_v43 = vld [vmem:[%s1793_s5 + $0x60] sm:$0xff]  }
  0x29   :  { %547 = vmatprep.subr.bf16.mxu1 %v1294_v44  ;;  %v1380_v44 = vld [vmem:[%s1793_s5 + $0x20] sm:$0xff]  }
  0x2b   :  { %406 = vmatpush1.bf16.msra.mxu0 %v1289_v45  ;;  %v1381_v45 = vld [vmem:[%s1793_s5 + $0x58] sm:$0xff]  }
  0x2c   :  { %548 = vmatpush1.bf16.msra.mxu1 %v1292_v46  ;;  %407 = vmatprep.subr.bf16.mxu0 %v1297_v47  ;;  %v1382_v46 = vld [vmem:[%s1793_s5 + $0x18] sm:$0xff]   ;;  %v1383_v47 = vld [vmem:[%s1793_s5 + $0x50] sm:$0xff]  }
  0x2d   :  { %549 = vmatprep.subr.bf16.mxu1 %v1300_v48  ;;  %v1384_v48 = vld [vmem:[%s1793_s5 + $0x10] sm:$0xff]  }
  0x2f   :  { %408 = vmatpush1.bf16.msra.mxu0 %v1295_v49 }
  0x30   :  { %550 = vmatpush1.bf16.msra.mxu1 %v1298_v50  ;;  %409 = vmatprep.subr.bf16.mxu0 %v1303_v51 }
  0x31   :  { %551 = vmatprep.subr.bf16.mxu1 %v1306_v52 }
  0x33   :  { %410 = vmatpush1.bf16.msra.mxu0 %v1301_v53 }
  0x34   :  { %552 = vmatpush1.bf16.msra.mxu1 %v1304_v54  ;;  %411 = vmatprep.subr.bf16.mxu0 %v1309_v55 }
  0x35   :  { %553 = vmatprep.subr.bf16.mxu1 %v1312_v56 }
  0x37   :  { %412 = vmatpush1.bf16.msra.mxu0 %v1307_v57  ;;  %v588_v57 = vlaneseq }
  0x38   :  { %554 = vmatpush1.bf16.msra.mxu1 %v1310_v58  ;;  %413 = vmatprep.subr.bf16.mxu0 %v1315_v59 }
  0x39   :  { %555 = vmatprep.subr.bf16.mxu1 %v1318_v60  ;;  %v589_v58 = vshrl.u32 %v588_v57, 7  ;;  %v586_v60 = vld [vmem:[%s1794_s2] sm:$0x3] }
  0x3b   :  { %414 = vmatpush1.bf16.msra.mxu0 %v1313_v61  ;;  %v590_v59 = vsub.s32 0, %v589_v58 }
  0x3c   :  { %556 = vmatpush1.bf16.msra.mxu1 %v1316_v62  ;;  %415 = vmatprep.subr.bf16.mxu0 %v1321_v63  ;;  %v594_v62 = vsub.s32 1, %v589_v58 }
  0x3d   :  { %557 = vmatprep.subr.bf16.mxu1 %v1324_v0 }
  0x3f   :  { %416 = vmatpush1.bf16.msra.mxu0 %v1319_v1 }
  0x40   :  { %558 = vmatpush1.bf16.msra.mxu1 %v1322_v2  ;;  %824 = vmatprep.subr.bf16.mxu0 %v1327_v6 }
  0x41   :  { %1206 = vmatprep.subr.bf16.mxu1 %v1373_v37  ;;  %v1386_v37 = vld [vmem:[%s1793_s5 + $0x8] sm:$0xff]  }
  0x42   :  { %434 = vmatmul.mubr.bf16.vlgmr.msra.gmra.mxu0 %v1092_v3  ;;  %v591_v3 = vrot.slane %v586_v60, %v590_v59 }
  0x43   :  { %576 = vmatmul.mubr.bf16.vlgmr.msra.gmra.mxu1 %v1125_v4  ;;  %825 = vmatpush1.bf16.msra.mxu0 %v1325_v5 }
  0x44   :  { %826 = vmatprep.subr.bf16.mxu0 %v1330_v7  ;;  %1207 = vmatpush3.bf16.msra.mxu1 %v1374_v38  ;;  %v1387_v38 = vld [vmem:[%s1793_s5 + $0x40] sm:$0xff]  }
  0x45   :  { %1208 = vmatprep.subr.bf16.mxu1 %v1375_v39  ;;  %v1388_v39 = vld [vmem:[%s1793_s5] sm:$0xff]  }
  0x47   :  { %827 = vmatpush1.bf16.msra.mxu0 %v1328_v8  ;;  %v595_v8 = vrot.slane %v586_v60, %v594_v62 }
  0x48   :  { %828 = vmatprep.subr.bf16.mxu0 %v1333_v9  ;;  %1209 = vmatpush3.bf16.msra.mxu1 %v1376_v40  ;;  %v652_v40 = vld [vmem:[%s1795_s4] sm:$0x3] }
  0x49   :  { %1210 = vmatprep.subr.bf16.mxu1 %v1377_v41  ;;  %v657_v41 = vrot.slane %v652_v40, %v590_v59 }
  0x4b   :  { %829 = vmatpush1.bf16.msra.mxu0 %v1331_v10 }
  0x4c   :  { %830 = vmatprep.subr.bf16.mxu0 %v1336_v11  ;;  %1211 = vmatpush3.bf16.msra.mxu1 %v1378_v42  ;;  %v661_v42 = vrot.slane %v652_v40, %v594_v62 }
  0x4d   :  { %1212 = vmatprep.subr.bf16.mxu1 %v1379_v43 }
  0x4f   :  { %831 = vmatpush1.bf16.msra.mxu0 %v1334_v12 }
  0x50   :  { %832 = vmatprep.subr.bf16.mxu0 %v1339_v13  ;;  %1213 = vmatpush3.bf16.msra.mxu1 %v1380_v44 }
  0x51   :  { %1214 = vmatprep.subr.bf16.mxu1 %v1381_v45 }
  0x53   :  { %833 = vmatpush1.bf16.msra.mxu0 %v1337_v14 }
  0x54   :  { %834 = vmatprep.subr.bf16.mxu0 %v1342_v15  ;;  %1215 = vmatpush3.bf16.msra.mxu1 %v1382_v46 }
  0x55   :  { %1216 = vmatprep.subr.bf16.mxu1 %v1383_v47 }
  0x57   :  { %835 = vmatpush1.bf16.msra.mxu0 %v1340_v16 }
  0x58   :  { %836 = vmatprep.subr.bf16.mxu0 %v1345_v17  ;;  %1217 = vmatpush3.bf16.msra.mxu1 %v1384_v48 }
  0x5b   :  { %837 = vmatpush1.bf16.msra.mxu0 %v1343_v18 }
  0x5c   :  { %838 = vmatprep.subr.bf16.mxu0 %v1348_v19 }
  0x5f   :  { %839 = vmatpush1.bf16.msra.mxu0 %v1346_v20 }
  0x60   :  { %840 = vmatprep.subr.bf16.mxu0 %v1351_v21 }
  0x63   :  { %841 = vmatpush2.bf16.msra.mxu0 %v1349_v22 }
  0x64   :  { %842 = vmatprep.subr.bf16.mxu0 %v1354_v23 }
  0x67   :  { %843 = vmatpush2.bf16.msra.mxu0 %v1352_v24 }
  0x68   :  { %844 = vmatprep.subr.bf16.mxu0 %v1357_v25 }
  0x6b   :  { %845 = vmatpush2.bf16.msra.mxu0 %v1355_v26 }
  0x6c   :  { %846 = vmatprep.subr.bf16.mxu0 %v1360_v27 }
  0x6f   :  { %847 = vmatpush2.bf16.msra.mxu0 %v1358_v28 }
  0x70   :  { %848 = vmatprep.subr.bf16.mxu0 %v1363_v29 }
  0x73   :  { %849 = vmatpush2.bf16.msra.mxu0 %v1361_v30 }
  0x74   :  { %850 = vmatprep.subr.bf16.mxu0 %v1366_v31 }
  0x77   :  { %851 = vmatpush2.bf16.msra.mxu0 %v1364_v32 }
  0x78   :  { %852 = vmatprep.subr.bf16.mxu0 %v1369_v33 }
  0x7b   :  { %853 = vmatpush2.bf16.msra.mxu0 %v1367_v34 }
  0x7c   :  { %854 = vmatprep.subr.bf16.mxu0 %v1372_v35 }
  0x7f   :  { %855 = vmatpush2.bf16.msra.mxu0 %v1370_v36  ;;  %v1385_v36 = vld [vmem:[%s1793_s5 + $0x48] sm:$0xff]  }
  0x80   :  { %1218 = vmatprep.subr.bf16.mxu1 %v1385_v36 }
  0x81   :  { %1219 = vmatpush3.bf16.msra.mxu1 %v1386_v37 }
  0x82   :  { %1220 = vmatprep.subr.bf16.mxu1 %v1387_v38 }
  0x85   :  { %1221 = vmatpush3.bf16.msra.mxu1 %v1388_v39 }
  0xe2   :  { %v174_v49 = vpop.f32.mrf.mxu0 }
  0xe3   :  { %v295_v50 = vpop.f32.mrf.mxu1 }
  0xe4   :  { %v176_v51 = vpop.f32.mrf.mxu0  ;;  %v296_v61 = vadd.f32 %v295_v50, %v174_v49 }
  0xe5   :  { %v297_v52 = vpop.f32.mrf.mxu1 }
  0xe6   :  { %v178_v53 = vpop.f32.mrf.mxu0  ;;  %v298_v1 = vadd.f32 %v297_v52, %v176_v51 }
  0xe7   :  { %v299_v54 = vpop.f32.mrf.mxu1 }
  0xe8   :  { %v179_v55 = vpop.f32.mrf.mxu0 }
  0xe9   :  { %v300_v56 = vpop.f32.mrf.mxu1 }
 0x102   :  { %v435_v63 = vpop.f32.mrf.mxu0 }
 0x103   :  { %v577_v0 = vpop.f32.mrf.mxu1  ;;  %v442_v2 = vadd.f32 %v435_v63, %v296_v61 }
 0x104   :  { %v437_v4 = vpop.f32.mrf.mxu0 }
 0x105   :  { %v579_v5 = vpop.f32.mrf.mxu1  ;;  %v584_v6 = vadd.f32 %v577_v0, %v442_v2  ;;  %v443_v7 = vadd.f32 %v437_v4, %v298_v1 }
 0x106   :  { %v439_v9 = vpop.f32.mrf.mxu0 }
 0x107   :  { %v581_v10 = vpop.f32.mrf.mxu1  ;;  %v598_v11 = vadd.f32 %v591_v3, %v584_v6  ;;  %v585_v12 = vadd.f32 %v579_v5, %v443_v7 }
 0x108   :  { %v440_v13 = vpop.f32.mrf.mxu0 }
 0x109   :  { %v582_v14 = vpop.f32.mrf.mxu1  ;;  %v602_v15 = vmul.f32 %v598_v11, %v598_v11  ;;  %v599_v16 = vadd.f32 %v595_v8, %v585_v12  ;;  %v600_v29 = vmul.f32 0.5, %v598_v11 }
 0x10b   :  { %v604_v17 = vmul.f32 %v602_v15, %v598_v11  ;;  %v603_v18 = vmul.f32 %v599_v16, %v599_v16  ;;  %v601_v30 = vmul.f32 0.5, %v599_v16 }
 0x10d   :  { %v606_v19 = vmul.f32 0.044715, %v604_v17  ;;  %v605_v20 = vmul.f32 %v603_v18, %v599_v16 }
 0x10f   :  { %v608_v21 = vadd.f32 %v606_v19, %v598_v11  ;;  %v607_v22 = vmul.f32 0.044715, %v605_v20 }
 0x111   :  { %v610_v23 = vmul.f32 0.7978846, %v608_v21  ;;  %v609_v24 = vadd.f32 %v607_v22, %v599_v16 }
 0x113   :  { %1389 = vtanh.f32 %v610_v23  ;;  %v611_v25 = vmul.f32 0.7978846, %v609_v24 }
 0x115   :  { %1391 = vtanh.f32 %v611_v25 }
 0x120   :  { %v1390_v26 = vpop.eup %1389 }
 0x121   :  { %v614_v27 = vadd.f32 1.0, %v1390_v26 }
 0x122   :  { %v1392_v28 = vpop.eup %1391 }
 0x123   :  { %v615_v31 = vadd.f32 1.0, %v1392_v28  ;;  %v616_v32 = vmul.f32 %v614_v27, %v600_v29 }
 0x125   :  { %v617_v33 = vmul.f32 %v615_v31, %v601_v30  ;;  %v618_v35 = vpack.c.bf16 %v616_v32, %v616_v32 }
 0x127   :  { %v619_v34 = vpack.c.bf16 %v617_v33, %v617_v33 }
 0x129   :  { %856 = vmatprep.mubr.bf16.mxu0 %v619_v34 }
 0x12a   :  { %857 = vmatmul.mubr.bf16.vlgmr.msra.gmra.mxu0 %v618_v35 }
 0x1ea   :  { %v858_v43 = vpop.f32.mrf.mxu0 }
 0x1eb   :  { %v859_v44 = vadd.f32 %v858_v43, %v657_v41 }
 0x1ec   :  { %v860_v45 = vpop.f32.mrf.mxu0 }
 0x1ed   :  { %v861_v46 = vadd.f32 %v860_v45, %v661_v42  ;;  %v865_v47 = vmax.f32 %v859_v44, 0.0 }
 0x1ee   :  { %v862_v48 = vpop.f32.mrf.mxu0 }
 0x1ef   :  { %v866_v49 = vmax.f32 %v861_v46, 0.0  ;;  %v867_v52 = vpack.c.bf16 %v865_v47, %v865_v47 }
 0x1f0   :  { %v863_v50 = vpop.f32.mrf.mxu0 }
 0x1f1   :  { %v868_v51 = vpack.c.bf16 %v866_v49, %v866_v49 }
 0x1f3   :  { %1029 = vmatprep.mubr.bf16.mxu1 %v868_v51 }
 0x1f4   :  { %1030 = vmatmul.mubr.bf16.vlgmr.msra.gmra.mxu1 %v867_v52 }
 0x2b4   :  { %v1222_v53 = vpop.f32.mrf.mxu1 }
 0x2b6   :  { %v1223_v54 = vpop.f32.mrf.mxu1 }
 0x2b7   :  { %v1224_v55 = vadd.f32 %v1223_v54, %v1222_v53 }
 0x2b8   :  { %v1225_v56 = vpop.f32.mrf.mxu1 }
 0x2b9   :  { %v1037_v57 = vpack.c.bf16 %v1224_v55, %v1224_v55 }
 0x2ba   :  { %v1226_v58 = vpop.f32.mrf.mxu1 }
 0x2bb   :  { %1038 = vst [vmem:[%s1796_s6] sm:$0x1] %v1037_v57 }

// kernel: net_forward.13
= control target key start
LH: loop header
LB: loop body
LE: loop exit
PB: predicated region body
PF: predicated region fallthrough
CT: control target
= control target key end

     0   :  { %s755_s18 = smov 0   ;;  %s757_s19 = smov 0   ;;  %s850_s0 = inlined_call_operand.vmem [shape: bf16[2,128], index: 0, kind: input, shape index: {}]   ;;  %s851_s1 = inlined_call_operand.vmem [shape: bf16[4,2,128], index: 1, kind: input, shape index: {}]   ;;  %s852_s2 = inlined_call_operand.vmem [shape: bf16[128,128], index: 2, kind: input, shape index: {}]   ;;  %s853_s3 = inlined_call_operand.vmem [shape: f32[1,128], index: 3, kind: input, shape index: {}]   ;;  %s854_s4 = inlined_call_operand.vmem [shape: bf16[128,64], index: 4, kind: input, shape index: {}]   ;;  %s855_s5 = inlined_call_operand.vmem [shape: bf16[4,2,64], index: 5, kind: output, shape index: {}]  }
   0x1   :  { %s759_s20 = smov 0  }
   0x2 LB: > { %s24_s21 = sadd.s32 1, %s717_s19  ;;  %p577_p0 = scmp.ge.s32.totalorder %s721_s20, 1  ;;  %s721_s20 = sphi %s759_s20, %s15_s20   ;;  %s717_s19 = sphi %s757_s19, %s857_s19   ;;  %s713_s18 = sphi %s755_s18, %s856_s18  }
   0x3   : > { %p25_p1 = scmp.ge.s32.totalorder %s24_s21, 4  ;;  %p212_p2 = scmp.lt.s32.totalorder %s721_s20, 5 }
   0x5   : > { %s859_s21 = smov (%p25_p1, %s24_s21), 0  ;;  %p213_p3 = pnand %p577_p0, %p212_p2 }
   0x6   : > { %p248_p4 = scmp.lt.s32.totalorder (!%p213_p3), %s713_s18, 3 }
   0x7   : > { %216 = sbr.rel (%p213_p3) target bundleno = 471 (0x1d7), region = 40 }
   0xc   : > { %v681_v0 = vld [vmem:[%s852_s2 + $0x38] sm:$0xff]   ;;  %v723_v1 = vmov 0.0   ;;  %v682_v2 = vld [vmem:[%s852_s2 + $0x30] sm:$0xff]   ;;  %vm724_vm0 = vmmov 0   ;;  %v683_v3 = vld [vmem:[%s852_s2 + $0x28] sm:$0xff]   ;;  %s861_s18 = smov (!%p248_p4, %s713_s18), 3 }
   0xd   : > { %615 = vmatprep.subr.bf16.mxu0 %v723_v1  ;;  %635 = vmatprep.subr.bf16.mxu1 %v723_v1  ;;  %v684_v4 = vld [vmem:[%s852_s2 + $0x20] sm:$0xff]   ;;  %v685_v5 = vld [vmem:[%s852_s2 + $0x18] sm:$0xff]   ;;  %v686_v6 = vld [vmem:[%s852_s2 + $0x10] sm:$0xff]   ;;  %s253_s15 = scalar_lea.vmem %s851_s1, %s861_s18  ;;  %s259_s17 = scalar_lea.vmem %s855_s5, %s861_s18  ;;  %vm492_vm1 = vcmask 516096  }
   0xe   : > { %616 = vmatpush3.bf16.msra.mxu0 %v681_v0  ;;  %631 = vmatprep.mubr.msk.bf16.mxu0 %vm724_vm0, %v723_v1  ;;  %v687_v7 = vld [vmem:[%s852_s2 + $0x8] sm:$0xff]   ;;  %v688_v8 = vld [vmem:[%s852_s2] sm:$0xff]   ;;  %v689_v10 = vld [vmem:[%s854_s4 + $0x38] sm:$0xff]  }
   0xf   : > { %617 = vmatprep.subr.bf16.mxu0 %v723_v1  ;;  %651 = vmatprep.mubr.msk.bf16.mxu1 %vm724_vm0, %v723_v1  ;;  %v263_v9 = vld [vmem:[%s253_s15] sm:$0x1]  ;;  %v690_v11 = vld [vmem:[%s854_s4 + $0x30] sm:$0xff]   ;;  %v691_v12 = vld [vmem:[%s854_s4 + $0x28] sm:$0xff]  }
  0x10   : > { %636 = vmatpush3.bf16.msra.mxu1 %v689_v10  ;;  %v692_v13 = vld [vmem:[%s854_s4 + $0x20] sm:$0xff]   ;;  %v693_v14 = vld [vmem:[%s854_s4 + $0x18] sm:$0xff]   ;;  %v694_v15 = vld [vmem:[%s854_s4 + $0x10] sm:$0xff]  }
  0x11   : > { %637 = vmatprep.subr.bf16.mxu1 %v723_v1  ;;  %v695_v16 = vld [vmem:[%s854_s4 + $0x8] sm:$0xff]   ;;  %v696_v17 = vld [vmem:[%s854_s4] sm:$0xff]  }
  0x12   : > { %618 = vmatpush3.bf16.msra.mxu0 %v682_v2  ;;  %v261_v18 = vld [vmem:[%s850_s0] sm:$0x1] }
  0x13   : > { %619 = vmatprep.subr.bf16.mxu0 %v723_v1  ;;  %v262_v19 = vunpack.c.l.bf16 %v261_v18  ;;  %v586_v21 = vld [vmem:[%s853_s3] ss:$0 sm:$0xff] }
  0x14   : > { %638 = vmatpush3.bf16.msra.mxu1 %v690_v11 }
  0x15   : > { %639 = vmatprep.subr.bf16.mxu1 %v723_v1 }
  0x16   : > { %620 = vmatpush3.bf16.msra.mxu0 %v683_v3 }
  0x17   : > { %621 = vmatprep.subr.bf16.mxu0 %v723_v1 }
  0x18   : > { %640 = vmatpush3.bf16.msra.mxu1 %v691_v12 }
  0x19   : > { %641 = vmatprep.subr.bf16.mxu1 %v723_v1 }
  0x1a   : > { %622 = vmatpush3.bf16.msra.mxu0 %v684_v4 }
  0x1b   : > { %623 = vmatprep.subr.bf16.mxu0 %v723_v1 }
  0x1c   : > { %642 = vmatpush3.bf16.msra.mxu1 %v692_v13 }
  0x1d   : > { %643 = vmatprep.subr.bf16.mxu1 %v723_v1 }
  0x1e   : > { %624 = vmatpush3.bf16.msra.mxu0 %v685_v5 }
  0x1f   : > { %625 = vmatprep.subr.bf16.mxu0 %v723_v1 }
  0x20   : > { %644 = vmatpush3.bf16.msra.mxu1 %v693_v14 }
  0x21   : > { %645 = vmatprep.subr.bf16.mxu1 %v723_v1 }
  0x22   : > { %626 = vmatpush3.bf16.msra.mxu0 %v686_v6 }
  0x23   : > { %627 = vmatprep.subr.bf16.mxu0 %v723_v1 }
  0x24   : > { %646 = vmatpush3.bf16.msra.mxu1 %v694_v15 }
  0x25   : > { %647 = vmatprep.subr.bf16.mxu1 %v723_v1 }
  0x26   : > { %628 = vmatpush3.bf16.msra.mxu0 %v687_v7 }
  0x27   : > { %629 = vmatprep.subr.bf16.mxu0 %v723_v1 }
  0x28   : > { %648 = vmatpush3.bf16.msra.mxu1 %v695_v16 }
  0x29   : > { %649 = vmatprep.subr.bf16.mxu1 %v723_v1 }
  0x2a   : > { %630 = vmatpush3.bf16.msra.mxu0 %v688_v8 }
  0x2c   : > { %650 = vmatpush3.bf16.msra.mxu1 %v696_v17 }
  0x2d   : > { %632 = vmatmul.mubr.bf16.vlgmr.msra.gmra.mxu0 %v263_v9 }
  0xed   : > { %v362_v20 = vpop.f32.mrf.mxu0 }
  0xee   : > { %v368_v22 = vadd.f32 %v362_v20, %v262_v19 }
  0xef   : > { %v633_v23 = vpop.f32.mrf.mxu0 }
  0xf0   : > { %v376_v24 = vadd.f32 %v586_v21, %v368_v22 }
  0xf1   : > { %v365_v25 = vpop.f32.mrf.mxu0 }
  0xf2   : > { %v378_v26 = vmul.f32 %v376_v24, %v376_v24  ;;  %v377_v33 = vmul.f32 0.5, %v376_v24 }
  0xf3   : > { %v634_v27 = vpop.f32.mrf.mxu0 }
  0xf4   : > { %v379_v28 = vmul.f32 %v378_v26, %v376_v24 }
  0xf6   : > { %v380_v29 = vmul.f32 0.044715, %v379_v28 }
  0xf8   : > { %v381_v30 = vadd.f32 %v380_v29, %v376_v24 }
  0xfa   : > { %v382_v31 = vmul.f32 0.7978846, %v381_v30 }
  0xfc   : > { %697 = vtanh.f32 %v382_v31 }
 0x109   : > { %v698_v32 = vpop.eup %697 }
 0x10a   : > { %v384_v34 = vadd.f32 1.0, %v698_v32 }
 0x10c   : > { %v385_v35 = vmul.f32 %v384_v34, %v377_v33 }
 0x10e   : > { %v386_v36 = vpack.c.bf16 %v385_v35, %v385_v35 }
 0x110   : > { %652 = vmatmul.mubr.bf16.vlgmr.msra.gmra.mxu1 %v386_v36 }
 0x1d0   : > { %v485_v37 = vpop.f32.mrf.mxu1 }
 0x1d1   : > { %v491_v38 = vpack.c.bf16 %v485_v37, %v485_v37 }
 0x1d2   : > { %v653_v39 = vpop.f32.mrf.mxu1 }
 0x1d3   : > { %493 = vst.msk [vmem:[%s259_s17] sm:$0x1] %vm492_vm1, %v491_v38 }
 0x1d4   : > { %v488_v40 = vpop.f32.mrf.mxu1 }
 0x1d6   : > { %v654_v41 = vpop.f32.mrf.mxu1 }
 0x1d7 PF: > { %s15_s20 = sadd.s32 1, %s721_s20   ;;  %s856_s18 = smov %s717_s19 }
 0x1d8   : > { %p12_p5 = scmp.ge.s32.totalorder %s15_s20, 6   ;;  %s857_s19 = smov %s859_s21 }
 0x1da   :  { %14 = sbr.rel (!%p12_p5) target bundleno = 2 (0x2), region = 73 }

// kernel: net_forward.14
= control target key start
LH: loop header
LB: loop body
LE: loop exit
PB: predicated region body
PF: predicated region fallthrough
CT: control target
= control target key end

     0   :  { %s672_s18 = smov 0   ;;  %s674_s19 = smov 0   ;;  %s744_s0 = inlined_call_operand.vmem [shape: bf16[8,64], index: 0, kind: input, shape index: {}]   ;;  %s745_s1 = inlined_call_operand.vmem [shape: bf16[4,8,64], index: 1, kind: input, shape index: {}]   ;;  %s746_s2 = inlined_call_operand.vmem [shape: bf16[64,64], index: 2, kind: input, shape index: {}]   ;;  %s747_s3 = inlined_call_operand.vmem [shape: f32[1,64], index: 3, kind: input, shape index: {}]   ;;  %s748_s4 = inlined_call_operand.vmem [shape: bf16[64,32], index: 4, kind: input, shape index: {}]   ;;  %s749_s5 = inlined_call_operand.vmem [shape: bf16[32,32], index: 5, kind: output, shape index: {}]  }
   0x1   :  { %s676_s20 = smov 0  }
   0x2 LB: > { %s24_s21 = sadd.s32 1, %s634_s19  ;;  %p530_p0 = scmp.ge.s32.totalorder %s638_s20, 1  ;;  %s638_s20 = sphi %s676_s20, %s15_s20   ;;  %s634_s19 = sphi %s674_s19, %s751_s19   ;;  %s630_s18 = sphi %s672_s18, %s750_s18  }
   0x3   : > { %p25_p1 = scmp.ge.s32.totalorder %s24_s21, 4  ;;  %p214_p2 = scmp.lt.s32.totalorder %s638_s20, 5 }
   0x5   : > { %s753_s21 = smov (%p25_p1, %s24_s21), 0  ;;  %p215_p3 = pnand %p530_p0, %p214_p2 }
   0x6   : > { %p252_p4 = scmp.lt.s32.totalorder (!%p215_p3), %s630_s18, 3 }
   0x7   : > { %218 = sbr.rel (%p215_p3) target bundleno = 455 (0x1c7), region = 40 }
   0xc   : > { %v606_v0 = vld [vmem:[%s746_s2 + $0x18] sm:$0xff]   ;;  %v640_v1 = vmov 0.0   ;;  %v607_v2 = vld [vmem:[%s746_s2 + $0x10] sm:$0xff]   ;;  %vm641_vm0 = vmmov 0   ;;  %s755_s18 = smov (!%p252_p4, %s630_s18), 3  ;;  %v608_v3 = vld [vmem:[%s746_s2 + $0x8] sm:$0xff]  }
   0xd   : > { %556 = vmatprep.subr.bf16.mxu0 %v640_v1  ;;  %568 = vmatprep.subr.bf16.mxu1 %v640_v1  ;;  %s531_s28 = sshll.u32 %s755_s18, 2  ;;  %v609_v4 = vld [vmem:[%s746_s2] sm:$0xff]   ;;  %vm301_vm1 = vcmask 523264   ;;  %v610_v6 = vld [vmem:[%s748_s4 + $0x18] sm:$0xff]   ;;  %v611_v7 = vld [vmem:[%s748_s4 + $0x10] sm:$0xff]   ;;  %vm440_vm2 = vcmask 257024  }
   0xe   : > { %557 = vmatpush3.bf16.msra.mxu0 %v606_v0  ;;  %564 = vmatprep.mubr.msk.bf16.mxu0 %vm641_vm0, %v640_v1  ;;  %s258_s8 = scalar_lea.vmem %s745_s1, %s531_s28  ;;  %v612_v8 = vld [vmem:[%s748_s4 + $0x8] sm:$0xff]   ;;  %v613_v9 = vld [vmem:[%s748_s4] sm:$0xff]   ;;  %s263_s27 = scalar_lea.vmem %s749_s5, %s531_s28 }
   0xf   : > { %558 = vmatprep.subr.bf16.mxu0 %v640_v1  ;;  %576 = vmatprep.mubr.msk.bf16.mxu1 %vm641_vm0, %v640_v1  ;;  %v268_v5 = vld [vmem:[%s258_s8] sm:$0xf] }
  0x10   : > { %569 = vmatpush3.bf16.msra.mxu1 %v610_v6  ;;  %v266_v10 = vld [vmem:[%s744_s0] sm:$0xf] }
  0x11   : > { %570 = vmatprep.subr.bf16.mxu1 %v640_v1  ;;  %v267_v11 = vunpack.c.l.bf16 %v266_v10  ;;  %v538_v13 = vld [vmem:[%s747_s3] ss:$0 sm:$0xff] }
  0x12   : > { %559 = vmatpush3.bf16.msra.mxu0 %v607_v2 }
  0x13   : > { %560 = vmatprep.subr.bf16.mxu0 %v640_v1 }
  0x14   : > { %571 = vmatpush3.bf16.msra.mxu1 %v611_v7 }
  0x15   : > { %572 = vmatprep.subr.bf16.mxu1 %v640_v1 }
  0x16   : > { %561 = vmatpush3.bf16.msra.mxu0 %v608_v3 }
  0x17   : > { %562 = vmatprep.subr.bf16.mxu0 %v640_v1 }
  0x18   : > { %573 = vmatpush3.bf16.msra.mxu1 %v612_v8 }
  0x19   : > { %574 = vmatprep.subr.bf16.mxu1 %v640_v1 }
  0x1a   : > { %563 = vmatpush3.bf16.msra.mxu0 %v609_v4 }
  0x1c   : > { %575 = vmatpush3.bf16.msra.mxu1 %v613_v9 }
  0x1d   : > { %565 = vmatmul.mubr.msk.bf16.vlgmr.msra.gmra.mxu0 %vm301_vm1, %v268_v5 }
  0xdd   : > { %v339_v12 = vpop.f32.mrf.mxu0 }
  0xde   : > { %v345_v14 = vadd.f32 %v339_v12, %v267_v11 }
  0xdf   : > { %v566_v15 = vpop.f32.mrf.mxu0 }
  0xe0   : > { %v353_v16 = vadd.f32 %v538_v13, %v345_v14 }
  0xe1   : > { %v342_v17 = vpop.f32.mrf.mxu0 }
  0xe2   : > { %v355_v18 = vmul.f32 %v353_v16, %v353_v16  ;;  %v354_v25 = vmul.f32 0.5, %v353_v16 }
  0xe3   : > { %v567_v19 = vpop.f32.mrf.mxu0 }
  0xe4   : > { %v356_v20 = vmul.f32 %v355_v18, %v353_v16 }
  0xe6   : > { %v357_v21 = vmul.f32 0.044715, %v356_v20 }
  0xe8   : > { %v358_v22 = vadd.f32 %v357_v21, %v353_v16 }
  0xea   : > { %v359_v23 = vmul.f32 0.7978846, %v358_v22 }
  0xec   : > { %614 = vtanh.f32 %v359_v23 }
  0xf9   : > { %v615_v24 = vpop.eup %614 }
  0xfa   : > { %v361_v26 = vadd.f32 1.0, %v615_v24 }
  0xfc   : > { %v362_v27 = vmul.f32 %v361_v26, %v354_v25 }
  0xfe   : > { %v363_v28 = vpack.c.bf16 %v362_v27, %v362_v27 }
 0x100   : > { %577 = vmatmul.mubr.msk.bf16.vlgmr.msra.gmra.mxu1 %vm301_vm1, %v363_v28 }
 0x1c0   : > { %v433_v29 = vpop.f32.mrf.mxu1 }
 0x1c1   : > { %v439_v30 = vpack.c.bf16 %v433_v29, %v433_v29 }
 0x1c2   : > { %v578_v31 = vpop.f32.mrf.mxu1 }
 0x1c3   : > { %441 = vst.msk [vmem:[%s263_s27] sm:$0xf] %vm440_vm2, %v439_v30 }
 0x1c4   : > { %v436_v32 = vpop.f32.mrf.mxu1 }
 0x1c6   : > { %v579_v33 = vpop.f32.mrf.mxu1 }
 0x1c7 PF: > { %s15_s20 = sadd.s32 1, %s638_s20   ;;  %s750_s18 = smov %s634_s19 }
 0x1c8   : > { %p12_p5 = scmp.ge.s32.totalorder %s15_s20, 6   ;;  %s751_s19 = smov %s753_s21 }
 0x1ca   :  { %14 = sbr.rel (!%p12_p5) target bundleno = 2 (0x2), region = 73 }

// kernel: net_forward.15
= control target key start
LH: loop header
LB: loop body
LE: loop exit
PB: predicated region body
PF: predicated region fallthrough
CT: control target
= control target key end

     0   :  { %s991_s29 = smov 0   ;;  %s993_s30 = smov 0   ;;  %s1064_s0 = inlined_call_operand.vmem [shape: bf16[32,32], index: 0, kind: input, shape index: {}]   ;;  %s1065_s1 = inlined_call_operand.vmem [shape: bf16[4,32,32], index: 1, kind: input, shape index: {}]   ;;  %s1066_s2 = inlined_call_operand.vmem [shape: bf16[32,32], index: 2, kind: input, shape index: {}]   ;;  %s1067_s3 = inlined_call_operand.vmem [shape: f32[1,32], index: 3, kind: input, shape index: {}]   ;;  %s1068_s4 = inlined_call_operand.vmem [shape: bf16[32,32], index: 4, kind: input, shape index: {}]   ;;  %s1069_s5 = inlined_call_operand.vmem [shape: f32[1,32], index: 5, kind: input, shape index: {}]   ;;  %s1070_s6 = inlined_call_operand.<no memory space> [shape: f32[1,1], index: 6, kind: input, shape index: {}]   ;;  %s1071_s7 = inlined_call_operand.vmem [shape: bf16[128,32], index: 7, kind: output, shape index: {0}]   ;;  %s1072_s8 = inlined_call_operand.vmem [shape: bf16[128,1], index: 8, kind: output, shape index: {1}]  }
   0x1   :  { %v14_v0 = vstv %s1070_s6  ;;  %s995_s9 = smov 0  }
   0x2   :  { %15 = vst [vmem:[#allocation2] sm:$0x1] %v14_v0 }
   0x3 LB: > { %s30_s6 = sadd.s32 1, %s937_s30  ;;  %p809_p0 = scmp.ge.s32.totalorder %s941_s9, 1  ;;  %s941_s9 = sphi %s995_s9, %s21_s9   ;;  %s937_s30 = sphi %s993_s30, %s1074_s30   ;;  %s933_s29 = sphi %s991_s29, %s1073_s29  }
   0x4   : > { %p31_p1 = scmp.ge.s32.totalorder %s30_s6, 4  ;;  %p301_p2 = scmp.lt.s32.totalorder %s941_s9, 5 }
   0x6   : > { %s1076_s6 = smov (%p31_p1, %s30_s6), 0  ;;  %p302_p3 = pnand %p809_p0, %p301_p2 }
   0x7   : > { %p358_p4 = scmp.lt.s32.totalorder (!%p302_p3), %s933_s29, 3  ;;  %s812_s12 = sshll.u32 (!%p302_p3), %s933_s29, 2 }
   0x8   : > { %305 = sbr.rel (%p302_p3) target bundleno = 458 (0x1ca), region = 48  ;;  %p369_p5 = scmp.lt.s32.totalorder (!%p302_p3), %s812_s12, 15 }
   0xd   : > { %v905_v1 = vld [vmem:[%s1066_s2 + $0x8] sm:$0xff]   ;;  %v906_v2 = vld [vmem:[%s1066_s2] sm:$0xff]   ;;  %s359_s14 = scalar_select %p358_p4, %s933_s29, 3  ;;  %vm422_vm0 = vcmask 261120   ;;  %vm673_vm1 = vcmask 3072   ;;  %vm618_vm2 = vcmask 257024  }
   0xe   : > { %865 = vmatprep.subr.bf16.mxu0 %v905_v1  ;;  %v909_v5 = vld [vmem:[%s1068_s4 + $0x8] sm:$0xff]   ;;  %v910_v6 = vld [vmem:[%s1068_s4] sm:$0xff]   ;;  %s1078_s12 = smov (!%p369_p5, %s812_s12), 15 }
   0xf   : > { %866 = vmatpush3.bf16.msra.mxu0 %v905_v1  ;;  %s839_s15 = sshll.u32 %s359_s14, 4  ;;  %873 = vmatprep.subr.bf16.mxu1 %v909_v5  ;;  %v856_v7 = vld [vmem:[%s1064_s0 + $0x8] sm:$0xff]   ;;  %v849_v8 = vld [vmem:[%s1064_s0] sm:$0xff]   ;;  %s813_s13 = sshll.u32 %s1078_s12, 2 }
  0x10   : > { %867 = vmatprep.subr.bf16.mxu0 %v906_v2  ;;  %s365_s18 = scalar_lea.vmem %s1065_s1, %s839_s15  ;;  %874 = vmatpush3.bf16.msra.mxu1 %v909_v5  ;;  %v854_v9 = vunpack.c.l.bf16 %v856_v7  ;;  %v850_v10 = vunpack.c.l.bf16 %v849_v8  ;;  %v822_v12 = vld [vmem:[%s1067_s3] ss:$0 sm:$0xff]  ;;  %v855_v14 = vunpack.c.h.bf16 %v856_v7  ;;  %v851_v18 = vunpack.c.h.bf16 %v849_v8  ;;  %s380_s16 = scalar_lea.vmem %s1072_s8, %s813_s13 }
  0x11   : > { %v907_v3 = vld [vmem:[%s365_s18] sm:$0xff]   ;;  %v908_v4 = vld [vmem:[%s365_s18 + $0x8] sm:$0xff]   ;;  %875 = vmatprep.subr.bf16.mxu1 %v910_v6  ;;  %s372_s18 = scalar_lea.vmem %s1071_s7, %s813_s13 }
  0x12   : > { %869 = vmatprep.mubr.msk.bf16.mxu0 %vm422_vm0, %v907_v3  ;;  %v831_v50 = vld [vmem:[%s1069_s5] ss:$0 sm:$0xff] }
  0x13   : > { %868 = vmatpush3.bf16.msra.mxu0 %v906_v2 }
  0x14   : > { %876 = vmatpush3.bf16.msra.mxu1 %v910_v6 }
  0x16   : > { %870 = vmatmul.mubr.msk.bf16.vlgmr.msra.gmra.mxu0 %vm422_vm0, %v908_v4 }
  0xd6   : > { %v871_v11 = vpop.f32.mrf.mxu0 }
  0xd7   : > { %v480_v13 = vadd.f32 %v871_v11, %v854_v9  ;;  %v832_v9 = vld [vmem:[#allocation2] ss:$0 sm:$0xff] }
  0xd8   : > { %v463_v15 = vpop.f32.mrf.mxu0 }
  0xd9   : > { %v491_v16 = vadd.f32 %v822_v12, %v480_v13  ;;  %v478_v17 = vadd.f32 %v850_v10, %v463_v15 }
  0xda   : > { %v872_v19 = vpop.f32.mrf.mxu0 }
  0xdb   : > { %v499_v20 = vmul.f32 %v491_v16, %v491_v16  ;;  %v489_v21 = vadd.f32 %v822_v12, %v478_v17  ;;  %v481_v22 = vadd.f32 %v872_v19, %v855_v14  ;;  %v495_v47 = vmul.f32 0.5, %v491_v16 }
  0xdc   : > { %v466_v23 = vpop.f32.mrf.mxu0 }
  0xdd   : > { %v503_v24 = vmul.f32 %v499_v20, %v491_v16  ;;  %v497_v25 = vmul.f32 %v489_v21, %v489_v21  ;;  %v492_v26 = vadd.f32 %v822_v12, %v481_v22  ;;  %v479_v27 = vadd.f32 %v851_v18, %v466_v23 }
  0xde   : > { %v493_v52 = vmul.f32 0.5, %v489_v21 }
  0xdf   : > { %v507_v28 = vmul.f32 0.044715, %v503_v24  ;;  %v501_v29 = vmul.f32 %v497_v25, %v489_v21  ;;  %v500_v30 = vmul.f32 %v492_v26, %v492_v26  ;;  %v490_v31 = vadd.f32 %v822_v12, %v479_v27 }
  0xe0   : > { %v496_v57 = vmul.f32 0.5, %v492_v26 }
  0xe1   : > { %v505_v32 = vmul.f32 0.044715, %v501_v29  ;;  %v504_v33 = vmul.f32 %v500_v30, %v492_v26  ;;  %v498_v34 = vmul.f32 %v490_v31, %v490_v31  ;;  %v511_v35 = vadd.f32 %v507_v28, %v491_v16 }
  0xe2   : > { %v494_v60 = vmul.f32 0.5, %v490_v31 }
  0xe3   : > { %v508_v36 = vmul.f32 0.044715, %v504_v33  ;;  %v502_v37 = vmul.f32 %v498_v34, %v490_v31  ;;  %v515_v38 = vmul.f32 0.7978846, %v511_v35  ;;  %v509_v39 = vadd.f32 %v505_v32, %v489_v21 }
  0xe5   : > { %v512_v40 = vadd.f32 %v508_v36, %v492_v26  ;;  %v506_v41 = vmul.f32 0.044715, %v502_v37  ;;  %911 = vtanh.f32 %v515_v38  ;;  %v513_v42 = vmul.f32 0.7978846, %v509_v39 }
  0xe7   : > { %913 = vtanh.f32 %v513_v42  ;;  %v516_v43 = vmul.f32 0.7978846, %v512_v40  ;;  %v510_v44 = vadd.f32 %v506_v41, %v490_v31 }
  0xe9   : > { %915 = vtanh.f32 %v516_v43  ;;  %v514_v45 = vmul.f32 0.7978846, %v510_v44 }
  0xeb   : > { %917 = vtanh.f32 %v514_v45 }
  0xf2   : > { %v912_v46 = vpop.eup %911 }
  0xf3   : > { %v523_v48 = vadd.f32 1.0, %v912_v46 }
  0xf4   : > { %v914_v49 = vpop.eup %913 }
  0xf5   : > { %v527_v51 = vmul.f32 %v523_v48, %v495_v47  ;;  %v521_v53 = vadd.f32 1.0, %v914_v49 }
  0xf6   : > { %v916_v54 = vpop.eup %915 }
  0xf7   : > { %v632_v55 = vmul.f32 %v831_v50, %v527_v51  ;;  %v525_v56 = vmul.f32 %v521_v53, %v493_v52  ;;  %v524_v58 = vadd.f32 1.0, %v916_v54 }
  0xf8   : > { %v918_v59 = vpop.eup %917 }
  0xf9   : > { %v640_v61 = vsel %vm422_vm0, %v632_v55, 0.0  ;;  %v630_v62 = vmul.f32 %v831_v50, %v525_v56  ;;  %v528_v63 = vmul.f32 %v524_v58, %v496_v57  ;;  %v522_v0 = vadd.f32 1.0, %v918_v59 }
  0xfa   : > { %641 = vadd.xlane.f32.xlu1 %v640_v61 }
  0xfb   : > { %v634_v1 = vsel %vm422_vm0, %v630_v62, 0.0  ;;  %v633_v2 = vmul.f32 %v831_v50, %v528_v63  ;;  %v526_v3 = vmul.f32 %v522_v0, %v494_v60  ;;  %v530_v7 = vpack.c.bf16 %v528_v63, %v527_v51 }
  0xfc   : > { %635 = vadd.xlane.f32.xlu0 %v634_v1 }
  0xfd   : > { %v643_v4 = vsel %vm422_vm0, %v633_v2, 0.0  ;;  %v529_v5 = vpack.c.bf16 %v526_v3, %v525_v56  ;;  %v631_v6 = vmul.f32 %v831_v50, %v526_v3 }
  0xfe   : > { %644 = vadd.xlane.f32.xlu1 %v643_v4 }
  0xff   : > { %877 = vmatprep.mubr.msk.bf16.mxu1 %vm422_vm0, %v529_v5  ;;  %v637_v8 = vsel %vm422_vm0, %v631_v6, 0.0 }
 0x100   : > { %638 = vadd.xlane.f32.xlu0 %v637_v8  ;;  %878 = vmatmul.mubr.msk.bf16.vlgmr.msra.gmra.mxu1 %vm422_vm0, %v530_v7 }
 0x183   : > { %v642_v10 = vpop.xlane.xlu1 %641 }
 0x184   : > { %v655_v11 = vadd.f32 %v832_v9, %v642_v10 }
 0x185   : > { %v636_v12 = vpop.xlane.xlu0 %635 }
 0x186   : > { %v846_v13 = vpack.c.bf16 %v655_v11, %v655_v11  ;;  %v653_v14 = vadd.f32 %v832_v9, %v636_v12 }
 0x187   : > { %v645_v15 = vpop.xlane.xlu1 %644 }
 0x188   : > { %676 = vst.msk [vmem:[%s380_s16 + $0x8] sm:$0xf] %vm673_vm1, %v846_v13  ;;  %v844_v16 = vpack.c.bf16 %v653_v14, %v653_v14  ;;  %v656_v17 = vadd.f32 %v832_v9, %v645_v15 }
 0x189   : > { %v639_v18 = vpop.xlane.xlu0 %638 }
 0x18a   : > { %674 = vst.msk [vmem:[%s380_s16] sm:$0xf] %vm673_vm1, %v844_v16  ;;  %v847_v19 = vpack.c.bf16 %v656_v17, %v656_v17  ;;  %v654_v20 = vadd.f32 %v832_v9, %v639_v18 }
 0x18c   : > { %677 = vst.msk [vmem:[%s380_s16 + $0xc] sm:$0xf] %vm673_vm1, %v847_v19  ;;  %v845_v21 = vpack.c.bf16 %v654_v20, %v654_v20 }
 0x18e   : > { %675 = vst.msk [vmem:[%s380_s16 + $0x4] sm:$0xf] %vm673_vm1, %v845_v21 }
 0x1c0   : > { %v879_v22 = vpop.f32.mrf.mxu1 }
 0x1c1   : > { %v842_v23 = vpack.c.bf16 %v879_v22, %v879_v22 }
 0x1c2   : > { %v587_v24 = vpop.f32.mrf.mxu1 }
 0x1c3   : > { %621 = vst.msk [vmem:[%s372_s18 + $0x8] sm:$0xf] %vm618_vm2, %v842_v23  ;;  %v840_v25 = vpack.c.bf16 %v587_v24, %v587_v24 }
 0x1c4   : > { %v880_v26 = vpop.f32.mrf.mxu1 }
 0x1c5   : > { %619 = vst.msk [vmem:[%s372_s18] sm:$0xf] %vm618_vm2, %v840_v25  ;;  %v843_v27 = vpack.c.bf16 %v880_v26, %v880_v26 }
 0x1c6   : > { %v590_v28 = vpop.f32.mrf.mxu1 }
 0x1c7   : > { %622 = vst.msk [vmem:[%s372_s18 + $0xc] sm:$0xf] %vm618_vm2, %v843_v27  ;;  %v841_v29 = vpack.c.bf16 %v590_v28, %v590_v28 }
 0x1c9   : > { %620 = vst.msk [vmem:[%s372_s18 + $0x4] sm:$0xf] %vm618_vm2, %v841_v29 }
 0x1ca PF: > { %s21_s9 = sadd.s32 1, %s941_s9   ;;  %s1073_s29 = smov %s937_s30 }
 0x1cb   : > { %p18_p6 = scmp.ge.s32.totalorder %s21_s9, 6   ;;  %s1074_s30 = smov %s1076_s6 }
 0x1cd   :  { %20 = sbr.rel (!%p18_p6) target bundleno = 3 (0x3), region = 93 }

// kernel: net_forward.16
= control target key start
LH: loop header
LB: loop body
LE: loop exit
PB: predicated region body
PF: predicated region fallthrough
CT: control target
= control target key end

     0   :  { %s1284_s23 = smov 0   ;;  %s1286_s24 = smov 0   ;;  %s1626_s0 = inlined_call_operand.vmem [shape: bf16[128,32], index: 0, kind: input, shape index: {}]   ;;  %s1627_s1 = inlined_call_operand.vmem [shape: f32[1,32], index: 1, kind: input, shape index: {}]   ;;  %s1628_s2 = inlined_call_operand.vmem [shape: bf16[32,32], index: 2, kind: input, shape index: {}]   ;;  %s1629_s3 = inlined_call_operand.vmem [shape: f32[1,32], index: 3, kind: input, shape index: {}]   ;;  %s1630_s4 = inlined_call_operand.<no memory space> [shape: f32[1,1], index: 4, kind: input, shape index: {}]   ;;  %s1631_s5 = inlined_call_operand.vmem [shape: bf16[512,32], index: 5, kind: output, shape index: {0}]   ;;  %s1632_s6 = inlined_call_operand.vmem [shape: bf16[512,1], index: 6, kind: output, shape index: {1}]  }
   0x1   :  { %v12_v0 = vstv %s1630_s4  ;;  %s1288_s25 = smov 0  }
   0x2   :  { %13 = vst [vmem:[#allocation2] sm:$0x1] %v12_v0 }
   0x3 LB: > { %s28_s4 = sadd.s32 1, %s1240_s24  ;;  %p1007_p0 = scmp.ge.s32.totalorder %s1244_s25, 1  ;;  %s1244_s25 = sphi %s1288_s25, %s19_s25   ;;  %s1240_s24 = sphi %s1286_s24, %s1634_s24   ;;  %s1236_s23 = sphi %s1284_s23, %s1633_s23  }
   0x4   : > { %p29_p1 = scmp.ge.s32.totalorder %s28_s4, 4  ;;  %p234_p2 = scmp.lt.s32.totalorder %s1244_s25, 5 }
   0x6   : > { %s1636_s4 = smov (%p29_p1, %s28_s4), 0  ;;  %p235_p3 = pnand %p1007_p0, %p234_p2 }
   0x7   : > { %s1008_s29 = sshll.u32 (!%p235_p3), %s1236_s23, 4 }
   0x8   : > { %238 = sbr.rel (%p235_p3) target bundleno = 282 (0x11a), region = 40  ;;  %p279_p4 = scmp.lt.s32.totalorder (!%p235_p3), %s1008_s29, 63 }
   0xd   : > { %v1188_v1 = vld [vmem:[%s1628_s2 + $0x8] sm:$0xff]   ;;  %v1189_v2 = vld [vmem:[%s1628_s2] sm:$0xff]   ;;  %v1124_v49 = vld [vmem:[%s1626_s0 + $0x10] sm:$0xff]   ;;  %vm517_vm0 = vcmask 261120   ;;  %s1638_s29 = smov (!%p279_p4, %s1008_s29), 63  ;;  %vm878_vm1 = vcmask 3072  }
   0xe   : > { %1140 = vmatprep.subr.bf16.mxu0 %v1188_v1  ;;  %1160 = vmatprep.subr.bf16.mxu1 %v1188_v1  ;;  %v1092_v3 = vld [vmem:[%s1626_s0] sm:$0xff]   ;;  %v1123_v10 = vld [vmem:[%s1626_s0 + $0x8] sm:$0xff]   ;;  %v1101_v60 = vunpack.c.l.bf16 %v1124_v49  ;;  %v1128_v61 = vld [vmem:[%s1626_s0 + $0x30] sm:$0xff]   ;;  %v1102_v0 = vunpack.c.h.bf16 %v1124_v49  ;;  %s1009_s30 = sshll.u32 %s1638_s29, 2  ;;  %vm703_vm2 = vcmask 257024  }
   0xf   : > { %v1316_v4 = vld [vmem:[%s1627_s1] ss:$0 sm:$0xff]  ;;  %1141 = vmatpush3.bf16.msra.mxu0 %v1188_v1  ;;  %1162 = vmatpush3.bf16.msra.mxu1 %v1188_v1  ;;  %v1093_v6 = vunpack.c.l.bf16 %v1092_v3  ;;  %v1094_v7 = vunpack.c.h.bf16 %v1092_v3  ;;  %v1127_v11 = vld [vmem:[%s1626_s0 + $0x28] sm:$0xff]   ;;  %v1097_v12 = vunpack.c.l.bf16 %v1123_v10  ;;  %v1098_v13 = vunpack.c.h.bf16 %v1123_v10  ;;  %s1529_s9 = scalar_lea.vmem %s1632_s6, %s1009_s30  ;;  %s1583_s11 = scalar_lea.vmem %s1631_s5, %s1009_s30 }
  0x10   : > { %v1126_v5 = vld [vmem:[%s1626_s0 + $0x20] sm:$0xff]   ;;  %1142 = vmatprep.subr.bf16.mxu0 %v1189_v2  ;;  %1161 = vmatprep.subr.bf16.mxu1 %v1189_v2  ;;  %v1113_v14 = vunpack.c.l.bf16 %v1127_v11  ;;  %v1114_v15 = vunpack.c.h.bf16 %v1127_v11  ;;  %v1380_v3 = vadd.f32 %v1101_v60, %v1316_v4 }
  0x11   : > { %v1109_v8 = vunpack.c.l.bf16 %v1126_v5  ;;  %v1110_v9 = vunpack.c.h.bf16 %v1126_v5  ;;  %v333_v16 = vadd.f32 %v1093_v6, %v1316_v4  ;;  %v334_v17 = vadd.f32 %v1094_v7, %v1316_v4 }
  0x12   : > { %v1336_v20 = vadd.f32 %v1097_v12, %v1316_v4  ;;  %v1339_v21 = vadd.f32 %v1098_v13, %v1316_v4  ;;  %v1346_v28 = vadd.f32 %v1113_v14, %v1316_v4  ;;  %v1349_v29 = vadd.f32 %v1114_v15, %v1316_v4 }
  0x13   : > { %v1330_v18 = vadd.f32 %v1109_v8, %v1316_v4  ;;  %v1333_v19 = vadd.f32 %v1110_v9, %v1316_v4  ;;  %1143 = vmatpush3.bf16.msra.mxu0 %v1189_v2  ;;  %1163 = vmatpush3.bf16.msra.mxu1 %v1189_v2  ;;  %v365_v22 = vmul.f32 %v333_v16, %v333_v16  ;;  %v1357_v34 = vmul.f32 0.5, %v333_v16  ;;  %v1125_v8 = vld [vmem:[%s1626_s0 + $0x18] sm:$0xff]  }
  0x14   : > { %v366_v23 = vmul.f32 %v334_v17, %v334_v17  ;;  %v367_v32 = vmul.f32 %v1336_v20, %v1336_v20  ;;  %v368_v33 = vmul.f32 %v1339_v21, %v1339_v21  ;;  %v375_v43 = vmul.f32 %v1346_v28, %v1346_v28 }
  0x15   : > { %v373_v24 = vmul.f32 %v1330_v18, %v1330_v18  ;;  %v374_v25 = vmul.f32 %v1333_v19, %v1333_v19  ;;  %v381_v26 = vmul.f32 %v365_v22, %v333_v16  ;;  %v376_v44 = vmul.f32 %v1349_v29, %v1349_v29 }
  0x16   : > { %v382_v27 = vmul.f32 %v366_v23, %v334_v17  ;;  %v383_v39 = vmul.f32 %v367_v32, %v1336_v20  ;;  %v384_v40 = vmul.f32 %v368_v33, %v1339_v21  ;;  %v391_v52 = vmul.f32 %v375_v43, %v1346_v28 }
  0x17   : > { %v389_v30 = vmul.f32 %v373_v24, %v1330_v18  ;;  %v390_v31 = vmul.f32 %v374_v25, %v1333_v19  ;;  %v397_v35 = vmul.f32 0.044715, %v381_v26  ;;  %v392_v53 = vmul.f32 %v376_v44, %v1349_v29  ;;  %v1129_v24 = vld [vmem:[%s1626_s0 + $0x38] sm:$0xff]  }
  0x18   : > { %v398_v36 = vmul.f32 0.044715, %v382_v27  ;;  %v399_v47 = vmul.f32 0.044715, %v383_v39  ;;  %v400_v48 = vmul.f32 0.044715, %v384_v40  ;;  %v1383_v5 = vadd.f32 %v1102_v0, %v1316_v4 }
  0x19   : > { %v405_v37 = vmul.f32 0.044715, %v389_v30  ;;  %v406_v38 = vmul.f32 0.044715, %v390_v31  ;;  %v413_v41 = vadd.f32 %v397_v35, %v333_v16  ;;  %v407_v58 = vmul.f32 0.044715, %v391_v52 }
  0x1a   : > { %v414_v42 = vadd.f32 %v398_v36, %v334_v17  ;;  %v415_v56 = vadd.f32 %v399_v47, %v1336_v20  ;;  %v416_v57 = vadd.f32 %v400_v48, %v1339_v21  ;;  %v408_v59 = vmul.f32 0.044715, %v392_v53 }
  0x1b   : > { %v421_v45 = vadd.f32 %v405_v37, %v1330_v18  ;;  %v422_v46 = vadd.f32 %v406_v38, %v1333_v19  ;;  %v429_v50 = vmul.f32 0.7978846, %v413_v41  ;;  %v423_v1 = vadd.f32 %v407_v58, %v1346_v28 }
  0x1c   : > { %v430_v51 = vmul.f32 0.7978846, %v414_v42  ;;  %v431_v62 = vmul.f32 0.7978846, %v415_v56  ;;  %v432_v63 = vmul.f32 0.7978846, %v416_v57  ;;  %v424_v2 = vadd.f32 %v408_v59, %v1349_v29 }
  0x1d   : > { %v437_v54 = vmul.f32 0.7978846, %v421_v45  ;;  %v438_v55 = vmul.f32 0.7978846, %v422_v46  ;;  %1190 = vtanh.f32 %v429_v50  ;;  %v1117_v6 = vunpack.c.l.bf16 %v1128_v61 }
  0x1e   : > { %1192 = vtanh.f32 %v430_v51  ;;  %v1118_v7 = vunpack.c.h.bf16 %v1128_v61  ;;  %v350_v9 = vmul.f32 0.5, %v334_v17  ;;  %v439_v10 = vmul.f32 0.7978846, %v423_v1 }
  0x1f   : > { %1194 = vtanh.f32 %v437_v54  ;;  %v440_v11 = vmul.f32 0.7978846, %v424_v2  ;;  %v357_v12 = vmul.f32 0.5, %v1330_v18  ;;  %v369_v13 = vmul.f32 %v1380_v3, %v1380_v3 }
  0x20   : > { %1196 = vtanh.f32 %v438_v55  ;;  %v370_v14 = vmul.f32 %v1383_v5, %v1383_v5  ;;  %v1394_v15 = vadd.f32 %v1117_v6, %v1316_v4  ;;  %v1397_v16 = vadd.f32 %v1118_v7, %v1316_v4 }
  0x21   : > { %1198 = vtanh.f32 %v431_v62  ;;  %v1105_v17 = vunpack.c.l.bf16 %v1125_v8  ;;  %v385_v22 = vmul.f32 %v369_v13, %v1380_v3  ;;  %v1106_v23 = vunpack.c.h.bf16 %v1125_v8 }
  0x22   : > { %1200 = vtanh.f32 %v432_v63  ;;  %v386_v18 = vmul.f32 %v370_v14, %v1383_v5  ;;  %v358_v25 = vmul.f32 0.5, %v1333_v19  ;;  %v351_v26 = vmul.f32 0.5, %v1336_v20 }
  0x23   : > { %1202 = vtanh.f32 %v439_v10  ;;  %v377_v27 = vmul.f32 %v1394_v15, %v1394_v15  ;;  %v378_v30 = vmul.f32 %v1397_v16, %v1397_v16  ;;  %v401_v31 = vmul.f32 0.044715, %v385_v22 }
  0x24   : > { %1204 = vtanh.f32 %v440_v11  ;;  %v402_v32 = vmul.f32 0.044715, %v386_v18  ;;  %v1411_v33 = vadd.f32 %v1105_v17, %v1316_v4  ;;  %v1414_v35 = vadd.f32 %v1106_v23, %v1316_v4 }
  0x25   : > { %v352_v36 = vmul.f32 0.5, %v1339_v21  ;;  %v393_v19 = vmul.f32 %v377_v27, %v1394_v15  ;;  %v394_v20 = vmul.f32 %v378_v30, %v1397_v16  ;;  %v1121_v37 = vunpack.c.l.bf16 %v1129_v24 }
  0x26   : > { %v359_v38 = vmul.f32 0.5, %v1346_v28  ;;  %v417_v39 = vadd.f32 %v401_v31, %v1380_v3  ;;  %v418_v40 = vadd.f32 %v402_v32, %v1383_v5  ;;  %v1122_v41 = vunpack.c.h.bf16 %v1129_v24 }
  0x27   : > { %v409_v42 = vmul.f32 0.044715, %v393_v19  ;;  %v410_v43 = vmul.f32 0.044715, %v394_v20  ;;  %v371_v44 = vmul.f32 %v1411_v33, %v1411_v33  ;;  %v372_v21 = vmul.f32 %v1414_v35, %v1414_v35 }
  0x28   : > { %v360_v46 = vmul.f32 0.5, %v1349_v29  ;;  %v433_v47 = vmul.f32 0.7978846, %v417_v39  ;;  %v434_v48 = vmul.f32 0.7978846, %v418_v40  ;;  %v1428_v28 = vadd.f32 %v1121_v37, %v1316_v4 }
  0x29   : > { %v425_v51 = vadd.f32 %v409_v42, %v1394_v15  ;;  %v426_v52 = vadd.f32 %v410_v43, %v1397_v16  ;;  %v387_v53 = vmul.f32 %v371_v44, %v1411_v33  ;;  %v388_v56 = vmul.f32 %v372_v21, %v1414_v35 }
  0x2a   : > { %v1191_v45 = vpop.eup %1190  ;;  %1206 = vtanh.f32 %v433_v47  ;;  %v1435_v29 = vadd.f32 %v1122_v41, %v1316_v4  ;;  %v379_v30 = vmul.f32 %v1428_v28, %v1428_v28  ;;  %v353_v21 = vmul.f32 0.5, %v1380_v3 }
  0x2b   : > { %v1193_v49 = vpop.eup %1192  ;;  %v461_v50 = vadd.f32 1.0, %v1191_v45  ;;  %1208 = vtanh.f32 %v434_v48  ;;  %v441_v60 = vmul.f32 0.7978846, %v425_v51  ;;  %v442_v0 = vmul.f32 0.7978846, %v426_v52 }
  0x2c   : > { %v1195_v54 = vpop.eup %1194  ;;  %v462_v55 = vadd.f32 1.0, %v1193_v49  ;;  %v403_v1 = vmul.f32 0.044715, %v387_v53  ;;  %v404_v8 = vmul.f32 0.044715, %v388_v56  ;;  %v380_v19 = vmul.f32 %v1435_v29, %v1435_v29 }
  0x2d   : > { %v1197_v57 = vpop.eup %1196  ;;  %v477_v58 = vmul.f32 %v461_v50, %v1357_v34  ;;  %v469_v59 = vadd.f32 1.0, %v1195_v54  ;;  %1210 = vtanh.f32 %v441_v60  ;;  %v354_v48 = vmul.f32 0.5, %v1383_v5 }
  0x2e   : > { %v1199_v61 = vpop.eup %1198  ;;  %v478_v62 = vmul.f32 %v462_v55, %v350_v9  ;;  %v470_v63 = vadd.f32 1.0, %v1197_v57  ;;  %1212 = vtanh.f32 %v442_v0  ;;  %v419_v9 = vadd.f32 %v403_v1, %v1411_v33 }
  0x2f   : > { %v1201_v2 = vpop.eup %1200  ;;  %v1438_v6 = vmul.f32 %v469_v59, %v357_v12  ;;  %v463_v7 = vadd.f32 1.0, %v1199_v61  ;;  %v420_v22 = vadd.f32 %v404_v8, %v1414_v35  ;;  %v1447_v12 = vld [vmem:[%s1629_s3] ss:$0 sm:$0xff]  ;;  %v396_v40 = vmul.f32 %v380_v19, %v1435_v29 }
  0x30   : > { %v1203_v10 = vpop.eup %1202  ;;  %v493_v4 = vpack.c.bf16 %v478_v62, %v477_v58  ;;  %v1440_v11 = vmul.f32 %v470_v63, %v358_v25  ;;  %v464_v13 = vadd.f32 1.0, %v1201_v2  ;;  %v727_v37 = vmul.f32 %v1447_v12, %v477_v58 }
  0x31   : > { %v1205_v34 = vpop.eup %1204  ;;  %v479_v14 = vmul.f32 %v463_v7, %v351_v26  ;;  %v471_v17 = vadd.f32 1.0, %v1203_v10  ;;  %v435_v26 = vmul.f32 0.7978846, %v419_v9  ;;  %v436_v27 = vmul.f32 0.7978846, %v420_v22 }
  0x32   : > { %1144 = vmatprep.mubr.msk.bf16.mxu0 %vm517_vm0, %v493_v4  ;;  %v497_v18 = vpack.c.bf16 %v1440_v11, %v1438_v6  ;;  %v480_v23 = vmul.f32 %v464_v13, %v352_v36  ;;  %v472_v24 = vadd.f32 1.0, %v1205_v34  ;;  %v395_v36 = vmul.f32 %v379_v30, %v1428_v28 }
  0x33   : > { %v1452_v25 = vmul.f32 %v471_v17, %v359_v38  ;;  %v729_v20 = vmul.f32 %v1447_v12, %v479_v14  ;;  %1214 = vtanh.f32 %v435_v26  ;;  %v743_v43 = vsel %vm517_vm0, %v727_v37, 0.0 }
  0x34   : > { %1152 = vmatprep.mubr.msk.bf16.mxu1 %vm517_vm0, %v497_v18  ;;  %v494_v31 = vpack.c.bf16 %v480_v23, %v479_v14  ;;  %v1457_v32 = vmul.f32 %v472_v24, %v360_v46  ;;  %v730_v38 = vmul.f32 %v1447_v12, %v480_v23  ;;  %1216 = vtanh.f32 %v436_v27  ;;  %744 = vadd.xlane.f32.xlu0 %v743_v43 }
  0x35   : > { %v749_v41 = vsel %vm517_vm0, %v729_v20, 0.0  ;;  %v411_v42 = vmul.f32 0.044715, %v395_v36  ;;  %v728_v44 = vmul.f32 %v1447_v12, %v478_v62  ;;  %v412_v45 = vmul.f32 0.044715, %v396_v40 }
  0x36   : > { %1145 = vmatmul.mubr.msk.bf16.vlgmr.msra.gmra.mxu0 %vm517_vm0, %v494_v31  ;;  %v498_v39 = vpack.c.bf16 %v1457_v32, %v1452_v25  ;;  %750 = vadd.xlane.f32.xlu1 %v749_v41  ;;  %v752_v46 = vsel %vm517_vm0, %v730_v38, 0.0  ;;  %v361_v55 = vmul.f32 0.5, %v1394_v15  ;;  %v362_v58 = vmul.f32 0.5, %v1397_v16 }
  0x37   : > { %v1207_v47 = vpop.eup %1206  ;;  %v427_v49 = vadd.f32 %v411_v42, %v1428_v28  ;;  %v746_v50 = vsel %vm517_vm0, %v728_v44, 0.0  ;;  %v428_v53 = vadd.f32 %v412_v45, %v1435_v29  ;;  %v355_v16 = vmul.f32 0.5, %v1411_v33 }
  0x38   : > { %1153 = vmatmul.mubr.msk.bf16.vlgmr.msra.gmra.mxu1 %vm517_vm0, %v498_v39  ;;  %v1209_v51 = vpop.eup %1208  ;;  %v465_v52 = vadd.f32 1.0, %v1207_v47  ;;  %747 = vadd.xlane.f32.xlu0 %v746_v50  ;;  %v356_v13 = vmul.f32 0.5, %v1414_v35  ;;  %v735_v33 = vmul.f32 %v1447_v12, %v1438_v6  ;;  %v736_v26 = vmul.f32 %v1447_v12, %v1440_v11 }
  0x39   : > { %v466_v54 = vadd.f32 1.0, %v1209_v51  ;;  %v443_v56 = vmul.f32 0.7978846, %v427_v49  ;;  %v444_v59 = vmul.f32 0.7978846, %v428_v53  ;;  %v363_v35 = vmul.f32 0.5, %v1428_v28 }
  0x3a   : > { %753 = vadd.xlane.f32.xlu1 %v752_v46  ;;  %v1211_v3 = vpop.eup %1210  ;;  %v481_v57 = vmul.f32 %v465_v52, %v353_v21  ;;  %v364_v31 = vmul.f32 0.5, %v1435_v29  ;;  %v767_v36 = vsel %vm517_vm0, %v735_v33, 0.0  ;;  %v737_v11 = vmul.f32 %v1447_v12, %v1452_v25 }
  0x3b   : > { %v1213_v5 = vpop.eup %1212  ;;  %v482_v60 = vmul.f32 %v466_v54, %v354_v48  ;;  %v473_v61 = vadd.f32 1.0, %v1211_v3  ;;  %1218 = vtanh.f32 %v443_v56  ;;  %v770_v28 = vsel %vm517_vm0, %v736_v26, 0.0  ;;  %v1520_v48 = vld [vmem:[#allocation2] ss:$0 sm:$0xff] }
  0x3c   : > { %v474_v62 = vadd.f32 1.0, %v1213_v5  ;;  %1220 = vtanh.f32 %v444_v59  ;;  %v731_v63 = vmul.f32 %v1447_v12, %v481_v57  ;;  %v738_v38 = vmul.f32 %v1447_v12, %v1457_v32 }
  0x3d   : > { %v495_v0 = vpack.c.bf16 %v482_v60, %v481_v57  ;;  %v489_v1 = vmul.f32 %v473_v61, %v361_v55  ;;  %v732_v15 = vmul.f32 %v1447_v12, %v482_v60  ;;  %v773_v29 = vsel %vm517_vm0, %v737_v11, 0.0 }
  0x3e   : > { %v490_v2 = vmul.f32 %v474_v62, %v362_v58  ;;  %v755_v7 = vsel %vm517_vm0, %v731_v63, 0.0  ;;  %v776_v43 = vsel %vm517_vm0, %v738_v38, 0.0 }
  0x3f   : > { %1148 = vmatprep.mubr.msk.bf16.mxu0 %vm517_vm0, %v495_v0  ;;  %v758_v8 = vsel %vm517_vm0, %v732_v15, 0.0  ;;  %756 = vadd.xlane.f32.xlu0 %v755_v7  ;;  %v739_v41 = vmul.f32 %v1447_v12, %v489_v1 }
  0x40   : > { %v1215_v10 = vpop.eup %1214  ;;  %v499_v4 = vpack.c.bf16 %v490_v2, %v489_v1  ;;  %759 = vadd.xlane.f32.xlu1 %v758_v8  ;;  %v740_v25 = vmul.f32 %v1447_v12, %v490_v2 }
  0x41   : > { %v1217_v34 = vpop.eup %1216  ;;  %v467_v14 = vadd.f32 1.0, %v1215_v10  ;;  %v779_v32 = vsel %vm517_vm0, %v739_v41, 0.0 }
  0x42   : > { %1156 = vmatprep.mubr.msk.bf16.mxu1 %vm517_vm0, %v499_v4  ;;  %v468_v17 = vadd.f32 1.0, %v1217_v34  ;;  %v782_v21 = vsel %vm517_vm0, %v740_v25, 0.0 }
  0x43   : > { %v483_v9 = vmul.f32 %v467_v14, %v355_v16 }
  0x44   : > { %v484_v22 = vmul.f32 %v468_v17, %v356_v13 }
  0x45   : > { %v733_v18 = vmul.f32 %v1447_v12, %v483_v9 }
  0x46   : > { %v496_v23 = vpack.c.bf16 %v484_v22, %v483_v9  ;;  %v734_v24 = vmul.f32 %v1447_v12, %v484_v22 }
  0x47   : > { %v761_v27 = vsel %vm517_vm0, %v733_v18, 0.0 }
  0x48   : > { %v1219_v30 = vpop.eup %1218  ;;  %1149 = vmatmul.mubr.msk.bf16.gmra.mxu0 %vm517_vm0, %v496_v23  ;;  %v764_v19 = vsel %vm517_vm0, %v734_v24, 0.0  ;;  %762 = vadd.xlane.f32.xlu0 %v761_v27 }
  0x49   : > { %v1221_v20 = vpop.eup %1220  ;;  %v475_v6 = vadd.f32 1.0, %v1219_v30  ;;  %765 = vadd.xlane.f32.xlu1 %v764_v19 }
  0x4a   : > { %v476_v37 = vadd.f32 1.0, %v1221_v20 }
  0x4b   : > { %v491_v39 = vmul.f32 %v475_v6, %v363_v35 }
  0x4c   : > { %v492_v40 = vmul.f32 %v476_v37, %v364_v31  ;;  %768 = vadd.xlane.f32.xlu0 %v767_v36 }
  0x4d   : > { %771 = vadd.xlane.f32.xlu1 %v770_v28  ;;  %v741_v44 = vmul.f32 %v1447_v12, %v491_v39 }
  0x4e   : > { %v500_v42 = vpack.c.bf16 %v492_v40, %v491_v39  ;;  %v742_v45 = vmul.f32 %v1447_v12, %v492_v40 }
  0x4f   : > { %v785_v46 = vsel %vm517_vm0, %v741_v44, 0.0 }
  0x50   : > { %1157 = vmatmul.mubr.msk.bf16.gmra.mxu1 %vm517_vm0, %v500_v42  ;;  %774 = vadd.xlane.f32.xlu0 %v773_v29  ;;  %v788_v47 = vsel %vm517_vm0, %v742_v45, 0.0 }
  0x51   : > { %777 = vadd.xlane.f32.xlu1 %v776_v43 }
  0x54   : > { %780 = vadd.xlane.f32.xlu0 %v779_v32 }
  0x55   : > { %783 = vadd.xlane.f32.xlu1 %v782_v21 }
  0x58   : > { %786 = vadd.xlane.f32.xlu0 %v785_v46 }
  0x59   : > { %789 = vadd.xlane.f32.xlu1 %v788_v47 }
  0xbd   : > { %v745_v50 = vpop.xlane.xlu0 %744 }
  0xbe   : > { %v798_v51 = vadd.f32 %v1520_v48, %v745_v50 }
  0xbf   : > { %v751_v49 = vpop.xlane.xlu1 %750 }
  0xc0   : > { %v800_v12 = vadd.f32 %v1520_v48, %v751_v49  ;;  %v1075_v53 = vpack.c.bf16 %v798_v51, %v798_v51 }
  0xc1   : > { %v748_v56 = vpop.xlane.xlu0 %747 }
  0xc2   : > { %v1077_v52 = vpack.c.bf16 %v800_v12, %v800_v12  ;;  %879 = vst.msk [vmem:[%s1529_s9] sm:$0xf] %vm878_vm1, %v1075_v53  ;;  %v799_v3 = vadd.f32 %v1520_v48, %v748_v56 }
  0xc3   : > { %v754_v54 = vpop.xlane.xlu1 %753 }
  0xc4   : > { %881 = vst.msk [vmem:[%s1529_s9 + $0x8] sm:$0xf] %vm878_vm1, %v1077_v52  ;;  %v801_v55 = vadd.f32 %v1520_v48, %v754_v54  ;;  %v1076_v58 = vpack.c.bf16 %v799_v3, %v799_v3 }
  0xc6   : > { %v1078_v57 = vpack.c.bf16 %v801_v55, %v801_v55  ;;  %880 = vst.msk [vmem:[%s1529_s9 + $0x4] sm:$0xf] %vm878_vm1, %v1076_v58 }
  0xc8   : > { %882 = vst.msk [vmem:[%s1529_s9 + $0xc] sm:$0xf] %vm878_vm1, %v1078_v57  ;;  %v757_v59 = vpop.xlane.xlu0 %756 }
  0xc9   : > { %v760_v5 = vpop.xlane.xlu1 %759  ;;  %v802_v60 = vadd.f32 %v1520_v48, %v757_v59 }
  0xca   : > { %v803_v61 = vadd.f32 %v1520_v48, %v760_v5 }
  0xcb   : > { %v1079_v62 = vpack.c.bf16 %v802_v60, %v802_v60 }
  0xcc   : > { %v1080_v63 = vpack.c.bf16 %v803_v61, %v803_v61 }
  0xcd   : > { %883 = vst.msk [vmem:[%s1529_s9 + $0x10] sm:$0xf] %vm878_vm1, %v1079_v62 }
  0xce   : > { %884 = vst.msk [vmem:[%s1529_s9 + $0x14] sm:$0xf] %vm878_vm1, %v1080_v63 }
  0xd1   : > { %v763_v0 = vpop.xlane.xlu0 %762 }
  0xd2   : > { %v766_v1 = vpop.xlane.xlu1 %765  ;;  %v804_v15 = vadd.f32 %v1520_v48, %v763_v0 }
  0xd3   : > { %v805_v2 = vadd.f32 %v1520_v48, %v766_v1 }
  0xd4   : > { %v1081_v7 = vpack.c.bf16 %v804_v15, %v804_v15 }
  0xd5   : > { %v1082_v16 = vpack.c.bf16 %v805_v2, %v805_v2  ;;  %v769_v8 = vpop.xlane.xlu0 %768 }
  0xd6   : > { %885 = vst.msk [vmem:[%s1529_s9 + $0x18] sm:$0xf] %vm878_vm1, %v1081_v7  ;;  %v772_v10 = vpop.xlane.xlu1 %771  ;;  %v806_v4 = vadd.f32 %v1520_v48, %v769_v8 }
  0xd7   : > { %886 = vst.msk [vmem:[%s1529_s9 + $0x1c] sm:$0xf] %vm878_vm1, %v1082_v16  ;;  %v807_v13 = vadd.f32 %v1520_v48, %v772_v10 }
  0xd8   : > { %v1083_v34 = vpack.c.bf16 %v806_v4, %v806_v4 }
  0xd9   : > { %v1084_v14 = vpack.c.bf16 %v807_v13, %v807_v13  ;;  %v775_v17 = vpop.xlane.xlu0 %774 }
  0xda   : > { %887 = vst.msk [vmem:[%s1529_s9 + $0x20] sm:$0xf] %vm878_vm1, %v1083_v34  ;;  %v778_v9 = vpop.xlane.xlu1 %777  ;;  %v808_v22 = vadd.f32 %v1520_v48, %v775_v17 }
  0xdb   : > { %888 = vst.msk [vmem:[%s1529_s9 + $0x24] sm:$0xf] %vm878_vm1, %v1084_v14  ;;  %v809_v18 = vadd.f32 %v1520_v48, %v778_v9 }
  0xdc   : > { %v1085_v33 = vpack.c.bf16 %v808_v22, %v808_v22 }
  0xdd   : > { %v1086_v23 = vpack.c.bf16 %v809_v18, %v809_v18  ;;  %v781_v24 = vpop.xlane.xlu0 %780 }
  0xde   : > { %889 = vst.msk [vmem:[%s1529_s9 + $0x28] sm:$0xf] %vm878_vm1, %v1085_v33  ;;  %v784_v26 = vpop.xlane.xlu1 %783  ;;  %v810_v35 = vadd.f32 %v1520_v48, %v781_v24 }
  0xdf   : > { %890 = vst.msk [vmem:[%s1529_s9 + $0x2c] sm:$0xf] %vm878_vm1, %v1086_v23  ;;  %v811_v27 = vadd.f32 %v1520_v48, %v784_v26 }
  0xe0   : > { %v1087_v30 = vpack.c.bf16 %v810_v35, %v810_v35 }
  0xe1   : > { %v1088_v31 = vpack.c.bf16 %v811_v27, %v811_v27  ;;  %v787_v19 = vpop.xlane.xlu0 %786 }
  0xe2   : > { %891 = vst.msk [vmem:[%s1529_s9 + $0x30] sm:$0xf] %vm878_vm1, %v1087_v30  ;;  %v790_v20 = vpop.xlane.xlu1 %789  ;;  %v812_v6 = vadd.f32 %v1520_v48, %v787_v19 }
  0xe3   : > { %892 = vst.msk [vmem:[%s1529_s9 + $0x34] sm:$0xf] %vm878_vm1, %v1088_v31  ;;  %v813_v36 = vadd.f32 %v1520_v48, %v790_v20 }
  0xe4   : > { %v1089_v11 = vpack.c.bf16 %v812_v6, %v812_v6 }
  0xe5   : > { %v1090_v37 = vpack.c.bf16 %v813_v36, %v813_v36 }
  0xe6   : > { %893 = vst.msk [vmem:[%s1529_s9 + $0x38] sm:$0xf] %vm878_vm1, %v1089_v11 }
  0xe7   : > { %894 = vst.msk [vmem:[%s1529_s9 + $0x3c] sm:$0xf] %vm878_vm1, %v1090_v37 }
  0xf6   : > { %v1146_v28 = vpop.f32.mrf.mxu0 }
  0xf7   : > { %v1061_v38 = vpack.c.bf16 %v1146_v28, %v1146_v28 }
  0xf8   : > { %v1154_v39 = vpop.f32.mrf.mxu1  ;;  %v576_v40 = vpop.f32.mrf.mxu0 }
  0xf9   : > { %v1069_v29 = vpack.c.bf16 %v1154_v39, %v1154_v39  ;;  %706 = vst.msk [vmem:[%s1583_s11 + $0x8] sm:$0xf] %vm703_vm2, %v1061_v38  ;;  %v1059_v41 = vpack.c.bf16 %v576_v40, %v576_v40 }
  0xfa   : > { %v608_v42 = vpop.f32.mrf.mxu1  ;;  %v1147_v43 = vpop.f32.mrf.mxu0 }
  0xfb   : > { %714 = vst.msk [vmem:[%s1583_s11 + $0x28] sm:$0xf] %vm703_vm2, %v1069_v29  ;;  %704 = vst.msk [vmem:[%s1583_s11] sm:$0xf] %vm703_vm2, %v1059_v41  ;;  %v1067_v25 = vpack.c.bf16 %v608_v42, %v608_v42  ;;  %v1062_v32 = vpack.c.bf16 %v1147_v43, %v1147_v43 }
  0xfc   : > { %v1155_v44 = vpop.f32.mrf.mxu1  ;;  %v579_v21 = vpop.f32.mrf.mxu0 }
  0xfd   : > { %712 = vst.msk [vmem:[%s1583_s11 + $0x20] sm:$0xf] %vm703_vm2, %v1067_v25  ;;  %v1070_v45 = vpack.c.bf16 %v1155_v44, %v1155_v44  ;;  %707 = vst.msk [vmem:[%s1583_s11 + $0xc] sm:$0xf] %vm703_vm2, %v1062_v32  ;;  %v1060_v46 = vpack.c.bf16 %v579_v21, %v579_v21 }
  0xfe   : > { %v611_v47 = vpop.f32.mrf.mxu1 }
  0xff   : > { %715 = vst.msk [vmem:[%s1583_s11 + $0x2c] sm:$0xf] %vm703_vm2, %v1070_v45  ;;  %705 = vst.msk [vmem:[%s1583_s11 + $0x4] sm:$0xf] %vm703_vm2, %v1060_v46  ;;  %v1068_v48 = vpack.c.bf16 %v611_v47, %v611_v47 }
 0x101   : > { %713 = vst.msk [vmem:[%s1583_s11 + $0x24] sm:$0xf] %vm703_vm2, %v1068_v48 }
 0x108   : > { %v1150_v49 = vpop.f32.mrf.mxu0 }
 0x109   : > { %v1065_v12 = vpack.c.bf16 %v1150_v49, %v1150_v49 }
 0x10a   : > { %v592_v50 = vpop.f32.mrf.mxu0 }
 0x10b   : > { %710 = vst.msk [vmem:[%s1583_s11 + $0x18] sm:$0xf] %vm703_vm2, %v1065_v12  ;;  %v1063_v51 = vpack.c.bf16 %v592_v50, %v592_v50 }
 0x10c   : > { %v1151_v52 = vpop.f32.mrf.mxu0 }
 0x10d   : > { %708 = vst.msk [vmem:[%s1583_s11 + $0x10] sm:$0xf] %vm703_vm2, %v1063_v51  ;;  %v1066_v53 = vpack.c.bf16 %v1151_v52, %v1151_v52 }
 0x10e   : > { %v595_v54 = vpop.f32.mrf.mxu0 }
 0x10f   : > { %711 = vst.msk [vmem:[%s1583_s11 + $0x1c] sm:$0xf] %vm703_vm2, %v1066_v53  ;;  %v1064_v55 = vpack.c.bf16 %v595_v54, %v595_v54 }
 0x110   : > { %v1158_v56 = vpop.f32.mrf.mxu1 }
 0x111   : > { %v1073_v3 = vpack.c.bf16 %v1158_v56, %v1158_v56  ;;  %709 = vst.msk [vmem:[%s1583_s11 + $0x14] sm:$0xf] %vm703_vm2, %v1064_v55 }
 0x112   : > { %v624_v57 = vpop.f32.mrf.mxu1 }
 0x113   : > { %718 = vst.msk [vmem:[%s1583_s11 + $0x38] sm:$0xf] %vm703_vm2, %v1073_v3  ;;  %v1071_v58 = vpack.c.bf16 %v624_v57, %v624_v57 }
 0x114   : > { %v1159_v59 = vpop.f32.mrf.mxu1 }
 0x115   : > { %716 = vst.msk [vmem:[%s1583_s11 + $0x30] sm:$0xf] %vm703_vm2, %v1071_v58  ;;  %v1074_v5 = vpack.c.bf16 %v1159_v59, %v1159_v59 }
 0x116   : > { %v627_v60 = vpop.f32.mrf.mxu1 }
 0x117   : > { %719 = vst.msk [vmem:[%s1583_s11 + $0x3c] sm:$0xf] %vm703_vm2, %v1074_v5  ;;  %v1072_v61 = vpack.c.bf16 %v627_v60, %v627_v60 }
 0x119   : > { %717 = vst.msk [vmem:[%s1583_s11 + $0x34] sm:$0xf] %vm703_vm2, %v1072_v61 }
 0x11a PF: > { %s19_s25 = sadd.s32 1, %s1244_s25   ;;  %s1633_s23 = smov %s1240_s24 }
 0x11b   : > { %p16_p5 = scmp.ge.s32.totalorder %s19_s25, 6   ;;  %s1634_s24 = smov %s1636_s4 }
 0x11d   :  { %18 = sbr.rel (!%p16_p5) target bundleno = 3 (0x3), region = 82 }

// kernel: net_forward.17
= control target key start
LH: loop header
LB: loop body
LE: loop exit
PB: predicated region body
PF: predicated region fallthrough
CT: control target
= control target key end

     0   :  { %s4525_s13 = smov 0   ;;  %s4527_s14 = smov 0   ;;  %s7172_s0 = inlined_call_operand.vmem [shape: bf16[512,32], index: 0, kind: input, shape index: {}]   ;;  %s7173_s1 = inlined_call_operand.vmem [shape: f32[1,32], index: 1, kind: input, shape index: {}]   ;;  %s7174_s2 = inlined_call_operand.vmem [shape: f32[1,32], index: 2, kind: input, shape index: {}]   ;;  %s7175_s3 = inlined_call_operand.<no memory space> [shape: f32[1,1], index: 3, kind: input, shape index: {}]   ;;  %s7176_s4 = inlined_call_operand.vmem [shape: bf16[32,32], index: 4, kind: input, shape index: {}]   ;;  %s7177_s5 = inlined_call_operand.vmem [shape: f32[1,32], index: 5, kind: input, shape index: {}]   ;;  %s7178_s6 = inlined_call_operand.vmem [shape: f32[1,32], index: 6, kind: input, shape index: {}]   ;;  %s7179_s8 = inlined_call_operand.vmem [shape: bf16[2048,1], index: 8, kind: output, shape index: {0}]   ;;  %s7180_s9 = inlined_call_operand.vmem [shape: bf16[2048,1], index: 9, kind: output, shape index: {1}]   ;;  %s7181_s7 = inlined_call_operand.<no memory space> [shape: f32[1,1], index: 7, kind: input, shape index: {}]  }
   0x1   :  { %v15_v0 = vstv %s7175_s3  ;;  %v17_v1 = vstv %s7181_s7  ;;  %s4529_s15 = smov 0  }
   0x2   :  { %16 = vst [vmem:[#allocation2] sm:$0x1] %v15_v0  ;;  %18 = vst [vmem:[#allocation3] sm:$0x1] %v17_v1 }
   0x3 LB: > { %s33_s3 = sadd.s32 1, %s4463_s14  ;;  %p3590_p0 = scmp.ge.s32.totalorder %s4467_s15, 1  ;;  %s4467_s15 = sphi %s4529_s15, %s24_s15   ;;  %s4463_s14 = sphi %s4527_s14, %s7304_s14   ;;  %s4459_s13 = sphi %s4525_s13, %s7303_s13  }
   0x4   : > { %p34_p1 = scmp.ge.s32.totalorder %s33_s3, 4  ;;  %p311_p2 = scmp.lt.s32.totalorder %s4467_s15, 5 }
   0x6   : > { %s7306_s3 = smov (%p34_p1, %s33_s3), 0  ;;  %p312_p3 = pnand %p3590_p0, %p311_p2 }
   0x8   : > { %315 = sbr.rel (%p312_p3) target bundleno = 631 (0x277), region = 52 }
   0xd   : > { %v4182_v2 = vld [vmem:[%s7176_s4 + $0x8] sm:$0xff]   ;;  %v4183_v3 = vld [vmem:[%s7176_s4] sm:$0xff]   ;;  %v4022_v51 = vld [vmem:[%s7172_s0 + $0x10] sm:$0xff]   ;;  %vm1223_vm0 = vcmask 261120   ;;  %s3591_s17 = sshll.u32 %s4459_s13, 6  ;;  %vm1743_vm1 = vcmask 3072  }
   0xe   : > { %4086 = vmatprep.subr.bf16.mxu0 %v4182_v2  ;;  %4154 = vmatprep.subr.bf16.mxu1 %v4182_v2  ;;  %v3894_v4 = vld [vmem:[%s7172_s0] sm:$0xff]   ;;  %v4021_v11 = vld [vmem:[%s7172_s0 + $0x8] sm:$0xff]   ;;  %v3903_v62 = vunpack.c.l.bf16 %v4022_v51  ;;  %v4038_v63 = vld [vmem:[%s7172_s0 + $0x90] sm:$0xff]   ;;  %p5980_p4 = scmp.lt.s32.totalorder %s3591_s17, 255 }
   0xf   : > { %v4557_v5 = vld [vmem:[%s7173_s1] ss:$0 sm:$0xff]  ;;  %4087 = vmatpush3.bf16.msra.mxu0 %v4182_v2  ;;  %4156 = vmatpush3.bf16.msra.mxu1 %v4182_v2  ;;  %v3895_v7 = vunpack.c.l.bf16 %v3894_v4  ;;  %v3896_v8 = vunpack.c.h.bf16 %v3894_v4  ;;  %v4037_v12 = vld [vmem:[%s7172_s0 + $0x88] sm:$0xff]   ;;  %v3899_v13 = vunpack.c.l.bf16 %v4021_v11  ;;  %v3900_v14 = vunpack.c.h.bf16 %v4021_v11 }
  0x10   : > { %v4036_v6 = vld [vmem:[%s7172_s0 + $0x80] sm:$0xff]   ;;  %4088 = vmatprep.subr.bf16.mxu0 %v4183_v3  ;;  %4155 = vmatprep.subr.bf16.mxu1 %v4183_v3  ;;  %v3963_v15 = vunpack.c.l.bf16 %v4037_v12  ;;  %v3964_v16 = vunpack.c.h.bf16 %v4037_v12  ;;  %v3904_v2 = vunpack.c.h.bf16 %v4022_v51  ;;  %s7308_s17 = smov (!%p5980_p4, %s3591_s17), 255 }
  0x11   : > { %v3959_v9 = vunpack.c.l.bf16 %v4036_v6  ;;  %v3960_v10 = vunpack.c.h.bf16 %v4036_v6  ;;  %v512_v17 = vadd.f32 %v3895_v7, %v4557_v5  ;;  %v513_v18 = vadd.f32 %v3896_v8, %v4557_v5  ;;  %s3592_s13 = sshll.u32 %s7308_s17, 2 }
  0x12   : > { %v4575_v21 = vadd.f32 %v3899_v13, %v4557_v5  ;;  %v4578_v22 = vadd.f32 %v3900_v14, %v4557_v5  ;;  %v4583_v29 = vadd.f32 %v3963_v15, %v4557_v5  ;;  %v4586_v30 = vadd.f32 %v3964_v16, %v4557_v5  ;;  %s6074_s21 = scalar_lea.vmem %s7179_s8, %s3592_s13  ;;  %s6953_s30 = scalar_lea.vmem %s7180_s9, %s3592_s13 }
  0x13   : > { %v544_v19 = vadd.f32 %v3959_v9, %v4557_v5  ;;  %v4572_v20 = vadd.f32 %v3960_v10, %v4557_v5  ;;  %4089 = vmatpush3.bf16.msra.mxu0 %v4183_v3  ;;  %4157 = vmatpush3.bf16.msra.mxu1 %v4183_v3  ;;  %v640_v23 = vmul.f32 %v512_v17, %v512_v17  ;;  %v4593_v35 = vmul.f32 0.5, %v512_v17  ;;  %v4023_v10 = vld [vmem:[%s7172_s0 + $0x18] sm:$0xff]  }
  0x14   : > { %v641_v24 = vmul.f32 %v513_v18, %v513_v18  ;;  %v642_v33 = vmul.f32 %v4575_v21, %v4575_v21  ;;  %v643_v34 = vmul.f32 %v4578_v22, %v4578_v22  ;;  %v4595_v36 = vmul.f32 0.5, %v513_v18 }
  0x15   : > { %v672_v25 = vmul.f32 %v544_v19, %v544_v19  ;;  %v673_v26 = vmul.f32 %v4572_v20, %v4572_v20  ;;  %v704_v27 = vmul.f32 %v640_v23, %v512_v17  ;;  %v674_v45 = vmul.f32 %v4583_v29, %v4583_v29 }
  0x16   : > { %v705_v28 = vmul.f32 %v641_v24, %v513_v18  ;;  %v706_v41 = vmul.f32 %v642_v33, %v4575_v21  ;;  %v707_v42 = vmul.f32 %v643_v34, %v4578_v22  ;;  %v675_v46 = vmul.f32 %v4586_v30, %v4586_v30 }
  0x17   : > { %v736_v31 = vmul.f32 %v672_v25, %v544_v19  ;;  %v737_v32 = vmul.f32 %v673_v26, %v4572_v20  ;;  %v768_v37 = vmul.f32 0.044715, %v704_v27  ;;  %v738_v54 = vmul.f32 %v674_v45, %v4583_v29 }
  0x18   : > { %v769_v38 = vmul.f32 0.044715, %v705_v28  ;;  %v770_v49 = vmul.f32 0.044715, %v706_v41  ;;  %v771_v50 = vmul.f32 0.044715, %v707_v42  ;;  %v739_v55 = vmul.f32 %v675_v46, %v4586_v30 }
  0x19   : > { %v800_v39 = vmul.f32 0.044715, %v736_v31  ;;  %v801_v40 = vmul.f32 0.044715, %v737_v32  ;;  %v832_v43 = vadd.f32 %v768_v37, %v512_v17  ;;  %v802_v60 = vmul.f32 0.044715, %v738_v54 }
  0x1a   : > { %v833_v44 = vadd.f32 %v769_v38, %v513_v18  ;;  %v834_v58 = vadd.f32 %v770_v49, %v4575_v21  ;;  %v835_v59 = vadd.f32 %v771_v50, %v4578_v22  ;;  %v803_v61 = vmul.f32 0.044715, %v739_v55 }
  0x1b   : > { %v864_v47 = vadd.f32 %v800_v39, %v544_v19  ;;  %v865_v48 = vadd.f32 %v801_v40, %v4572_v20  ;;  %v896_v52 = vmul.f32 0.7978846, %v832_v43  ;;  %v866_v3 = vadd.f32 %v802_v60, %v4583_v29 }
  0x1c   : > { %v897_v53 = vmul.f32 0.7978846, %v833_v44  ;;  %v898_v0 = vmul.f32 0.7978846, %v834_v58  ;;  %v899_v1 = vmul.f32 0.7978846, %v835_v59  ;;  %v867_v4 = vadd.f32 %v803_v61, %v4586_v30 }
  0x1d   : > { %v928_v56 = vmul.f32 0.7978846, %v864_v47  ;;  %v929_v57 = vmul.f32 0.7978846, %v865_v48  ;;  %4184 = vtanh.f32 %v896_v52  ;;  %v516_v6 = vadd.f32 %v3903_v62, %v4557_v5 }
  0x1e   : > { %4186 = vtanh.f32 %v897_v53  ;;  %v4618_v7 = vadd.f32 %v3904_v2, %v4557_v5  ;;  %v3967_v8 = vunpack.c.l.bf16 %v4038_v63  ;;  %v3968_v9 = vunpack.c.h.bf16 %v4038_v63 }
  0x1f   : > { %4188 = vtanh.f32 %v928_v56  ;;  %v4623_v11 = vmul.f32 0.5, %v544_v19  ;;  %v930_v12 = vmul.f32 0.7978846, %v866_v3  ;;  %v931_v13 = vmul.f32 0.7978846, %v867_v4 }
  0x20   : > { %4190 = vtanh.f32 %v929_v57  ;;  %v4626_v14 = vmul.f32 0.5, %v4572_v20  ;;  %v644_v15 = vmul.f32 %v516_v6, %v516_v6  ;;  %v645_v16 = vmul.f32 %v4618_v7, %v4618_v7  ;;  %v4039_v20 = vld [vmem:[%s7172_s0 + $0x98] sm:$0xff]  }
  0x21   : > { %4192 = vtanh.f32 %v898_v0  ;;  %v4631_v17 = vadd.f32 %v3967_v8, %v4557_v5  ;;  %v4634_v18 = vadd.f32 %v3968_v9, %v4557_v5  ;;  %v3907_v19 = vunpack.c.l.bf16 %v4023_v10 }
  0x22   : > { %4194 = vtanh.f32 %v899_v1  ;;  %v708_v23 = vmul.f32 %v644_v15, %v516_v6  ;;  %v709_v24 = vmul.f32 %v645_v16, %v4618_v7  ;;  %v3908_v25 = vunpack.c.h.bf16 %v4023_v10 }
  0x23   : > { %4196 = vtanh.f32 %v930_v12  ;;  %v578_v26 = vmul.f32 0.5, %v4575_v21  ;;  %v4642_v27 = vmul.f32 0.5, %v4578_v22  ;;  %v676_v28 = vmul.f32 %v4631_v17, %v4631_v17 }
  0x24   : > { %4198 = vtanh.f32 %v931_v13  ;;  %v677_v31 = vmul.f32 %v4634_v18, %v4634_v18  ;;  %v772_v32 = vmul.f32 0.044715, %v708_v23  ;;  %v773_v33 = vmul.f32 0.044715, %v709_v24  ;;  %v4024_v24 = vld [vmem:[%s7172_s0 + $0x20] sm:$0xff]  }
  0x25   : > { %v4649_v34 = vadd.f32 %v3907_v19, %v4557_v5  ;;  %v4652_v37 = vadd.f32 %v3908_v25, %v4557_v5  ;;  %v610_v21 = vmul.f32 0.5, %v4583_v29  ;;  %v740_v22 = vmul.f32 %v676_v28, %v4631_v17  ;;  %v4040_v28 = vld [vmem:[%s7172_s0 + $0xa0] sm:$0xff]  }
  0x26   : > { %v741_v38 = vmul.f32 %v677_v31, %v4634_v18  ;;  %v3971_v39 = vunpack.c.l.bf16 %v4039_v20  ;;  %v611_v40 = vmul.f32 0.5, %v4586_v30  ;;  %v836_v41 = vadd.f32 %v772_v32, %v516_v6 }
  0x27   : > { %v837_v42 = vadd.f32 %v773_v33, %v4618_v7  ;;  %v3972_v43 = vunpack.c.h.bf16 %v4039_v20  ;;  %v804_v44 = vmul.f32 0.044715, %v740_v22  ;;  %v646_v46 = vmul.f32 %v4649_v34, %v4649_v34 }
  0x28   : > { %v805_v45 = vmul.f32 0.044715, %v741_v38  ;;  %v647_v47 = vmul.f32 %v4652_v37, %v4652_v37  ;;  %v4663_v48 = vmul.f32 0.5, %v516_v6  ;;  %v900_v49 = vmul.f32 0.7978846, %v836_v41 }
  0x29   : > { %v901_v50 = vmul.f32 0.7978846, %v837_v42  ;;  %v4666_v51 = vadd.f32 %v3971_v39, %v4557_v5  ;;  %v868_v53 = vadd.f32 %v804_v44, %v4631_v17  ;;  %v710_v55 = vmul.f32 %v646_v46, %v4649_v34 }
  0x2a   : > { %v4185_v29 = vpop.eup %4184  ;;  %v869_v54 = vadd.f32 %v805_v45, %v4634_v18  ;;  %4200 = vtanh.f32 %v900_v49  ;;  %v711_v58 = vmul.f32 %v647_v47, %v4652_v37  ;;  %v4673_v59 = vadd.f32 %v3972_v43, %v4557_v5 }
  0x2b   : > { %v4187_v30 = vpop.eup %4186  ;;  %v1024_v52 = vadd.f32 1.0, %v4185_v29  ;;  %4202 = vtanh.f32 %v901_v50  ;;  %v932_v63 = vmul.f32 0.7978846, %v868_v53  ;;  %v774_v4 = vmul.f32 0.044715, %v710_v55 }
  0x2c   : > { %v4189_v56 = vpop.eup %4188  ;;  %v1025_v57 = vadd.f32 1.0, %v4187_v30  ;;  %v933_v3 = vmul.f32 0.7978846, %v869_v54  ;;  %v775_v10 = vmul.f32 0.044715, %v711_v58  ;;  %v678_v22 = vmul.f32 %v4666_v51, %v4666_v51 }
  0x2d   : > { %v4191_v60 = vpop.eup %4190  ;;  %v4676_v61 = vmul.f32 %v1024_v52, %v4593_v35  ;;  %v1056_v62 = vadd.f32 1.0, %v4189_v56  ;;  %4204 = vtanh.f32 %v932_v63  ;;  %v838_v23 = vadd.f32 %v774_v4, %v4649_v34 }
  0x2e   : > { %v4193_v0 = vpop.eup %4192  ;;  %v4679_v1 = vmul.f32 %v1025_v57, %v4595_v36  ;;  %v1057_v2 = vadd.f32 1.0, %v4191_v60  ;;  %4206 = vtanh.f32 %v933_v3  ;;  %v3911_v39 = vunpack.c.l.bf16 %v4024_v24 }
  0x2f   : > { %v4195_v6 = vpop.eup %4194  ;;  %v4682_v8 = vmul.f32 %v1056_v62, %v4623_v11  ;;  %v1026_v9 = vadd.f32 1.0, %v4193_v0  ;;  %v839_v11 = vadd.f32 %v775_v10, %v4652_v37  ;;  %v902_v32 = vmul.f32 0.7978846, %v838_v23 }
  0x30   : > { %v4197_v12 = vpop.eup %4196  ;;  %v1808_v35 = vpack.c.bf16 %v4679_v1, %v4676_v61  ;;  %v4687_v13 = vmul.f32 %v1057_v2, %v4626_v14  ;;  %v1027_v15 = vadd.f32 1.0, %v4195_v6  ;;  %v3912_v41 = vunpack.c.h.bf16 %v4024_v24 }
  0x31   : > { %v4199_v36 = vpop.eup %4198  ;;  %v4689_v16 = vmul.f32 %v1026_v9, %v578_v26  ;;  %v1058_v19 = vadd.f32 1.0, %v4197_v12  ;;  %v581_v26 = vmul.f32 0.5, %v4618_v7  ;;  %v903_v33 = vmul.f32 0.7978846, %v839_v11 }
  0x32   : > { %4090 = vmatprep.mubr.msk.bf16.mxu0 %vm1223_vm0, %v1808_v35  ;;  %v1824_v14 = vpack.c.bf16 %v4687_v13, %v4682_v8  ;;  %v4700_v25 = vmul.f32 %v1027_v15, %v4642_v27  ;;  %v1059_v20 = vadd.f32 1.0, %v4199_v36  ;;  %v679_v7 = vmul.f32 %v4673_v59, %v4673_v59 }
  0x33   : > { %v4706_v31 = vmul.f32 %v1058_v19, %v610_v21  ;;  %4208 = vtanh.f32 %v902_v32  ;;  %v742_v21 = vmul.f32 %v678_v22, %v4666_v51  ;;  %v3975_v42 = vunpack.c.l.bf16 %v4040_v28 }
  0x34   : > { %4122 = vmatprep.mubr.msk.bf16.mxu1 %vm1223_vm0, %v1824_v14  ;;  %v1809_v27 = vpack.c.bf16 %v4700_v25, %v4689_v16  ;;  %v4713_v38 = vmul.f32 %v1059_v20, %v611_v40  ;;  %4210 = vtanh.f32 %v903_v33  ;;  %v743_v44 = vmul.f32 %v679_v7, %v4673_v59 }
  0x35   : > { %7218 = vst [vmem:[#allocation4_spill] sm:$0xff] %v4706_v31  ;;  %v4723_v40 = vadd.f32 %v3911_v39, %v4557_v5  ;;  %v612_v45 = vmul.f32 0.5, %v4631_v17  ;;  %v806_v46 = vmul.f32 0.044715, %v742_v21  ;;  %v4727_v47 = vadd.f32 %v3912_v41, %v4557_v5  ;;  %v4025_v17 = vld [vmem:[%s7172_s0 + $0x28] sm:$0xff]  }
  0x36   : > { %7219 = vst [vmem:[#allocation5_spill] sm:$0xff] %v4713_v38  ;;  %4091 = vmatmul.mubr.msk.bf16.vlgmr.msra.gmra.mxu0 %vm1223_vm0, %v1809_v27  ;;  %v1825_v43 = vpack.c.bf16 %v4713_v38, %v4706_v31  ;;  %v3976_v29 = vunpack.c.h.bf16 %v4040_v28  ;;  %v613_v49 = vmul.f32 0.5, %v4634_v18  ;;  %v807_v50 = vmul.f32 0.044715, %v743_v44 }
  0x37   : > { %v648_v30 = vmul.f32 %v4723_v40, %v4723_v40  ;;  %v4734_v52 = vadd.f32 %v3975_v42, %v4557_v5  ;;  %v4201_v53 = vpop.eup %4200  ;;  %v582_v54 = vmul.f32 0.5, %v4649_v34  ;;  %v583_v55 = vmul.f32 0.5, %v4652_v37 }
  0x38   : > { %4123 = vmatmul.mubr.msk.bf16.vlgmr.msra.gmra.mxu1 %vm1223_vm0, %v1825_v43  ;;  %v870_v56 = vadd.f32 %v806_v46, %v4666_v51  ;;  %v649_v18 = vmul.f32 %v4727_v47, %v4727_v47  ;;  %v4203_v57 = vpop.eup %4202  ;;  %v1028_v58 = vadd.f32 1.0, %v4201_v53  ;;  %v871_v60 = vadd.f32 %v807_v50, %v4673_v59 }
  0x39   : > { %v712_v62 = vmul.f32 %v648_v30, %v4723_v40  ;;  %v4747_v63 = vadd.f32 %v3976_v29, %v4557_v5  ;;  %v1029_v0 = vadd.f32 1.0, %v4203_v57  ;;  %v3915_v3 = vunpack.c.l.bf16 %v4025_v17 }
  0x3a   : > { %v934_v2 = vmul.f32 0.7978846, %v870_v56  ;;  %v713_v34 = vmul.f32 %v649_v18, %v4727_v47  ;;  %v4205_v37 = vpop.eup %4204  ;;  %v4751_v4 = vmul.f32 %v1028_v58, %v4663_v48  ;;  %v935_v6 = vmul.f32 0.7978846, %v871_v60  ;;  %v4041_v48 = vld [vmem:[%s7172_s0 + $0xa8] sm:$0xff]   ;;  %v4026_v56 = vld [vmem:[%s7172_s0 + $0x30] sm:$0xff]  }
  0x3b   : > { %v776_v9 = vmul.f32 0.044715, %v712_v62  ;;  %v680_v10 = vmul.f32 %v4734_v52, %v4734_v52  ;;  %v4207_v12 = vpop.eup %4206  ;;  %v4755_v35 = vmul.f32 %v1029_v0, %v581_v26  ;;  %v1060_v15 = vadd.f32 1.0, %v4205_v37 }
  0x3c   : > { %4212 = vtanh.f32 %v934_v2  ;;  %v777_v36 = vmul.f32 0.044715, %v713_v34  ;;  %v1061_v19 = vadd.f32 1.0, %v4207_v12  ;;  %v681_v11 = vmul.f32 %v4747_v63, %v4747_v63 }
  0x3d   : > { %4214 = vtanh.f32 %v935_v6  ;;  %v840_v23 = vadd.f32 %v776_v9, %v4723_v40  ;;  %v1810_v24 = vpack.c.bf16 %v4755_v35, %v4751_v4  ;;  %v4765_v14 = vmul.f32 %v1060_v15, %v612_v45 }
  0x3e   : > { %v841_v20 = vadd.f32 %v777_v36, %v4727_v47  ;;  %v744_v26 = vmul.f32 %v680_v10, %v4734_v52  ;;  %v4769_v28 = vmul.f32 %v1061_v19, %v613_v49  ;;  %v745_v33 = vmul.f32 %v681_v11, %v4747_v63 }
  0x3f   : > { %7220 = vst [vmem:[#allocation6_spill] sm:$0xff] %v4765_v14  ;;  %v904_v32 = vmul.f32 0.7978846, %v840_v23  ;;  %v3916_v22 = vunpack.c.h.bf16 %v4025_v17  ;;  %4094 = vmatprep.mubr.msk.bf16.mxu0 %vm1223_vm0, %v1810_v24  ;;  %v4774_v39 = vadd.f32 %v3915_v3, %v4557_v5  ;;  %v3979_v21 = vunpack.c.l.bf16 %v4041_v48 }
  0x40   : > { %7221 = vst [vmem:[#allocation7_spill] sm:$0xff] %v4769_v28  ;;  %v905_v27 = vmul.f32 0.7978846, %v841_v20  ;;  %v808_v7 = vmul.f32 0.044715, %v744_v26  ;;  %v4209_v41 = vpop.eup %4208  ;;  %v1826_v42 = vpack.c.bf16 %v4769_v28, %v4765_v14  ;;  %v614_v29 = vmul.f32 0.5, %v4666_v51 }
  0x41   : > { %4216 = vtanh.f32 %v904_v32  ;;  %v809_v43 = vmul.f32 0.044715, %v745_v33  ;;  %v4779_v44 = vadd.f32 %v3916_v22, %v4557_v5  ;;  %v4211_v45 = vpop.eup %4210  ;;  %v1030_v46 = vadd.f32 1.0, %v4209_v41  ;;  %v4042_v26 = vld [vmem:[%s7172_s0 + $0xb0] sm:$0xff]  }
  0x42   : > { %4218 = vtanh.f32 %v905_v27  ;;  %v872_v49 = vadd.f32 %v808_v7, %v4734_v52  ;;  %4126 = vmatprep.mubr.msk.bf16.mxu1 %vm1223_vm0, %v1826_v42  ;;  %v1031_v50 = vadd.f32 1.0, %v4211_v45  ;;  %v615_v30 = vmul.f32 0.5, %v4673_v59 }
  0x43   : > { %v873_v17 = vadd.f32 %v809_v43, %v4747_v63  ;;  %v650_v53 = vmul.f32 %v4774_v39, %v4774_v39  ;;  %v4791_v18 = vmul.f32 %v1030_v46, %v582_v54  ;;  %v651_v57 = vmul.f32 %v4779_v44, %v4779_v44 }
  0x44   : > { %v936_v51 = vmul.f32 0.7978846, %v872_v49  ;;  %v3980_v58 = vunpack.c.h.bf16 %v4041_v48  ;;  %v4795_v60 = vmul.f32 %v1031_v50, %v583_v55  ;;  %v4799_v0 = vadd.f32 %v3979_v21, %v4557_v5 }
  0x45   : > { %v937_v62 = vmul.f32 0.7978846, %v873_v17  ;;  %v714_v59 = vmul.f32 %v650_v53, %v4774_v39  ;;  %v715_v2 = vmul.f32 %v651_v57, %v4779_v44  ;;  %v3919_v54 = vunpack.c.l.bf16 %v4026_v56 }
  0x46   : > { %4220 = vtanh.f32 %v936_v51  ;;  %v4803_v34 = vadd.f32 %v3980_v58, %v4557_v5  ;;  %v1811_v3 = vpack.c.bf16 %v4795_v60, %v4791_v18  ;;  %v584_v37 = vmul.f32 0.5, %v4723_v40  ;;  %v4027_v51 = vld [vmem:[%s7172_s0 + $0x38] sm:$0xff]  }
  0x47   : > { %4222 = vtanh.f32 %v937_v62  ;;  %v778_v55 = vmul.f32 0.044715, %v714_v59  ;;  %v585_v6 = vmul.f32 0.5, %v4727_v47  ;;  %v779_v9 = vmul.f32 0.044715, %v715_v2 }
  0x48   : > { %v682_v10 = vmul.f32 %v4799_v0, %v4799_v0  ;;  %v683_v12 = vmul.f32 %v4803_v34, %v4803_v34  ;;  %4095 = vmatmul.mubr.msk.bf16.gmra.mxu0 %vm1223_vm0, %v1811_v3  ;;  %v616_v36 = vmul.f32 0.5, %v4734_v52  ;;  %v3920_v23 = vunpack.c.h.bf16 %v4026_v56 }
  0x49   : > { %v4213_v15 = vpop.eup %4212  ;;  %v842_v19 = vadd.f32 %v778_v55, %v4774_v39  ;;  %v4817_v40 = vadd.f32 %v3919_v54, %v4557_v5  ;;  %v843_v48 = vadd.f32 %v779_v9, %v4779_v44  ;;  %v617_v52 = vmul.f32 0.5, %v4747_v63 }
  0x4a   : > { %v4215_v11 = vpop.eup %4214  ;;  %v1062_v47 = vadd.f32 1.0, %v4213_v15  ;;  %v746_v24 = vmul.f32 %v682_v10, %v4799_v0  ;;  %v747_v20 = vmul.f32 %v683_v12, %v4803_v34  ;;  %v4827_v22 = vadd.f32 %v3920_v23, %v4557_v5 }
  0x4b   : > { %v1063_v32 = vadd.f32 1.0, %v4215_v11  ;;  %v906_v33 = vmul.f32 0.7978846, %v842_v19  ;;  %v907_v7 = vmul.f32 0.7978846, %v843_v48  ;;  %v652_v43 = vmul.f32 %v4817_v40, %v4817_v40 }
  0x4c   : > { %v4829_v27 = vmul.f32 %v1062_v47, %v614_v29  ;;  %v810_v21 = vmul.f32 0.044715, %v746_v24  ;;  %v811_v41 = vmul.f32 0.044715, %v747_v20  ;;  %v3983_v45 = vunpack.c.l.bf16 %v4042_v26 }
  0x4d   : > { %v4831_v42 = vmul.f32 %v1063_v32, %v615_v30  ;;  %4224 = vtanh.f32 %v906_v33  ;;  %v653_v29 = vmul.f32 %v4827_v22, %v4827_v22  ;;  %v716_v53 = vmul.f32 %v652_v43, %v4817_v40 }
  0x4e   : > { %7222 = vst [vmem:[#allocation8_spill] sm:$0xff] %v4829_v27  ;;  %v4217_v46 = vpop.eup %4216  ;;  %4226 = vtanh.f32 %v907_v7  ;;  %v874_v63 = vadd.f32 %v810_v21, %v4799_v0  ;;  %v875_v49 = vadd.f32 %v811_v41, %v4803_v34  ;;  %v3984_v56 = vunpack.c.h.bf16 %v4042_v26 }
  0x4f   : > { %7223 = vst [vmem:[#allocation9_spill] sm:$0xff] %v4831_v42  ;;  %v4219_v50 = vpop.eup %4218  ;;  %v1827_v17 = vpack.c.bf16 %v4831_v42, %v4829_v27  ;;  %v1032_v30 = vadd.f32 1.0, %v4217_v46  ;;  %v717_v59 = vmul.f32 %v653_v29, %v4827_v22  ;;  %v780_v54 = vmul.f32 0.044715, %v716_v53  ;;  %v4043_v46 = vld [vmem:[%s7172_s0 + $0xb8] sm:$0xff]  }
  0x50   : > { %v1033_v57 = vadd.f32 1.0, %v4219_v50  ;;  %v938_v58 = vmul.f32 0.7978846, %v874_v63  ;;  %v939_v62 = vmul.f32 0.7978846, %v875_v49  ;;  %v4850_v3 = vadd.f32 %v3983_v45, %v4557_v5 }
  0x51   : > { %4127 = vmatmul.mubr.msk.bf16.gmra.mxu1 %vm1223_vm0, %v1827_v17  ;;  %v4847_v2 = vmul.f32 %v1032_v30, %v584_v37  ;;  %v4853_v55 = vadd.f32 %v3984_v56, %v4557_v5  ;;  %v781_v10 = vmul.f32 0.044715, %v717_v59  ;;  %v3923_v12 = vunpack.c.l.bf16 %v4027_v51 }
  0x52   : > { %v4855_v9 = vmul.f32 %v1033_v57, %v585_v6  ;;  %4228 = vtanh.f32 %v938_v58  ;;  %v586_v19 = vmul.f32 0.5, %v4774_v39  ;;  %v587_v23 = vmul.f32 0.5, %v4779_v44 }
  0x53   : > { %v4221_v15 = vpop.eup %4220  ;;  %4230 = vtanh.f32 %v939_v62  ;;  %v844_v37 = vadd.f32 %v780_v54, %v4817_v40  ;;  %v845_v24 = vadd.f32 %v781_v10, %v4827_v22  ;;  %v684_v6 = vmul.f32 %v4850_v3, %v4850_v3  ;;  %v4028_v54 = vld [vmem:[%s7172_s0 + $0x40] sm:$0xff]  }
  0x54   : > { %v4223_v11 = vpop.eup %4222  ;;  %v1812_v47 = vpack.c.bf16 %v4855_v9, %v4847_v2  ;;  %v1064_v48 = vadd.f32 1.0, %v4221_v15  ;;  %v685_v39 = vmul.f32 %v4853_v55, %v4853_v55  ;;  %v3924_v32 = vunpack.c.h.bf16 %v4027_v51 }
  0x55   : > { %v1065_v20 = vadd.f32 1.0, %v4223_v11  ;;  %v908_v26 = vmul.f32 0.7978846, %v844_v37  ;;  %v909_v33 = vmul.f32 0.7978846, %v845_v24  ;;  %v748_v7 = vmul.f32 %v684_v6, %v4850_v3 }
  0x56   : > { %4098 = vmatprep.mubr.msk.bf16.mxu0 %vm1223_vm0, %v1812_v47  ;;  %v4868_v44 = vmul.f32 %v1064_v48, %v616_v36  ;;  %v4872_v21 = vadd.f32 %v3923_v12, %v4557_v5  ;;  %v749_v43 = vmul.f32 %v685_v39, %v4853_v55  ;;  %v4878_v45 = vadd.f32 %v3924_v32, %v4557_v5 }
  0x57   : > { %v4874_v41 = vmul.f32 %v1065_v20, %v617_v52  ;;  %4232 = vtanh.f32 %v908_v26  ;;  %v618_v36 = vmul.f32 0.5, %v4799_v0  ;;  %v812_v63 = vmul.f32 0.044715, %v748_v7 }
  0x58   : > { %7224 = vst [vmem:[#allocation10_spill] sm:$0xff] %v4868_v44  ;;  %4234 = vtanh.f32 %v909_v33  ;;  %v654_v49 = vmul.f32 %v4872_v21, %v4872_v21  ;;  %v619_v29 = vmul.f32 0.5, %v4803_v34  ;;  %v813_v50 = vmul.f32 0.044715, %v749_v43 }
  0x59   : > { %7225 = vst [vmem:[#allocation11_spill] sm:$0xff] %v4874_v41  ;;  %v1828_v52 = vpack.c.bf16 %v4874_v41, %v4868_v44  ;;  %v655_v17 = vmul.f32 %v4878_v45, %v4878_v45  ;;  %v876_v53 = vadd.f32 %v812_v63, %v4850_v3  ;;  %v3987_v0 = vunpack.c.l.bf16 %v4043_v46 }
  0x5a   : > { %v4225_v30 = vpop.eup %4224  ;;  %v718_v56 = vmul.f32 %v654_v49, %v4872_v21  ;;  %v3988_v51 = vunpack.c.h.bf16 %v4043_v46  ;;  %v588_v62 = vmul.f32 0.5, %v4817_v40  ;;  %v877_v59 = vadd.f32 %v813_v50, %v4853_v55  ;;  %v4029_v50 = vld [vmem:[%s7172_s0 + $0x48] sm:$0xff]  }
  0x5b   : > { %v4227_v57 = vpop.eup %4226  ;;  %4130 = vmatprep.mubr.msk.bf16.mxu1 %vm1223_vm0, %v1828_v52  ;;  %v1034_v58 = vadd.f32 1.0, %v4225_v30  ;;  %v719_v34 = vmul.f32 %v655_v17, %v4878_v45  ;;  %v940_v12 = vmul.f32 0.7978846, %v876_v53  ;;  %v4901_v37 = vadd.f32 %v3987_v0, %v4557_v5 }
  0x5c   : > { %v1035_v10 = vadd.f32 1.0, %v4227_v57  ;;  %v782_v15 = vmul.f32 0.044715, %v718_v56  ;;  %v941_v47 = vmul.f32 0.7978846, %v877_v59  ;;  %v4906_v40 = vadd.f32 %v3988_v51, %v4557_v5 }
  0x5d   : > { %v4903_v11 = vmul.f32 %v1034_v58, %v586_v19  ;;  %v783_v48 = vmul.f32 0.044715, %v719_v34  ;;  %4236 = vtanh.f32 %v940_v12  ;;  %v3927_v20 = vunpack.c.l.bf16 %v4028_v54 }
  0x5e   : > { %v4908_v24 = vmul.f32 %v1035_v10, %v587_v23  ;;  %v846_v6 = vadd.f32 %v782_v15, %v4872_v21  ;;  %v589_v39 = vmul.f32 0.5, %v4827_v22  ;;  %4238 = vtanh.f32 %v941_v47 }
  0x5f   : > { %v4229_v26 = vpop.eup %4228  ;;  %v847_v32 = vadd.f32 %v783_v48, %v4878_v45  ;;  %v686_v19 = vmul.f32 %v4901_v37, %v4901_v37  ;;  %v687_v46 = vmul.f32 %v4906_v40, %v4906_v40  ;;  %v3928_v22 = vunpack.c.h.bf16 %v4028_v54 }
  0x60   : > { %v4231_v33 = vpop.eup %4230  ;;  %v1813_v7 = vpack.c.bf16 %v4908_v24, %v4903_v11  ;;  %v1066_v43 = vadd.f32 1.0, %v4229_v26  ;;  %v910_v23 = vmul.f32 0.7978846, %v846_v6  ;;  %v4928_v53 = vadd.f32 %v3927_v20, %v4557_v5 }
  0x61   : > { %v1067_v63 = vadd.f32 1.0, %v4231_v33  ;;  %v911_v49 = vmul.f32 0.7978846, %v847_v32  ;;  %v750_v52 = vmul.f32 %v686_v19, %v4901_v37  ;;  %v751_v30 = vmul.f32 %v687_v46, %v4906_v40 }
  0x62   : > { %4099 = vmatmul.mubr.msk.bf16.gmra.mxu0 %vm1223_vm0, %v1813_v7  ;;  %v4924_v17 = vmul.f32 %v1066_v43, %v618_v36  ;;  %4240 = vtanh.f32 %v910_v23  ;;  %v4933_v51 = vadd.f32 %v3928_v22, %v4557_v5  ;;  %v620_v58 = vmul.f32 0.5, %v4850_v3  ;;  %v4044_v23 = vld [vmem:[%s7172_s0 + $0xc0] sm:$0xff]  }
  0x63   : > { %v4930_v56 = vmul.f32 %v1067_v63, %v619_v29  ;;  %4242 = vtanh.f32 %v911_v49  ;;  %v814_v0 = vmul.f32 0.044715, %v750_v52  ;;  %v815_v59 = vmul.f32 0.044715, %v751_v30 }
  0x64   : > { %7226 = vst [vmem:[#allocation12_spill] sm:$0xff] %v4924_v17  ;;  %v4233_v57 = vpop.eup %4232  ;;  %v656_v36 = vmul.f32 %v4928_v53, %v4928_v53  ;;  %v3931_v34 = vunpack.c.l.bf16 %v4029_v50  ;;  %v621_v29 = vmul.f32 0.5, %v4853_v55  ;;  %v657_v3 = vmul.f32 %v4933_v51, %v4933_v51 }
  0x65   : > { %7227 = vst [vmem:[#allocation13_spill] sm:$0xff] %v4930_v56  ;;  %v4235_v54 = vpop.eup %4234  ;;  %v1829_v10 = vpack.c.bf16 %v4930_v56, %v4924_v17  ;;  %v1036_v12 = vadd.f32 1.0, %v4233_v57  ;;  %v878_v15 = vadd.f32 %v814_v0, %v4901_v37  ;;  %v879_v48 = vadd.f32 %v815_v59, %v4906_v40 }
  0x66   : > { %v1037_v47 = vadd.f32 1.0, %v4235_v54  ;;  %v720_v6 = vmul.f32 %v656_v36, %v4928_v53  ;;  %v3932_v32 = vunpack.c.h.bf16 %v4029_v50  ;;  %v4950_v19 = vadd.f32 %v3931_v34, %v4557_v5 }
  0x67   : > { %4131 = vmatmul.mubr.msk.bf16.gmra.mxu1 %vm1223_vm0, %v1829_v10  ;;  %v4947_v20 = vmul.f32 %v1036_v12, %v588_v62  ;;  %v942_v26 = vmul.f32 0.7978846, %v878_v15  ;;  %v943_v33 = vmul.f32 0.7978846, %v879_v48  ;;  %v721_v7 = vmul.f32 %v657_v3, %v4933_v51 }
  0x68   : > { %v4952_v55 = vmul.f32 %v1037_v47, %v589_v39  ;;  %v784_v43 = vmul.f32 0.044715, %v720_v6  ;;  %v590_v46 = vmul.f32 0.5, %v4872_v21  ;;  %v4960_v62 = vadd.f32 %v3932_v32, %v4557_v5 }
  0x69   : > { %4244 = vtanh.f32 %v942_v26  ;;  %v658_v63 = vmul.f32 %v4950_v19, %v4950_v19  ;;  %v785_v49 = vmul.f32 0.044715, %v721_v7  ;;  %v591_v50 = vmul.f32 0.5, %v4878_v45 }
  0x6a   : > { %v1814_v39 = vpack.c.bf16 %v4952_v55, %v4947_v20  ;;  %4246 = vtanh.f32 %v943_v33  ;;  %v848_v52 = vadd.f32 %v784_v43, %v4928_v53  ;;  %v4237_v22 = vpop.eup %4236  ;;  %v659_v21 = vmul.f32 %v4960_v62, %v4960_v62  ;;  %v4045_v43 = vld [vmem:[%s7172_s0 + $0xc8] sm:$0xff]  }
  0x6b   : > { %v722_v30 = vmul.f32 %v658_v63, %v4950_v19  ;;  %v3991_v0 = vunpack.c.l.bf16 %v4044_v23  ;;  %v4239_v57 = vpop.eup %4238  ;;  %v1068_v59 = vadd.f32 1.0, %v4237_v22  ;;  %v849_v36 = vadd.f32 %v785_v49, %v4933_v51  ;;  %v4030_v22 = vld [vmem:[%s7172_s0 + $0x50] sm:$0xff]  }
  0x6c   : > { %4102 = vmatprep.mubr.msk.bf16.mxu0 %vm1223_vm0, %v1814_v39  ;;  %v912_v34 = vmul.f32 0.7978846, %v848_v52  ;;  %v3992_v54 = vunpack.c.h.bf16 %v4044_v23  ;;  %v1069_v10 = vadd.f32 1.0, %v4239_v57  ;;  %v723_v12 = vmul.f32 %v659_v21, %v4960_v62 }
  0x6d   : > { %v786_v15 = vmul.f32 0.044715, %v722_v30  ;;  %v4975_v45 = vadd.f32 %v3991_v0, %v4557_v5  ;;  %v4977_v47 = vmul.f32 %v1068_v59, %v620_v58  ;;  %v913_v48 = vmul.f32 0.7978846, %v849_v36 }
  0x6e   : > { %4248 = vtanh.f32 %v912_v34  ;;  %v4980_v3 = vadd.f32 %v3992_v54, %v4557_v5  ;;  %v4982_v26 = vmul.f32 %v1069_v10, %v621_v29  ;;  %v622_v32 = vmul.f32 0.5, %v4901_v37 }
  0x6f   : > { %7228 = vst [vmem:[#allocation14_spill] sm:$0xff] %v4977_v47  ;;  %v4241_v6 = vpop.eup %4240  ;;  %v787_v33 = vmul.f32 0.044715, %v723_v12  ;;  %v850_v7 = vadd.f32 %v786_v15, %v4950_v19  ;;  %v623_v63 = vmul.f32 0.5, %v4906_v40  ;;  %4250 = vtanh.f32 %v913_v48 }
  0x70   : > { %7229 = vst [vmem:[#allocation15_spill] sm:$0xff] %v4982_v26  ;;  %v4243_v23 = vpop.eup %4242  ;;  %v1038_v58 = vadd.f32 1.0, %v4241_v6  ;;  %v688_v39 = vmul.f32 %v4975_v45, %v4975_v45  ;;  %v1830_v29 = vpack.c.bf16 %v4982_v26, %v4977_v47  ;;  %v689_v40 = vmul.f32 %v4980_v3, %v4980_v3 }
  0x71   : > { %v1039_v49 = vadd.f32 1.0, %v4243_v23  ;;  %v851_v37 = vadd.f32 %v787_v33, %v4960_v62  ;;  %v914_v52 = vmul.f32 0.7978846, %v850_v7  ;;  %v3995_v0 = vunpack.c.l.bf16 %v4045_v43 }
  0x72   : > { %v4998_v21 = vmul.f32 %v1038_v58, %v590_v46  ;;  %v752_v30 = vmul.f32 %v688_v39, %v4975_v45  ;;  %4134 = vmatprep.mubr.msk.bf16.mxu1 %vm1223_vm0, %v1830_v29  ;;  %v3996_v36 = vunpack.c.h.bf16 %v4045_v43  ;;  %v753_v34 = vmul.f32 %v689_v40, %v4980_v3 }
  0x73   : > { %v5004_v57 = vmul.f32 %v1039_v49, %v591_v50  ;;  %v915_v59 = vmul.f32 0.7978846, %v851_v37  ;;  %4252 = vtanh.f32 %v914_v52  ;;  %v5008_v10 = vadd.f32 %v3995_v0, %v4557_v5 }
  0x74   : > { %v816_v54 = vmul.f32 0.044715, %v752_v30  ;;  %v3935_v46 = vunpack.c.l.bf16 %v4030_v22  ;;  %v5013_v15 = vadd.f32 %v3996_v36, %v4557_v5  ;;  %v3936_v48 = vunpack.c.h.bf16 %v4030_v22 }
  0x75   : > { %v1815_v12 = vpack.c.bf16 %v5004_v57, %v4998_v21  ;;  %4254 = vtanh.f32 %v915_v59  ;;  %v592_v6 = vmul.f32 0.5, %v4928_v53  ;;  %v817_v33 = vmul.f32 0.044715, %v753_v34 }
  0x76   : > { %v4245_v50 = vpop.eup %4244  ;;  %v880_v7 = vadd.f32 %v816_v54, %v4975_v45  ;;  %v690_v43 = vmul.f32 %v5008_v10, %v5008_v10  ;;  %v593_v39 = vmul.f32 0.5, %v4933_v51  ;;  %v691_v29 = vmul.f32 %v5013_v15, %v5013_v15  ;;  %v4031_v54 = vld [vmem:[%s7172_s0 + $0x58] sm:$0xff]  }
  0x77   : > { %v4247_v23 = vpop.eup %4246  ;;  %4103 = vmatmul.mubr.msk.bf16.gmra.mxu0 %vm1223_vm0, %v1815_v12  ;;  %v1070_v58 = vadd.f32 1.0, %v4245_v50  ;;  %v5024_v49 = vadd.f32 %v3935_v46, %v4557_v5  ;;  %v881_v53 = vadd.f32 %v817_v33, %v4980_v3  ;;  %v594_v30 = vmul.f32 0.5, %v4950_v19 }
  0x78   : > { %v1071_v37 = vadd.f32 1.0, %v4247_v23  ;;  %v944_v52 = vmul.f32 0.7978846, %v880_v7  ;;  %v754_v22 = vmul.f32 %v690_v43, %v5008_v10  ;;  %v755_v0 = vmul.f32 %v691_v29, %v5013_v15 }
  0x79   : > { %v5028_v40 = vmul.f32 %v1070_v58, %v622_v32  ;;  %v5033_v51 = vadd.f32 %v3936_v48, %v4557_v5  ;;  %v945_v36 = vmul.f32 0.7978846, %v881_v53  ;;  %v595_v32 = vmul.f32 0.5, %v4960_v62  ;;  %v4046_v58 = vld [vmem:[%s7172_s0 + $0xd0] sm:$0xff]  }
  0x7a   : > { %v5035_v59 = vmul.f32 %v1071_v37, %v623_v63  ;;  %4256 = vtanh.f32 %v944_v52  ;;  %v818_v34 = vmul.f32 0.044715, %v754_v22  ;;  %v819_v12 = vmul.f32 0.044715, %v755_v0 }
  0x7b   : > { %7230 = vst [vmem:[#allocation16_spill] sm:$0xff] %v5028_v40  ;;  %v4249_v46 = vpop.eup %4248  ;;  %v660_v19 = vmul.f32 %v5024_v49, %v5024_v49  ;;  %v661_v5 = vmul.f32 %v5033_v51, %v5033_v51  ;;  %4258 = vtanh.f32 %v945_v36  ;;  %v3939_v23 = vunpack.c.l.bf16 %v4031_v54 }
  0x7c   : > { %7231 = vst [vmem:[#allocation17_spill] sm:$0xff] %v5035_v59  ;;  %v1831_v63 = vpack.c.bf16 %v5035_v59, %v5028_v40  ;;  %v1040_v48 = vadd.f32 1.0, %v4249_v46  ;;  %v882_v50 = vadd.f32 %v818_v34, %v5008_v10  ;;  %v4251_v33 = vpop.eup %4250  ;;  %v883_v7 = vadd.f32 %v819_v12, %v5013_v15  ;;  %v5060_v34 = vld [vmem:[%s7173_s1] ss:$0 sm:$0xff] }
  0x7d   : > { %v724_v43 = vmul.f32 %v660_v19, %v5024_v49  ;;  %v725_v62 = vmul.f32 %v661_v5, %v5033_v51  ;;  %v1041_v29 = vadd.f32 1.0, %v4251_v33  ;;  %v3940_v52 = vunpack.c.h.bf16 %v4031_v54 }
  0x7e   : > { %4135 = vmatmul.mubr.msk.bf16.gmra.mxu1 %vm1223_vm0, %v1831_v63  ;;  %v5055_v37 = vmul.f32 %v1040_v48, %v592_v6  ;;  %v946_v53 = vmul.f32 0.7978846, %v882_v50  ;;  %v947_v22 = vmul.f32 0.7978846, %v883_v7  ;;  %v5063_v46 = vadd.f32 %v5060_v34, %v3939_v23 }
  0x7f   : > { %v788_v0 = vmul.f32 0.044715, %v724_v43  ;;  %v789_v36 = vmul.f32 0.044715, %v725_v62  ;;  %v5065_v19 = vmul.f32 %v1041_v29, %v593_v39  ;;  %v5068_v6 = vadd.f32 %v5060_v34, %v3940_v52  ;;  %v4047_v62 = vld [vmem:[%s7172_s0 + $0xd8] sm:$0xff]  }
  0x80   : > { %v4253_v12 = vpop.eup %4252  ;;  %4260 = vtanh.f32 %v946_v53  ;;  %v3999_v5 = vunpack.c.l.bf16 %v4046_v58  ;;  %v624_v7 = vmul.f32 0.5, %v4975_v45  ;;  %v625_v39 = vmul.f32 0.5, %v4980_v3 }
  0x81   : > { %v1042_v54 = vadd.f32 1.0, %v4253_v12  ;;  %4262 = vtanh.f32 %v947_v22  ;;  %v852_v63 = vadd.f32 %v788_v0, %v5024_v49  ;;  %v853_v48 = vadd.f32 %v789_v36, %v5033_v51 }
  0x82   : > { %v4255_v50 = vpop.eup %4254  ;;  %v1816_v33 = vpack.c.bf16 %v5065_v19, %v5055_v37  ;;  %v662_v43 = vmul.f32 %v5063_v46, %v5063_v46  ;;  %v663_v22 = vmul.f32 %v5068_v6, %v5068_v6  ;;  %v4000_v3 = vunpack.c.h.bf16 %v4046_v58 }
  0x83   : > { %v1043_v23 = vadd.f32 1.0, %v4255_v50  ;;  %v5081_v29 = vmul.f32 %v1042_v54, %v594_v30  ;;  %v916_v53 = vmul.f32 0.7978846, %v852_v63  ;;  %v917_v52 = vmul.f32 0.7978846, %v853_v48 }
  0x84   : > { %4106 = vmatprep.mubr.msk.bf16.mxu0 %vm1223_vm0, %v1816_v33  ;;  %v726_v45 = vmul.f32 %v662_v43, %v5063_v46  ;;  %v5088_v0 = vadd.f32 %v5060_v34, %v3999_v5  ;;  %v4003_v12 = vunpack.c.l.bf16 %v4047_v62  ;;  %v4004_v50 = vunpack.c.h.bf16 %v4047_v62 }
  0x85   : > { %v5090_v36 = vmul.f32 %v1043_v23, %v595_v32  ;;  %4264 = vtanh.f32 %v916_v53  ;;  %v727_v30 = vmul.f32 %v663_v22, %v5068_v6  ;;  %v5094_v63 = vadd.f32 %v5060_v34, %v4000_v3 }
  0x86   : > { %4266 = vtanh.f32 %v917_v52  ;;  %v790_v54 = vmul.f32 0.044715, %v726_v45  ;;  %v626_v58 = vmul.f32 0.5, %v5008_v10  ;;  %v692_v32 = vmul.f32 %v5088_v0, %v5088_v0 }
  0x87   : > { %v4257_v48 = vpop.eup %4256  ;;  %v1817_v33 = vpack.c.bf16 %v5090_v36, %v5081_v29  ;;  %v5102_v5 = vadd.f32 %v5060_v34, %v4003_v12  ;;  %v627_v62 = vmul.f32 0.5, %v5013_v15  ;;  %v791_v23 = vmul.f32 0.044715, %v727_v30 }
  0x88   : > { %v1072_v43 = vadd.f32 1.0, %v4257_v48  ;;  %v854_v53 = vadd.f32 %v790_v54, %v5063_v46  ;;  %v4259_v52 = vpop.eup %4258  ;;  %v596_v22 = vmul.f32 0.5, %v5024_v49  ;;  %v693_v10 = vmul.f32 %v5094_v63, %v5094_v63  ;;  %v4032_v54 = vld [vmem:[%s7172_s0 + $0x60] sm:$0xff]  }
  0x89   : > { %4107 = vmatmul.mubr.msk.bf16.gmra.mxu0 %vm1223_vm0, %v1817_v33  ;;  %v756_v45 = vmul.f32 %v692_v32, %v5088_v0  ;;  %v5112_v3 = vadd.f32 %v5060_v34, %v4004_v50  ;;  %v1073_v12 = vadd.f32 1.0, %v4259_v52  ;;  %v855_v15 = vadd.f32 %v791_v23, %v5068_v6 }
  0x8a   : > { %v5114_v48 = vmul.f32 %v1072_v43, %v624_v7  ;;  %v918_v30 = vmul.f32 0.7978846, %v854_v53  ;;  %v597_v49 = vmul.f32 0.5, %v5033_v51  ;;  %v757_v33 = vmul.f32 %v693_v10, %v5094_v63 }
  0x8b   : > { %v820_v59 = vmul.f32 0.044715, %v756_v45  ;;  %v694_v32 = vmul.f32 %v5102_v5, %v5102_v5  ;;  %v5124_v50 = vmul.f32 %v1073_v12, %v625_v39  ;;  %v919_v52 = vmul.f32 0.7978846, %v855_v15 }
  0x8c   : > { %7232 = vst [vmem:[#allocation18_spill] sm:$0xff] %v5114_v48  ;;  %4268 = vtanh.f32 %v918_v30  ;;  %v695_v7 = vmul.f32 %v5112_v3, %v5112_v3  ;;  %v821_v23 = vmul.f32 0.044715, %v757_v33  ;;  %v3943_v51 = vunpack.c.l.bf16 %v4032_v54 }
  0x8d   : > { %7233 = vst [vmem:[#allocation19_spill] sm:$0xff] %v5124_v50  ;;  %v4261_v43 = vpop.eup %4260  ;;  %v884_v53 = vadd.f32 %v820_v59, %v5088_v0  ;;  %v758_v40 = vmul.f32 %v694_v32, %v5102_v5  ;;  %v1832_v10 = vpack.c.bf16 %v5124_v50, %v5114_v48  ;;  %4270 = vtanh.f32 %v919_v52 }
  0x8e   : > { %v4263_v26 = vpop.eup %4262  ;;  %v1074_v45 = vadd.f32 1.0, %v4261_v43  ;;  %v759_v39 = vmul.f32 %v695_v7, %v5112_v3  ;;  %v885_v15 = vadd.f32 %v821_v23, %v5094_v63  ;;  %v3944_v32 = vunpack.c.h.bf16 %v4032_v54 }
  0x8f   : > { %v1075_v12 = vadd.f32 1.0, %v4263_v26  ;;  %v948_v30 = vmul.f32 0.7978846, %v884_v53  ;;  %v822_v47 = vmul.f32 0.044715, %v758_v40  ;;  %4138 = vmatprep.mubr.msk.bf16.mxu1 %vm1223_vm0, %v1832_v10  ;;  %v5138_v56 = vadd.f32 %v5060_v34, %v3943_v51 }
  0x90   : > { %v5135_v33 = vmul.f32 %v1074_v45, %v626_v58  ;;  %v823_v59 = vmul.f32 0.044715, %v759_v39  ;;  %v949_v43 = vmul.f32 0.7978846, %v885_v15  ;;  %v598_v7 = vmul.f32 0.5, %v5063_v46 }
  0x91   : > { %v5140_v17 = vmul.f32 %v1075_v12, %v627_v62  ;;  %4272 = vtanh.f32 %v948_v30  ;;  %v886_v52 = vadd.f32 %v822_v47, %v5102_v5  ;;  %v5146_v23 = vadd.f32 %v5060_v34, %v3944_v32  ;;  %v4033_v62 = vld [vmem:[%s7172_s0 + $0x68] sm:$0xff]   ;;  %v4048_v12 = vld [vmem:[%s7172_s0 + $0xe0] sm:$0xff]  }
  0x92   : > { %7234 = vst [vmem:[#allocation20_spill] sm:$0xff] %v5135_v33  ;;  %v4265_v26 = vpop.eup %4264  ;;  %v887_v40 = vadd.f32 %v823_v59, %v5112_v3  ;;  %v664_v58 = vmul.f32 %v5138_v56, %v5138_v56  ;;  %4274 = vtanh.f32 %v949_v43  ;;  %v599_v10 = vmul.f32 0.5, %v5068_v6 }
  0x93   : > { %7235 = vst [vmem:[#allocation21_spill] sm:$0xff] %v5140_v17  ;;  %v4267_v54 = vpop.eup %4266  ;;  %v1833_v53 = vpack.c.bf16 %v5140_v17, %v5135_v33  ;;  %v1044_v47 = vadd.f32 1.0, %v4265_v26  ;;  %v950_v51 = vmul.f32 0.7978846, %v886_v52  ;;  %v665_v39 = vmul.f32 %v5146_v23, %v5146_v23 }
  0x94   : > { %v1045_v46 = vadd.f32 1.0, %v4267_v54  ;;  %v951_v45 = vmul.f32 0.7978846, %v887_v40  ;;  %v728_v30 = vmul.f32 %v664_v58, %v5138_v56  ;;  %v3947_v59 = vunpack.c.l.bf16 %v4033_v62 }
  0x95   : > { %4139 = vmatmul.mubr.msk.bf16.gmra.mxu1 %vm1223_vm0, %v1833_v53  ;;  %v5162_v15 = vmul.f32 %v1044_v47, %v596_v22  ;;  %4276 = vtanh.f32 %v950_v51  ;;  %v729_v6 = vmul.f32 %v665_v39, %v5146_v23  ;;  %v3948_v43 = vunpack.c.h.bf16 %v4033_v62 }
  0x96   : > { %v5165_v32 = vmul.f32 %v1045_v46, %v597_v49  ;;  %4278 = vtanh.f32 %v951_v45  ;;  %v792_v52 = vmul.f32 0.044715, %v728_v30  ;;  %v5169_v26 = vadd.f32 %v5060_v34, %v3947_v59  ;;  %v4049_v49 = vld [vmem:[%s7172_s0 + $0xe8] sm:$0xff]  }
  0x97   : > { %v4007_v40 = vunpack.c.l.bf16 %v4048_v12  ;;  %v4008_v54 = vunpack.c.h.bf16 %v4048_v12  ;;  %v628_v53 = vmul.f32 0.5, %v5088_v0  ;;  %v793_v47 = vmul.f32 0.044715, %v729_v6 }
  0x98   : > { %v1818_v22 = vpack.c.bf16 %v5165_v32, %v5162_v15  ;;  %v5175_v58 = vadd.f32 %v5060_v34, %v3948_v43  ;;  %v629_v51 = vmul.f32 0.5, %v5094_v63  ;;  %v856_v46 = vadd.f32 %v792_v52, %v5138_v56 }
  0x99   : > { %v4269_v62 = vpop.eup %4268  ;;  %v666_v45 = vmul.f32 %v5169_v26, %v5169_v26  ;;  %v5185_v39 = vadd.f32 %v5060_v34, %v4007_v40  ;;  %v630_v12 = vmul.f32 0.5, %v5102_v5  ;;  %v857_v30 = vadd.f32 %v793_v47, %v5146_v23 }
  0x9a   : > { %4110 = vmatprep.mubr.msk.bf16.mxu0 %vm1223_vm0, %v1818_v22  ;;  %v1046_v0 = vadd.f32 1.0, %v4269_v62  ;;  %v667_v59 = vmul.f32 %v5175_v58, %v5175_v58  ;;  %v4271_v6 = vpop.eup %4270  ;;  %v920_v63 = vmul.f32 0.7978846, %v856_v46  ;;  %v5194_v52 = vadd.f32 %v5060_v34, %v4008_v54 }
  0x9b   : > { %v730_v43 = vmul.f32 %v666_v45, %v5169_v26  ;;  %v4011_v17 = vunpack.c.l.bf16 %v4049_v49  ;;  %v1047_v40 = vadd.f32 1.0, %v4271_v6  ;;  %v921_v22 = vmul.f32 0.7978846, %v857_v30 }
  0x9c   : > { %v5196_v33 = vmul.f32 %v1046_v0, %v598_v7  ;;  %v731_v62 = vmul.f32 %v667_v59, %v5175_v58  ;;  %v631_v5 = vmul.f32 0.5, %v5112_v3  ;;  %4280 = vtanh.f32 %v920_v63 }
  0x9d   : > { %v794_v47 = vmul.f32 0.044715, %v730_v43  ;;  %v696_v50 = vmul.f32 %v5185_v39, %v5185_v39  ;;  %v5202_v48 = vmul.f32 %v1047_v40, %v599_v10  ;;  %4282 = vtanh.f32 %v921_v22 }
  0x9e   : > { %v4273_v46 = vpop.eup %4272  ;;  %v795_v54 = vmul.f32 0.044715, %v731_v62  ;;  %v697_v45 = vmul.f32 %v5194_v52, %v5194_v52  ;;  %v4012_v59 = vunpack.c.h.bf16 %v4049_v49  ;;  %v5213_v43 = vadd.f32 %v5060_v34, %v4011_v17 }
  0x9f   : > { %v1076_v7 = vadd.f32 1.0, %v4273_v46  ;;  %v858_v0 = vadd.f32 %v794_v47, %v5169_v26  ;;  %v760_v30 = vmul.f32 %v696_v50, %v5185_v39  ;;  %v4275_v3 = vpop.eup %4274  ;;  %v1819_v6 = vpack.c.bf16 %v5202_v48, %v5196_v33 }
  0xa0   : > { %v859_v63 = vadd.f32 %v795_v54, %v5175_v58  ;;  %v761_v10 = vmul.f32 %v697_v45, %v5194_v52  ;;  %v1077_v40 = vadd.f32 1.0, %v4275_v3  ;;  %v600_v50 = vmul.f32 0.5, %v5138_v56 }
  0xa1   : > { %v5215_v22 = vmul.f32 %v1076_v7, %v628_v53  ;;  %v922_v62 = vmul.f32 0.7978846, %v858_v0  ;;  %v824_v46 = vmul.f32 0.044715, %v760_v30  ;;  %4111 = vmatmul.mubr.msk.bf16.gmra.mxu0 %vm1223_vm0, %v1819_v6  ;;  %v5220_v44 = vadd.f32 %v5060_v34, %v4012_v59  ;;  %v4034_v7 = vld [vmem:[%s7172_s0 + $0x70] sm:$0xff]   ;;  %v4035_v59 = vld [vmem:[%s7172_s0 + $0x78] sm:$0xff]  }
  0xa2   : > { %v4277_v47 = vpop.eup %4276  ;;  %v923_v49 = vmul.f32 0.7978846, %v859_v63  ;;  %v825_v41 = vmul.f32 0.044715, %v761_v10  ;;  %v5222_v45 = vmul.f32 %v1077_v40, %v629_v51  ;;  %v601_v30 = vmul.f32 0.5, %v5146_v23 }
  0xa3   : > { %v4279_v54 = vpop.eup %4278  ;;  %v1078_v17 = vadd.f32 1.0, %v4277_v47  ;;  %4284 = vtanh.f32 %v922_v62  ;;  %v888_v53 = vadd.f32 %v824_v46, %v5185_v39  ;;  %v698_v63 = vmul.f32 %v5213_v43, %v5213_v43 }
  0xa4   : > { %v1079_v0 = vadd.f32 1.0, %v4279_v54  ;;  %4286 = vtanh.f32 %v923_v49  ;;  %v889_v56 = vadd.f32 %v825_v41, %v5194_v52  ;;  %v1834_v51 = vpack.c.bf16 %v5222_v45, %v5215_v22 }
  0xa5   : > { %v5235_v3 = vmul.f32 %v1078_v17, %v630_v12  ;;  %v952_v6 = vmul.f32 0.7978846, %v888_v53  ;;  %v699_v23 = vmul.f32 %v5220_v44, %v5220_v44  ;;  %v3951_v41 = vunpack.c.l.bf16 %v4034_v7 }
  0xa6   : > { %v5239_v10 = vmul.f32 %v1079_v0, %v631_v5  ;;  %v953_v40 = vmul.f32 0.7978846, %v889_v56  ;;  %4142 = vmatprep.mubr.msk.bf16.mxu1 %vm1223_vm0, %v1834_v51  ;;  %v762_v62 = vmul.f32 %v698_v63, %v5213_v43  ;;  %v3952_v46 = vunpack.c.h.bf16 %v4034_v7 }
  0xa7   : > { %4288 = vtanh.f32 %v952_v6  ;;  %v3955_v47 = vunpack.c.l.bf16 %v4035_v59  ;;  %v763_v49 = vmul.f32 %v699_v23, %v5220_v44  ;;  %v5249_v5 = vadd.f32 %v5060_v34, %v3951_v41 }
  0xa8   : > { %v1835_v12 = vpack.c.bf16 %v5239_v10, %v5235_v3  ;;  %4290 = vtanh.f32 %v953_v40  ;;  %v602_v54 = vmul.f32 0.5, %v5169_v26  ;;  %v826_v17 = vmul.f32 0.044715, %v762_v62 }
  0xa9   : > { %v5253_v53 = vadd.f32 %v5060_v34, %v3952_v46  ;;  %v3956_v0 = vunpack.c.h.bf16 %v4035_v59  ;;  %v4281_v56 = vpop.eup %4280  ;;  %v603_v7 = vmul.f32 0.5, %v5175_v58  ;;  %v632_v51 = vmul.f32 0.5, %v5185_v39  ;;  %v4050_v58 = vld [vmem:[%s7172_s0 + $0xf0] sm:$0xff]  }
  0xaa   : > { %4143 = vmatmul.mubr.msk.bf16.gmra.mxu1 %vm1223_vm0, %v1835_v12  ;;  %v827_v6 = vmul.f32 0.044715, %v763_v49  ;;  %v668_v63 = vmul.f32 %v5249_v5, %v5249_v5  ;;  %v4283_v40 = vpop.eup %4282  ;;  %v1048_v23 = vadd.f32 1.0, %v4281_v56  ;;  %v890_v26 = vadd.f32 %v826_v17, %v5213_v43 }
  0xab   : > { %v669_v41 = vmul.f32 %v5253_v53, %v5253_v53  ;;  %v5264_v59 = vadd.f32 %v5060_v34, %v3955_v47  ;;  %v1049_v62 = vadd.f32 1.0, %v4283_v40  ;;  %v5272_v12 = vadd.f32 %v5060_v34, %v3956_v0 }
  0xac   : > { %v891_v39 = vadd.f32 %v827_v6, %v5220_v44  ;;  %v732_v46 = vmul.f32 %v668_v63, %v5249_v5  ;;  %v5274_v49 = vmul.f32 %v1048_v23, %v600_v50  ;;  %v633_v17 = vmul.f32 0.5, %v5194_v52 }
  0xad   : > { %v954_v56 = vmul.f32 0.7978846, %v890_v26  ;;  %v733_v47 = vmul.f32 %v669_v41, %v5253_v53  ;;  %v5278_v42 = vmul.f32 %v1049_v62, %v601_v30  ;;  %v4015_v14 = vunpack.c.l.bf16 %v4050_v58 }
  0xae   : > { %v955_v27 = vmul.f32 0.7978846, %v891_v39  ;;  %v796_v28 = vmul.f32 0.044715, %v732_v46  ;;  %v670_v6 = vmul.f32 %v5264_v59, %v5264_v59  ;;  %v671_v0 = vmul.f32 %v5272_v12, %v5272_v12 }
  0xaf   : > { %4292 = vtanh.f32 %v954_v56  ;;  %v797_v40 = vmul.f32 0.044715, %v733_v47  ;;  %v1820_v52 = vpack.c.bf16 %v5278_v42, %v5274_v49  ;;  %v4016_v30 = vunpack.c.h.bf16 %v4050_v58 }
  0xb0   : > { %v4285_v50 = vpop.eup %4284  ;;  %4294 = vtanh.f32 %v955_v27  ;;  %v860_v63 = vadd.f32 %v796_v28, %v5249_v5  ;;  %v734_v62 = vmul.f32 %v670_v6, %v5264_v59  ;;  %v735_v39 = vmul.f32 %v671_v0, %v5272_v12 }
  0xb1   : > { %v4287_v23 = vpop.eup %4286  ;;  %v1050_v26 = vadd.f32 1.0, %v4285_v50  ;;  %v861_v41 = vadd.f32 %v797_v40, %v5253_v53  ;;  %4114 = vmatprep.mubr.msk.bf16.mxu0 %vm1223_vm0, %v1820_v52  ;;  %v5292_v47 = vadd.f32 %v5060_v34, %v4015_v14  ;;  %v5295_v27 = vadd.f32 %v5060_v34, %v4016_v30  ;;  %v4051_v14 = vld [vmem:[%s7172_s0 + $0xf8] sm:$0xff]  }
  0xb2   : > { %v1051_v46 = vadd.f32 1.0, %v4287_v23  ;;  %v924_v56 = vmul.f32 0.7978846, %v860_v63  ;;  %v798_v50 = vmul.f32 0.044715, %v734_v62  ;;  %v634_v6 = vmul.f32 0.5, %v5213_v43 }
  0xb3   : > { %v5297_v28 = vmul.f32 %v1050_v26, %v602_v54  ;;  %v925_v58 = vmul.f32 0.7978846, %v861_v41  ;;  %v799_v38 = vmul.f32 0.044715, %v735_v39  ;;  %v635_v0 = vmul.f32 0.5, %v5220_v44 }
  0xb4   : > { %v4289_v40 = vpop.eup %4288  ;;  %v5299_v31 = vmul.f32 %v1051_v46, %v603_v7  ;;  %4296 = vtanh.f32 %v924_v56  ;;  %v862_v54 = vadd.f32 %v798_v50, %v5264_v59  ;;  %v700_v43 = vmul.f32 %v5292_v47, %v5292_v47  ;;  %v5317_v26 = vld [vmem:[%s7174_s2] ss:$0 sm:$0xff] }
  0xb5   : > { %v4291_v52 = vpop.eup %4290  ;;  %v1080_v63 = vadd.f32 1.0, %v4289_v40  ;;  %4298 = vtanh.f32 %v925_v58  ;;  %v863_v30 = vadd.f32 %v799_v38, %v5272_v12  ;;  %v701_v44 = vmul.f32 %v5295_v27, %v5295_v27 }
  0xb6   : > { %v1821_v7 = vpack.c.bf16 %v5299_v31, %v5297_v28  ;;  %v1081_v23 = vadd.f32 1.0, %v4291_v52  ;;  %v926_v62 = vmul.f32 0.7978846, %v862_v54  ;;  %v4019_v38 = vunpack.c.l.bf16 %v4051_v14 }
  0xb7   : > { %v5319_v41 = vmul.f32 %v1080_v63, %v632_v51  ;;  %v927_v39 = vmul.f32 0.7978846, %v863_v30  ;;  %v764_v56 = vmul.f32 %v700_v43, %v5292_v47  ;;  %v765_v58 = vmul.f32 %v701_v44, %v5295_v27 }
  0xb8   : > { %4115 = vmatmul.mubr.msk.bf16.gmra.mxu0 %vm1223_vm0, %v1821_v7  ;;  %v5322_v46 = vmul.f32 %v1081_v23, %v633_v17  ;;  %v4020_v50 = vunpack.c.h.bf16 %v4051_v14  ;;  %4300 = vtanh.f32 %v926_v62  ;;  %v5327_v40 = vadd.f32 %v5060_v34, %v4019_v38 }
  0xb9   : > { %v1159_v51 = vmul.f32 %v5317_v26, %v4676_v61  ;;  %v1161_v52 = vmul.f32 %v5317_v26, %v4689_v16  ;;  %4302 = vtanh.f32 %v927_v39  ;;  %v828_v17 = vmul.f32 0.044715, %v764_v56 }
  0xba   : > { %v1836_v63 = vpack.c.bf16 %v5322_v46, %v5319_v41  ;;  %v829_v54 = vmul.f32 0.044715, %v765_v58  ;;  %v604_v30 = vmul.f32 0.5, %v5249_v5  ;;  %v5337_v14 = vadd.f32 %v5060_v34, %v4020_v50 }
  0xbb   : > { %v702_v7 = vmul.f32 %v5327_v40, %v5327_v40  ;;  %v1224_v23 = vsel %vm1223_vm0, %v1159_v51, 0.0  ;;  %v892_v16 = vadd.f32 %v828_v17, %v5292_v47  ;;  %v1230_v44 = vsel %vm1223_vm0, %v1161_v52, 0.0 }
  0xbc   : > { %v4293_v61 = vpop.eup %4292  ;;  %4146 = vmatprep.mubr.msk.bf16.mxu1 %vm1223_vm0, %v1836_v63  ;;  %v893_v43 = vadd.f32 %v829_v54, %v5295_v27  ;;  %1225 = vadd.xlane.f32.xlu0 %v1224_v23  ;;  %v1160_v5 = vmul.f32 %v5317_v26, %v4679_v1  ;;  %v605_v39 = vmul.f32 0.5, %v5253_v53  ;;  %v703_v38 = vmul.f32 %v5337_v14, %v5337_v14 }
  0xbd   : > { %v4295_v34 = vpop.eup %4294  ;;  %v1082_v62 = vadd.f32 1.0, %v4293_v61  ;;  %v766_v56 = vmul.f32 %v702_v7, %v5327_v40  ;;  %1231 = vadd.xlane.f32.xlu1 %v1230_v44  ;;  %v956_v50 = vmul.f32 0.7978846, %v892_v16  ;;  %v1162_v54 = vmul.f32 %v5317_v26, %v4700_v25 }
  0xbe   : > { %v1083_v58 = vadd.f32 1.0, %v4295_v34  ;;  %v957_v51 = vmul.f32 0.7978846, %v893_v43  ;;  %v1227_v63 = vsel %vm1223_vm0, %v1160_v5, 0.0  ;;  %v767_v52 = vmul.f32 %v703_v38, %v5337_v14 }
  0xbf   : > { %v5353_v17 = vmul.f32 %v1082_v62, %v634_v6  ;;  %v830_v1 = vmul.f32 0.044715, %v766_v56  ;;  %4304 = vtanh.f32 %v956_v50  ;;  %v1163_v7 = vmul.f32 %v5317_v26, %v4751_v4 }
  0xc0   : > { %v5358_v53 = vmul.f32 %v1083_v58, %v635_v0  ;;  %1228 = vadd.xlane.f32.xlu0 %v1227_v63  ;;  %v1164_v23 = vmul.f32 %v5317_v26, %v4755_v35  ;;  %4306 = vtanh.f32 %v957_v51  ;;  %v831_v6 = vmul.f32 0.044715, %v767_v52 }
  0xc1   : > { %v4297_v61 = vpop.eup %4296  ;;  %v894_v16 = vadd.f32 %v830_v1, %v5327_v40  ;;  %v1233_v43 = vsel %vm1223_vm0, %v1162_v54, 0.0  ;;  %v1236_v5 = vsel %vm1223_vm0, %v1163_v7, 0.0  ;;  %v1165_v38 = vmul.f32 %v5317_v26, %v4791_v18 }
  0xc2   : > { %v4299_v44 = vpop.eup %4298  ;;  %v1837_v25 = vpack.c.bf16 %v5358_v53, %v5353_v17  ;;  %v1052_v0 = vadd.f32 1.0, %v4297_v61  ;;  %1234 = vadd.xlane.f32.xlu1 %v1233_v43  ;;  %v1239_v4 = vsel %vm1223_vm0, %v1164_v23, 0.0  ;;  %v895_v35 = vadd.f32 %v831_v6, %v5337_v14 }
  0xc3   : > { %v1053_v34 = vadd.f32 1.0, %v4299_v44  ;;  %v958_v62 = vmul.f32 0.7978846, %v894_v16  ;;  %v606_v58 = vmul.f32 0.5, %v5264_v59  ;;  %v1166_v50 = vmul.f32 %v5317_v26, %v4795_v60 }
  0xc4   : > { %4147 = vmatmul.mubr.msk.bf16.gmra.mxu1 %vm1223_vm0, %v1837_v25  ;;  %v5374_v56 = vmul.f32 %v1052_v0, %v604_v30  ;;  %1237 = vadd.xlane.f32.xlu0 %v1236_v5  ;;  %v1167_v51 = vmul.f32 %v5317_v26, %v4847_v2  ;;  %v959_v52 = vmul.f32 0.7978846, %v895_v35  ;;  %v1242_v1 = vsel %vm1223_vm0, %v1165_v38, 0.0 }
  0xc5   : > { %v5381_v63 = vmul.f32 %v1053_v34, %v605_v39  ;;  %4308 = vtanh.f32 %v958_v62  ;;  %v4301_v18 = vpop.eup %4300  ;;  %v607_v54 = vmul.f32 0.5, %v5272_v12  ;;  %v1245_v30 = vsel %vm1223_vm0, %v1166_v50, 0.0 }
  0xc6   : > { %1240 = vadd.xlane.f32.xlu1 %v1239_v4  ;;  %v4303_v59 = vpop.eup %4302  ;;  %v1054_v60 = vadd.f32 1.0, %v4301_v18  ;;  %4310 = vtanh.f32 %v959_v52  ;;  %v1168_v2 = vmul.f32 %v5317_v26, %v4855_v9  ;;  %v1248_v12 = vsel %vm1223_vm0, %v1167_v51, 0.0 }
  0xc7   : > { %v1822_v7 = vpack.c.bf16 %v5381_v63, %v5374_v56  ;;  %v1055_v39 = vadd.f32 1.0, %v4303_v59  ;;  %v1169_v61 = vmul.f32 %v5317_v26, %v4903_v11  ;;  %v1170_v43 = vmul.f32 %v5317_v26, %v4908_v24 }
  0xc8   : > { %1243 = vadd.xlane.f32.xlu0 %v1242_v1  ;;  %v5391_v23 = vmul.f32 %v1054_v60, %v606_v58  ;;  %v1251_v16 = vsel %vm1223_vm0, %v1168_v2, 0.0  ;;  %v636_v44 = vmul.f32 0.5, %v5292_v47  ;;  %v637_v0 = vmul.f32 0.5, %v5295_v27 }
  0xc9   : > { %4118 = vmatprep.mubr.msk.bf16.mxu0 %vm1223_vm0, %v1822_v7  ;;  %v5396_v6 = vmul.f32 %v1055_v39, %v607_v54  ;;  %v1254_v5 = vsel %vm1223_vm0, %v1169_v61, 0.0  ;;  %v1171_v11 = vmul.f32 %v5317_v26, %v4947_v20  ;;  %v1257_v35 = vsel %vm1223_vm0, %v1170_v43, 0.0 }
  0xca   : > { %1246 = vadd.xlane.f32.xlu1 %v1245_v30  ;;  %v1172_v47 = vmul.f32 %v5317_v26, %v4952_v55  ;;  %v638_v27 = vmul.f32 0.5, %v5327_v40  ;;  %v1173_v20 = vmul.f32 %v5317_v26, %v4998_v21  ;;  %v639_v51 = vmul.f32 0.5, %v5337_v14 }
  0xcb   : > { %v1823_v9 = vpack.c.bf16 %v5396_v6, %v5391_v23  ;;  %v1260_v58 = vsel %vm1223_vm0, %v1171_v11, 0.0  ;;  %v1174_v55 = vmul.f32 %v5317_v26, %v5004_v57  ;;  %v1175_v21 = vmul.f32 %v5317_v26, %v5055_v37 }
  0xcc   : > { %1249 = vadd.xlane.f32.xlu0 %v1248_v12  ;;  %v4305_v25 = vpop.eup %4304  ;;  %v1263_v18 = vsel %vm1223_vm0, %v1172_v47, 0.0  ;;  %v1266_v59 = vsel %vm1223_vm0, %v1173_v20, 0.0  ;;  %v1176_v60 = vmul.f32 %v5317_v26, %v5065_v19  ;;  %v1177_v39 = vmul.f32 %v5317_v26, %v5081_v29 }
  0xcd   : > { %v4307_v4 = vpop.eup %4306  ;;  %4119 = vmatmul.mubr.msk.bf16.gmra.mxu0 %vm1223_vm0, %v1823_v9  ;;  %v1084_v34 = vadd.f32 1.0, %v4305_v25  ;;  %v1269_v7 = vsel %vm1223_vm0, %v1174_v55, 0.0  ;;  %v1272_v2 = vsel %vm1223_vm0, %v1175_v21, 0.0  ;;  %v1178_v37 = vmul.f32 %v5317_v26, %v5090_v36  ;;  %v7243_v21 = vld [vmem:[#allocation11_spill] sm:$0xff] }
  0xce   : > { %1252 = vadd.xlane.f32.xlu1 %v1251_v16  ;;  %v1085_v24 = vadd.f32 1.0, %v4307_v4  ;;  %v1275_v12 = vsel %vm1223_vm0, %v1176_v60, 0.0  ;;  %v1278_v61 = vsel %vm1223_vm0, %v1177_v39, 0.0  ;;  %v1179_v19 = vmul.f32 %v5317_v26, %v5162_v15  ;;  %v7244_v39 = vld [vmem:[#allocation12_spill] sm:$0xff] }
  0xcf   : > { %v1148_v62 = vmul.f32 %v1084_v34, %v636_v44  ;;  %v1281_v16 = vsel %vm1223_vm0, %v1178_v37, 0.0  ;;  %v1180_v29 = vmul.f32 %v5317_v26, %v5165_v32  ;;  %v5442_v43 = vmul.f32 %v5317_v26, %v5215_v22 }
  0xd0   : > { %1255 = vadd.xlane.f32.xlu0 %v1254_v5  ;;  %v1149_v38 = vmul.f32 %v1085_v24, %v637_v0  ;;  %v5446_v9 = vmul.f32 %v5317_v26, %v5222_v45  ;;  %v5450_v36 = vmul.f32 %v5317_v26, %v5235_v3  ;;  %v1284_v15 = vsel %vm1223_vm0, %v1179_v19, 0.0 }
  0xd1   : > { %v1181_v44 = vmul.f32 %v5317_v26, %v5196_v33  ;;  %v5457_v32 = vmul.f32 %v5317_v26, %v5239_v10  ;;  %v5461_v22 = vmul.f32 %v5317_v26, %v5319_v41  ;;  %v5465_v45 = vmul.f32 %v5317_v26, %v5322_v46 }
  0xd2   : > { %v4309_v50 = vpop.eup %4308  ;;  %1258 = vadd.xlane.f32.xlu1 %v1257_v35  ;;  %v1838_v52 = vpack.c.bf16 %v1149_v38, %v1148_v62  ;;  %v5469_v3 = vmul.f32 %v5317_v26, %v5353_v17  ;;  %v5473_v33 = vmul.f32 %v5317_v26, %v5358_v53  ;;  %v1287_v10 = vsel %vm1223_vm0, %v1180_v29, 0.0 }
  0xd3   : > { %v1086_v1 = vadd.f32 1.0, %v4309_v50  ;;  %v4311_v54 = vpop.eup %4310  ;;  %v1182_v25 = vmul.f32 %v5317_v26, %v5202_v48  ;;  %v5479_v41 = vmul.f32 %v5317_v26, %v1148_v62  ;;  %v5482_v0 = vmul.f32 %v5317_v26, %v1149_v38 }
  0xd4   : > { %1261 = vadd.xlane.f32.xlu0 %v1260_v58  ;;  %4150 = vmatprep.mubr.msk.bf16.mxu1 %vm1223_vm0, %v1838_v52  ;;  %v1087_v40 = vadd.f32 1.0, %v4311_v54  ;;  %v1290_v17 = vsel %vm1223_vm0, %v1181_v44, 0.0  ;;  %v1183_v53 = vmul.f32 %v5317_v26, %v5274_v49  ;;  %v1184_v11 = vmul.f32 %v5317_v26, %v5278_v42  ;;  %v7241_v54 = vld [vmem:[#allocation9_spill] sm:$0xff] }
  0xd5   : > { %v1150_v30 = vmul.f32 %v1086_v1, %v638_v27  ;;  %v1293_v48 = vsel %vm1223_vm0, %v1182_v25, 0.0  ;;  %v1185_v34 = vmul.f32 %v5317_v26, %v5297_v28  ;;  %v1186_v49 = vmul.f32 %v5317_v26, %v5299_v31 }
  0xd6   : > { %1264 = vadd.xlane.f32.xlu1 %v1263_v18  ;;  %v1151_v14 = vmul.f32 %v1087_v40, %v639_v51  ;;  %v1296_v4 = vsel %vm1223_vm0, %v1183_v53, 0.0  ;;  %v1299_v24 = vsel %vm1223_vm0, %v1184_v11, 0.0  ;;  %v1187_v47 = vmul.f32 %v5317_v26, %v5374_v56  ;;  %v7236_v56 = vld [vmem:[#allocation4_spill] sm:$0xff]  ;;  %v7238_v51 = vld [vmem:[#allocation6_spill] sm:$0xff] }
  0xd7   : > { %v5485_v46 = vmul.f32 %v5317_v26, %v1150_v30  ;;  %v1302_v35 = vsel %vm1223_vm0, %v1185_v34, 0.0  ;;  %v1188_v42 = vmul.f32 %v5317_v26, %v5381_v63  ;;  %v1189_v62 = vmul.f32 %v5317_v26, %v5391_v23  ;;  %v7237_v23 = vld [vmem:[#allocation5_spill] sm:$0xff] }
  0xd8   : > { %1267 = vadd.xlane.f32.xlu0 %v1266_v59  ;;  %v1839_v57 = vpack.c.bf16 %v1151_v14, %v1150_v30  ;;  %v5491_v5 = vmul.f32 %v5317_v26, %v1151_v14  ;;  %v1305_v28 = vsel %vm1223_vm0, %v1186_v49, 0.0  ;;  %v1190_v38 = vmul.f32 %v5317_v26, %v5396_v6  ;;  %v7242_v30 = vld [vmem:[#allocation10_spill] sm:$0xff] }
  0xd9   : > { %v1191_v31 = vmul.f32 %v5317_v26, %v4682_v8  ;;  %v1192_v27 = vmul.f32 %v5317_v26, %v4687_v13  ;;  %v1193_v58 = vmul.f32 %v5317_v26, %v7236_v56  ;;  %v1308_v63 = vsel %vm1223_vm0, %v1187_v47, 0.0  ;;  %v7239_v8 = vld [vmem:[#allocation7_spill] sm:$0xff]  ;;  %v7240_v13 = vld [vmem:[#allocation8_spill] sm:$0xff] }
  0xda   : > { %1270 = vadd.xlane.f32.xlu1 %v1269_v7  ;;  %4151 = vmatmul.mubr.msk.bf16.gmra.mxu1 %vm1223_vm0, %v1839_v57  ;;  %v1311_v20 = vsel %vm1223_vm0, %v1188_v42, 0.0  ;;  %v1194_v50 = vmul.f32 %v5317_v26, %v7237_v23  ;;  %v1314_v6 = vsel %vm1223_vm0, %v1189_v62, 0.0  ;;  %v1195_v52 = vmul.f32 %v5317_v26, %v7238_v51  ;;  %v5539_v7 = vld [vmem:[%s7177_s5] ss:$0 sm:$0xff] }
  0xdb   : > { %v1196_v1 = vmul.f32 %v5317_v26, %v7239_v8  ;;  %v1197_v18 = vmul.f32 %v5317_v26, %v7240_v13  ;;  %v1317_v55 = vsel %vm1223_vm0, %v1190_v38, 0.0  ;;  %v1198_v40 = vmul.f32 %v5317_v26, %v7241_v54  ;;  %v7251_v54 = vld [vmem:[#allocation19_spill] sm:$0xff] }
  0xdc   : > { %1273 = vadd.xlane.f32.xlu0 %v1272_v2  ;;  %v1199_v59 = vmul.f32 %v5317_v26, %v7242_v30  ;;  %v1200_v14 = vmul.f32 %v5317_v26, %v7243_v21  ;;  %v1320_v60 = vsel %vm1223_vm0, %v1191_v31, 0.0  ;;  %v1323_v57 = vsel %vm1223_vm0, %v1192_v27, 0.0 }
  0xdd   : > { %v1326_v2 = vsel %vm1223_vm0, %v1193_v58, 0.0  ;;  %v5547_v37 = vsel %vm1223_vm0, %v1194_v50, 0.0  ;;  %v5556_v25 = vsel %vm1223_vm0, %v1195_v52, 0.0  ;;  %v5562_v53 = vsel %vm1223_vm0, %v1197_v18, 0.0 }
  0xde   : > { %1276 = vadd.xlane.f32.xlu1 %v1275_v12  ;;  %v1201_v12 = vmul.f32 %v5317_v26, %v7244_v39  ;;  %v5568_v11 = vsel %vm1223_vm0, %v1198_v40, 0.0  ;;  %v5574_v34 = vsel %vm1223_vm0, %v1200_v14, 0.0  ;;  %v1208_v40 = vmul.f32 %v5317_v26, %v7251_v54 }
  0xe0   : > { %1279 = vadd.xlane.f32.xlu0 %v1278_v61  ;;  %v7245_v61 = vld [vmem:[#allocation13_spill] sm:$0xff]  ;;  %v5579_v42 = vsel %vm1223_vm0, %v1201_v12, 0.0 }
  0xe1   : > { %v1202_v19 = vmul.f32 %v5317_v26, %v7245_v61 }
  0xe2   : > { %1282 = vadd.xlane.f32.xlu1 %v1281_v16  ;;  %v7246_v16 = vld [vmem:[#allocation14_spill] sm:$0xff] }
  0xe3   : > { %v1203_v29 = vmul.f32 %v5317_v26, %v7246_v16  ;;  %v5590_v31 = vsel %vm1223_vm0, %v1202_v19, 0.0 }
  0xe4   : > { %1285 = vadd.xlane.f32.xlu0 %v1284_v15  ;;  %v7247_v15 = vld [vmem:[#allocation15_spill] sm:$0xff] }
  0xe5   : > { %v1204_v44 = vmul.f32 %v5317_v26, %v7247_v15  ;;  %v5593_v27 = vsel %vm1223_vm0, %v1203_v29, 0.0  ;;  %v7252_v29 = vld [vmem:[#allocation20_spill] sm:$0xff] }
  0xe6   : > { %1288 = vadd.xlane.f32.xlu1 %v1287_v10 }
  0xe7   : > { %v5596_v56 = vsel %vm1223_vm0, %v1204_v44, 0.0 }
  0xe8   : > { %1291 = vadd.xlane.f32.xlu0 %v1290_v17  ;;  %v5559_v17 = vsel %vm1223_vm0, %v1196_v1, 0.0  ;;  %v7250_v1 = vld [vmem:[#allocation18_spill] sm:$0xff] }
  0xe9   : > { %v1207_v13 = vmul.f32 %v5317_v26, %v7250_v1 }
  0xea   : > { %1294 = vadd.xlane.f32.xlu1 %v1293_v48 }
  0xec   : > { %1297 = vadd.xlane.f32.xlu0 %v1296_v4  ;;  %v5571_v4 = vsel %vm1223_vm0, %v1199_v59, 0.0 }
  0xee   : > { %1300 = vadd.xlane.f32.xlu1 %v1299_v24  ;;  %v7248_v24 = vld [vmem:[#allocation16_spill] sm:$0xff] }
  0xef   : > { %v1205_v49 = vmul.f32 %v5317_v26, %v7248_v24 }
  0xf0   : > { %1303 = vadd.xlane.f32.xlu0 %v1302_v35 }
  0xf1   : > { %v5609_v8 = vsel %vm1223_vm0, %v1205_v49, 0.0 }
  0xf2   : > { %1306 = vadd.xlane.f32.xlu1 %v1305_v28 }
  0xf4   : > { %1309 = vadd.xlane.f32.xlu0 %v1308_v63  ;;  %v7249_v63 = vld [vmem:[#allocation17_spill] sm:$0xff] }
  0xf6   : > { %v4092_v10 = vpop.f32.mrf.mxu0  ;;  %1312 = vadd.xlane.f32.xlu1 %v1311_v20  ;;  %v1206_v20 = vmul.f32 %v5317_v26, %v7249_v63 }
  0xf7   : > { %v5565_v48 = vadd.f32 %v4092_v10, %v5539_v7 }
  0xf8   : > { %v4124_v35 = vpop.f32.mrf.mxu1  ;;  %v1993_v47 = vpop.f32.mrf.mxu0  ;;  %1315 = vadd.xlane.f32.xlu0 %v1314_v6 }
  0xf9   : > { %v2314_v62 = vmul.f32 %v5565_v48, %v5565_v48  ;;  %v5584_v28 = vadd.f32 %v4124_v35, %v5539_v7  ;;  %v5587_v38 = vadd.f32 %v5539_v7, %v1993_v47 }
  0xfa   : > { %v2121_v58 = vpop.f32.mrf.mxu1  ;;  %v4093_v23 = vpop.f32.mrf.mxu0  ;;  %1318 = vadd.xlane.f32.xlu1 %v1317_v55 }
  0xfb   : > { %v2378_v50 = vmul.f32 %v2314_v62, %v5565_v48  ;;  %v2346_v6 = vmul.f32 %v5584_v28, %v5584_v28  ;;  %v5604_v51 = vadd.f32 %v5539_v7, %v2121_v58  ;;  %v2312_v52 = vmul.f32 %v5587_v38, %v5587_v38 }
  0xfc   : > { %v5614_v18 = vadd.f32 %v4093_v23, %v5539_v7  ;;  %v4125_v55 = vpop.f32.mrf.mxu1  ;;  %v1996_v30 = vpop.f32.mrf.mxu0  ;;  %1321 = vadd.xlane.f32.xlu0 %v1320_v60  ;;  %v1209_v60 = vmul.f32 %v5317_v26, %v7252_v29 }
  0xfd   : > { %v2442_v59 = vmul.f32 0.044715, %v2378_v50  ;;  %v2410_v21 = vmul.f32 %v2346_v6, %v5584_v28  ;;  %v2344_v14 = vmul.f32 %v5604_v51, %v5604_v51  ;;  %v2376_v39 = vmul.f32 %v2312_v52, %v5587_v38 }
  0xfe   : > { %v2315_v12 = vmul.f32 %v5614_v18, %v5614_v18  ;;  %v5625_v61 = vadd.f32 %v4125_v55, %v5539_v7  ;;  %v2124_v19 = vpop.f32.mrf.mxu1  ;;  %v5628_v16 = vadd.f32 %v5539_v7, %v1996_v30  ;;  %1324 = vadd.xlane.f32.xlu1 %v1323_v57 }
  0xff   : > { %v2506_v15 = vadd.f32 %v2442_v59, %v5565_v48  ;;  %v2474_v44 = vmul.f32 0.044715, %v2410_v21  ;;  %v2408_v10 = vmul.f32 %v2344_v14, %v5604_v51  ;;  %v2440_v24 = vmul.f32 0.044715, %v2376_v39 }
 0x100   : > { %v2379_v49 = vmul.f32 %v2315_v12, %v5614_v18  ;;  %v2347_v35 = vmul.f32 %v5625_v61, %v5625_v61  ;;  %v5638_v47 = vadd.f32 %v5539_v7, %v2124_v19  ;;  %v2313_v62 = vmul.f32 %v5628_v16, %v5628_v16  ;;  %1327 = vadd.xlane.f32.xlu0 %v1326_v2  ;;  %v7253_v2 = vld [vmem:[#allocation21_spill] sm:$0xff] }
 0x101   : > { %v2570_v58 = vmul.f32 0.7978846, %v2506_v15  ;;  %v2538_v57 = vadd.f32 %v2474_v44, %v5584_v28  ;;  %v2472_v63 = vmul.f32 0.044715, %v2408_v10  ;;  %v2504_v23 = vadd.f32 %v2440_v24, %v5587_v38 }
 0x102   : > { %v2443_v50 = vmul.f32 0.044715, %v2379_v49  ;;  %v2411_v6 = vmul.f32 %v2347_v35, %v5625_v61  ;;  %v2345_v52 = vmul.f32 %v5638_v47, %v5638_v47  ;;  %v2377_v1 = vmul.f32 %v2313_v62, %v5628_v16  ;;  %1330 = vadd.xlane.f32.xlu1 %v5547_v37 }
 0x103   : > { %4312 = vtanh.f32 %v2570_v58  ;;  %v2602_v55 = vmul.f32 0.7978846, %v2538_v57  ;;  %v2568_v54 = vmul.f32 0.7978846, %v2504_v23  ;;  %v1210_v30 = vmul.f32 %v5317_v26, %v7253_v2 }
 0x104   : > { %v2507_v59 = vadd.f32 %v2443_v50, %v5614_v18  ;;  %v2475_v21 = vmul.f32 0.044715, %v2411_v6  ;;  %v2409_v14 = vmul.f32 %v2345_v52, %v5638_v47  ;;  %v2441_v39 = vmul.f32 0.044715, %v2377_v1  ;;  %1333 = vadd.xlane.f32.xlu0 %v5556_v25 }
 0x105   : > { %4314 = vtanh.f32 %v2602_v55  ;;  %v2536_v12 = vadd.f32 %v2472_v63, %v5604_v51  ;;  %v5656_v19 = vsel %vm1223_vm0, %v1206_v20, 0.0  ;;  %v5659_v37 = vsel %vm1223_vm0, %v1207_v13, 0.0 }
 0x106   : > { %4316 = vtanh.f32 %v2568_v54  ;;  %v2571_v29 = vmul.f32 0.7978846, %v2507_v59  ;;  %v2539_v26 = vadd.f32 %v2475_v21, %v5625_v61  ;;  %v2473_v15 = vmul.f32 0.044715, %v2409_v14  ;;  %1336 = vadd.xlane.f32.xlu1 %v5559_v17 }
 0x107   : > { %v5664_v44 = vsel %vm1223_vm0, %v1208_v40, 0.0  ;;  %v2505_v25 = vadd.f32 %v2441_v39, %v5628_v16  ;;  %v5668_v10 = vsel %vm1223_vm0, %v1209_v60, 0.0  ;;  %v5671_v20 = vsel %vm1223_vm0, %v1210_v30, 0.0 }
 0x108   : > { %4318 = vtanh.f32 %v2571_v29  ;;  %v2537_v13 = vadd.f32 %v2473_v15, %v5638_v47  ;;  %v5676_v24 = vsel %vm1223_vm0, %v5442_v43, 0.0  ;;  %v5680_v17 = vsel %vm1223_vm0, %v5446_v9, 0.0  ;;  %1339 = vadd.xlane.f32.xlu0 %v5562_v53  ;;  %v4096_v62 = vpop.f32.mrf.mxu0 }
 0x109   : > { %v2600_v40 = vmul.f32 0.7978846, %v2536_v12  ;;  %v5685_v60 = vsel %vm1223_vm0, %v5450_v36, 0.0  ;;  %v5689_v49 = vsel %vm1223_vm0, %v5457_v32, 0.0  ;;  %v5693_v35 = vsel %vm1223_vm0, %v5461_v22, 0.0 }
 0x10a   : > { %v2603_v43 = vmul.f32 0.7978846, %v2539_v26  ;;  %v5697_v9 = vsel %vm1223_vm0, %v5465_v45, 0.0  ;;  %v5701_v53 = vsel %vm1223_vm0, %v5469_v3, 0.0  ;;  %v5705_v36 = vsel %vm1223_vm0, %v5473_v33, 0.0  ;;  %1342 = vadd.xlane.f32.xlu1 %v5568_v11  ;;  %v2009_v3 = vpop.f32.mrf.mxu0 }
 0x10b   : > { %v2569_v32 = vmul.f32 0.7978846, %v2505_v25  ;;  %v2018_v22 = vadd.f32 %v4096_v62, %v5539_v7  ;;  %v5711_v58 = vsel %vm1223_vm0, %v5479_v41, 0.0  ;;  %v5715_v45 = vsel %vm1223_vm0, %v5482_v0, 0.0  ;;  %v5768_v26 = vld [vmem:[%s7178_s6] ss:$0 sm:$0xff] }
 0x10c   : > { %v2601_v57 = vmul.f32 0.7978846, %v2537_v13  ;;  %v5719_v63 = vsel %vm1223_vm0, %v5485_v46, 0.0  ;;  %v5723_v33 = vsel %vm1223_vm0, %v5491_v5, 0.0  ;;  %v2250_v11 = vmul.f32 0.5, %v5565_v48  ;;  %1345 = vadd.xlane.f32.xlu0 %v5571_v4  ;;  %v4097_v50 = vpop.f32.mrf.mxu0 }
 0x10d   : > { %4320 = vtanh.f32 %v2600_v40  ;;  %v2318_v41 = vmul.f32 %v2018_v22, %v2018_v22  ;;  %v2010_v23 = vadd.f32 %v5539_v7, %v2009_v3  ;;  %v5729_v0 = vmul.f32 0.5, %v5584_v28 }
 0x10e   : > { %4322 = vtanh.f32 %v2603_v43  ;;  %v5732_v46 = vmul.f32 0.5, %v5614_v18  ;;  %v5735_v6 = vmul.f32 0.5, %v5625_v61  ;;  %v5738_v5 = vmul.f32 0.5, %v5587_v38  ;;  %1348 = vadd.xlane.f32.xlu1 %v5574_v34  ;;  %v2012_v1 = vpop.f32.mrf.mxu0 }
 0x10f   : > { %4324 = vtanh.f32 %v2569_v32  ;;  %v2382_v48 = vmul.f32 %v2318_v41, %v2018_v22  ;;  %v2316_v4 = vmul.f32 %v2010_v23, %v2010_v23  ;;  %v2021_v52 = vadd.f32 %v4097_v50, %v5539_v7 }
 0x110   : > { %v4313_v28 = vpop.eup %4312  ;;  %4326 = vtanh.f32 %v2601_v57  ;;  %v5743_v55 = vmul.f32 0.5, %v5628_v16  ;;  %v5746_v18 = vmul.f32 0.5, %v5604_v51  ;;  %v5749_v61 = vmul.f32 0.5, %v5638_v47  ;;  %1351 = vadd.xlane.f32.xlu0 %v5579_v42 }
 0x111   : > { %v2446_v34 = vmul.f32 0.044715, %v2382_v48  ;;  %v2380_v38 = vmul.f32 %v2316_v4, %v2010_v23  ;;  %v2319_v54 = vmul.f32 %v2021_v52, %v2021_v52  ;;  %v5753_v2 = vadd.f32 %v5539_v7, %v2012_v1  ;;  %v4128_v59 = vpop.f32.mrf.mxu1 }
 0x112   : > { %v4315_v30 = vpop.eup %4314  ;;  %v2698_v21 = vadd.f32 1.0, %v4313_v28  ;;  %v5755_v14 = vmul.f32 0.5, %v2018_v22  ;;  %v5757_v16 = vmul.f32 0.5, %v2021_v52  ;;  %v5759_v51 = vmul.f32 0.5, %v2010_v23  ;;  %1354 = vadd.xlane.f32.xlu1 %v5590_v31 }
 0x113   : > { %v4317_v39 = vpop.eup %4316  ;;  %v2510_v47 = vadd.f32 %v2446_v34, %v2018_v22  ;;  %v5763_v42 = vadd.f32 %v4128_v59, %v5539_v7  ;;  %v2444_v12 = vmul.f32 0.044715, %v2380_v38  ;;  %v2383_v29 = vmul.f32 %v2319_v54, %v2021_v52  ;;  %v2137_v15 = vpop.f32.mrf.mxu1 }
 0x114   : > { %v2317_v25 = vmul.f32 %v5753_v2, %v5753_v2  ;;  %v2762_v13 = vmul.f32 %v2698_v21, %v2250_v11  ;;  %v2730_v40 = vadd.f32 1.0, %v4315_v30  ;;  %v2696_v43 = vadd.f32 1.0, %v4317_v39  ;;  %1357 = vadd.xlane.f32.xlu0 %v5593_v27 }
 0x115   : > { %v4319_v62 = vpop.eup %4318  ;;  %v2574_v31 = vmul.f32 0.7978846, %v2510_v47  ;;  %v2350_v32 = vmul.f32 %v5763_v42, %v5763_v42  ;;  %v5776_v22 = vadd.f32 %v5539_v7, %v2137_v15  ;;  %v2508_v57 = vadd.f32 %v2444_v12, %v2010_v23  ;;  %v4129_v41 = vpop.f32.mrf.mxu1 }
 0x116   : > { %v2447_v3 = vmul.f32 0.044715, %v2383_v29  ;;  %v2381_v50 = vmul.f32 %v2317_v25, %v5753_v2  ;;  %v2833_v48 = vmul.f32 %v5768_v26, %v2762_v13  ;;  %v2699_v11 = vadd.f32 1.0, %v4319_v62  ;;  %1360 = vadd.xlane.f32.xlu1 %v5596_v56 }
 0x117   : > { %4328 = vtanh.f32 %v2574_v31  ;;  %v2414_v27 = vmul.f32 %v2350_v32, %v5763_v42  ;;  %v2348_v4 = vmul.f32 %v5776_v22, %v5776_v22  ;;  %v2572_v28 = vmul.f32 0.7978846, %v2508_v57  ;;  %v2140_v23 = vpop.f32.mrf.mxu1 }
 0x118   : > { %v2511_v1 = vadd.f32 %v2447_v3, %v2021_v52  ;;  %v5785_v34 = vadd.f32 %v4129_v41, %v5539_v7  ;;  %v2445_v38 = vmul.f32 0.044715, %v2381_v50  ;;  %v5788_v54 = vsel %vm1223_vm0, %v2833_v48, 0.0  ;;  %1363 = vadd.xlane.f32.xlu0 %v5609_v8 }
 0x119   : > { %v2478_v30 = vmul.f32 0.044715, %v2414_v27  ;;  %v2412_v56 = vmul.f32 %v2348_v4, %v5776_v22  ;;  %4330 = vtanh.f32 %v2572_v28  ;;  %v5793_v59 = vadd.f32 %v5539_v7, %v2140_v23 }
 0x11a   : > { %v4321_v21 = vpop.eup %4320  ;;  %v2575_v39 = vmul.f32 0.7978846, %v2511_v1  ;;  %v2351_v52 = vmul.f32 %v5785_v34, %v5785_v34  ;;  %v2509_v47 = vadd.f32 %v2445_v38, %v5753_v2  ;;  %v2763_v12 = vmul.f32 %v2699_v11, %v5732_v46  ;;  %1366 = vadd.xlane.f32.xlu1 %v5656_v19 }
 0x11b   : > { %v4323_v29 = vpop.eup %4322  ;;  %v2542_v8 = vadd.f32 %v2478_v30, %v5763_v42  ;;  %v2476_v15 = vmul.f32 0.044715, %v2412_v56  ;;  %v2349_v25 = vmul.f32 %v5793_v59, %v5793_v59  ;;  %v2794_v13 = vmul.f32 %v2730_v40, %v5729_v0 }
 0x11c   : > { %v4325_v62 = vpop.eup %4324  ;;  %4332 = vtanh.f32 %v2575_v39  ;;  %v2415_v31 = vmul.f32 %v2351_v52, %v5785_v34  ;;  %v2573_v32 = vmul.f32 0.7978846, %v2509_v47  ;;  %v2834_v57 = vmul.f32 %v5768_v26, %v2763_v12  ;;  %1369 = vadd.xlane.f32.xlu0 %v5659_v37 }
 0x11d   : > { %v4327_v3 = vpop.eup %4326  ;;  %v2606_v46 = vmul.f32 0.7978846, %v2542_v8  ;;  %v2540_v19 = vadd.f32 %v2476_v15, %v5776_v22  ;;  %v2413_v41 = vmul.f32 %v2349_v25, %v5793_v59  ;;  %v2865_v50 = vmul.f32 %v5768_v26, %v2794_v13 }
 0x11e   : > { %v2479_v48 = vmul.f32 0.044715, %v2415_v31  ;;  %4334 = vtanh.f32 %v2573_v32  ;;  %v5811_v0 = vsel %vm1223_vm0, %v2834_v57, 0.0  ;;  %v2731_v40 = vadd.f32 1.0, %v4323_v29  ;;  %1372 = vadd.xlane.f32.xlu1 %v5664_v44 }
 0x11f   : > { %4336 = vtanh.f32 %v2606_v46  ;;  %v2604_v11 = vmul.f32 0.7978846, %v2540_v19  ;;  %v2477_v27 = vmul.f32 0.044715, %v2413_v41  ;;  %v5815_v37 = vsel %vm1223_vm0, %v2865_v50, 0.0 }
 0x120   : > { %v2543_v4 = vadd.f32 %v2479_v48, %v5785_v34  ;;  %v2795_v28 = vmul.f32 %v2731_v40, %v5735_v6  ;;  %v2760_v1 = vmul.f32 %v2696_v43, %v5738_v5  ;;  %v2697_v23 = vadd.f32 1.0, %v4325_v62  ;;  %1375 = vadd.xlane.f32.xlu0 %v5668_v10 }
 0x121   : > { %4338 = vtanh.f32 %v2604_v11  ;;  %v2541_v38 = vadd.f32 %v2477_v27, %v5793_v59  ;;  %v2728_v30 = vadd.f32 1.0, %v4321_v21  ;;  %v2729_v44 = vadd.f32 1.0, %v4327_v3 }
 0x122   : > { %v2607_v56 = vmul.f32 0.7978846, %v2543_v4  ;;  %v2866_v39 = vmul.f32 %v5768_v26, %v2795_v28  ;;  %v2831_v52 = vmul.f32 %v5768_v26, %v2760_v1  ;;  %v2761_v47 = vmul.f32 %v2697_v23, %v5743_v55  ;;  %1378 = vadd.xlane.f32.xlu1 %v5671_v20  ;;  %v4100_v12 = vpop.f32.mrf.mxu0 }
 0x123   : > { %v2605_v6 = vmul.f32 0.7978846, %v2541_v38  ;;  %v2792_v5 = vmul.f32 %v2728_v30, %v5746_v18  ;;  %v2793_v10 = vmul.f32 %v2729_v44, %v5749_v61  ;;  %v5829_v43 = vmul.f32 0.5, %v5763_v42 }
 0x124   : > { %v4329_v21 = vpop.eup %4328  ;;  %4340 = vtanh.f32 %v2607_v56  ;;  %v5832_v29 = vadd.f32 %v4100_v12, %v5539_v7  ;;  %v5835_v8 = vsel %vm1223_vm0, %v2866_v39, 0.0  ;;  %v5838_v55 = vsel %vm1223_vm0, %v2831_v52, 0.0  ;;  %1381 = vadd.xlane.f32.xlu0 %v5676_v24  ;;  %v2025_v20 = vpop.f32.mrf.mxu0 }
 0x125   : > { %4342 = vtanh.f32 %v2605_v6  ;;  %v2832_v18 = vmul.f32 %v5768_v26, %v2761_v47  ;;  %v2863_v61 = vmul.f32 %v5768_v26, %v2792_v5  ;;  %v2864_v42 = vmul.f32 %v5768_v26, %v2793_v10 }
 0x126   : > { %v4331_v15 = vpop.eup %4330  ;;  %v2322_v25 = vmul.f32 %v5832_v29, %v5832_v29  ;;  %v5847_v13 = vadd.f32 %v5539_v7, %v2025_v20  ;;  %v2702_v62 = vadd.f32 1.0, %v4329_v21  ;;  %v5850_v31 = vmul.f32 0.5, %v5785_v34  ;;  %1384 = vadd.xlane.f32.xlu1 %v5680_v17  ;;  %v4101_v24 = vpop.f32.mrf.mxu0 }
 0x127   : > { %v5854_v32 = vsel %vm1223_vm0, %v2832_v18, 0.0  ;;  %v5857_v57 = vsel %vm1223_vm0, %v2863_v61, 0.0  ;;  %v5860_v3 = vsel %vm1223_vm0, %v2864_v42, 0.0  ;;  %v2700_v46 = vadd.f32 1.0, %v4331_v15  ;;  %v4132_v41 = vpop.f32.mrf.mxu1 }
 0x128   : > { %v2386_v19 = vmul.f32 %v2322_v25, %v5832_v29  ;;  %v2320_v34 = vmul.f32 %v5847_v13, %v5847_v13  ;;  %v5866_v50 = vadd.f32 %v4101_v24, %v5539_v7  ;;  %v2766_v17 = vmul.f32 %v2702_v62, %v5755_v14  ;;  %1387 = vadd.xlane.f32.xlu0 %v5685_v60  ;;  %v2028_v11 = vpop.f32.mrf.mxu0 }
 0x129   : > { %v4333_v48 = vpop.eup %4332  ;;  %v5871_v40 = vadd.f32 %v4132_v41, %v5539_v7  ;;  %v5874_v27 = vmul.f32 %v2700_v46, %v5759_v51  ;;  %v5877_v4 = vmul.f32 0.5, %v5753_v2  ;;  %v5880_v28 = vmul.f32 0.5, %v5776_v22  ;;  %v2153_v23 = vpop.f32.mrf.mxu1 }
 0x12a   : > { %v2450_v1 = vmul.f32 0.044715, %v2386_v19  ;;  %v2384_v14 = vmul.f32 %v2320_v34, %v5847_v13  ;;  %v2323_v60 = vmul.f32 %v5866_v50, %v5866_v50  ;;  %v5886_v38 = vadd.f32 %v5539_v7, %v2028_v11  ;;  %1390 = vadd.xlane.f32.xlu1 %v5689_v49 }
 0x12b   : > { %v5888_v30 = vpop.eup %4334  ;;  %v2354_v51 = vmul.f32 %v5871_v40, %v5871_v40  ;;  %v5893_v2 = vadd.f32 %v5539_v7, %v2153_v23  ;;  %v2837_v22 = vmul.f32 %v5768_v26, %v2766_v17  ;;  %v2703_v44 = vadd.f32 1.0, %v4333_v48  ;;  %v4133_v6 = vpop.f32.mrf.mxu1 }
 0x12c   : > { %v4337_v56 = vpop.eup %4336  ;;  %v2514_v39 = vadd.f32 %v2450_v1, %v5832_v29  ;;  %v2448_v52 = vmul.f32 0.044715, %v2384_v14  ;;  %v2387_v47 = vmul.f32 %v2323_v60, %v5866_v50  ;;  %v2321_v12 = vmul.f32 %v5886_v38, %v5886_v38  ;;  %1393 = vadd.xlane.f32.xlu0 %v5693_v35 }
 0x12d   : > { %v2418_v5 = vmul.f32 %v2354_v51, %v5871_v40  ;;  %v2352_v10 = vmul.f32 %v5893_v2, %v5893_v2  ;;  %v5906_v49 = vadd.f32 %v4133_v6, %v5539_v7  ;;  %v5909_v21 = vsel %vm1223_vm0, %v2837_v22, 0.0  ;;  %v2156_v15 = vpop.f32.mrf.mxu1 }
 0x12e   : > { %v4339_v20 = vpop.eup %4338  ;;  %v2578_v18 = vmul.f32 0.7978846, %v2514_v39  ;;  %v2512_v61 = vadd.f32 %v2448_v52, %v5847_v13  ;;  %v2451_v42 = vmul.f32 0.044715, %v2387_v47  ;;  %v2385_v25 = vmul.f32 %v2321_v12, %v5886_v38  ;;  %1396 = vadd.xlane.f32.xlu1 %v5697_v9 }
 0x12f   : > { %v2482_v62 = vmul.f32 0.044715, %v2418_v5  ;;  %v2416_v24 = vmul.f32 %v2352_v10, %v5893_v2  ;;  %v2355_v35 = vmul.f32 %v5906_v49, %v5906_v49  ;;  %v5917_v46 = vadd.f32 %v5539_v7, %v2156_v15 }
 0x130   : > { %4344 = vtanh.f32 %v2578_v18  ;;  %v2576_v19 = vmul.f32 0.7978846, %v2512_v61  ;;  %v2515_v41 = vadd.f32 %v2451_v42, %v5866_v50  ;;  %v2449_v34 = vmul.f32 0.044715, %v2385_v25  ;;  %1399 = vadd.xlane.f32.xlu0 %v5701_v53 }
 0x131   : > { %v4341_v17 = vpop.eup %4340  ;;  %v2546_v48 = vadd.f32 %v2482_v62, %v5871_v40  ;;  %v2480_v11 = vmul.f32 0.044715, %v2416_v24  ;;  %v2419_v1 = vmul.f32 %v2355_v35, %v5906_v49  ;;  %v2353_v23 = vmul.f32 %v5917_v46, %v5917_v46 }
 0x132   : > { %v4343_v14 = vpop.eup %4342  ;;  %4346 = vtanh.f32 %v2576_v19  ;;  %v2579_v60 = vmul.f32 0.7978846, %v2515_v41  ;;  %v2513_v9 = vadd.f32 %v2449_v34, %v5886_v38  ;;  %v2767_v51 = vmul.f32 %v2703_v44, %v5757_v16  ;;  %1402 = vadd.xlane.f32.xlu1 %v5705_v36 }
 0x133   : > { %v2610_v22 = vmul.f32 0.7978846, %v2546_v48  ;;  %v2544_v39 = vadd.f32 %v2480_v11, %v5893_v2  ;;  %v2483_v52 = vmul.f32 0.044715, %v2419_v1  ;;  %v2417_v47 = vmul.f32 %v2353_v23, %v5917_v46 }
 0x134   : > { %4348 = vtanh.f32 %v2579_v60  ;;  %v2577_v6 = vmul.f32 0.7978846, %v2513_v9  ;;  %v2838_v12 = vmul.f32 %v5768_v26, %v2767_v51  ;;  %v2734_v53 = vadd.f32 1.0, %v4337_v56  ;;  %1405 = vadd.xlane.f32.xlu0 %v5711_v58 }
 0x135   : > { %4350 = vtanh.f32 %v2610_v22  ;;  %v2608_v5 = vmul.f32 0.7978846, %v2544_v39  ;;  %v2547_v10 = vadd.f32 %v2483_v52, %v5906_v49  ;;  %v2481_v18 = vmul.f32 0.044715, %v2417_v47 }
 0x136   : > { %4352 = vtanh.f32 %v2577_v6  ;;  %v5935_v16 = vsel %vm1223_vm0, %v2838_v12, 0.0  ;;  %v2798_v44 = vmul.f32 %v2734_v53, %v5829_v43  ;;  %v2735_v61 = vadd.f32 1.0, %v4341_v17  ;;  %1408 = vadd.xlane.f32.xlu1 %v5715_v45 }
 0x137   : > { %4354 = vtanh.f32 %v2608_v5  ;;  %v2611_v36 = vmul.f32 0.7978846, %v2547_v10  ;;  %v2545_v42 = vadd.f32 %v2481_v18, %v5917_v46  ;;  %v2835_v56 = vmul.f32 %v5768_v26, %v5874_v27  ;;  %v4104_v15 = vpop.f32.mrf.mxu0 }
 0x138   : > { %v2869_v58 = vmul.f32 %v5768_v26, %v2798_v44  ;;  %v2799_v25 = vmul.f32 %v2735_v61, %v5850_v31  ;;  %v2701_v62 = vadd.f32 1.0, %v5888_v30  ;;  %v2732_v24 = vadd.f32 1.0, %v4339_v20  ;;  %1411 = vadd.xlane.f32.xlu0 %v5719_v63 }
 0x139   : > { %4356 = vtanh.f32 %v2611_v36  ;;  %v2609_v43 = vmul.f32 0.7978846, %v2545_v42  ;;  %v5946_v35 = vadd.f32 %v4104_v15, %v5539_v7  ;;  %v5950_v45 = vsel %vm1223_vm0, %v2835_v56, 0.0  ;;  %v2041_v19 = vpop.f32.mrf.mxu0 }
 0x13a   : > { %v5954_v27 = vsel %vm1223_vm0, %v2869_v58, 0.0  ;;  %v2870_v31 = vmul.f32 %v5768_v26, %v2799_v25  ;;  %v2765_v30 = vmul.f32 %v2701_v62, %v5877_v4  ;;  %v2796_v20 = vmul.f32 %v2732_v24, %v5880_v28  ;;  %1414 = vadd.xlane.f32.xlu1 %v5723_v33 }
 0x13b   : > { %4358 = vtanh.f32 %v2609_v43  ;;  %v2326_v41 = vmul.f32 %v5946_v35, %v5946_v35  ;;  %v5962_v63 = vadd.f32 %v5539_v7, %v2041_v19  ;;  %v2285_v34 = vmul.f32 0.5, %v5793_v59  ;;  %v4105_v17 = vpop.f32.mrf.mxu0 }
 0x13c   : > { %v5967_v48 = vsel %vm1223_vm0, %v2870_v31, 0.0  ;;  %v2836_v4 = vmul.f32 %v5768_v26, %v2765_v30  ;;  %v2867_v28 = vmul.f32 %v5768_v26, %v2796_v20  ;;  %v2733_v11 = vadd.f32 1.0, %v4343_v14  ;;  %2902 = vadd.xlane.f32.xlu0 %v5788_v54 }
 0x13d   : > { %v4345_v1 = vpop.eup %4344  ;;  %v2390_v23 = vmul.f32 %v2326_v41, %v5946_v35  ;;  %v2324_v60 = vmul.f32 %v5962_v63, %v5962_v63  ;;  %v5975_v9 = vadd.f32 %v4105_v17, %v5539_v7  ;;  %v2258_v33 = vmul.f32 0.5, %v5832_v29  ;;  %v2044_v59 = vpop.f32.mrf.mxu0 }
 0x13e   : > { %v5986_v14 = vsel %vm1223_vm0, %v2836_v4, 0.0  ;;  %v5989_v51 = vsel %vm1223_vm0, %v2867_v28, 0.0  ;;  %v2797_v22 = vmul.f32 %v2733_v11, %v2285_v34  ;;  %v2706_v39 = vadd.f32 1.0, %v4345_v1  ;;  %v4136_v54 = vpop.f32.mrf.mxu1  ;;  %2905 = vadd.xlane.f32.xlu1 %v5811_v0  ;;  %v6044_v4 = vld [vmem:[#allocation2] ss:$0 sm:$0xff] }
 0x13f   : > { %v5991_v52 = vpop.eup %4346  ;;  %v2454_v47 = vmul.f32 0.044715, %v2390_v23  ;;  %v2388_v6 = vmul.f32 %v2324_v60, %v5962_v63  ;;  %v2327_v29 = vmul.f32 %v5975_v9, %v5975_v9  ;;  %v5997_v12 = vadd.f32 %v5539_v7, %v2044_v59 }
 0x140   : > { %v6001_v53 = vadd.f32 %v4136_v54, %v5539_v7  ;;  %v2868_v5 = vmul.f32 %v5768_v26, %v2797_v22  ;;  %v2770_v10 = vmul.f32 %v2706_v39, %v2258_v33  ;;  %v6005_v18 = vmul.f32 0.5, %v5866_v50  ;;  %v2169_v36 = vpop.f32.mrf.mxu1  ;;  %2998 = vadd.xlane.f32.xlu0 %v5815_v37 }
 0x141   : > { %v6007_v44 = vpop.eup %4348  ;;  %v2518_v61 = vadd.f32 %v2454_v47, %v5946_v35  ;;  %v2452_v42 = vmul.f32 0.044715, %v2388_v6  ;;  %v2391_v56 = vmul.f32 %v2327_v29, %v5975_v9  ;;  %v2325_v0 = vmul.f32 %v5997_v12, %v5997_v12 }
 0x142   : > { %v6020_v15 = vpop.eup %4350  ;;  %v2358_v50 = vmul.f32 %v6001_v53, %v6001_v53  ;;  %v6025_v58 = vadd.f32 %v5539_v7, %v2169_v36  ;;  %v6028_v25 = vsel %vm1223_vm0, %v2868_v5, 0.0  ;;  %v2841_v62 = vmul.f32 %v5768_v26, %v2770_v10  ;;  %v4137_v31 = vpop.f32.mrf.mxu1  ;;  %3001 = vadd.xlane.f32.xlu1 %v5835_v8 }
 0x143   : > { %v6031_v24 = vpop.eup %4352  ;;  %v2582_v37 = vmul.f32 0.7978846, %v2518_v61  ;;  %v2516_v43 = vadd.f32 %v2452_v42, %v5962_v63  ;;  %v2455_v19 = vmul.f32 0.044715, %v2391_v56  ;;  %v2389_v30 = vmul.f32 %v2325_v0, %v5997_v12 }
 0x144   : > { %v6036_v20 = vpop.eup %4354  ;;  %v2422_v41 = vmul.f32 %v2358_v50, %v6001_v53  ;;  %v2356_v34 = vmul.f32 %v6025_v58, %v6025_v58  ;;  %v6042_v17 = vadd.f32 %v4137_v31, %v5539_v7  ;;  %v6047_v28 = vsel %vm1223_vm0, %v2841_v62, 0.0  ;;  %v2172_v8 = vpop.f32.mrf.mxu1  ;;  %2896 = vadd.xlane.f32.xlu0 %v5838_v55 }
 0x145   : > { %4360 = vtanh.f32 %v2582_v37  ;;  %v2580_v11 = vmul.f32 0.7978846, %v2516_v43  ;;  %v2519_v1 = vadd.f32 %v2455_v19, %v5975_v9  ;;  %v2453_v23 = vmul.f32 0.044715, %v2389_v30  ;;  %v1226_v47 = vpop.xlane.xlu0 %1225 }
 0x146   : > { %v6052_v60 = vpop.eup %4356  ;;  %v2486_v33 = vmul.f32 0.044715, %v2422_v41  ;;  %v2420_v59 = vmul.f32 %v2356_v34, %v6025_v58  ;;  %v2359_v22 = vmul.f32 %v6042_v17, %v6042_v17  ;;  %v6058_v39 = vadd.f32 %v5539_v7, %v2172_v8  ;;  %2899 = vadd.xlane.f32.xlu1 %v5854_v32  ;;  %v1232_v29 = vpop.xlane.xlu1 %1231 }
 0x147   : > { %4362 = vtanh.f32 %v2580_v11  ;;  %v2583_v54 = vmul.f32 0.7978846, %v2519_v1  ;;  %v2517_v6 = vadd.f32 %v2453_v23, %v5997_v12  ;;  %v1423_v55 = vadd.f32 %v6044_v4, %v1226_v47 }
 0x148   : > { %v6063_v5 = vpop.eup %4358  ;;  %v2550_v10 = vadd.f32 %v2486_v33, %v6001_v53  ;;  %v2484_v61 = vmul.f32 0.044715, %v2420_v59  ;;  %v2423_v36 = vmul.f32 %v2359_v22, %v6042_v17  ;;  %v2357_v42 = vmul.f32 %v6058_v39, %v6058_v39  ;;  %2992 = vadd.xlane.f32.xlu0 %v5857_v57 }
 0x149   : > { %4364 = vtanh.f32 %v2583_v54  ;;  %v2581_v32 = vmul.f32 0.7978846, %v2517_v6  ;;  %v3765_v56 = vpack.c.bf16 %v1423_v55, %v1423_v55  ;;  %v1425_v0 = vadd.f32 %v6044_v4, %v1232_v29  ;;  %v4108_v19 = vpop.f32.mrf.mxu0  ;;  %v1229_v31 = vpop.xlane.xlu0 %1228 }
 0x14a   : > { %v2614_v50 = vmul.f32 0.7978846, %v2550_v10  ;;  %v2548_v62 = vadd.f32 %v2484_v61, %v6025_v58  ;;  %v2487_v37 = vmul.f32 0.044715, %v2423_v36  ;;  %v2421_v43 = vmul.f32 %v2357_v42, %v6058_v39  ;;  %2995 = vadd.xlane.f32.xlu1 %v5860_v3 }
 0x14b   : > { %4366 = vtanh.f32 %v2581_v32  ;;  %v6081_v30 = vadd.f32 %v4108_v19, %v5539_v7  ;;  %1744 = vst.msk [vmem:[%s6074_s21] sm:$0xf] %vm1743_vm1, %v3765_v56  ;;  %v3767_v41 = vpack.c.bf16 %v1425_v0, %v1425_v0  ;;  %v1424_v57 = vadd.f32 %v6044_v4, %v1229_v31  ;;  %v2057_v8 = vpop.f32.mrf.mxu0  ;;  %v1235_v23 = vpop.xlane.xlu1 %1234 }
 0x14c   : > { %4368 = vtanh.f32 %v2614_v50  ;;  %v2612_v34 = vmul.f32 0.7978846, %v2548_v62  ;;  %v2551_v11 = vadd.f32 %v2487_v37, %v6042_v17  ;;  %v2485_v1 = vmul.f32 0.044715, %v2421_v43  ;;  %2914 = vadd.xlane.f32.xlu0 %v5909_v21 }
 0x14d   : > { %v2330_v33 = vmul.f32 %v6081_v30, %v6081_v30  ;;  %v6091_v59 = vadd.f32 %v5539_v7, %v2057_v8  ;;  %1746 = vst.msk [vmem:[%s6074_s21 + $0x8] sm:$0xf] %vm1743_vm1, %v3767_v41  ;;  %v3766_v22 = vpack.c.bf16 %v1424_v57, %v1424_v57  ;;  %v1426_v3 = vadd.f32 %v6044_v4, %v1235_v23  ;;  %v4109_v6 = vpop.f32.mrf.mxu0  ;;  %v1238_v55 = vpop.xlane.xlu0 %1237 }
 0x14e   : > { %4370 = vtanh.f32 %v2612_v34  ;;  %v2615_v47 = vmul.f32 0.7978846, %v2551_v11  ;;  %v2549_v54 = vadd.f32 %v2485_v1, %v6058_v39  ;;  %v2707_v29 = vadd.f32 1.0, %v6007_v44  ;;  %2917 = vadd.xlane.f32.xlu1 %v5935_v16 }
 0x14f   : > { %v2394_v10 = vmul.f32 %v2330_v33, %v6081_v30  ;;  %v2328_v61 = vmul.f32 %v6091_v59, %v6091_v59  ;;  %v6103_v36 = vadd.f32 %v4109_v6, %v5539_v7  ;;  %1745 = vst.msk [vmem:[%s6074_s21 + $0x4] sm:$0xf] %vm1743_vm1, %v3766_v22  ;;  %v3768_v21 = vpack.c.bf16 %v1426_v3, %v1426_v3  ;;  %v2060_v32 = vpop.f32.mrf.mxu0  ;;  %v1241_v44 = vpop.xlane.xlu1 %1240 }
 0x150   : > { %4372 = vtanh.f32 %v2615_v47  ;;  %v2613_v42 = vmul.f32 0.7978846, %v2549_v54  ;;  %v1427_v56 = vadd.f32 %v6044_v4, %v1238_v55  ;;  %v2771_v0 = vmul.f32 %v2707_v29, %v6005_v18  ;;  %3010 = vadd.xlane.f32.xlu0 %v5954_v27 }
 0x151   : > { %v2458_v50 = vmul.f32 0.044715, %v2394_v10  ;;  %v2392_v62 = vmul.f32 %v2328_v61, %v6091_v59  ;;  %v2331_v37 = vmul.f32 %v6103_v36, %v6103_v36  ;;  %v6114_v43 = vadd.f32 %v5539_v7, %v2060_v32  ;;  %1747 = vst.msk [vmem:[%s6074_s21 + $0xc] sm:$0xf] %vm1743_vm1, %v3768_v21  ;;  %v1244_v31 = vpop.xlane.xlu0 %1243 }
 0x152   : > { %v6119_v16 = vpop.eup %4360  ;;  %4374 = vtanh.f32 %v2613_v42  ;;  %v3769_v19 = vpack.c.bf16 %v1427_v56, %v1427_v56  ;;  %v1428_v18 = vadd.f32 %v6044_v4, %v1241_v44  ;;  %v2842_v41 = vmul.f32 %v5768_v26, %v2771_v0  ;;  %3013 = vadd.xlane.f32.xlu1 %v5967_v48 }
 0x153   : > { %v2522_v57 = vadd.f32 %v2458_v50, %v6081_v30  ;;  %v2456_v34 = vmul.f32 0.044715, %v2392_v62  ;;  %v2395_v11 = vmul.f32 %v2331_v37, %v6103_v36  ;;  %v2329_v7 = vmul.f32 %v6114_v43, %v6114_v43  ;;  %v1247_v23 = vpop.xlane.xlu1 %1246 }
 0x154   : > { %v6128_v27 = vpop.eup %4362  ;;  %1748 = vst.msk [vmem:[%s6074_s21 + $0x10] sm:$0xf] %vm1743_vm1, %v3769_v19  ;;  %v3770_v1 = vpack.c.bf16 %v1428_v18, %v1428_v18  ;;  %v1429_v8 = vadd.f32 %v6044_v4, %v1244_v31  ;;  %v6134_v33 = vsel %vm1223_vm0, %v2842_v41, 0.0  ;;  %v2290_v22 = vmul.f32 0.5, %v5871_v40  ;;  %2908 = vadd.xlane.f32.xlu0 %v5950_v45  ;;  %v6152_v45 = vld [vmem:[%s7177_s5] ss:$0 sm:$0xff] }
 0x155   : > { %v2586_v3 = vmul.f32 0.7978846, %v2522_v57  ;;  %v2520_v47 = vadd.f32 %v2456_v34, %v6091_v59  ;;  %v2459_v54 = vmul.f32 0.044715, %v2395_v11  ;;  %v2393_v6 = vmul.f32 %v2329_v7, %v6114_v43  ;;  %v4140_v55 = vpop.f32.mrf.mxu1  ;;  %v1250_v61 = vpop.xlane.xlu0 %1249 }
 0x156   : > { %v6140_v48 = vpop.eup %4364  ;;  %1749 = vst.msk [vmem:[%s6074_s21 + $0x14] sm:$0xf] %vm1743_vm1, %v3770_v1  ;;  %v3771_v29 = vpack.c.bf16 %v1429_v8, %v1429_v8  ;;  %v1430_v10 = vadd.f32 %v6044_v4, %v1247_v23  ;;  %v2738_v40 = vadd.f32 1.0, %v6020_v15  ;;  %v6147_v21 = vmul.f32 0.5, %v5906_v49  ;;  %2911 = vadd.xlane.f32.xlu1 %v5986_v14 }
 0x157   : > { %4376 = vtanh.f32 %v2586_v3  ;;  %v2584_v42 = vmul.f32 0.7978846, %v2520_v47  ;;  %v6155_v32 = vadd.f32 %v6152_v45, %v4140_v55  ;;  %v2523_v56 = vadd.f32 %v2459_v54, %v6103_v36  ;;  %v2185_v49 = vpop.f32.mrf.mxu1  ;;  %v1253_v62 = vpop.xlane.xlu1 %1252 }
 0x158   : > { %v6159_v44 = vpop.eup %4366  ;;  %v2457_v15 = vmul.f32 0.044715, %v2393_v6  ;;  %1750 = vst.msk [vmem:[%s6074_s21 + $0x18] sm:$0xf] %vm1743_vm1, %v3771_v29  ;;  %v3772_v0 = vpack.c.bf16 %v1430_v10, %v1430_v10  ;;  %v1431_v50 = vadd.f32 %v6044_v4, %v1250_v61  ;;  %v2802_v37 = vmul.f32 %v2738_v40, %v2290_v22  ;;  %3004 = vadd.xlane.f32.xlu0 %v5989_v51 }
 0x159   : > { %v6164_v19 = vpop.eup %4368  ;;  %4378 = vtanh.f32 %v2584_v42  ;;  %v2362_v18 = vmul.f32 %v6155_v32, %v6155_v32  ;;  %v2587_v31 = vmul.f32 0.7978846, %v2523_v56  ;;  %v6169_v14 = vadd.f32 %v6152_v45, %v2185_v49  ;;  %v4141_v57 = vpop.f32.mrf.mxu1 }
 0x15a   : > { %v2521_v41 = vadd.f32 %v2457_v15, %v6114_v43  ;;  %1751 = vst.msk [vmem:[%s6074_s21 + $0x1c] sm:$0xf] %vm1743_vm1, %v3772_v0  ;;  %v3773_v34 = vpack.c.bf16 %v1431_v50, %v1431_v50  ;;  %v1432_v11 = vadd.f32 %v6044_v4, %v1253_v62  ;;  %v1256_v7 = vpop.xlane.xlu0 %1255  ;;  %v2873_v1 = vmul.f32 %v5768_v26, %v2802_v37 }
 0x15b   : > { %v6177_v8 = vpop.eup %4370  ;;  %v2426_v23 = vmul.f32 %v2362_v18, %v6155_v32  ;;  %4380 = vtanh.f32 %v2587_v31  ;;  %v2360_v51 = vmul.f32 %v6169_v14, %v6169_v14  ;;  %v6183_v22 = vadd.f32 %v6152_v45, %v4141_v57  ;;  %3007 = vadd.xlane.f32.xlu1 %v6028_v25  ;;  %v2188_v47 = vpop.f32.mrf.mxu1 }
 0x15c   : > { %v2585_v3 = vmul.f32 0.7978846, %v2521_v41  ;;  %1752 = vst.msk [vmem:[%s6074_s21 + $0x20] sm:$0xf] %vm1743_vm1, %v3773_v34  ;;  %v3774_v54 = vpack.c.bf16 %v1432_v11, %v1432_v11  ;;  %v1433_v6 = vadd.f32 %v6044_v4, %v1256_v7  ;;  %v1259_v55 = vpop.xlane.xlu1 %1258  ;;  %v3021_v29 = vsel %vm1223_vm0, %v2873_v1, 0.0  ;;  %2926 = vadd.xlane.f32.xlu0 %v6047_v28 }
 0x15d   : > { %v6190_v10 = vpop.eup %4372  ;;  %v2490_v61 = vmul.f32 0.044715, %v2426_v23  ;;  %v2424_v40 = vmul.f32 %v2360_v51, %v6169_v14  ;;  %v2363_v42 = vmul.f32 %v6183_v22, %v6183_v22  ;;  %v6196_v25 = vadd.f32 %v6152_v45, %v2188_v47 }
 0x15e   : > { %4382 = vtanh.f32 %v2585_v3  ;;  %1753 = vst.msk [vmem:[%s6074_s21 + $0x24] sm:$0xf] %vm1743_vm1, %v3774_v54  ;;  %v3775_v56 = vpack.c.bf16 %v1433_v6, %v1433_v6  ;;  %v1434_v15 = vadd.f32 %v6044_v4, %v1259_v55  ;;  %v1262_v49 = vpop.xlane.xlu0 %1261  ;;  %v2739_v0 = vadd.f32 1.0, %v6052_v60 }
 0x15f   : > { %v6203_v50 = vpop.eup %4374  ;;  %v2554_v62 = vadd.f32 %v2490_v61, %v6155_v32  ;;  %v2488_v37 = vmul.f32 0.044715, %v2424_v40  ;;  %v2427_v18 = vmul.f32 %v2363_v42, %v6183_v22  ;;  %v2361_v28 = vmul.f32 %v6196_v25, %v6196_v25  ;;  %2929 = vadd.xlane.f32.xlu1 %v6134_v33 }
 0x160   : > { %1754 = vst.msk [vmem:[%s6074_s21 + $0x28] sm:$0xf] %vm1743_vm1, %v3775_v56  ;;  %v3776_v31 = vpack.c.bf16 %v1434_v15, %v1434_v15  ;;  %v1435_v41 = vadd.f32 %v6044_v4, %v1262_v49  ;;  %v1265_v57 = vpop.xlane.xlu1 %1264  ;;  %v2803_v60 = vmul.f32 %v2739_v0, %v6147_v21  ;;  %v2256_v34 = vmul.f32 0.5, %v5847_v13  ;;  %3022 = vadd.xlane.f32.xlu0 %v3021_v29 }
 0x161   : > { %v2618_v11 = vmul.f32 0.7978846, %v2554_v62  ;;  %v2552_v7 = vadd.f32 %v2488_v37, %v6169_v14  ;;  %v2491_v1 = vmul.f32 0.044715, %v2427_v18  ;;  %v2425_v23 = vmul.f32 %v2361_v28, %v6196_v25  ;;  %v4112_v55 = vpop.f32.mrf.mxu0 }
 0x162   : > { %1755 = vst.msk [vmem:[%s6074_s21 + $0x2c] sm:$0xf] %vm1743_vm1, %v3776_v31  ;;  %v3777_v33 = vpack.c.bf16 %v1435_v41, %v1435_v41  ;;  %v1436_v51 = vadd.f32 %v6044_v4, %v1265_v57  ;;  %v1268_v3 = vpop.xlane.xlu0 %1267  ;;  %v2874_v47 = vmul.f32 %v5768_v26, %v2803_v60  ;;  %v2704_v21 = vadd.f32 1.0, %v5991_v52 }
 0x163   : > { %4384 = vtanh.f32 %v2618_v11  ;;  %v2616_v13 = vmul.f32 0.7978846, %v2552_v7  ;;  %v2555_v54 = vadd.f32 %v2491_v1, %v6183_v22  ;;  %v2489_v6 = vmul.f32 0.044715, %v2425_v23  ;;  %v2073_v0 = vpop.f32.mrf.mxu0 }
 0x164   : > { %v6223_v61 = vpop.eup %4376  ;;  %v6226_v29 = vadd.f32 %v6152_v45, %v4112_v55  ;;  %1756 = vst.msk [vmem:[%s6074_s21 + $0x30] sm:$0xf] %vm1743_vm1, %v3777_v33  ;;  %v3778_v40 = vpack.c.bf16 %v1436_v51, %v1436_v51  ;;  %v1437_v42 = vadd.f32 %v6044_v4, %v1268_v3  ;;  %v3024_v56 = vsel %vm1223_vm0, %v2874_v47, 0.0  ;;  %v1271_v52 = vpop.xlane.xlu1 %1270 }
 0x165   : > { %4386 = vtanh.f32 %v2616_v13  ;;  %v2619_v15 = vmul.f32 0.7978846, %v2555_v54  ;;  %v2553_v49 = vadd.f32 %v2489_v6, %v6196_v25  ;;  %3025 = vadd.xlane.f32.xlu1 %v3024_v56  ;;  %v2768_v62 = vmul.f32 %v2704_v21, %v2256_v34  ;;  %v4113_v11 = vpop.f32.mrf.mxu0 }
 0x166   : > { %v6233_v37 = vpop.eup %4378  ;;  %v2334_v18 = vmul.f32 %v6226_v29, %v6226_v29  ;;  %v6238_v28 = vadd.f32 %v6152_v45, %v2073_v0  ;;  %1757 = vst.msk [vmem:[%s6074_s21 + $0x34] sm:$0xf] %vm1743_vm1, %v3778_v40  ;;  %v3779_v31 = vpack.c.bf16 %v1437_v42, %v1437_v42  ;;  %v1438_v41 = vadd.f32 %v6044_v4, %v1271_v52  ;;  %v1274_v57 = vpop.xlane.xlu0 %1273 }
 0x167   : > { %4388 = vtanh.f32 %v2619_v15  ;;  %v2617_v60 = vmul.f32 0.7978846, %v2553_v49  ;;  %v2839_v34 = vmul.f32 %v5768_v26, %v2768_v62  ;;  %v1439_v7 = vadd.f32 %v6044_v4, %v1274_v57  ;;  %v2076_v26 = vpop.f32.mrf.mxu0 }
 0x168   : > { %7255 = vst [vmem:[#allocation4_spill] sm:$0xff] %v6238_v28  ;;  %v6245_v1 = vpop.eup %4380  ;;  %v2398_v23 = vmul.f32 %v2334_v18, %v6226_v29  ;;  %v2332_v33 = vmul.f32 %v6238_v28, %v6238_v28  ;;  %v6251_v51 = vadd.f32 %v6152_v45, %v4113_v11  ;;  %1758 = vst.msk [vmem:[%s6074_s21 + $0x38] sm:$0xf] %vm1743_vm1, %v3779_v31  ;;  %v1277_v47 = vpop.xlane.xlu1 %1276  ;;  %v2257_v54 = vmul.f32 0.5, %v5886_v38 }
 0x169   : > { %v3780_v3 = vpack.c.bf16 %v1438_v41, %v1438_v41  ;;  %4390 = vtanh.f32 %v2617_v60  ;;  %v2919_v21 = vsel %vm1223_vm0, %v2839_v34, 0.0  ;;  %v3781_v13 = vpack.c.bf16 %v1439_v7, %v1439_v7 }
 0x16a   : > { %v2462_v6 = vmul.f32 0.044715, %v2398_v23  ;;  %v2396_v55 = vmul.f32 %v2332_v33, %v6238_v28  ;;  %v2335_v40 = vmul.f32 %v6251_v51, %v6251_v51  ;;  %v6261_v42 = vadd.f32 %v6152_v45, %v2076_v26  ;;  %2920 = vadd.xlane.f32.xlu0 %v2919_v21  ;;  %v1280_v56 = vpop.xlane.xlu0 %1279  ;;  %v4144_v15 = vpop.f32.mrf.mxu1 }
 0x16b   : > { %1759 = vst.msk [vmem:[%s6074_s21 + $0x3c] sm:$0xf] %vm1743_vm1, %v3780_v3  ;;  %v6265_v52 = vpop.eup %4382  ;;  %1760 = vst.msk [vmem:[%s6074_s21 + $0x40] sm:$0xf] %vm1743_vm1, %v3781_v13  ;;  %v2705_v38 = vadd.f32 1.0, %v6031_v24  ;;  %v2288_v49 = vmul.f32 0.5, %v5893_v2  ;;  %v1440_v62 = vadd.f32 %v6044_v4, %v1277_v47  ;;  %v6276_v57 = vadd.f32 %v6152_v45, %v4144_v15 }
 0x16c   : > { %7256 = vst [vmem:[#allocation5_spill] sm:$0xff] %v6261_v42  ;;  %v2736_v0 = vadd.f32 1.0, %v6036_v20  ;;  %v2526_v18 = vadd.f32 %v2462_v6, %v6226_v29  ;;  %v2460_v31 = vmul.f32 0.044715, %v2396_v55  ;;  %v2399_v41 = vmul.f32 %v2335_v40, %v6251_v51  ;;  %v6278_v60 = vpop.xlane.xlu1 %1282  ;;  %v2201_v24 = vpop.f32.mrf.mxu1 }
 0x16d   : > { %7257 = vst [vmem:[#allocation6_spill] sm:$0xff] %v6276_v57  ;;  %v2333_v11 = vmul.f32 %v6261_v42, %v6261_v42  ;;  %v2769_v2 = vmul.f32 %v2705_v38, %v2257_v54  ;;  %v3782_v20 = vpack.c.bf16 %v1440_v62, %v1440_v62  ;;  %v2366_v3 = vmul.f32 %v6276_v57, %v6276_v57  ;;  %v6292_v54 = vld [vmem:[%s7178_s6] ss:$0 sm:$0xff] }
 0x16e   : > { %v2800_v34 = vmul.f32 %v2736_v0, %v2288_v49  ;;  %v2590_v7 = vmul.f32 0.7978846, %v2526_v18  ;;  %v2524_v23 = vadd.f32 %v2460_v31, %v6238_v28  ;;  %v2463_v33 = vmul.f32 0.044715, %v2399_v41  ;;  %v1286_v47 = vpop.xlane.xlu0 %1285  ;;  %v4145_v13 = vpop.f32.mrf.mxu1 }
 0x16f   : > { %v2397_v26 = vmul.f32 %v2333_v11, %v6261_v42  ;;  %v6287_v21 = vadd.f32 %v6152_v45, %v2201_v24  ;;  %v2840_v6 = vmul.f32 %v6292_v54, %v2769_v2  ;;  %1761 = vst.msk [vmem:[%s6074_s21 + $0x44] sm:$0xf] %vm1743_vm1, %v3782_v20  ;;  %v2430_v49 = vmul.f32 %v2366_v3, %v6276_v57 }
 0x170   : > { %v2871_v55 = vmul.f32 %v6292_v54, %v2800_v34  ;;  %v6298_v40 = vpop.eup %4384  ;;  %4392 = vtanh.f32 %v2590_v7  ;;  %v2588_v15 = vmul.f32 0.7978846, %v2524_v23  ;;  %v2527_v38 = vadd.f32 %v2463_v33, %v6251_v51  ;;  %v6302_v0 = vpop.xlane.xlu1 %1288 }
 0x171   : > { %7258 = vst [vmem:[#allocation7_spill] sm:$0xff] %v6287_v21  ;;  %v2461_v62 = vmul.f32 0.044715, %v2397_v26  ;;  %v2364_v18 = vmul.f32 %v6287_v21, %v6287_v21  ;;  %v6307_v31 = vadd.f32 %v6152_v45, %v4145_v13  ;;  %v2204_v41 = vpop.f32.mrf.mxu1  ;;  %v2922_v11 = vsel %vm1223_vm0, %v2840_v6, 0.0 }
 0x172   : > { %v6310_v24 = vpop.eup %4386  ;;  %4394 = vtanh.f32 %v2588_v15  ;;  %v2591_v2 = vmul.f32 0.7978846, %v2527_v38  ;;  %v2494_v34 = vmul.f32 0.044715, %v2430_v49  ;;  %v6313_v20 = vadd.f32 %v6152_v45, %v2204_v41  ;;  %2923 = vadd.xlane.f32.xlu1 %v2922_v11  ;;  %v6315_v7 = vpop.xlane.xlu0 %1291 }
 0x173   : > { %7259 = vst [vmem:[#allocation8_spill] sm:$0xff] %v6307_v31  ;;  %v2525_v23 = vadd.f32 %v2461_v62, %v6261_v42  ;;  %v2428_v33 = vmul.f32 %v2364_v18, %v6287_v21  ;;  %v2367_v3 = vmul.f32 %v6307_v31, %v6307_v31  ;;  %v3015_v26 = vsel %vm1223_vm0, %v2871_v55, 0.0 }
 0x174   : > { %7260 = vst [vmem:[#allocation9_spill] sm:$0xff] %v6313_v20  ;;  %v6322_v13 = vpop.eup %4388  ;;  %4396 = vtanh.f32 %v2591_v2  ;;  %v2558_v6 = vadd.f32 %v2494_v34, %v6276_v57  ;;  %v2365_v15 = vmul.f32 %v6313_v20, %v6313_v20  ;;  %3016 = vadd.xlane.f32.xlu0 %v3015_v26  ;;  %v1441_v38 = vadd.f32 %v6044_v4, %v1280_v56  ;;  %v6328_v49 = vpop.xlane.xlu1 %1294 }
 0x175   : > { %v2589_v62 = vmul.f32 0.7978846, %v2525_v23  ;;  %v2492_v18 = vmul.f32 0.044715, %v2428_v33  ;;  %v2431_v41 = vmul.f32 %v2367_v3, %v6307_v31  ;;  %v2289_v55 = vmul.f32 0.5, %v5917_v46 }
 0x176   : > { %v6332_v11 = vpop.eup %4390  ;;  %v2622_v2 = vmul.f32 0.7978846, %v2558_v6  ;;  %v2429_v34 = vmul.f32 %v2365_v15, %v6313_v20  ;;  %v3783_v42 = vpack.c.bf16 %v1441_v38, %v1441_v38  ;;  %v2737_v28 = vadd.f32 1.0, %v6063_v5  ;;  %v6336_v26 = vpop.xlane.xlu0 %1297 }
 0x177   : > { %4398 = vtanh.f32 %v2589_v62  ;;  %v2556_v56 = vadd.f32 %v2492_v18, %v6287_v21  ;;  %v2495_v23 = vmul.f32 0.044715, %v2431_v41  ;;  %v2262_v33 = vmul.f32 0.5, %v5946_v35 }
 0x178   : > { %4400 = vtanh.f32 %v2622_v2  ;;  %v2493_v3 = vmul.f32 0.044715, %v2429_v34  ;;  %1762 = vst.msk [vmem:[%s6074_s21 + $0x48] sm:$0xf] %vm1743_vm1, %v3783_v42  ;;  %v2801_v46 = vmul.f32 %v2737_v28, %v2289_v55  ;;  %v2710_v6 = vadd.f32 1.0, %v6119_v16  ;;  %v6343_v57 = vpop.xlane.xlu1 %1300  ;;  %v4116_v38 = vpop.f32.mrf.mxu0 }
 0x179   : > { %v2620_v15 = vmul.f32 0.7978846, %v2556_v56  ;;  %v2559_v5 = vadd.f32 %v2495_v23, %v6307_v31  ;;  %v1442_v62 = vadd.f32 %v6044_v4, %v6278_v60  ;;  %v1443_v18 = vadd.f32 %v6044_v4, %v1286_v47 }
 0x17a   : > { %v2557_v35 = vadd.f32 %v2493_v3, %v6313_v20  ;;  %v6351_v41 = vadd.f32 %v6152_v45, %v4116_v38  ;;  %v2872_v28 = vmul.f32 %v6292_v54, %v2801_v46  ;;  %v2774_v42 = vmul.f32 %v2710_v6, %v2262_v33  ;;  %v6354_v16 = vpop.xlane.xlu0 %1303  ;;  %v2089_v2 = vpop.f32.mrf.mxu0 }
 0x17b   : > { %4402 = vtanh.f32 %v2620_v15  ;;  %v2623_v55 = vmul.f32 0.7978846, %v2559_v5  ;;  %v3784_v34 = vpack.c.bf16 %v1442_v62, %v1442_v62  ;;  %v3785_v56 = vpack.c.bf16 %v1443_v18, %v1443_v18 }
 0x17c   : > { %7261 = vst [vmem:[#allocation10_spill] sm:$0xff] %v6351_v41  ;;  %v2621_v60 = vmul.f32 0.7978846, %v2557_v35  ;;  %v2338_v47 = vmul.f32 %v6351_v41, %v6351_v41  ;;  %v6359_v23 = vadd.f32 %v6152_v45, %v2089_v2  ;;  %v3018_v3 = vsel %vm1223_vm0, %v2872_v28, 0.0  ;;  %v6362_v46 = vpop.xlane.xlu1 %1306  ;;  %v4117_v6 = vpop.f32.mrf.mxu0 }
 0x17d   : > { %v6364_v33 = vpop.eup %4392  ;;  %4404 = vtanh.f32 %v2623_v55  ;;  %3019 = vadd.xlane.f32.xlu1 %v3018_v3  ;;  %v2845_v15 = vmul.f32 %v6292_v54, %v2774_v42  ;;  %1763 = vst.msk [vmem:[%s6074_s21 + $0x4c] sm:$0xf] %vm1743_vm1, %v3784_v34  ;;  %1764 = vst.msk [vmem:[%s6074_s21 + $0x50] sm:$0xf] %vm1743_vm1, %v3785_v56  ;;  %v2263_v5 = vmul.f32 0.5, %v5975_v9  ;;  %v2711_v38 = vadd.f32 1.0, %v6140_v48 }
 0x17e   : > { %7262 = vst [vmem:[#allocation11_spill] sm:$0xff] %v6359_v23  ;;  %4406 = vtanh.f32 %v2621_v60  ;;  %v2402_v62 = vmul.f32 %v2338_v47, %v6351_v41  ;;  %v2336_v18 = vmul.f32 %v6359_v23, %v6359_v23  ;;  %v6377_v35 = vadd.f32 %v6152_v45, %v4117_v6  ;;  %v6379_v28 = vpop.xlane.xlu0 %1309  ;;  %v2092_v55 = vpop.f32.mrf.mxu0 }
 0x17f   : > { %v6381_v42 = vpop.eup %4394  ;;  %v2937_v2 = vsel %vm1223_vm0, %v2845_v15, 0.0  ;;  %v2775_v34 = vmul.f32 %v2711_v38, %v2263_v5  ;;  %v2294_v9 = vmul.f32 0.5, %v6001_v53  ;;  %v2742_v48 = vadd.f32 1.0, %v6164_v19 }
 0x180   : > { %7263 = vst [vmem:[#allocation12_spill] sm:$0xff] %v6377_v35  ;;  %7264 = vst [vmem:[#allocation13_spill] sm:$0xff] %v6381_v42  ;;  %v2466_v56 = vmul.f32 0.044715, %v2402_v62  ;;  %v2400_v60 = vmul.f32 %v2336_v18, %v6359_v23  ;;  %v2339_v47 = vmul.f32 %v6377_v35, %v6377_v35  ;;  %v6390_v3 = vadd.f32 %v6152_v45, %v2092_v55  ;;  %v6392_v6 = vpop.xlane.xlu1 %1312 }
 0x181   : > { %2938 = vadd.xlane.f32.xlu0 %v2937_v2  ;;  %v6394_v20 = vpop.eup %4396  ;;  %v2846_v15 = vmul.f32 %v6292_v54, %v2775_v34  ;;  %v2806_v5 = vmul.f32 %v2742_v48, %v2294_v9  ;;  %v1444_v53 = vadd.f32 %v6044_v4, %v6302_v0  ;;  %v1445_v19 = vadd.f32 %v6044_v4, %v6315_v7 }
 0x182   : > { %7265 = vst [vmem:[#allocation14_spill] sm:$0xff] %v6390_v3  ;;  %v2530_v38 = vadd.f32 %v2466_v56, %v6351_v41  ;;  %v2464_v62 = vmul.f32 0.044715, %v2400_v60  ;;  %v2403_v18 = vmul.f32 %v2339_v47, %v6377_v35  ;;  %v2337_v55 = vmul.f32 %v6390_v3, %v6390_v3  ;;  %v6405_v2 = vpop.xlane.xlu0 %1315 }
 0x183   : > { %v2940_v34 = vsel %vm1223_vm0, %v2846_v15, 0.0  ;;  %v2877_v9 = vmul.f32 %v6292_v54, %v2806_v5  ;;  %v3786_v0 = vpack.c.bf16 %v1444_v53, %v1444_v53  ;;  %v3787_v48 = vpack.c.bf16 %v1445_v19, %v1445_v19 }
 0x184   : > { %v6409_v21 = vpop.eup %4398  ;;  %v2594_v7 = vmul.f32 0.7978846, %v2530_v38  ;;  %v2528_v56 = vadd.f32 %v2464_v62, %v6359_v23  ;;  %v2467_v60 = vmul.f32 0.044715, %v2403_v18  ;;  %v2401_v47 = vmul.f32 %v2337_v55, %v6390_v3  ;;  %2941 = vadd.xlane.f32.xlu1 %v2940_v34  ;;  %v6413_v41 = vpop.xlane.xlu1 %1318 }
 0x185   : > { %7266 = vst [vmem:[#allocation15_spill] sm:$0xff] %v6409_v21  ;;  %v6415_v42 = vpop.eup %4400  ;;  %v4148_v31 = vpop.f32.mrf.mxu1  ;;  %v3033_v15 = vsel %vm1223_vm0, %v2877_v9, 0.0  ;;  %1765 = vst.msk [vmem:[%s6074_s21 + $0x54] sm:$0xf] %vm1743_vm1, %v3786_v0  ;;  %v2295_v5 = vmul.f32 0.5, %v6042_v17  ;;  %v2743_v53 = vadd.f32 1.0, %v6190_v10  ;;  %v1446_v17 = vadd.f32 %v6044_v4, %v6328_v49 }
 0x186   : > { %1766 = vst.msk [vmem:[%s6074_s21 + $0x58] sm:$0xf] %vm1743_vm1, %v3787_v48  ;;  %v2260_v19 = vmul.f32 0.5, %v5962_v63  ;;  %4408 = vtanh.f32 %v2594_v7  ;;  %v2592_v38 = vmul.f32 0.7978846, %v2528_v56  ;;  %v2531_v62 = vadd.f32 %v2467_v60, %v6377_v35  ;;  %3034 = vadd.xlane.f32.xlu0 %v3033_v15  ;;  %v6429_v55 = vpop.xlane.xlu0 %1321 }
 0x187   : > { %v6427_v18 = vadd.f32 %v6152_v45, %v4148_v31  ;;  %v2465_v34 = vmul.f32 0.044715, %v2401_v47  ;;  %v2217_v9 = vpop.f32.mrf.mxu1  ;;  %v2807_v0 = vmul.f32 %v2743_v53, %v2295_v5  ;;  %v2708_v48 = vadd.f32 1.0, %v6128_v27 }
 0x188   : > { %v6434_v10 = vpop.eup %4402  ;;  %4410 = vtanh.f32 %v2592_v38  ;;  %v2595_v63 = vmul.f32 0.7978846, %v2531_v62  ;;  %v6439_v31 = vadd.f32 %v6152_v45, %v2217_v9  ;;  %v6441_v56 = vpop.xlane.xlu1 %1324  ;;  %v3788_v49 = vpack.c.bf16 %v1446_v17, %v1446_v17 }
 0x189   : > { %7267 = vst [vmem:[#allocation16_spill] sm:$0xff] %v6427_v18  ;;  %7268 = vst [vmem:[#allocation17_spill] sm:$0xff] %v6434_v10  ;;  %v2370_v7 = vmul.f32 %v6427_v18, %v6427_v18  ;;  %v2529_v60 = vadd.f32 %v2465_v34, %v6390_v3  ;;  %v4149_v47 = vpop.f32.mrf.mxu1  ;;  %v2878_v27 = vmul.f32 %v6292_v54, %v2807_v0 }
 0x18a   : > { %7269 = vst [vmem:[#allocation18_spill] sm:$0xff] %v6439_v31  ;;  %v2772_v15 = vmul.f32 %v2708_v48, %v2260_v19  ;;  %v6445_v5 = vpop.eup %4404  ;;  %4412 = vtanh.f32 %v2595_v63  ;;  %v2368_v38 = vmul.f32 %v6439_v31, %v6439_v31  ;;  %v6451_v62 = vadd.f32 %v6152_v45, %v4149_v47  ;;  %v6453_v9 = vpop.xlane.xlu0 %1327  ;;  %1767 = vst.msk [vmem:[%s6074_s21 + $0x5c] sm:$0xf] %vm1743_vm1, %v3788_v49 }
 0x18b   : > { %v2434_v53 = vmul.f32 %v2370_v7, %v6427_v18  ;;  %v6455_v34 = vpop.eup %4406  ;;  %v2593_v3 = vmul.f32 0.7978846, %v2529_v60  ;;  %v2220_v23 = vpop.f32.mrf.mxu1  ;;  %v3036_v19 = vsel %vm1223_vm0, %v2878_v27, 0.0  ;;  %v1447_v48 = vadd.f32 %v6044_v4, %v6336_v26 }
 0x18c   : > { %7270 = vst [vmem:[#allocation19_spill] sm:$0xff] %v6451_v62  ;;  %7271 = vst [vmem:[#allocation20_spill] sm:$0xff] %v6455_v34  ;;  %v2843_v0 = vmul.f32 %v6292_v54, %v2772_v15  ;;  %v2432_v63 = vmul.f32 %v2368_v38, %v6439_v31  ;;  %v2371_v7 = vmul.f32 %v6451_v62, %v6451_v62  ;;  %3037 = vadd.xlane.f32.xlu1 %v3036_v19  ;;  %v6469_v60 = vpop.xlane.xlu1 %1330 }
 0x18d   : > { %v2498_v17 = vmul.f32 0.044715, %v2434_v53  ;;  %v6467_v47 = vadd.f32 %v6152_v45, %v2220_v23  ;;  %4414 = vtanh.f32 %v2593_v3  ;;  %v3789_v15 = vpack.c.bf16 %v1447_v48, %v1447_v48  ;;  %v4120_v19 = vpop.f32.mrf.mxu0 }
 0x18e   : > { %v2931_v27 = vsel %vm1223_vm0, %v2843_v0, 0.0  ;;  %v2261_v49 = vmul.f32 0.5, %v5997_v12  ;;  %v2496_v53 = vmul.f32 0.044715, %v2432_v63  ;;  %v2435_v38 = vmul.f32 %v2371_v7, %v6451_v62  ;;  %v6477_v23 = vpop.xlane.xlu0 %1333 }
 0x18f   : > { %7272 = vst [vmem:[#allocation21_spill] sm:$0xff] %v6467_v47  ;;  %v2562_v26 = vadd.f32 %v2498_v17, %v6427_v18  ;;  %v2369_v35 = vmul.f32 %v6467_v47, %v6467_v47  ;;  %2932 = vadd.xlane.f32.xlu0 %v2931_v27  ;;  %1768 = vst.msk [vmem:[%s6074_s21 + $0x60] sm:$0xf] %vm1743_vm1, %v3789_v15  ;;  %v2709_v3 = vadd.f32 1.0, %v6159_v44  ;;  %v2292_v0 = vmul.f32 0.5, %v6025_v58  ;;  %v2105_v44 = vpop.f32.mrf.mxu0 }
 0x190   : > { %v2740_v12 = vadd.f32 1.0, %v6177_v8  ;;  %v1448_v48 = vadd.f32 %v6044_v4, %v6343_v57  ;;  %v2560_v63 = vadd.f32 %v2496_v53, %v6439_v31  ;;  %v2499_v7 = vmul.f32 0.044715, %v2435_v38  ;;  %v6488_v18 = vpop.xlane.xlu1 %1336 }
 0x191   : > { %v2626_v17 = vmul.f32 0.7978846, %v2562_v26  ;;  %v2433_v27 = vmul.f32 %v2369_v35, %v6467_v47  ;;  %v6491_v34 = vadd.f32 %v6152_v45, %v4120_v19  ;;  %v2773_v15 = vmul.f32 %v2709_v3, %v2261_v49  ;;  %v4121_v19 = vpop.f32.mrf.mxu0 }
 0x192   : > { %v2804_v58 = vmul.f32 %v2740_v12, %v2292_v0  ;;  %v3790_v10 = vpack.c.bf16 %v1448_v48, %v1448_v48  ;;  %v2624_v8 = vmul.f32 0.7978846, %v2560_v63  ;;  %v2563_v57 = vadd.f32 %v2499_v7, %v6451_v62  ;;  %v6494_v21 = vpop.xlane.xlu0 %1339 }
 0x193   : > { %4416 = vtanh.f32 %v2626_v17  ;;  %v2497_v26 = vmul.f32 0.044715, %v2433_v27  ;;  %v6496_v53 = vpop.eup %4408  ;;  %v2342_v35 = vmul.f32 %v6491_v34, %v6491_v34  ;;  %v6501_v38 = vadd.f32 %v6152_v45, %v2105_v44  ;;  %v2108_v44 = vpop.f32.mrf.mxu0 }
 0x194   : > { %v2844_v49 = vmul.f32 %v6292_v54, %v2773_v15  ;;  %v2875_v3 = vmul.f32 %v6292_v54, %v2804_v58  ;;  %1769 = vst.msk [vmem:[%s6074_s21 + $0x64] sm:$0xf] %vm1743_vm1, %v3790_v10  ;;  %4418 = vtanh.f32 %v2624_v8  ;;  %v2627_v0 = vmul.f32 0.7978846, %v2563_v57  ;;  %v6511_v17 = vpop.xlane.xlu1 %1342 }
 0x195   : > { %7273 = vst [vmem:[#allocation22_spill] sm:$0xff] %v6501_v38  ;;  %v2561_v12 = vadd.f32 %v2497_v26, %v6467_v47  ;;  %v6509_v48 = vadd.f32 %v6152_v45, %v4121_v19  ;;  %v6513_v63 = vpop.eup %4410  ;;  %v2406_v7 = vmul.f32 %v2342_v35, %v6491_v34  ;;  %v2340_v27 = vmul.f32 %v6501_v38, %v6501_v38 }
 0x196   : > { %7275 = vst [vmem:[#allocation24_spill] sm:$0xff] %v6513_v63  ;;  %v2934_v15 = vsel %vm1223_vm0, %v2844_v49, 0.0  ;;  %v3027_v10 = vsel %vm1223_vm0, %v2875_v3, 0.0  ;;  %4420 = vtanh.f32 %v2627_v0  ;;  %v6523_v57 = vadd.f32 %v6152_v45, %v2108_v44  ;;  %v6525_v26 = vpop.xlane.xlu0 %1345 }
 0x197   : > { %7274 = vst [vmem:[#allocation23_spill] sm:$0xff] %v6509_v48  ;;  %v2625_v58 = vmul.f32 0.7978846, %v2561_v12  ;;  %v2343_v8 = vmul.f32 %v6509_v48, %v6509_v48  ;;  %2935 = vadd.xlane.f32.xlu1 %v2934_v15  ;;  %3028 = vadd.xlane.f32.xlu0 %v3027_v10  ;;  %v6527_v35 = vpop.eup %4412  ;;  %v2470_v19 = vmul.f32 0.044715, %v2406_v7  ;;  %v2404_v47 = vmul.f32 %v2340_v27, %v6501_v38 }
 0x198   : > { %7276 = vst [vmem:[#allocation25_spill] sm:$0xff] %v6523_v57  ;;  %7277 = vst [vmem:[#allocation26_spill] sm:$0xff] %v6527_v35  ;;  %v1449_v49 = vadd.f32 %v6044_v4, %v6354_v16  ;;  %v2293_v3 = vmul.f32 0.5, %v6058_v39  ;;  %v2341_v12 = vmul.f32 %v6523_v57, %v6523_v57  ;;  %v2741_v44 = vadd.f32 1.0, %v6203_v50  ;;  %v6537_v15 = vpop.xlane.xlu1 %1348 }
 0x199   : > { %4422 = vtanh.f32 %v2625_v58  ;;  %v2407_v0 = vmul.f32 %v2343_v8, %v6509_v48  ;;  %v2534_v7 = vadd.f32 %v2470_v19, %v6491_v34  ;;  %v2468_v10 = vmul.f32 0.044715, %v2404_v47 }
 0x19a   : > { %v3791_v27 = vpack.c.bf16 %v1449_v49, %v1449_v49  ;;  %v2266_v31 = vmul.f32 0.5, %v6081_v30  ;;  %v6541_v16 = vpop.eup %4414  ;;  %v2405_v58 = vmul.f32 %v2341_v12, %v6523_v57  ;;  %v2805_v8 = vmul.f32 %v2741_v44, %v2293_v3  ;;  %v6545_v62 = vpop.xlane.xlu0 %1351 }
 0x19b   : > { %v2471_v39 = vmul.f32 0.044715, %v2407_v0  ;;  %v2714_v63 = vadd.f32 1.0, %v6223_v61  ;;  %v2598_v35 = vmul.f32 0.7978846, %v2534_v7  ;;  %v2532_v50 = vadd.f32 %v2468_v10, %v6501_v38  ;;  %v4152_v0 = vpop.f32.mrf.mxu1 }
 0x19c   : > { %1770 = vst.msk [vmem:[%s6074_s21 + $0x68] sm:$0xf] %vm1743_vm1, %v3791_v27  ;;  %v1450_v47 = vadd.f32 %v6044_v4, %v6362_v46  ;;  %v1451_v30 = vadd.f32 %v6044_v4, %v6379_v28  ;;  %v2469_v49 = vmul.f32 0.044715, %v2405_v58  ;;  %v2876_v3 = vmul.f32 %v6292_v54, %v2805_v8  ;;  %v6556_v12 = vpop.xlane.xlu1 %1354 }
 0x19d   : > { %v2535_v19 = vadd.f32 %v2471_v39, %v6509_v48  ;;  %v2778_v61 = vmul.f32 %v2714_v63, %v2266_v31  ;;  %4424 = vtanh.f32 %v2598_v35  ;;  %v2596_v44 = vmul.f32 0.7978846, %v2532_v50  ;;  %v2233_v4 = vpop.f32.mrf.mxu1 }
 0x19e   : > { %v6559_v7 = vadd.f32 %v6152_v45, %v4152_v0  ;;  %v3792_v10 = vpack.c.bf16 %v1450_v47, %v1450_v47  ;;  %v2533_v27 = vadd.f32 %v2469_v49, %v6523_v57  ;;  %v3030_v28 = vsel %vm1223_vm0, %v2876_v3, 0.0  ;;  %v6564_v58 = vpop.xlane.xlu0 %1357 }
 0x19f   : > { %v2599_v46 = vmul.f32 0.7978846, %v2535_v19  ;;  %v2849_v39 = vmul.f32 %v6292_v54, %v2778_v61  ;;  %4426 = vtanh.f32 %v2596_v44  ;;  %v6571_v35 = vadd.f32 %v6152_v45, %v2233_v4  ;;  %3031 = vadd.xlane.f32.xlu1 %v3030_v28  ;;  %v4153_v47 = vpop.f32.mrf.mxu1 }
 0x1a0   : > { %7278 = vst [vmem:[#allocation27_spill] sm:$0xff] %v6559_v7  ;;  %v6566_v31 = vpop.eup %4416  ;;  %v2374_v63 = vmul.f32 %v6559_v7, %v6559_v7  ;;  %1771 = vst.msk [vmem:[%s6074_s21 + $0x6c] sm:$0xf] %vm1743_vm1, %v3792_v10  ;;  %v3793_v8 = vpack.c.bf16 %v1451_v30, %v1451_v30  ;;  %v2597_v50 = vmul.f32 0.7978846, %v2533_v27  ;;  %v2267_v49 = vmul.f32 0.5, %v6103_v36  ;;  %v6577_v0 = vpop.xlane.xlu1 %1360 }
 0x1a1   : > { %4428 = vtanh.f32 %v2599_v46  ;;  %v2949_v19 = vsel %vm1223_vm0, %v2849_v39, 0.0  ;;  %v6579_v3 = vpop.eup %4418  ;;  %v2372_v44 = vmul.f32 %v6571_v35, %v6571_v35  ;;  %v6585_v4 = vadd.f32 %v6152_v45, %v4153_v47  ;;  %v2236_v10 = vpop.f32.mrf.mxu1  ;;  %v6592_v27 = vld [vmem:[#allocation2] ss:$0 sm:$0xff] }
 0x1a2   : > { %v2438_v61 = vmul.f32 %v2374_v63, %v6559_v7  ;;  %2950 = vadd.xlane.f32.xlu0 %v2949_v19  ;;  %1772 = vst.msk [vmem:[%s6074_s21 + $0x70] sm:$0xf] %vm1743_vm1, %v3793_v8  ;;  %v2715_v30 = vadd.f32 1.0, %v6245_v1  ;;  %4430 = vtanh.f32 %v2597_v50  ;;  %v2298_v36 = vmul.f32 0.5, %v6155_v32  ;;  %v6596_v39 = vpop.xlane.xlu0 %1363 }
 0x1a3   : > { %v2746_v46 = vadd.f32 1.0, %v6298_v40  ;;  %v1452_v28 = vadd.f32 %v6592_v27, %v6392_v6  ;;  %v6598_v63 = vpop.eup %4420  ;;  %v2436_v8 = vmul.f32 %v2372_v44, %v6571_v35  ;;  %v2375_v1 = vmul.f32 %v6585_v4, %v6585_v4 }
 0x1a4   : > { %v2502_v47 = vmul.f32 0.044715, %v2438_v61  ;;  %v6604_v32 = vadd.f32 %v6152_v45, %v2236_v10  ;;  %v2779_v40 = vmul.f32 %v2715_v30, %v2267_v49  ;;  %v1453_v6 = vadd.f32 %v6592_v27, %v6405_v2  ;;  %v6608_v57 = vpop.xlane.xlu1 %1366 }
 0x1a5   : > { %v2810_v50 = vmul.f32 %v2746_v46, %v2298_v36  ;;  %v3794_v19 = vpack.c.bf16 %v1452_v28, %v1452_v28  ;;  %v2500_v44 = vmul.f32 0.044715, %v2436_v8  ;;  %v2439_v48 = vmul.f32 %v2375_v1, %v6585_v4 }
 0x1a6   : > { %v6610_v38 = vpop.eup %4422  ;;  %v2566_v61 = vadd.f32 %v2502_v47, %v6559_v7  ;;  %v2373_v45 = vmul.f32 %v6604_v32, %v6604_v32  ;;  %v2850_v49 = vmul.f32 %v6292_v54, %v2779_v40  ;;  %v3795_v2 = vpack.c.bf16 %v1453_v6, %v1453_v6  ;;  %v6621_v36 = vpop.xlane.xlu0 %1369 }
 0x1a7   : > { %v2881_v30 = vmul.f32 %v6292_v54, %v2810_v50  ;;  %1773 = vst.msk [vmem:[%s6074_s21 + $0x74] sm:$0xf] %vm1743_vm1, %v3794_v19  ;;  %v2299_v10 = vmul.f32 0.5, %v6183_v22  ;;  %v2564_v28 = vadd.f32 %v2500_v44, %v6571_v35  ;;  %v2503_v47 = vmul.f32 0.044715, %v2439_v48 }
 0x1a8   : > { %v2630_v46 = vmul.f32 0.7978846, %v2566_v61  ;;  %v2437_v8 = vmul.f32 %v2373_v45, %v6604_v32  ;;  %v2952_v1 = vsel %vm1223_vm0, %v2850_v49, 0.0  ;;  %1774 = vst.msk [vmem:[%s6074_s21 + $0x78] sm:$0xf] %vm1743_vm1, %v3795_v2  ;;  %v2747_v40 = vadd.f32 1.0, %v6322_v13  ;;  %v6631_v19 = vpop.xlane.xlu1 %1372 }
 0x1a9   : > { %v3045_v7 = vsel %vm1223_vm0, %v2881_v30, 0.0  ;;  %v2264_v50 = vmul.f32 0.5, %v6091_v59  ;;  %v2628_v22 = vmul.f32 0.7978846, %v2564_v28  ;;  %v2567_v6 = vadd.f32 %v2503_v47, %v6585_v4  ;;  %2953 = vadd.xlane.f32.xlu1 %v2952_v1 }
 0x1aa   : > { %4432 = vtanh.f32 %v2630_v46  ;;  %v2501_v61 = vmul.f32 0.044715, %v2437_v8  ;;  %3046 = vadd.xlane.f32.xlu0 %v3045_v7  ;;  %v6634_v48 = vpop.eup %4424  ;;  %v2811_v44 = vmul.f32 %v2747_v40, %v2299_v10  ;;  %v2712_v45 = vadd.f32 1.0, %v6233_v37  ;;  %v6641_v13 = vpop.xlane.xlu0 %1375 }
 0x1ab   : > { %v1454_v49 = vadd.f32 %v6592_v27, %v6413_v41  ;;  %v1455_v59 = vadd.f32 %v6592_v27, %v6429_v55  ;;  %4434 = vtanh.f32 %v2628_v22  ;;  %v2631_v30 = vmul.f32 0.7978846, %v2567_v6 }
 0x1ac   : > { %v2565_v2 = vadd.f32 %v2501_v61, %v6604_v32  ;;  %v2265_v7 = vmul.f32 0.5, %v6114_v43  ;;  %v6645_v46 = vpop.eup %4426  ;;  %v2882_v37 = vmul.f32 %v6292_v54, %v2811_v44  ;;  %v2776_v10 = vmul.f32 %v2712_v45, %v2264_v50  ;;  %v6648_v47 = vpop.xlane.xlu1 %1378 }
 0x1ad   : > { %v3796_v28 = vpack.c.bf16 %v1454_v49, %v1454_v49  ;;  %v3797_v41 = vpack.c.bf16 %v1455_v59, %v1455_v59  ;;  %4436 = vtanh.f32 %v2631_v30  ;;  %v2713_v8 = vadd.f32 1.0, %v6265_v52 }
 0x1ae   : > { %v6650_v55 = vpop.eup %4428  ;;  %v2296_v1 = vmul.f32 0.5, %v6169_v14  ;;  %v3048_v40 = vsel %vm1223_vm0, %v2882_v37, 0.0  ;;  %v2847_v43 = vmul.f32 %v6292_v54, %v2776_v10  ;;  %v2744_v50 = vadd.f32 1.0, %v6310_v24  ;;  %v6663_v6 = vpop.xlane.xlu0 %1381 }
 0x1af   : > { %1775 = vst.msk [vmem:[%s6074_s21 + $0x7c] sm:$0xf] %vm1743_vm1, %v3796_v28  ;;  %1776 = vst.msk [vmem:[%s6074_s21 + $0x80] sm:$0xf] %vm1743_vm1, %v3797_v41  ;;  %v1456_v22 = vadd.f32 %v6592_v27, %v6441_v56  ;;  %v6665_v61 = vpop.eup %4430  ;;  %v6667_v52 = vmul.f32 0.7978846, %v2565_v2  ;;  %3049 = vadd.xlane.f32.xlu1 %v3048_v40  ;;  %v2777_v14 = vmul.f32 %v2713_v8, %v2265_v7 }
 0x1b0   : > { %v1457_v44 = vadd.f32 %v6592_v27, %v6453_v9  ;;  %v2297_v45 = vmul.f32 0.5, %v6196_v25  ;;  %v2943_v49 = vsel %vm1223_vm0, %v2847_v43, 0.0  ;;  %v2808_v24 = vmul.f32 %v2744_v50, %v2296_v1  ;;  %v6674_v30 = vpop.xlane.xlu1 %1384 }
 0x1b1   : > { %v3798_v59 = vpack.c.bf16 %v1456_v22, %v1456_v22  ;;  %v2745_v56 = vadd.f32 1.0, %v6332_v11  ;;  %2944 = vadd.xlane.f32.xlu0 %v2943_v49  ;;  %v2848_v2 = vmul.f32 %v6292_v54, %v2777_v14  ;;  %v2270_v7 = vmul.f32 0.5, %v6226_v29 }
 0x1b2   : > { %v3799_v37 = vpack.c.bf16 %v1457_v44, %v1457_v44  ;;  %v2718_v10 = vadd.f32 1.0, %v6364_v33  ;;  %v2879_v9 = vmul.f32 %v6292_v54, %v2808_v24  ;;  %v1458_v28 = vadd.f32 %v6592_v27, %v6469_v60  ;;  %v6686_v41 = vpop.xlane.xlu0 %1387  ;;  %v7279_v44 = vld [vmem:[#allocation6_spill] sm:$0xff] }
 0x1b3   : > { %1777 = vst.msk [vmem:[%s6074_s21 + $0x84] sm:$0xf] %vm1743_vm1, %v3798_v59  ;;  %v2809_v25 = vmul.f32 %v2745_v56, %v2297_v45  ;;  %v1459_v11 = vadd.f32 %v6592_v27, %v6477_v23  ;;  %v2946_v8 = vsel %vm1223_vm0, %v2848_v2, 0.0  ;;  %v2271_v33 = vmul.f32 0.5, %v6251_v51  ;;  %v7280_v56 = vld [vmem:[#allocation8_spill] sm:$0xff] }
 0x1b4   : > { %1778 = vst.msk [vmem:[%s6074_s21 + $0x88] sm:$0xf] %vm1743_vm1, %v3799_v37  ;;  %v2782_v29 = vmul.f32 %v2718_v10, %v2270_v7  ;;  %v2719_v1 = vadd.f32 1.0, %v6394_v20  ;;  %2947 = vadd.xlane.f32.xlu1 %v2946_v8  ;;  %v3039_v40 = vsel %vm1223_vm0, %v2879_v9, 0.0  ;;  %v3800_v43 = vpack.c.bf16 %v1458_v28, %v1458_v28  ;;  %v6695_v50 = vpop.xlane.xlu1 %1390  ;;  %v7282_v8 = vld [vmem:[#allocation13_spill] sm:$0xff] }
 0x1b5   : > { %v2880_v60 = vmul.f32 %v6292_v54, %v2809_v25  ;;  %v3801_v23 = vpack.c.bf16 %v1459_v11, %v1459_v11  ;;  %3040 = vadd.xlane.f32.xlu0 %v3039_v40  ;;  %v2302_v45 = vmul.f32 0.5, %v7279_v44  ;;  %v2750_v51 = vadd.f32 1.0, %v6415_v42  ;;  %v7281_v11 = vld [vmem:[#allocation4_spill] sm:$0xff] }
 0x1b6   : > { %v2853_v22 = vmul.f32 %v6292_v54, %v2782_v29  ;;  %v2783_v14 = vmul.f32 %v2719_v1, %v2271_v33  ;;  %1779 = vst.msk [vmem:[%s6074_s21 + $0x8c] sm:$0xf] %vm1743_vm1, %v3800_v43  ;;  %v1460_v24 = vadd.f32 %v6592_v27, %v6488_v18  ;;  %v1461_v59 = vadd.f32 %v6592_v27, %v6494_v21  ;;  %v6712_v37 = vpop.xlane.xlu0 %1393 }
 0x1b7   : > { %v6700_v49 = vpop.eup %4432  ;;  %v3042_v20 = vsel %vm1223_vm0, %v2880_v60, 0.0  ;;  %1780 = vst.msk [vmem:[%s6074_s21 + $0x90] sm:$0xf] %vm1743_vm1, %v3801_v23  ;;  %v2303_v2 = vmul.f32 0.5, %v7280_v56  ;;  %v2814_v10 = vmul.f32 %v2750_v51, %v2302_v45  ;;  %v2751_v9 = vadd.f32 1.0, %v6445_v5  ;;  %v7284_v45 = vld [vmem:[#allocation15_spill] sm:$0xff] }
 0x1b8   : > { %v2961_v42 = vsel %vm1223_vm0, %v2853_v22, 0.0  ;;  %v2854_v7 = vmul.f32 %v6292_v54, %v2783_v14  ;;  %v6717_v25 = vpop.eup %4434  ;;  %3043 = vadd.xlane.f32.xlu1 %v3042_v20  ;;  %v3802_v18 = vpack.c.bf16 %v1460_v24, %v1460_v24  ;;  %v3803_v28 = vpack.c.bf16 %v1461_v59, %v1461_v59  ;;  %v6721_v33 = vpop.xlane.xlu1 %1396  ;;  %v7283_v14 = vld [vmem:[#allocation5_spill] sm:$0xff]  ;;  %v7285_v56 = vld [vmem:[#allocation7_spill] sm:$0xff] }
 0x1b9   : > { %v2268_v21 = vmul.f32 0.5, %v7281_v11  ;;  %v2716_v29 = vadd.f32 1.0, %v7282_v8  ;;  %2962 = vadd.xlane.f32.xlu0 %v2961_v42  ;;  %v2885_v40 = vmul.f32 %v6292_v54, %v2814_v10  ;;  %v2815_v60 = vmul.f32 %v2751_v9, %v2303_v2  ;;  %v7286_v10 = vld [vmem:[#allocation17_spill] sm:$0xff] }
 0x1ba   : > { %v2964_v1 = vsel %vm1223_vm0, %v2854_v7, 0.0  ;;  %v1462_v5 = vadd.f32 %v6592_v27, %v6511_v17  ;;  %v6727_v43 = vpop.eup %4436  ;;  %1781 = vst.msk [vmem:[%s6074_s21 + $0x94] sm:$0xf] %vm1743_vm1, %v3802_v18  ;;  %1782 = vst.msk [vmem:[%s6074_s21 + $0x98] sm:$0xf] %vm1743_vm1, %v3803_v28  ;;  %v1463_v22 = vadd.f32 %v6592_v27, %v6525_v26  ;;  %v2269_v44 = vmul.f32 0.5, %v7283_v14  ;;  %v6737_v20 = vpop.xlane.xlu0 %1399 }
 0x1bb   : > { %v2780_v23 = vmul.f32 %v2716_v29, %v2268_v21  ;;  %v2717_v51 = vadd.f32 1.0, %v7284_v45  ;;  %v3057_v24 = vsel %vm1223_vm0, %v2885_v40, 0.0  ;;  %v2886_v17 = vmul.f32 %v6292_v54, %v2815_v60  ;;  %v7287_v21 = vld [vmem:[#allocation9_spill] sm:$0xff]  ;;  %v7288_v40 = vld [vmem:[#allocation20_spill] sm:$0xff] }
 0x1bc   : > { %v3804_v59 = vpack.c.bf16 %v1462_v5, %v1462_v5  ;;  %v2300_v2 = vmul.f32 0.5, %v7285_v56  ;;  %2965 = vadd.xlane.f32.xlu1 %v2964_v1  ;;  %v3805_v7 = vpack.c.bf16 %v1463_v22, %v1463_v22  ;;  %v2748_v9 = vadd.f32 1.0, %v7286_v10  ;;  %v6744_v18 = vpop.xlane.xlu1 %1402  ;;  %v7289_v22 = vld [vmem:[#allocation10_spill] sm:$0xff]  ;;  %v7290_v56 = vld [vmem:[#allocation12_spill] sm:$0xff] }
 0x1bd   : > { %v2851_v42 = vmul.f32 %v6292_v54, %v2780_v23  ;;  %v2781_v26 = vmul.f32 %v2717_v51, %v2269_v44  ;;  %4438 = vtanh.f32 %v6667_v52  ;;  %3058 = vadd.xlane.f32.xlu0 %v3057_v24  ;;  %v1464_v28 = vadd.f32 %v6592_v27, %v6537_v15 }
 0x1be   : > { %1783 = vst.msk [vmem:[%s6074_s21 + $0x9c] sm:$0xf] %vm1743_vm1, %v3804_v59  ;;  %v1465_v11 = vadd.f32 %v6592_v27, %v6545_v62  ;;  %v2301_v8 = vmul.f32 0.5, %v7287_v21  ;;  %v3060_v29 = vsel %vm1223_vm0, %v2886_v17, 0.0  ;;  %1784 = vst.msk [vmem:[%s6074_s21 + $0xa0] sm:$0xf] %vm1743_vm1, %v3805_v7  ;;  %v2812_v52 = vmul.f32 %v2748_v9, %v2300_v2  ;;  %v6759_v5 = vpop.xlane.xlu0 %1405 }
 0x1bf   : > { %v2852_v1 = vmul.f32 %v6292_v54, %v2781_v26  ;;  %v2749_v60 = vadd.f32 1.0, %v7288_v40  ;;  %v3806_v23 = vpack.c.bf16 %v1464_v28, %v1464_v28  ;;  %v2274_v14 = vmul.f32 0.5, %v7289_v22  ;;  %v7292_v9 = vld [vmem:[#allocation16_spill] sm:$0xff] }
 0x1c0   : > { %v3807_v15 = vpack.c.bf16 %v1465_v11, %v1465_v11  ;;  %v2722_v62 = vadd.f32 1.0, %v6496_v53  ;;  %3061 = vadd.xlane.f32.xlu1 %v3060_v29  ;;  %v2955_v44 = vsel %vm1223_vm0, %v2851_v42, 0.0  ;;  %v2883_v45 = vmul.f32 %v6292_v54, %v2812_v52  ;;  %v6767_v17 = vpop.xlane.xlu1 %1408  ;;  %v7291_v42 = vld [vmem:[#allocation26_spill] sm:$0xff] }
 0x1c1   : > { %v2813_v51 = vmul.f32 %v2749_v60, %v2301_v8  ;;  %v1466_v24 = vadd.f32 %v6592_v27, %v6556_v12  ;;  %2956 = vadd.xlane.f32.xlu0 %v2955_v44  ;;  %1785 = vst.msk [vmem:[%s6074_s21 + $0xa4] sm:$0xf] %vm1743_vm1, %v3806_v23  ;;  %v1467_v53 = vadd.f32 %v6592_v27, %v6564_v58  ;;  %v2275_v2 = vmul.f32 0.5, %v7290_v56  ;;  %v7293_v60 = vld [vmem:[#allocation19_spill] sm:$0xff] }
 0x1c2   : > { %1786 = vst.msk [vmem:[%s6074_s21 + $0xa8] sm:$0xf] %vm1743_vm1, %v3807_v15  ;;  %v2786_v59 = vmul.f32 %v2722_v62, %v2274_v14  ;;  %v2723_v7 = vadd.f32 1.0, %v7291_v42  ;;  %v2958_v26 = vsel %vm1223_vm0, %v2852_v1, 0.0  ;;  %v2306_v28 = vmul.f32 0.5, %v7292_v9  ;;  %v6780_v11 = vpop.xlane.xlu0 %1411 }
 0x1c3   : > { %v2884_v12 = vmul.f32 %v6292_v54, %v2813_v51  ;;  %v3808_v10 = vpack.c.bf16 %v1466_v24, %v1466_v24  ;;  %v3809_v8 = vpack.c.bf16 %v1467_v53, %v1467_v53  ;;  %v2754_v58 = vadd.f32 1.0, %v6566_v31  ;;  %v7295_v51 = vld [vmem:[#allocation24_spill] sm:$0xff] }
 0x1c4   : > { %v2857_v21 = vmul.f32 %v6292_v54, %v2786_v59  ;;  %v2787_v29 = vmul.f32 %v2723_v7, %v2275_v2  ;;  %2959 = vadd.xlane.f32.xlu1 %v2958_v26  ;;  %v3051_v52 = vsel %vm1223_vm0, %v2883_v45, 0.0  ;;  %v1468_v1 = vadd.f32 %v6592_v27, %v6577_v0  ;;  %v6792_v15 = vpop.xlane.xlu1 %1414  ;;  %v7294_v45 = vld [vmem:[#allocation11_spill] sm:$0xff]  ;;  %v7296_v26 = vld [vmem:[#allocation14_spill] sm:$0xff] }
 0x1c5   : > { %1787 = vst.msk [vmem:[%s6074_s21 + $0xac] sm:$0xf] %vm1743_vm1, %v3808_v10  ;;  %v1469_v40 = vadd.f32 %v6592_v27, %v6596_v39  ;;  %v2307_v23 = vmul.f32 0.5, %v7293_v60  ;;  %3052 = vadd.xlane.f32.xlu0 %v3051_v52  ;;  %v3054_v22 = vsel %vm1223_vm0, %v2884_v12, 0.0  ;;  %1788 = vst.msk [vmem:[%s6074_s21 + $0xb0] sm:$0xf] %vm1743_vm1, %v3809_v8  ;;  %v2818_v14 = vmul.f32 %v2754_v58, %v2306_v28 }
 0x1c6   : > { %v2858_v31 = vmul.f32 %v6292_v54, %v2787_v29  ;;  %v2755_v62 = vadd.f32 1.0, %v6598_v63  ;;  %v3810_v0 = vpack.c.bf16 %v1468_v1, %v1468_v1  ;;  %v2272_v39 = vmul.f32 0.5, %v7294_v45  ;;  %v6801_v59 = vpop.xlane.xlu0 %2902  ;;  %v7297_v8 = vld [vmem:[#allocation18_spill] sm:$0xff] }
 0x1c7   : > { %v3811_v44 = vpack.c.bf16 %v1469_v40, %v1469_v40  ;;  %v2720_v24 = vadd.f32 1.0, %v7295_v51  ;;  %v2973_v53 = vsel %vm1223_vm0, %v2857_v21, 0.0  ;;  %v2889_v56 = vmul.f32 %v6292_v54, %v2818_v14 }
 0x1c8   : > { %v2819_v2 = vmul.f32 %v2755_v62, %v2307_v23  ;;  %v1470_v42 = vadd.f32 %v6592_v27, %v6608_v57  ;;  %3055 = vadd.xlane.f32.xlu1 %v3054_v22  ;;  %1789 = vst.msk [vmem:[%s6074_s21 + $0xb4] sm:$0xf] %vm1743_vm1, %v3810_v0  ;;  %v1471_v7 = vadd.f32 %v6592_v27, %v6621_v36  ;;  %v2273_v12 = vmul.f32 0.5, %v7296_v26  ;;  %v6815_v9 = vpop.xlane.xlu1 %2905 }
 0x1c9   : > { %1790 = vst.msk [vmem:[%s6074_s21 + $0xb8] sm:$0xf] %vm1743_vm1, %v3811_v44  ;;  %v2784_v63 = vmul.f32 %v2720_v24, %v2272_v39  ;;  %v2721_v10 = vadd.f32 1.0, %v6541_v16  ;;  %2974 = vadd.xlane.f32.xlu0 %v2973_v53  ;;  %v2976_v28 = vsel %vm1223_vm0, %v2858_v31, 0.0  ;;  %v2304_v29 = vmul.f32 0.5, %v7297_v8  ;;  %v7298_v31 = vld [vmem:[#allocation21_spill] sm:$0xff] }
 0x1ca   : > { %v2890_v57 = vmul.f32 %v6292_v54, %v2819_v2  ;;  %v3812_v21 = vpack.c.bf16 %v1470_v42, %v1470_v42  ;;  %v6820_v58 = vpop.eup %4438  ;;  %v3813_v52 = vpack.c.bf16 %v1471_v7, %v1471_v7  ;;  %v2752_v40 = vadd.f32 1.0, %v6579_v3  ;;  %v6824_v16 = vpop.xlane.xlu0 %2998  ;;  %v6840_v3 = vld [vmem:[%s7178_s6] ss:$0 sm:$0xff] }
 0x1cb   : > { %v2855_v36 = vmul.f32 %v6292_v54, %v2784_v63  ;;  %v2785_v1 = vmul.f32 %v2721_v10, %v2273_v12  ;;  %v3069_v60 = vsel %vm1223_vm0, %v2889_v56, 0.0  ;;  %v1472_v23 = vadd.f32 %v6592_v27, %v6631_v19  ;;  %v7300_v10 = vld [vmem:[#allocation22_spill] sm:$0xff] }
 0x1cc   : > { %1791 = vst.msk [vmem:[%s6074_s21 + $0xbc] sm:$0xf] %vm1743_vm1, %v3812_v21  ;;  %v1473_v22 = vadd.f32 %v6592_v27, %v6641_v13  ;;  %v2305_v14 = vmul.f32 0.5, %v7298_v31  ;;  %2977 = vadd.xlane.f32.xlu1 %v2976_v28  ;;  %v3072_v54 = vsel %vm1223_vm0, %v2890_v57, 0.0  ;;  %1792 = vst.msk [vmem:[%s6074_s21 + $0xc0] sm:$0xf] %vm1743_vm1, %v3813_v52  ;;  %v2816_v19 = vmul.f32 %v2752_v40, %v2304_v29  ;;  %v6844_v13 = vpop.xlane.xlu1 %3001 }
 0x1cd   : > { %v2856_v62 = vmul.f32 %v6840_v3, %v2785_v1  ;;  %v2753_v0 = vadd.f32 1.0, %v6610_v38  ;;  %3070 = vadd.xlane.f32.xlu0 %v3069_v60  ;;  %v3814_v44 = vpack.c.bf16 %v1472_v23, %v1472_v23  ;;  %v2278_v39 = vmul.f32 0.5, %v6491_v34  ;;  %v7301_v1 = vld [vmem:[#allocation25_spill] sm:$0xff] }
 0x1ce   : > { %v3815_v45 = vpack.c.bf16 %v1473_v22, %v1473_v22  ;;  %v2726_v51 = vadd.f32 1.0, %v6634_v48  ;;  %v2967_v24 = vsel %vm1223_vm0, %v2855_v36, 0.0  ;;  %v2887_v53 = vmul.f32 %v6840_v3, %v2816_v19  ;;  %v6852_v42 = vpop.xlane.xlu0 %2896  ;;  %v7299_v48 = vld [vmem:[#allocation23_spill] sm:$0xff] }
 0x1cf   : > { %v2817_v56 = vmul.f32 %v2753_v0, %v2305_v14  ;;  %v1474_v2 = vadd.f32 %v6592_v27, %v6648_v47  ;;  %1793 = vst.msk [vmem:[%s6074_s21 + $0xc4] sm:$0xf] %vm1743_vm1, %v3814_v44  ;;  %v1475_v34 = vadd.f32 %v6592_v27, %v6663_v6  ;;  %v2279_v63 = vmul.f32 0.5, %v7299_v48 }
 0x1d0   : > { %1794 = vst.msk [vmem:[%s6074_s21 + $0xc8] sm:$0xf] %vm1743_vm1, %v3815_v45  ;;  %v2790_v38 = vmul.f32 %v2726_v51, %v2278_v39  ;;  %v2727_v7 = vadd.f32 1.0, %v6650_v55  ;;  %3073 = vadd.xlane.f32.xlu1 %v3072_v54  ;;  %v2970_v26 = vsel %vm1223_vm0, %v2856_v62, 0.0  ;;  %v2276_v28 = vmul.f32 0.5, %v7300_v10  ;;  %v6865_v57 = vpop.xlane.xlu1 %2899 }
 0x1d1   : > { %v2888_v47 = vmul.f32 %v6840_v3, %v2817_v56  ;;  %v3816_v12 = vpack.c.bf16 %v1474_v2, %v1474_v2  ;;  %2968 = vadd.xlane.f32.xlu0 %v2967_v24  ;;  %v3817_v8 = vpack.c.bf16 %v1475_v34, %v1475_v34  ;;  %v2724_v29 = vadd.f32 1.0, %v6645_v46  ;;  %v7302_v56 = vld [vmem:[#allocation27_spill] sm:$0xff] }
 0x1d2   : > { %v2861_v21 = vmul.f32 %v6840_v3, %v2790_v38  ;;  %v2791_v6 = vmul.f32 %v2727_v7, %v2279_v63  ;;  %v3063_v55 = vsel %vm1223_vm0, %v2887_v53, 0.0  ;;  %v1476_v36 = vadd.f32 %v6592_v27, %v6674_v30  ;;  %v6877_v60 = vpop.xlane.xlu0 %2992 }
 0x1d3   : > { %1795 = vst.msk [vmem:[%s6074_s21 + $0xcc] sm:$0xf] %vm1743_vm1, %v3816_v12  ;;  %v1477_v52 = vadd.f32 %v6592_v27, %v6686_v41  ;;  %v2277_v40 = vmul.f32 0.5, %v7301_v1  ;;  %v3066_v23 = vsel %vm1223_vm0, %v2888_v47, 0.0  ;;  %1796 = vst.msk [vmem:[%s6074_s21 + $0xd0] sm:$0xf] %vm1743_vm1, %v3817_v8  ;;  %v2788_v22 = vmul.f32 %v2724_v29, %v2276_v28 }
 0x1d4   : > { %v2862_v46 = vmul.f32 %v6840_v3, %v2791_v6  ;;  %v2725_v31 = vadd.f32 1.0, %v6665_v61  ;;  %2971 = vadd.xlane.f32.xlu1 %v2970_v26  ;;  %v3818_v30 = vpack.c.bf16 %v1476_v36, %v1476_v36  ;;  %v2308_v41 = vmul.f32 0.5, %v6571_v35  ;;  %v6886_v62 = vpop.xlane.xlu1 %2995 }
 0x1d5   : > { %v3819_v14 = vpack.c.bf16 %v1477_v52, %v1477_v52  ;;  %v2756_v54 = vadd.f32 1.0, %v6717_v25  ;;  %3064 = vadd.xlane.f32.xlu0 %v3063_v55  ;;  %v2985_v19 = vsel %vm1223_vm0, %v2861_v21, 0.0  ;;  %v2859_v0 = vmul.f32 %v6840_v3, %v2788_v22 }
 0x1d6   : > { %v2789_v44 = vmul.f32 %v2725_v31, %v2277_v40  ;;  %v1478_v45 = vadd.f32 %v6592_v27, %v6695_v50  ;;  %1797 = vst.msk [vmem:[%s6074_s21 + $0xd4] sm:$0xf] %vm1743_vm1, %v3818_v30  ;;  %v1479_v35 = vadd.f32 %v6592_v27, %v6712_v37  ;;  %v2309_v25 = vmul.f32 0.5, %v6604_v32  ;;  %v6900_v51 = vpop.xlane.xlu0 %2914 }
 0x1d7   : > { %1798 = vst.msk [vmem:[%s6074_s21 + $0xd8] sm:$0xf] %vm1743_vm1, %v3819_v14  ;;  %v2820_v61 = vmul.f32 %v2756_v54, %v2308_v41  ;;  %v2757_v39 = vadd.f32 1.0, %v6820_v58  ;;  %v2988_v24 = vsel %vm1223_vm0, %v2862_v46, 0.0  ;;  %v2310_v2 = vmul.f32 0.5, %v7302_v56 }
 0x1d8   : > { %v2860_v53 = vmul.f32 %v6840_v3, %v2789_v44  ;;  %v3820_v50 = vpack.c.bf16 %v1478_v45, %v1478_v45  ;;  %3067 = vadd.xlane.f32.xlu1 %v3066_v23  ;;  %v3821_v34 = vpack.c.bf16 %v1479_v35, %v1479_v35  ;;  %v2758_v48 = vadd.f32 1.0, %v6700_v49  ;;  %v6907_v32 = vpop.xlane.xlu1 %2917 }
 0x1d9   : > { %v2891_v38 = vmul.f32 %v6840_v3, %v2820_v61  ;;  %v2821_v37 = vmul.f32 %v2757_v39, %v2309_v25  ;;  %2986 = vadd.xlane.f32.xlu0 %v2985_v19  ;;  %v2979_v58 = vsel %vm1223_vm0, %v2859_v0, 0.0  ;;  %v1480_v63 = vadd.f32 %v6592_v27, %v6721_v33 }
 0x1da   : > { %1799 = vst.msk [vmem:[%s6074_s21 + $0xdc] sm:$0xf] %vm1743_vm1, %v3820_v50  ;;  %v1481_v7 = vadd.f32 %v6592_v27, %v6737_v20  ;;  %v2311_v26 = vmul.f32 0.5, %v6585_v4  ;;  %v2982_v47 = vsel %vm1223_vm0, %v2860_v53, 0.0  ;;  %1800 = vst.msk [vmem:[%s6074_s21 + $0xe0] sm:$0xf] %vm1743_vm1, %v3821_v34  ;;  %v2822_v12 = vmul.f32 %v2758_v48, %v2310_v2  ;;  %v3011_v28 = vpop.xlane.xlu0 %3010 }
 0x1db   : > { %v2892_v49 = vmul.f32 %v6840_v3, %v2821_v37  ;;  %v2759_v10 = vadd.f32 1.0, %v6727_v43  ;;  %v3822_v21 = vpack.c.bf16 %v1480_v63, %v1480_v63  ;;  %v1482_v33 = vadd.f32 %v6592_v27, %v6744_v18  ;;  %v6926_v20 = vld [vmem:[#allocation3] ss:$0 sm:$0xff] }
 0x1dc   : > { %v3823_v8 = vpack.c.bf16 %v1481_v7, %v1481_v7  ;;  %v1483_v4 = vadd.f32 %v6592_v27, %v6759_v5  ;;  %2989 = vadd.xlane.f32.xlu1 %v2988_v24  ;;  %v3075_v6 = vsel %vm1223_vm0, %v2891_v38, 0.0  ;;  %v2893_v29 = vmul.f32 %v6840_v3, %v2822_v12  ;;  %v3014_v36 = vpop.xlane.xlu1 %3013 }
 0x1dd   : > { %v2823_v55 = vmul.f32 %v2759_v10, %v2311_v26  ;;  %v1484_v43 = vadd.f32 %v6592_v27, %v6767_v17  ;;  %2980 = vadd.xlane.f32.xlu0 %v2979_v58  ;;  %1801 = vst.msk [vmem:[%s6074_s21 + $0xe4] sm:$0xf] %vm1743_vm1, %v3822_v21  ;;  %v3824_v18 = vpack.c.bf16 %v1482_v33, %v1482_v33  ;;  %v3078_v40 = vsel %vm1223_vm0, %v2892_v49, 0.0 }
 0x1de   : > { %1802 = vst.msk [vmem:[%s6074_s21 + $0xe8] sm:$0xf] %vm1743_vm1, %v3823_v8  ;;  %v3825_v5 = vpack.c.bf16 %v1483_v4, %v1483_v4  ;;  %v1485_v52 = vadd.f32 %v6592_v27, %v6780_v11  ;;  %v1486_v1 = vadd.f32 %v6592_v27, %v6792_v15  ;;  %v3081_v17 = vsel %vm1223_vm0, %v2893_v29, 0.0  ;;  %v2909_v22 = vpop.xlane.xlu0 %2908 }
 0x1df   : > { %v3826_v23 = vpack.c.bf16 %v1484_v43, %v1484_v43  ;;  %v3096_v46 = vadd.f32 %v6926_v20, %v6801_v59  ;;  %1803 = vst.msk [vmem:[%s6074_s21 + $0xec] sm:$0xf] %vm1743_vm1, %v3824_v18  ;;  %v3097_v27 = vadd.f32 %v6926_v20, %v6815_v9  ;;  %v3128_v15 = vadd.f32 %v6926_v20, %v6824_v16 }
 0x1e0   : > { %1804 = vst.msk [vmem:[%s6074_s21 + $0xf0] sm:$0xf] %vm1743_vm1, %v3825_v5  ;;  %v3827_v11 = vpack.c.bf16 %v1485_v52, %v1485_v52  ;;  %v3828_v31 = vpack.c.bf16 %v1486_v1, %v1486_v1  ;;  %2983 = vadd.xlane.f32.xlu1 %v2982_v47  ;;  %v2894_v59 = vmul.f32 %v6840_v3, %v2823_v55  ;;  %v2912_v54 = vpop.xlane.xlu1 %2911 }
 0x1e1   : > { %1805 = vst.msk [vmem:[%s6074_s21 + $0xf4] sm:$0xf] %vm1743_vm1, %v3826_v23  ;;  %v3831_v30 = vpack.c.bf16 %v3096_v46, %v3096_v46  ;;  %v3129_v14 = vadd.f32 %v6926_v20, %v6844_v13  ;;  %v3094_v41 = vadd.f32 %v6926_v20, %v6852_v42  ;;  %3076 = vadd.xlane.f32.xlu0 %v3075_v6 }
 0x1e2   : > { %1806 = vst.msk [vmem:[%s6074_s21 + $0xf8] sm:$0xf] %vm1743_vm1, %v3827_v11  ;;  %1807 = vst.msk [vmem:[%s6074_s21 + $0xfc] sm:$0xf] %vm1743_vm1, %v3828_v31  ;;  %v3832_v9 = vpack.c.bf16 %v3097_v27, %v3097_v27  ;;  %v3863_v16 = vpack.c.bf16 %v3128_v15, %v3128_v15  ;;  %v3095_v3 = vadd.f32 %v6926_v20, %v6865_v57  ;;  %v3005_v45 = vpop.xlane.xlu0 %3004 }
 0x1e3   : > { %v3126_v13 = vadd.f32 %v6926_v20, %v6877_v60  ;;  %3416 = vst.msk [vmem:[%s6953_s30 + $0x8] sm:$0xf] %vm1743_vm1, %v3831_v30  ;;  %v3864_v42 = vpack.c.bf16 %v3129_v14, %v3129_v14  ;;  %v3829_v19 = vpack.c.bf16 %v3094_v41, %v3094_v41  ;;  %v3127_v0 = vadd.f32 %v6926_v20, %v6886_v62 }
 0x1e4   : > { %v3100_v44 = vadd.f32 %v6926_v20, %v6900_v51  ;;  %3417 = vst.msk [vmem:[%s6953_s30 + $0xc] sm:$0xf] %vm1743_vm1, %v3832_v9  ;;  %3448 = vst.msk [vmem:[%s6953_s30 + $0x88] sm:$0xf] %vm1743_vm1, %v3863_v16  ;;  %v3830_v57 = vpack.c.bf16 %v3095_v3, %v3095_v3  ;;  %v3101_v60 = vadd.f32 %v6926_v20, %v6907_v32  ;;  %3079 = vadd.xlane.f32.xlu1 %v3078_v40  ;;  %v3008_v24 = vpop.xlane.xlu1 %3007 }
 0x1e5   : > { %v3861_v61 = vpack.c.bf16 %v3126_v13, %v3126_v13  ;;  %v3132_v35 = vadd.f32 %v6926_v20, %v3011_v28  ;;  %3449 = vst.msk [vmem:[%s6953_s30 + $0x8c] sm:$0xf] %vm1743_vm1, %v3864_v42  ;;  %3414 = vst.msk [vmem:[%s6953_s30] sm:$0xf] %vm1743_vm1, %v3829_v19  ;;  %v3862_v62 = vpack.c.bf16 %v3127_v0, %v3127_v0  ;;  %3082 = vadd.xlane.f32.xlu0 %v3081_v17 }
 0x1e6   : > { %v3835_v25 = vpack.c.bf16 %v3100_v44, %v3100_v44  ;;  %v3133_v39 = vadd.f32 %v6926_v20, %v3014_v36  ;;  %v3098_v51 = vadd.f32 %v6926_v20, %v2909_v22  ;;  %3415 = vst.msk [vmem:[%s6953_s30 + $0x4] sm:$0xf] %vm1743_vm1, %v3830_v57  ;;  %v3836_v53 = vpack.c.bf16 %v3101_v60, %v3101_v60  ;;  %v2927_v48 = vpop.xlane.xlu0 %2926 }
 0x1e7   : > { %3446 = vst.msk [vmem:[%s6953_s30 + $0x80] sm:$0xf] %vm1743_vm1, %v3861_v61  ;;  %v3867_v50 = vpack.c.bf16 %v3132_v35, %v3132_v35  ;;  %v3099_v56 = vadd.f32 %v6926_v20, %v2912_v54  ;;  %v3130_v2 = vadd.f32 %v6926_v20, %v3005_v45  ;;  %3447 = vst.msk [vmem:[%s6953_s30 + $0x84] sm:$0xf] %vm1743_vm1, %v3862_v62  ;;  %v3084_v32 = vsel %vm1223_vm0, %v2894_v59, 0.0 }
 0x1e8   : > { %3420 = vst.msk [vmem:[%s6953_s30 + $0x18] sm:$0xf] %vm1743_vm1, %v3835_v25  ;;  %v3868_v38 = vpack.c.bf16 %v3133_v39, %v3133_v39  ;;  %v3833_v34 = vpack.c.bf16 %v3098_v51, %v3098_v51  ;;  %v3131_v37 = vadd.f32 %v6926_v20, %v3008_v24  ;;  %3421 = vst.msk [vmem:[%s6953_s30 + $0x1c] sm:$0xf] %vm1743_vm1, %v3836_v53  ;;  %3085 = vadd.xlane.f32.xlu1 %v3084_v32  ;;  %v2930_v47 = vpop.xlane.xlu1 %2929 }
 0x1e9   : > { %3452 = vst.msk [vmem:[%s6953_s30 + $0x98] sm:$0xf] %vm1743_vm1, %v3867_v50  ;;  %v3834_v58 = vpack.c.bf16 %v3099_v56, %v3099_v56  ;;  %v3865_v63 = vpack.c.bf16 %v3130_v2, %v3130_v2  ;;  %v3104_v7 = vadd.f32 %v6926_v20, %v2927_v48  ;;  %v3105_v12 = vadd.f32 %v6926_v20, %v2930_v47 }
 0x1ea   : > { %3453 = vst.msk [vmem:[%s6953_s30 + $0x9c] sm:$0xf] %vm1743_vm1, %v3868_v38  ;;  %3418 = vst.msk [vmem:[%s6953_s30 + $0x10] sm:$0xf] %vm1743_vm1, %v3833_v34  ;;  %v3866_v26 = vpack.c.bf16 %v3131_v37, %v3131_v37  ;;  %v3023_v10 = vpop.xlane.xlu0 %3022 }
 0x1eb   : > { %3419 = vst.msk [vmem:[%s6953_s30 + $0x14] sm:$0xf] %vm1743_vm1, %v3834_v58  ;;  %3450 = vst.msk [vmem:[%s6953_s30 + $0x90] sm:$0xf] %vm1743_vm1, %v3865_v63  ;;  %v3839_v49 = vpack.c.bf16 %v3104_v7, %v3104_v7  ;;  %v3840_v28 = vpack.c.bf16 %v3105_v12, %v3105_v12  ;;  %v3136_v21 = vadd.f32 %v6926_v20, %v3023_v10 }
 0x1ec   : > { %3451 = vst.msk [vmem:[%s6953_s30 + $0x94] sm:$0xf] %vm1743_vm1, %v3866_v26 }
 0x1ed   : > { %3424 = vst.msk [vmem:[%s6953_s30 + $0x28] sm:$0xf] %vm1743_vm1, %v3839_v49  ;;  %3425 = vst.msk [vmem:[%s6953_s30 + $0x2c] sm:$0xf] %vm1743_vm1, %v3840_v28  ;;  %v3871_v8 = vpack.c.bf16 %v3136_v21, %v3136_v21 }
 0x1ee   : > { %v3026_v33 = vpop.xlane.xlu1 %3025 }
 0x1ef   : > { %3456 = vst.msk [vmem:[%s6953_s30 + $0xa8] sm:$0xf] %vm1743_vm1, %v3871_v8  ;;  %v3137_v4 = vadd.f32 %v6926_v20, %v3026_v33 }
 0x1f1   : > { %v3872_v6 = vpack.c.bf16 %v3137_v4, %v3137_v4 }
 0x1f3   : > { %3457 = vst.msk [vmem:[%s6953_s30 + $0xac] sm:$0xf] %vm1743_vm1, %v3872_v6  ;;  %v2921_v29 = vpop.xlane.xlu0 %2920 }
 0x1f4   : > { %v3102_v55 = vadd.f32 %v6926_v20, %v2921_v29 }
 0x1f6   : > { %v3837_v43 = vpack.c.bf16 %v3102_v55, %v3102_v55 }
 0x1f8   : > { %3422 = vst.msk [vmem:[%s6953_s30 + $0x20] sm:$0xf] %vm1743_vm1, %v3837_v43 }
 0x1fb   : > { %v2924_v36 = vpop.xlane.xlu1 %2923 }
 0x1fc   : > { %v3103_v18 = vadd.f32 %v6926_v20, %v2924_v36 }
 0x1fd   : > { %v3017_v5 = vpop.xlane.xlu0 %3016 }
 0x1fe   : > { %v3838_v52 = vpack.c.bf16 %v3103_v18, %v3103_v18  ;;  %v3134_v1 = vadd.f32 %v6926_v20, %v3017_v5 }
 0x200   : > { %3423 = vst.msk [vmem:[%s6953_s30 + $0x24] sm:$0xf] %vm1743_vm1, %v3838_v52  ;;  %v3869_v40 = vpack.c.bf16 %v3134_v1, %v3134_v1 }
 0x202   : > { %3454 = vst.msk [vmem:[%s6953_s30 + $0xa0] sm:$0xf] %vm1743_vm1, %v3869_v40 }
 0x206   : > { %v3020_v17 = vpop.xlane.xlu1 %3019 }
 0x207   : > { %v3135_v23 = vadd.f32 %v6926_v20, %v3020_v17 }
 0x209   : > { %v3870_v46 = vpack.c.bf16 %v3135_v23, %v3135_v23 }
 0x20a   : > { %v2939_v22 = vpop.xlane.xlu0 %2938 }
 0x20b   : > { %v3108_v11 = vadd.f32 %v6926_v20, %v2939_v22  ;;  %3455 = vst.msk [vmem:[%s6953_s30 + $0xa4] sm:$0xf] %vm1743_vm1, %v3870_v46 }
 0x20d   : > { %v3843_v31 = vpack.c.bf16 %v3108_v11, %v3108_v11  ;;  %v2942_v27 = vpop.xlane.xlu1 %2941 }
 0x20e   : > { %v3109_v15 = vadd.f32 %v6926_v20, %v2942_v27 }
 0x20f   : > { %3428 = vst.msk [vmem:[%s6953_s30 + $0x38] sm:$0xf] %vm1743_vm1, %v3843_v31  ;;  %v3035_v59 = vpop.xlane.xlu0 %3034 }
 0x210   : > { %v3844_v30 = vpack.c.bf16 %v3109_v15, %v3109_v15  ;;  %v3140_v14 = vadd.f32 %v6926_v20, %v3035_v59 }
 0x212   : > { %3429 = vst.msk [vmem:[%s6953_s30 + $0x3c] sm:$0xf] %vm1743_vm1, %v3844_v30  ;;  %v3875_v41 = vpack.c.bf16 %v3140_v14, %v3140_v14 }
 0x214   : > { %3460 = vst.msk [vmem:[%s6953_s30 + $0xb8] sm:$0xf] %vm1743_vm1, %v3875_v41 }
 0x215   : > { %v3038_v54 = vpop.xlane.xlu1 %3037 }
 0x216   : > { %v3141_v9 = vadd.f32 %v6926_v20, %v3038_v54 }
 0x218   : > { %v2933_v16 = vpop.xlane.xlu0 %2932  ;;  %v3876_v3 = vpack.c.bf16 %v3141_v9, %v3141_v9 }
 0x219   : > { %v3106_v13 = vadd.f32 %v6926_v20, %v2933_v16 }
 0x21a   : > { %3461 = vst.msk [vmem:[%s6953_s30 + $0xbc] sm:$0xf] %vm1743_vm1, %v3876_v3 }
 0x21b   : > { %v3841_v42 = vpack.c.bf16 %v3106_v13, %v3106_v13 }
 0x21d   : > { %3426 = vst.msk [vmem:[%s6953_s30 + $0x30] sm:$0xf] %vm1743_vm1, %v3841_v42 }
 0x220   : > { %v2936_v19 = vpop.xlane.xlu1 %2935  ;;  %v3029_v0 = vpop.xlane.xlu0 %3028 }
 0x221   : > { %v3107_v44 = vadd.f32 %v6926_v20, %v2936_v19  ;;  %v3138_v45 = vadd.f32 %v6926_v20, %v3029_v0 }
 0x223   : > { %v3842_v57 = vpack.c.bf16 %v3107_v44, %v3107_v44  ;;  %v3873_v61 = vpack.c.bf16 %v3138_v45, %v3138_v45 }
 0x225   : > { %3427 = vst.msk [vmem:[%s6953_s30 + $0x34] sm:$0xf] %vm1743_vm1, %v3842_v57  ;;  %3458 = vst.msk [vmem:[%s6953_s30 + $0xb0] sm:$0xf] %vm1743_vm1, %v3873_v61 }
 0x228   : > { %v3032_v60 = vpop.xlane.xlu1 %3031 }
 0x229   : > { %v3139_v35 = vadd.f32 %v6926_v20, %v3032_v60 }
 0x22b   : > { %v2951_v62 = vpop.xlane.xlu0 %2950  ;;  %v3874_v25 = vpack.c.bf16 %v3139_v35, %v3139_v35 }
 0x22c   : > { %v3112_v39 = vadd.f32 %v6926_v20, %v2951_v62 }
 0x22d   : > { %3459 = vst.msk [vmem:[%s6953_s30 + $0xb4] sm:$0xf] %vm1743_vm1, %v3874_v25 }
 0x22e   : > { %v3847_v51 = vpack.c.bf16 %v3112_v39, %v3112_v39 }
 0x230   : > { %3432 = vst.msk [vmem:[%s6953_s30 + $0x48] sm:$0xf] %vm1743_vm1, %v3847_v51 }
 0x232   : > { %v2954_v24 = vpop.xlane.xlu1 %2953 }
 0x233   : > { %v3047_v53 = vpop.xlane.xlu0 %3046  ;;  %v3113_v50 = vadd.f32 %v6926_v20, %v2954_v24 }
 0x234   : > { %v3144_v56 = vadd.f32 %v6926_v20, %v3047_v53 }
 0x235   : > { %v3848_v2 = vpack.c.bf16 %v3113_v50, %v3113_v50 }
 0x236   : > { %v3879_v38 = vpack.c.bf16 %v3144_v56, %v3144_v56 }
 0x237   : > { %3433 = vst.msk [vmem:[%s6953_s30 + $0x4c] sm:$0xf] %vm1743_vm1, %v3848_v2 }
 0x238   : > { %3464 = vst.msk [vmem:[%s6953_s30 + $0xc8] sm:$0xf] %vm1743_vm1, %v3879_v38  ;;  %v3050_v34 = vpop.xlane.xlu1 %3049 }
 0x239   : > { %v3145_v37 = vadd.f32 %v6926_v20, %v3050_v34 }
 0x23a   : > { %v2945_v48 = vpop.xlane.xlu0 %2944 }
 0x23b   : > { %v3880_v32 = vpack.c.bf16 %v3145_v37, %v3145_v37  ;;  %v3110_v58 = vadd.f32 %v6926_v20, %v2945_v48 }
 0x23d   : > { %3465 = vst.msk [vmem:[%s6953_s30 + $0xcc] sm:$0xf] %vm1743_vm1, %v3880_v32  ;;  %v3845_v63 = vpack.c.bf16 %v3110_v58, %v3110_v58  ;;  %v2948_v7 = vpop.xlane.xlu1 %2947 }
 0x23e   : > { %v3111_v26 = vadd.f32 %v6926_v20, %v2948_v7  ;;  %v3041_v47 = vpop.xlane.xlu0 %3040 }
 0x23f   : > { %3430 = vst.msk [vmem:[%s6953_s30 + $0x40] sm:$0xf] %vm1743_vm1, %v3845_v63  ;;  %v3142_v49 = vadd.f32 %v6926_v20, %v3041_v47 }
 0x240   : > { %v3846_v12 = vpack.c.bf16 %v3111_v26, %v3111_v26 }
 0x241   : > { %v3877_v10 = vpack.c.bf16 %v3142_v49, %v3142_v49  ;;  %v3044_v28 = vpop.xlane.xlu1 %3043 }
 0x242   : > { %3431 = vst.msk [vmem:[%s6953_s30 + $0x44] sm:$0xf] %vm1743_vm1, %v3846_v12  ;;  %v3143_v21 = vadd.f32 %v6926_v20, %v3044_v28  ;;  %v2963_v8 = vpop.xlane.xlu0 %2962 }
 0x243   : > { %3462 = vst.msk [vmem:[%s6953_s30 + $0xc0] sm:$0xf] %vm1743_vm1, %v3877_v10  ;;  %v3116_v33 = vadd.f32 %v6926_v20, %v2963_v8 }
 0x244   : > { %v3878_v4 = vpack.c.bf16 %v3143_v21, %v3143_v21 }
 0x245   : > { %v3851_v6 = vpack.c.bf16 %v3116_v33, %v3116_v33  ;;  %v2966_v29 = vpop.xlane.xlu1 %2965 }
 0x246   : > { %3463 = vst.msk [vmem:[%s6953_s30 + $0xc4] sm:$0xf] %vm1743_vm1, %v3878_v4  ;;  %v3117_v55 = vadd.f32 %v6926_v20, %v2966_v29  ;;  %v3059_v43 = vpop.xlane.xlu0 %3058 }
 0x247   : > { %3436 = vst.msk [vmem:[%s6953_s30 + $0x58] sm:$0xf] %vm1743_vm1, %v3851_v6  ;;  %v3148_v36 = vadd.f32 %v6926_v20, %v3059_v43 }
 0x248   : > { %v3852_v18 = vpack.c.bf16 %v3117_v55, %v3117_v55 }
 0x249   : > { %v3883_v5 = vpack.c.bf16 %v3148_v36, %v3148_v36  ;;  %v3062_v52 = vpop.xlane.xlu1 %3061 }
 0x24a   : > { %3437 = vst.msk [vmem:[%s6953_s30 + $0x5c] sm:$0xf] %vm1743_vm1, %v3852_v18  ;;  %v3149_v1 = vadd.f32 %v6926_v20, %v3062_v52  ;;  %v2957_v40 = vpop.xlane.xlu0 %2956 }
 0x24b   : > { %3468 = vst.msk [vmem:[%s6953_s30 + $0xd8] sm:$0xf] %vm1743_vm1, %v3883_v5  ;;  %v3114_v17 = vadd.f32 %v6926_v20, %v2957_v40 }
 0x24c   : > { %v3884_v23 = vpack.c.bf16 %v3149_v1, %v3149_v1 }
 0x24d   : > { %v3849_v46 = vpack.c.bf16 %v3114_v17, %v3114_v17  ;;  %v2960_v22 = vpop.xlane.xlu1 %2959 }
 0x24e   : > { %3469 = vst.msk [vmem:[%s6953_s30 + $0xdc] sm:$0xf] %vm1743_vm1, %v3884_v23  ;;  %v3115_v11 = vadd.f32 %v6926_v20, %v2960_v22  ;;  %v3053_v31 = vpop.xlane.xlu0 %3052 }
 0x24f   : > { %3434 = vst.msk [vmem:[%s6953_s30 + $0x50] sm:$0xf] %vm1743_vm1, %v3849_v46  ;;  %v3146_v27 = vadd.f32 %v6926_v20, %v3053_v31 }
 0x250   : > { %v3850_v15 = vpack.c.bf16 %v3115_v11, %v3115_v11 }
 0x251   : > { %v3881_v59 = vpack.c.bf16 %v3146_v27, %v3146_v27  ;;  %v3056_v30 = vpop.xlane.xlu1 %3055 }
 0x252   : > { %3435 = vst.msk [vmem:[%s6953_s30 + $0x54] sm:$0xf] %vm1743_vm1, %v3850_v15  ;;  %v3147_v14 = vadd.f32 %v6926_v20, %v3056_v30  ;;  %v2975_v41 = vpop.xlane.xlu0 %2974 }
 0x253   : > { %3466 = vst.msk [vmem:[%s6953_s30 + $0xd0] sm:$0xf] %vm1743_vm1, %v3881_v59  ;;  %v3120_v54 = vadd.f32 %v6926_v20, %v2975_v41 }
 0x254   : > { %v3882_v9 = vpack.c.bf16 %v3147_v14, %v3147_v14 }
 0x255   : > { %v3855_v16 = vpack.c.bf16 %v3120_v54, %v3120_v54  ;;  %v2978_v3 = vpop.xlane.xlu1 %2977 }
 0x256   : > { %3467 = vst.msk [vmem:[%s6953_s30 + $0xd4] sm:$0xf] %vm1743_vm1, %v3882_v9  ;;  %v3121_v13 = vadd.f32 %v6926_v20, %v2978_v3  ;;  %v3071_v42 = vpop.xlane.xlu0 %3070 }
 0x257   : > { %3440 = vst.msk [vmem:[%s6953_s30 + $0x68] sm:$0xf] %vm1743_vm1, %v3855_v16  ;;  %v3152_v19 = vadd.f32 %v6926_v20, %v3071_v42 }
 0x258   : > { %v3856_v0 = vpack.c.bf16 %v3121_v13, %v3121_v13 }
 0x259   : > { %v3887_v44 = vpack.c.bf16 %v3152_v19, %v3152_v19  ;;  %v3074_v45 = vpop.xlane.xlu1 %3073 }
 0x25a   : > { %3441 = vst.msk [vmem:[%s6953_s30 + $0x6c] sm:$0xf] %vm1743_vm1, %v3856_v0  ;;  %v3153_v57 = vadd.f32 %v6926_v20, %v3074_v45  ;;  %v2969_v61 = vpop.xlane.xlu0 %2968 }
 0x25b   : > { %3472 = vst.msk [vmem:[%s6953_s30 + $0xe8] sm:$0xf] %vm1743_vm1, %v3887_v44  ;;  %v3118_v60 = vadd.f32 %v6926_v20, %v2969_v61 }
 0x25c   : > { %v3888_v35 = vpack.c.bf16 %v3153_v57, %v3153_v57 }
 0x25d   : > { %v3853_v62 = vpack.c.bf16 %v3118_v60, %v3118_v60  ;;  %v2972_v25 = vpop.xlane.xlu1 %2971 }
 0x25e   : > { %3473 = vst.msk [vmem:[%s6953_s30 + $0xec] sm:$0xf] %vm1743_vm1, %v3888_v35  ;;  %v3119_v39 = vadd.f32 %v6926_v20, %v2972_v25  ;;  %v3065_v51 = vpop.xlane.xlu0 %3064 }
 0x25f   : > { %3438 = vst.msk [vmem:[%s6953_s30 + $0x60] sm:$0xf] %vm1743_vm1, %v3853_v62  ;;  %v3150_v24 = vadd.f32 %v6926_v20, %v3065_v51 }
 0x260   : > { %v3854_v53 = vpack.c.bf16 %v3119_v39, %v3119_v39 }
 0x261   : > { %v3885_v50 = vpack.c.bf16 %v3150_v24, %v3150_v24  ;;  %v3068_v56 = vpop.xlane.xlu1 %3067 }
 0x262   : > { %3439 = vst.msk [vmem:[%s6953_s30 + $0x64] sm:$0xf] %vm1743_vm1, %v3854_v53  ;;  %v3151_v2 = vadd.f32 %v6926_v20, %v3068_v56  ;;  %v2987_v38 = vpop.xlane.xlu0 %2986 }
 0x263   : > { %3470 = vst.msk [vmem:[%s6953_s30 + $0xe0] sm:$0xf] %vm1743_vm1, %v3885_v50  ;;  %v3124_v34 = vadd.f32 %v6926_v20, %v2987_v38 }
 0x264   : > { %v3886_v37 = vpack.c.bf16 %v3151_v2, %v3151_v2 }
 0x265   : > { %v3859_v48 = vpack.c.bf16 %v3124_v34, %v3124_v34  ;;  %v2990_v32 = vpop.xlane.xlu1 %2989 }
 0x266   : > { %3471 = vst.msk [vmem:[%s6953_s30 + $0xe4] sm:$0xf] %vm1743_vm1, %v3886_v37  ;;  %v3125_v58 = vadd.f32 %v6926_v20, %v2990_v32  ;;  %v2981_v63 = vpop.xlane.xlu0 %2980 }
 0x267   : > { %3444 = vst.msk [vmem:[%s6953_s30 + $0x78] sm:$0xf] %vm1743_vm1, %v3859_v48  ;;  %v3122_v7 = vadd.f32 %v6926_v20, %v2981_v63 }
 0x268   : > { %v3860_v26 = vpack.c.bf16 %v3125_v58, %v3125_v58 }
 0x269   : > { %v3857_v47 = vpack.c.bf16 %v3122_v7, %v3122_v7  ;;  %v2984_v49 = vpop.xlane.xlu1 %2983 }
 0x26a   : > { %3445 = vst.msk [vmem:[%s6953_s30 + $0x7c] sm:$0xf] %vm1743_vm1, %v3860_v26  ;;  %v3123_v12 = vadd.f32 %v6926_v20, %v2984_v49  ;;  %v3077_v10 = vpop.xlane.xlu0 %3076 }
 0x26b   : > { %3442 = vst.msk [vmem:[%s6953_s30 + $0x70] sm:$0xf] %vm1743_vm1, %v3857_v47  ;;  %v3154_v28 = vadd.f32 %v6926_v20, %v3077_v10 }
 0x26c   : > { %v3858_v21 = vpack.c.bf16 %v3123_v12, %v3123_v12 }
 0x26d   : > { %v3889_v8 = vpack.c.bf16 %v3154_v28, %v3154_v28  ;;  %v3080_v33 = vpop.xlane.xlu1 %3079 }
 0x26e   : > { %3443 = vst.msk [vmem:[%s6953_s30 + $0x74] sm:$0xf] %vm1743_vm1, %v3858_v21  ;;  %v3155_v4 = vadd.f32 %v6926_v20, %v3080_v33  ;;  %v3083_v6 = vpop.xlane.xlu0 %3082 }
 0x26f   : > { %3474 = vst.msk [vmem:[%s6953_s30 + $0xf0] sm:$0xf] %vm1743_vm1, %v3889_v8  ;;  %v3156_v29 = vadd.f32 %v6926_v20, %v3083_v6 }
 0x270   : > { %v3890_v55 = vpack.c.bf16 %v3155_v4, %v3155_v4 }
 0x271   : > { %v3891_v43 = vpack.c.bf16 %v3156_v29, %v3156_v29  ;;  %v3086_v36 = vpop.xlane.xlu1 %3085 }
 0x272   : > { %3475 = vst.msk [vmem:[%s6953_s30 + $0xf4] sm:$0xf] %vm1743_vm1, %v3890_v55  ;;  %v3157_v18 = vadd.f32 %v6926_v20, %v3086_v36 }
 0x273   : > { %3476 = vst.msk [vmem:[%s6953_s30 + $0xf8] sm:$0xf] %vm1743_vm1, %v3891_v43 }
 0x274   : > { %v3892_v5 = vpack.c.bf16 %v3157_v18, %v3157_v18 }
 0x276   : > { %3477 = vst.msk [vmem:[%s6953_s30 + $0xfc] sm:$0xf] %vm1743_vm1, %v3892_v5 }
 0x277 PF: > { %s24_s15 = sadd.s32 1, %s4467_s15   ;;  %s7303_s13 = smov %s4463_s14 }
 0x278   : > { %p21_p5 = scmp.ge.s32.totalorder %s24_s15, 6   ;;  %s7304_s14 = smov %s7306_s3 }
 0x27a   :  { %23 = sbr.rel (!%p21_p5) target bundleno = 3 (0x3), region = 94 }

</bundles_post_ra>
